<compile_context>
chip_gen: v7x
topology: tpu7x:2x2x1
jax: 0.10.0
libtpu: 0.0.40
codegen_flags: <defaults>
</compile_context>

<pallas_src>
import functools

import jax
import jax.numpy as jnp
from jax.experimental import pallas as pl
from jax.experimental.pallas import tpu as pltpu


def _slab_layout(cin, d, ff, cnn_out=128):
    """Row offsets of each weight block inside the packed (rows, 128) bf16 weight slab."""
    a8 = lambda n: -(-n // 8) * 8
    lay = {"tap_stride": a8(cin), "conv": 0}
    lay["qkv"] = 9 * lay["tap_stride"]
    lay["wo"] = lay["qkv"] + d
    lay["w1"] = lay["wo"] + d
    lay["w2"] = lay["w1"] + d
    lay["wc"] = lay["w2"] + ff
    lay["total"] = a8(lay["wc"] + cnn_out + d)
    return lay


def _hybrid_kernel(img_ref, x_ref, wslab_ref, bslab_ref, pcnn_ref, pseq_ref, out_ref,
                   *, num_heads, ff_dim):
    f32, bf16 = jnp.float32, jnp.bfloat16
    B, Hp, Wp, Cin = img_ref.shape
    H, W = Hp - 2, Wp - 2
    T, D = x_ref.shape                       # T = B * S
    dh = D // num_heads
    lay = _slab_layout(Cin, D, ff_dim)

    # bias / LayerNorm slab (f32):
    # 0 conv_b | 1 qkv_b | 2 out_proj_b | 3 ln1w | 4 ln1b | 5 b1 | 6 b2 | 7 ln2w | 8 ln2b | 9 cls_b
    b = bslab_ref[...]

    # ---------------- CNN: 3x3 conv as 9 accumulated tap matmuls (im2col built
    # in-kernel from static ref slices — no patches HBM round trip), ReLU, pool matmul.
    conv = None
    t = 0
    for ky in range(3):
        for kx in range(3):
            tap = img_ref[:, ky:ky + H, kx:kx + W, :].reshape(B * H * W, Cin)   # bf16
            r = lay["conv"] + lay["tap_stride"] * t
            w_t = wslab_ref[r:r + Cin, :]                                       # (Cin, 128)
            d_t = jnp.dot(tap, w_t, preferred_element_type=f32)
            conv = d_t if conv is None else conv + d_t
            t += 1
    conv = jnp.maximum(conv + b[0:1, :], 0.0)                                   # (B*H*W, 128)
    cnn_feat = jnp.dot(pcnn_ref[...], conv.astype(bf16),
                       preferred_element_type=f32)                              # (B, 128)

    # ---------------- Transformer: fused QKV matmul, per-head attention on lane
    # slices, concat-heads out-projection, post-LN, feed-forward, post-LN.
    x2 = x_ref[...]                                                             # (T, D) f32
    wqkv = wslab_ref[lay["qkv"]:lay["qkv"] + D, :]                              # (D, 128)
    qkv = (jnp.dot(x2.astype(bf16), wqkv, preferred_element_type=f32)
           + b[1:2, :]).astype(bf16)                                            # (T, 128)

    scale = dh ** -0.5
    o_heads = []
    for h in range(num_heads):
        qh = qkv[:, h * dh:(h + 1) * dh].reshape(B, T // B, dh)
        kh = qkv[:, D + h * dh:D + (h + 1) * dh].reshape(B, T // B, dh)
        vh = qkv[:, 2 * D + h * dh:2 * D + (h + 1) * dh].reshape(B, T // B, dh)
        s = jnp.einsum("bqd,bkd->bqk", qh, kh, preferred_element_type=f32) * scale
        s = s - jnp.max(s, axis=-1, keepdims=True)
        e = jnp.exp(s)
        p = e * pl.reciprocal(jnp.sum(e, axis=-1, keepdims=True), approx=True)
        o_heads.append(jnp.einsum("bqk,bkd->bqd", p.astype(bf16), vh,
                                  preferred_element_type=f32))
    o = jnp.concatenate(o_heads, axis=-1).reshape(T, D).astype(bf16)            # (T, D)

    wo = wslab_ref[lay["wo"]:lay["wo"] + D, :D]
    attn = jnp.dot(o, wo, preferred_element_type=f32) + b[2:3, :D]

    def layer_norm(y, gamma, beta, eps=1e-5):
        mu = jnp.mean(y, axis=-1, keepdims=True)
        var = jnp.mean((y - mu) ** 2, axis=-1, keepdims=True)
        return (y - mu) * jax.lax.rsqrt(var + eps) * gamma + beta

    h1 = layer_norm(x2 + attn, b[3:4, :D], b[4:5, :D])                          # (T, D)
    w1 = wslab_ref[lay["w1"]:lay["w1"] + D, :ff_dim]
    w2 = wslab_ref[lay["w2"]:lay["w2"] + ff_dim, :D]
    ff = jnp.dot(h1.astype(bf16), w1, preferred_element_type=f32) + b[5:6, :ff_dim]
    ff = jnp.dot(jnp.maximum(ff, 0.0).astype(bf16), w2,
                 preferred_element_type=f32) + b[6:7, :D]
    h2 = layer_norm(h1 + ff, b[7:8, :D], b[8:9, :D])                            # (T, D)
    tr_feat = jnp.dot(pseq_ref[...], h2.astype(bf16),
                      preferred_element_type=f32)                               # (B, D)

    # ---------------- Classifier: concat features, one lane-dense (B,128+D)@(128+D,128).
    feat = jnp.concatenate([cnn_feat, tr_feat], axis=-1).astype(bf16)           # (B, 128+D)
    wc = wslab_ref[lay["wc"]:lay["wc"] + 128 + D, :]
    out_ref[...] = jnp.dot(feat, wc, preferred_element_type=f32) + b[9:10, :]


def prepare_params(params, *, num_heads, batch, height, width, seq_len, ff_dim):
    """One-time preprocessing: pack PyTorch-layout weights into kernel slabs.

    Expected PyTorch layouts:
      conv_w (Cout, Cin, 3, 3) OIHW; conv_b (Cout,)
      in_proj_weight (3D, D), in_proj_bias (3D,)   (packed q|k|v, applied as x @ W.T)
      out_proj_weight (D, D), out_proj_bias (D,)
      w1 (FF, D), b1 (FF,);  w2 (D, FF), b2 (D,)   (applied as x @ W.T)
      ln{1,2}{w,b} (D,);  cls_w (NC, 128 + D), cls_b (NC,)
    """
    f32, bf16 = jnp.float32, jnp.bfloat16
    conv_w = jnp.asarray(params["conv_w"], f32)
    cout, cin = conv_w.shape[0], conv_w.shape[1]
    d = params["in_proj_weight"].shape[1]
    nc = params["cls_w"].shape[0]
    assert cout == 128 and 3 * d <= 128 and ff_dim <= 128 and nc <= 128
    assert d % num_heads == 0
    lay = _slab_layout(cin, d, ff_dim, cout)

    wslab = jnp.zeros((lay["total"], 128), f32)
    for t, (ky, kx) in enumerate([(a, c) for a in range(3) for c in range(3)]):
        r = lay["conv"] + lay["tap_stride"] * t
        wslab = wslab.at[r:r + cin, :cout].set(conv_w[:, :, ky, kx].T)          # OIHW -> tap
    wslab = wslab.at[lay["qkv"]:lay["qkv"] + d, :3 * d].set(
        jnp.asarray(params["in_proj_weight"], f32).T)
    wslab = wslab.at[lay["wo"]:lay["wo"] + d, :d].set(
        jnp.asarray(params["out_proj_weight"], f32).T)
    wslab = wslab.at[lay["w1"]:lay["w1"] + d, :ff_dim].set(
        jnp.asarray(params["w1"], f32).T)
    wslab = wslab.at[lay["w2"]:lay["w2"] + ff_dim, :d].set(
        jnp.asarray(params["w2"], f32).T)
    wslab = wslab.at[lay["wc"]:lay["wc"] + cout + d, :nc].set(
        jnp.asarray(params["cls_w"], f32).T)
    wslab = wslab.astype(bf16)

    def row(v):
        v = jnp.asarray(v, f32).reshape(-1)
        return jnp.pad(v, (0, 128 - v.shape[0]))

    bslab = jnp.stack([
        row(params["conv_b"]), row(params["in_proj_bias"]), row(params["out_proj_bias"]),
        row(params["ln1w"]), row(params["ln1b"]),
        row(params["b1"]), row(params["b2"]),
        row(params["ln2w"]), row(params["ln2b"]),
        row(params["cls_b"]),
    ])                                                                          # (10, 128) f32

    def seg_mean(nseg, total):          # hoisted pooling matrices (exact in bf16)
        seg = total // nseg
        r = jnp.arange(nseg, dtype=jnp.int32)[:, None]
        c = jnp.arange(total, dtype=jnp.int32)[None, :]
        return jnp.where(c // seg == r, 1.0 / seg, 0.0).astype(bf16)

    return dict(wslab=wslab, bslab=bslab,
                pool_cnn=seg_mean(batch, batch * height * width),
                pool_seq=seg_mean(batch, batch * seq_len))


def hybrid_forward(cnn_input, transformer_input, prep, *, num_classes, num_heads, ff_dim):
    B, Cin, H, W = cnn_input.shape
    _, S, D = transformer_input.shape
    # Glue (single tiny XLA fusion): NCHW -> NHWC, zero-pad spatial by 1, cast bf16.
    img = jnp.pad(jnp.transpose(cnn_input, (0, 2, 3, 1)),
                  ((0, 0), (1, 1), (1, 1), (0, 0))).astype(jnp.bfloat16)
    x2 = transformer_input.astype(jnp.float32).reshape(B * S, D)

    vmem = pl.BlockSpec(memory_space=pltpu.MemorySpace.VMEM)
    # TODO(synk): for large batch add a grid axis over B (dimension_semantics=("parallel",))
    # to use v7x's second TensorCore and tile the conv rows; gridless is fastest at B=2.
    logits = pl.pallas_call(
        functools.partial(_hybrid_kernel, num_heads=num_heads, ff_dim=ff_dim),
        out_shape=jax.ShapeDtypeStruct((B, 128), jnp.float32),
        in_specs=[vmem] * 6,
        out_specs=vmem,
    )(img, x2, prep["wslab"], prep["bslab"], prep["pool_cnn"], prep["pool_seq"])
    return logits[:, :num_classes]


if __name__ == "__main__":
    B, Cin, H, W = 2, 4, 16, 16        # cnn_input_dim = 4
    D, NH, FF = 32, 4, 64              # transformer_input_dim=32, num_heads=4, ff_dim=64
    S, NC = 8, 10                      # seq len, num_classes
    CNN_OUT = 128

    key = jax.random.PRNGKey(0)
    ks = jax.random.split(key, 16)

    def rnd(k, shape, scale=0.05):
        return (scale * jax.random.normal(k, shape)).astype(jnp.float32)

    # Parameters in native PyTorch layouts; prepare_params performs the permutes/transposes.
    params = {
        "conv_w": rnd(ks[0], (CNN_OUT, Cin, 3, 3)),          # Conv2d OIHW
        "conv_b": rnd(ks[1], (CNN_OUT,)),
        "in_proj_weight": rnd(ks[2], (3 * D, D)),            # MHA packed q|k|v
        "in_proj_bias": rnd(ks[3], (3 * D,)),
        "out_proj_weight": rnd(ks[4], (D, D)),
        "out_proj_bias": rnd(ks[5], (D,)),
        "ln1w": jnp.ones((D,), jnp.float32), "ln1b": jnp.zeros((D,), jnp.float32),
        "w1": rnd(ks[6], (FF, D)), "b1": rnd(ks[7], (FF,)),
        "w2": rnd(ks[8], (D, FF)), "b2": rnd(ks[9], (D,)),
        "ln2w": jnp.ones((D,), jnp.float32), "ln2b": jnp.zeros((D,), jnp.float32),
        "cls_w": rnd(ks[10], (NC, CNN_OUT + D)),              # Linear (out, in)
        "cls_b": rnd(ks[11], (NC,)),
    }

    prep = prepare_params(params, num_heads=NH, batch=B, height=H, width=W,
                          seq_len=S, ff_dim=FF)

    cnn_input = jax.random.normal(ks[12], (B, Cin, H, W), jnp.float32)         # NCHW
    transformer_input = jax.random.normal(ks[13], (B, S, D), jnp.float32)      # (batch, seq, dim)

    fwd = jax.jit(hybrid_forward, static_argnames=("num_classes", "num_heads", "ff_dim"))
    out = fwd(cnn_input, transformer_input, prep,
              num_classes=NC, num_heads=NH, ff_dim=FF)
    out = jax.block_until_ready(out)
    assert out.shape == (B, NC), out.shape
    assert bool(jnp.all(jnp.isfinite(out)))
    print("KERNEL_OK")
</pallas_src>

<mosaic_0001>
module attributes {stable_mosaic.version = 11 : i64} {
  func.func @_hybrid_kernel(%arg0: memref<2x18x18x4xbf16, #tpu.memory_space<vmem>>, %arg1: memref<16x32xf32, #tpu.memory_space<vmem>>, %arg2: memref<392x128xbf16, #tpu.memory_space<vmem>>, %arg3: memref<10x128xf32, #tpu.memory_space<vmem>>, %arg4: memref<2x512xbf16, #tpu.memory_space<vmem>>, %arg5: memref<2x16xbf16, #tpu.memory_space<vmem>>, %arg6: memref<2x128xf32, #tpu.memory_space<vmem>>) attributes {dimension_semantics = [], scalar_prefetch = 0 : i64, scratch_operands = 0 : i64, tpu.core_type = #tpu.core_type<tc>} {
    %c0 = arith.constant 0 : index
    %c0_0 = arith.constant 0 : index
    %0 = vector.load %arg3[%c0, %c0_0] : memref<10x128xf32, #tpu.memory_space<vmem>>, vector<10x128xf32>
    %c0_1 = arith.constant 0 : index
    %c0_2 = arith.constant 0 : index
    %c0_3 = arith.constant 0 : index
    %c0_4 = arith.constant 0 : index
    %1 = vector.load %arg0[%c0_1, %c0_2, %c0_3, %c0_4] : memref<2x18x18x4xbf16, #tpu.memory_space<vmem>>, vector<2x16x16x4xbf16>
    %2 = vector.shape_cast %1 : vector<2x16x16x4xbf16> to vector<512x4xbf16>
    %c0_5 = arith.constant 0 : index
    %c0_6 = arith.constant 0 : index
    %3 = vector.load %arg2[%c0_5, %c0_6] : memref<392x128xbf16, #tpu.memory_space<vmem>>, vector<4x128xbf16>
    %cst = arith.constant dense<0.000000e+00> : vector<512x128xf32>
    %4 = tpu.matmul %2, %3, %cst {dimension_numbers = #tpu.dot_dimension_numbers<[1], [0], [0], [1], [0, 0, 1, 1], [], []>} : vector<512x4xbf16>, vector<4x128xbf16>, vector<512x128xf32> -> vector<512x128xf32>
    %c0_7 = arith.constant 0 : index
    %c0_8 = arith.constant 0 : index
    %c1 = arith.constant 1 : index
    %c0_9 = arith.constant 0 : index
    %5 = vector.load %arg0[%c0_7, %c0_8, %c1, %c0_9] : memref<2x18x18x4xbf16, #tpu.memory_space<vmem>>, vector<2x16x16x4xbf16>
    %6 = vector.shape_cast %5 : vector<2x16x16x4xbf16> to vector<512x4xbf16>
    %c8 = arith.constant 8 : index
    %c0_10 = arith.constant 0 : index
    %7 = vector.load %arg2[%c8, %c0_10] : memref<392x128xbf16, #tpu.memory_space<vmem>>, vector<4x128xbf16>
    %cst_11 = arith.constant dense<0.000000e+00> : vector<512x128xf32>
    %8 = tpu.matmul %6, %7, %cst_11 {dimension_numbers = #tpu.dot_dimension_numbers<[1], [0], [0], [1], [0, 0, 1, 1], [], []>} : vector<512x4xbf16>, vector<4x128xbf16>, vector<512x128xf32> -> vector<512x128xf32>
    %9 = arith.addf %4, %8 : vector<512x128xf32>
    %c0_12 = arith.constant 0 : index
    %c0_13 = arith.constant 0 : index
    %c2 = arith.constant 2 : index
    %c0_14 = arith.constant 0 : index
    %10 = vector.load %arg0[%c0_12, %c0_13, %c2, %c0_14] : memref<2x18x18x4xbf16, #tpu.memory_space<vmem>>, vector<2x16x16x4xbf16>
    %11 = vector.shape_cast %10 : vector<2x16x16x4xbf16> to vector<512x4xbf16>
    %c16 = arith.constant 16 : index
    %c0_15 = arith.constant 0 : index
    %12 = vector.load %arg2[%c16, %c0_15] : memref<392x128xbf16, #tpu.memory_space<vmem>>, vector<4x128xbf16>
    %cst_16 = arith.constant dense<0.000000e+00> : vector<512x128xf32>
    %13 = tpu.matmul %11, %12, %cst_16 {dimension_numbers = #tpu.dot_dimension_numbers<[1], [0], [0], [1], [0, 0, 1, 1], [], []>} : vector<512x4xbf16>, vector<4x128xbf16>, vector<512x128xf32> -> vector<512x128xf32>
    %14 = arith.addf %9, %13 : vector<512x128xf32>
    %c0_17 = arith.constant 0 : index
    %c1_18 = arith.constant 1 : index
    %c0_19 = arith.constant 0 : index
    %c0_20 = arith.constant 0 : index
    %15 = vector.load %arg0[%c0_17, %c1_18, %c0_19, %c0_20] : memref<2x18x18x4xbf16, #tpu.memory_space<vmem>>, vector<2x16x16x4xbf16>
    %16 = vector.shape_cast %15 : vector<2x16x16x4xbf16> to vector<512x4xbf16>
    %c24 = arith.constant 24 : index
    %c0_21 = arith.constant 0 : index
    %17 = vector.load %arg2[%c24, %c0_21] : memref<392x128xbf16, #tpu.memory_space<vmem>>, vector<4x128xbf16>
    %cst_22 = arith.constant dense<0.000000e+00> : vector<512x128xf32>
    %18 = tpu.matmul %16, %17, %cst_22 {dimension_numbers = #tpu.dot_dimension_numbers<[1], [0], [0], [1], [0, 0, 1, 1], [], []>} : vector<512x4xbf16>, vector<4x128xbf16>, vector<512x128xf32> -> vector<512x128xf32>
    %19 = arith.addf %14, %18 : vector<512x128xf32>
    %c0_23 = arith.constant 0 : index
    %c1_24 = arith.constant 1 : index
    %c1_25 = arith.constant 1 : index
    %c0_26 = arith.constant 0 : index
    %20 = vector.load %arg0[%c0_23, %c1_24, %c1_25, %c0_26] : memref<2x18x18x4xbf16, #tpu.memory_space<vmem>>, vector<2x16x16x4xbf16>
    %21 = vector.shape_cast %20 : vector<2x16x16x4xbf16> to vector<512x4xbf16>
    %c32 = arith.constant 32 : index
    %c0_27 = arith.constant 0 : index
    %22 = vector.load %arg2[%c32, %c0_27] : memref<392x128xbf16, #tpu.memory_space<vmem>>, vector<4x128xbf16>
    %cst_28 = arith.constant dense<0.000000e+00> : vector<512x128xf32>
    %23 = tpu.matmul %21, %22, %cst_28 {dimension_numbers = #tpu.dot_dimension_numbers<[1], [0], [0], [1], [0, 0, 1, 1], [], []>} : vector<512x4xbf16>, vector<4x128xbf16>, vector<512x128xf32> -> vector<512x128xf32>
    %24 = arith.addf %19, %23 : vector<512x128xf32>
    %c0_29 = arith.constant 0 : index
    %c1_30 = arith.constant 1 : index
    %c2_31 = arith.constant 2 : index
    %c0_32 = arith.constant 0 : index
    %25 = vector.load %arg0[%c0_29, %c1_30, %c2_31, %c0_32] : memref<2x18x18x4xbf16, #tpu.memory_space<vmem>>, vector<2x16x16x4xbf16>
    %26 = vector.shape_cast %25 : vector<2x16x16x4xbf16> to vector<512x4xbf16>
    %c40 = arith.constant 40 : index
    %c0_33 = arith.constant 0 : index
    %27 = vector.load %arg2[%c40, %c0_33] : memref<392x128xbf16, #tpu.memory_space<vmem>>, vector<4x128xbf16>
    %cst_34 = arith.constant dense<0.000000e+00> : vector<512x128xf32>
    %28 = tpu.matmul %26, %27, %cst_34 {dimension_numbers = #tpu.dot_dimension_numbers<[1], [0], [0], [1], [0, 0, 1, 1], [], []>} : vector<512x4xbf16>, vector<4x128xbf16>, vector<512x128xf32> -> vector<512x128xf32>
    %29 = arith.addf %24, %28 : vector<512x128xf32>
    %c0_35 = arith.constant 0 : index
    %c2_36 = arith.constant 2 : index
    %c0_37 = arith.constant 0 : index
    %c0_38 = arith.constant 0 : index
    %30 = vector.load %arg0[%c0_35, %c2_36, %c0_37, %c0_38] : memref<2x18x18x4xbf16, #tpu.memory_space<vmem>>, vector<2x16x16x4xbf16>
    %31 = vector.shape_cast %30 : vector<2x16x16x4xbf16> to vector<512x4xbf16>
    %c48 = arith.constant 48 : index
    %c0_39 = arith.constant 0 : index
    %32 = vector.load %arg2[%c48, %c0_39] : memref<392x128xbf16, #tpu.memory_space<vmem>>, vector<4x128xbf16>
    %cst_40 = arith.constant dense<0.000000e+00> : vector<512x128xf32>
    %33 = tpu.matmul %31, %32, %cst_40 {dimension_numbers = #tpu.dot_dimension_numbers<[1], [0], [0], [1], [0, 0, 1, 1], [], []>} : vector<512x4xbf16>, vector<4x128xbf16>, vector<512x128xf32> -> vector<512x128xf32>
    %34 = arith.addf %29, %33 : vector<512x128xf32>
    %c0_41 = arith.constant 0 : index
    %c2_42 = arith.constant 2 : index
    %c1_43 = arith.constant 1 : index
    %c0_44 = arith.constant 0 : index
    %35 = vector.load %arg0[%c0_41, %c2_42, %c1_43, %c0_44] : memref<2x18x18x4xbf16, #tpu.memory_space<vmem>>, vector<2x16x16x4xbf16>
    %36 = vector.shape_cast %35 : vector<2x16x16x4xbf16> to vector<512x4xbf16>
    %c56 = arith.constant 56 : index
    %c0_45 = arith.constant 0 : index
    %37 = vector.load %arg2[%c56, %c0_45] : memref<392x128xbf16, #tpu.memory_space<vmem>>, vector<4x128xbf16>
    %cst_46 = arith.constant dense<0.000000e+00> : vector<512x128xf32>
    %38 = tpu.matmul %36, %37, %cst_46 {dimension_numbers = #tpu.dot_dimension_numbers<[1], [0], [0], [1], [0, 0, 1, 1], [], []>} : vector<512x4xbf16>, vector<4x128xbf16>, vector<512x128xf32> -> vector<512x128xf32>
    %39 = arith.addf %34, %38 : vector<512x128xf32>
    %c0_47 = arith.constant 0 : index
    %c2_48 = arith.constant 2 : index
    %c2_49 = arith.constant 2 : index
    %c0_50 = arith.constant 0 : index
    %40 = vector.load %arg0[%c0_47, %c2_48, %c2_49, %c0_50] : memref<2x18x18x4xbf16, #tpu.memory_space<vmem>>, vector<2x16x16x4xbf16>
    %41 = vector.shape_cast %40 : vector<2x16x16x4xbf16> to vector<512x4xbf16>
    %c64 = arith.constant 64 : index
    %c0_51 = arith.constant 0 : index
    %42 = vector.load %arg2[%c64, %c0_51] : memref<392x128xbf16, #tpu.memory_space<vmem>>, vector<4x128xbf16>
    %cst_52 = arith.constant dense<0.000000e+00> : vector<512x128xf32>
    %43 = tpu.matmul %41, %42, %cst_52 {dimension_numbers = #tpu.dot_dimension_numbers<[1], [0], [0], [1], [0, 0, 1, 1], [], []>} : vector<512x4xbf16>, vector<4x128xbf16>, vector<512x128xf32> -> vector<512x128xf32>
    %44 = arith.addf %39, %43 : vector<512x128xf32>
    %45 = vector.extract_strided_slice %0 {offsets = [0, 0], sizes = [1, 128], strides = [1, 1]} : vector<10x128xf32> to vector<1x128xf32>
    %46 = vector.broadcast %45 : vector<1x128xf32> to vector<512x128xf32>
    %47 = arith.addf %44, %46 : vector<512x128xf32>
    %cst_53 = arith.constant 0.000000e+00 : f32
    %48 = vector.broadcast %cst_53 : f32 to vector<512x128xf32>
    %49 = arith.maximumf %47, %48 : vector<512x128xf32>
    %c0_54 = arith.constant 0 : index
    %c0_55 = arith.constant 0 : index
    %50 = vector.load %arg4[%c0_54, %c0_55] : memref<2x512xbf16, #tpu.memory_space<vmem>>, vector<2x512xbf16>
    %51 = arith.truncf %49 : vector<512x128xf32> to vector<512x128xbf16>
    %cst_56 = arith.constant dense<0.000000e+00> : vector<2x128xf32>
    %52 = tpu.matmul %50, %51, %cst_56 {dimension_numbers = #tpu.dot_dimension_numbers<[1], [0], [0], [1], [0, 0, 1, 1], [], []>} : vector<2x512xbf16>, vector<512x128xbf16>, vector<2x128xf32> -> vector<2x128xf32>
    %c0_57 = arith.constant 0 : index
    %c0_58 = arith.constant 0 : index
    %53 = vector.load %arg1[%c0_57, %c0_58] : memref<16x32xf32, #tpu.memory_space<vmem>>, vector<16x32xf32>
    %c72 = arith.constant 72 : index
    %c0_59 = arith.constant 0 : index
    %54 = vector.load %arg2[%c72, %c0_59] : memref<392x128xbf16, #tpu.memory_space<vmem>>, vector<32x128xbf16>
    %55 = arith.truncf %53 : vector<16x32xf32> to vector<16x32xbf16>
    %cst_60 = arith.constant dense<0.000000e+00> : vector<16x128xf32>
    %56 = tpu.matmul %55, %54, %cst_60 {dimension_numbers = #tpu.dot_dimension_numbers<[1], [0], [0], [1], [0, 0, 1, 1], [], []>} : vector<16x32xbf16>, vector<32x128xbf16>, vector<16x128xf32> -> vector<16x128xf32>
    %57 = vector.extract_strided_slice %0 {offsets = [1, 0], sizes = [1, 128], strides = [1, 1]} : vector<10x128xf32> to vector<1x128xf32>
    %58 = vector.broadcast %57 : vector<1x128xf32> to vector<16x128xf32>
    %59 = arith.addf %56, %58 : vector<16x128xf32>
    %60 = arith.truncf %59 : vector<16x128xf32> to vector<16x128xbf16>
    %61 = vector.extract_strided_slice %60 {offsets = [0, 0], sizes = [16, 8], strides = [1, 1]} : vector<16x128xbf16> to vector<16x8xbf16>
    %62 = vector.shape_cast %61 : vector<16x8xbf16> to vector<2x8x8xbf16>
    %63 = vector.extract_strided_slice %60 {offsets = [0, 32], sizes = [16, 8], strides = [1, 1]} : vector<16x128xbf16> to vector<16x8xbf16>
    %64 = vector.shape_cast %63 : vector<16x8xbf16> to vector<2x8x8xbf16>
    %65 = vector.extract_strided_slice %60 {offsets = [0, 64], sizes = [16, 8], strides = [1, 1]} : vector<16x128xbf16> to vector<16x8xbf16>
    %66 = vector.shape_cast %65 : vector<16x8xbf16> to vector<2x8x8xbf16>
    "tpu.trace_start"() <{level = 10 : i32, message = "bqd,bkd->bqk"}> : () -> ()
    %cst_61 = arith.constant dense<0.000000e+00> : vector<2x8x8xf32>
    %67 = tpu.matmul %62, %64, %cst_61 {dimension_numbers = #tpu.dot_dimension_numbers<[2], [2], [1], [1], [0, 0, 0, 1, 1, 1], [0], [0]>} : vector<2x8x8xbf16>, vector<2x8x8xbf16>, vector<2x8x8xf32> -> vector<2x8x8xf32>
    "tpu.trace_stop"() : () -> ()
    %cst_62 = arith.constant 0.353553385 : f32
    %68 = vector.broadcast %cst_62 : f32 to vector<2x8x8xf32>
    %69 = arith.mulf %67, %68 : vector<2x8x8xf32>
    %cst_63 = arith.constant dense<0xFF800000> : vector<2x8xf32>
    %70 = vector.multi_reduction <maximumf>, %69, %cst_63 [2] : vector<2x8x8xf32> to vector<2x8xf32>
    %71 = vector.shape_cast %70 : vector<2x8xf32> to vector<2x8x1xf32>
    %72 = vector.broadcast %71 : vector<2x8x1xf32> to vector<2x8x8xf32>
    %73 = arith.subf %69, %72 : vector<2x8x8xf32>
    %74 = math.exp %73 : vector<2x8x8xf32>
    %cst_64 = arith.constant dense<0.000000e+00> : vector<2x8xf32>
    %75 = vector.multi_reduction <add>, %74, %cst_64 [2] : vector<2x8x8xf32> to vector<2x8xf32>
    %76 = vector.shape_cast %75 : vector<2x8xf32> to vector<2x8x1xf32>
    %77 = tpu.reciprocal %76 {approx = true} : vector<2x8x1xf32> -> vector<2x8x1xf32>
    %78 = vector.broadcast %77 : vector<2x8x1xf32> to vector<2x8x8xf32>
    %79 = arith.mulf %74, %78 : vector<2x8x8xf32>
    %80 = arith.truncf %79 : vector<2x8x8xf32> to vector<2x8x8xbf16>
    "tpu.trace_start"() <{level = 10 : i32, message = "bqk,bkd->bqd"}> : () -> ()
    %cst_65 = arith.constant dense<0.000000e+00> : vector<2x8x8xf32>
    %81 = tpu.matmul %80, %66, %cst_65 {dimension_numbers = #tpu.dot_dimension_numbers<[2], [1], [1], [2], [0, 0, 0, 1, 1, 2], [0], [0]>} : vector<2x8x8xbf16>, vector<2x8x8xbf16>, vector<2x8x8xf32> -> vector<2x8x8xf32>
    "tpu.trace_stop"() : () -> ()
    %82 = vector.extract_strided_slice %60 {offsets = [0, 8], sizes = [16, 8], strides = [1, 1]} : vector<16x128xbf16> to vector<16x8xbf16>
    %83 = vector.shape_cast %82 : vector<16x8xbf16> to vector<2x8x8xbf16>
    %84 = vector.extract_strided_slice %60 {offsets = [0, 40], sizes = [16, 8], strides = [1, 1]} : vector<16x128xbf16> to vector<16x8xbf16>
    %85 = vector.shape_cast %84 : vector<16x8xbf16> to vector<2x8x8xbf16>
    %86 = vector.extract_strided_slice %60 {offsets = [0, 72], sizes = [16, 8], strides = [1, 1]} : vector<16x128xbf16> to vector<16x8xbf16>
    %87 = vector.shape_cast %86 : vector<16x8xbf16> to vector<2x8x8xbf16>
    "tpu.trace_start"() <{level = 10 : i32, message = "bqd,bkd->bqk"}> : () -> ()
    %cst_66 = arith.constant dense<0.000000e+00> : vector<2x8x8xf32>
    %88 = tpu.matmul %83, %85, %cst_66 {dimension_numbers = #tpu.dot_dimension_numbers<[2], [2], [1], [1], [0, 0, 0, 1, 1, 1], [0], [0]>} : vector<2x8x8xbf16>, vector<2x8x8xbf16>, vector<2x8x8xf32> -> vector<2x8x8xf32>
    "tpu.trace_stop"() : () -> ()
    %cst_67 = arith.constant 0.353553385 : f32
    %89 = vector.broadcast %cst_67 : f32 to vector<2x8x8xf32>
    %90 = arith.mulf %88, %89 : vector<2x8x8xf32>
    %cst_68 = arith.constant dense<0xFF800000> : vector<2x8xf32>
    %91 = vector.multi_reduction <maximumf>, %90, %cst_68 [2] : vector<2x8x8xf32> to vector<2x8xf32>
    %92 = vector.shape_cast %91 : vector<2x8xf32> to vector<2x8x1xf32>
    %93 = vector.broadcast %92 : vector<2x8x1xf32> to vector<2x8x8xf32>
    %94 = arith.subf %90, %93 : vector<2x8x8xf32>
    %95 = math.exp %94 : vector<2x8x8xf32>
    %cst_69 = arith.constant dense<0.000000e+00> : vector<2x8xf32>
    %96 = vector.multi_reduction <add>, %95, %cst_69 [2] : vector<2x8x8xf32> to vector<2x8xf32>
    %97 = vector.shape_cast %96 : vector<2x8xf32> to vector<2x8x1xf32>
    %98 = tpu.reciprocal %97 {approx = true} : vector<2x8x1xf32> -> vector<2x8x1xf32>
    %99 = vector.broadcast %98 : vector<2x8x1xf32> to vector<2x8x8xf32>
    %100 = arith.mulf %95, %99 : vector<2x8x8xf32>
    %101 = arith.truncf %100 : vector<2x8x8xf32> to vector<2x8x8xbf16>
    "tpu.trace_start"() <{level = 10 : i32, message = "bqk,bkd->bqd"}> : () -> ()
    %cst_70 = arith.constant dense<0.000000e+00> : vector<2x8x8xf32>
    %102 = tpu.matmul %101, %87, %cst_70 {dimension_numbers = #tpu.dot_dimension_numbers<[2], [1], [1], [2], [0, 0, 0, 1, 1, 2], [0], [0]>} : vector<2x8x8xbf16>, vector<2x8x8xbf16>, vector<2x8x8xf32> -> vector<2x8x8xf32>
    "tpu.trace_stop"() : () -> ()
    %103 = vector.extract_strided_slice %60 {offsets = [0, 16], sizes = [16, 8], strides = [1, 1]} : vector<16x128xbf16> to vector<16x8xbf16>
    %104 = vector.shape_cast %103 : vector<16x8xbf16> to vector<2x8x8xbf16>
    %105 = vector.extract_strided_slice %60 {offsets = [0, 48], sizes = [16, 8], strides = [1, 1]} : vector<16x128xbf16> to vector<16x8xbf16>
    %106 = vector.shape_cast %105 : vector<16x8xbf16> to vector<2x8x8xbf16>
    %107 = vector.extract_strided_slice %60 {offsets = [0, 80], sizes = [16, 8], strides = [1, 1]} : vector<16x128xbf16> to vector<16x8xbf16>
    %108 = vector.shape_cast %107 : vector<16x8xbf16> to vector<2x8x8xbf16>
    "tpu.trace_start"() <{level = 10 : i32, message = "bqd,bkd->bqk"}> : () -> ()
    %cst_71 = arith.constant dense<0.000000e+00> : vector<2x8x8xf32>
    %109 = tpu.matmul %104, %106, %cst_71 {dimension_numbers = #tpu.dot_dimension_numbers<[2], [2], [1], [1], [0, 0, 0, 1, 1, 1], [0], [0]>} : vector<2x8x8xbf16>, vector<2x8x8xbf16>, vector<2x8x8xf32> -> vector<2x8x8xf32>
    "tpu.trace_stop"() : () -> ()
    %cst_72 = arith.constant 0.353553385 : f32
    %110 = vector.broadcast %cst_72 : f32 to vector<2x8x8xf32>
    %111 = arith.mulf %109, %110 : vector<2x8x8xf32>
    %cst_73 = arith.constant dense<0xFF800000> : vector<2x8xf32>
    %112 = vector.multi_reduction <maximumf>, %111, %cst_73 [2] : vector<2x8x8xf32> to vector<2x8xf32>
    %113 = vector.shape_cast %112 : vector<2x8xf32> to vector<2x8x1xf32>
    %114 = vector.broadcast %113 : vector<2x8x1xf32> to vector<2x8x8xf32>
    %115 = arith.subf %111, %114 : vector<2x8x8xf32>
    %116 = math.exp %115 : vector<2x8x8xf32>
    %cst_74 = arith.constant dense<0.000000e+00> : vector<2x8xf32>
    %117 = vector.multi_reduction <add>, %116, %cst_74 [2] : vector<2x8x8xf32> to vector<2x8xf32>
    %118 = vector.shape_cast %117 : vector<2x8xf32> to vector<2x8x1xf32>
    %119 = tpu.reciprocal %118 {approx = true} : vector<2x8x1xf32> -> vector<2x8x1xf32>
    %120 = vector.broadcast %119 : vector<2x8x1xf32> to vector<2x8x8xf32>
    %121 = arith.mulf %116, %120 : vector<2x8x8xf32>
    %122 = arith.truncf %121 : vector<2x8x8xf32> to vector<2x8x8xbf16>
    "tpu.trace_start"() <{level = 10 : i32, message = "bqk,bkd->bqd"}> : () -> ()
    %cst_75 = arith.constant dense<0.000000e+00> : vector<2x8x8xf32>
    %123 = tpu.matmul %122, %108, %cst_75 {dimension_numbers = #tpu.dot_dimension_numbers<[2], [1], [1], [2], [0, 0, 0, 1, 1, 2], [0], [0]>} : vector<2x8x8xbf16>, vector<2x8x8xbf16>, vector<2x8x8xf32> -> vector<2x8x8xf32>
    "tpu.trace_stop"() : () -> ()
    %124 = vector.extract_strided_slice %60 {offsets = [0, 24], sizes = [16, 8], strides = [1, 1]} : vector<16x128xbf16> to vector<16x8xbf16>
    %125 = vector.shape_cast %124 : vector<16x8xbf16> to vector<2x8x8xbf16>
    %126 = vector.extract_strided_slice %60 {offsets = [0, 56], sizes = [16, 8], strides = [1, 1]} : vector<16x128xbf16> to vector<16x8xbf16>
    %127 = vector.shape_cast %126 : vector<16x8xbf16> to vector<2x8x8xbf16>
    %128 = vector.extract_strided_slice %60 {offsets = [0, 88], sizes = [16, 8], strides = [1, 1]} : vector<16x128xbf16> to vector<16x8xbf16>
    %129 = vector.shape_cast %128 : vector<16x8xbf16> to vector<2x8x8xbf16>
    "tpu.trace_start"() <{level = 10 : i32, message = "bqd,bkd->bqk"}> : () -> ()
    %cst_76 = arith.constant dense<0.000000e+00> : vector<2x8x8xf32>
    %130 = tpu.matmul %125, %127, %cst_76 {dimension_numbers = #tpu.dot_dimension_numbers<[2], [2], [1], [1], [0, 0, 0, 1, 1, 1], [0], [0]>} : vector<2x8x8xbf16>, vector<2x8x8xbf16>, vector<2x8x8xf32> -> vector<2x8x8xf32>
    "tpu.trace_stop"() : () -> ()
    %cst_77 = arith.constant 0.353553385 : f32
    %131 = vector.broadcast %cst_77 : f32 to vector<2x8x8xf32>
    %132 = arith.mulf %130, %131 : vector<2x8x8xf32>
    %cst_78 = arith.constant dense<0xFF800000> : vector<2x8xf32>
    %133 = vector.multi_reduction <maximumf>, %132, %cst_78 [2] : vector<2x8x8xf32> to vector<2x8xf32>
    %134 = vector.shape_cast %133 : vector<2x8xf32> to vector<2x8x1xf32>
    %135 = vector.broadcast %134 : vector<2x8x1xf32> to vector<2x8x8xf32>
    %136 = arith.subf %132, %135 : vector<2x8x8xf32>
    %137 = math.exp %136 : vector<2x8x8xf32>
    %cst_79 = arith.constant dense<0.000000e+00> : vector<2x8xf32>
    %138 = vector.multi_reduction <add>, %137, %cst_79 [2] : vector<2x8x8xf32> to vector<2x8xf32>
    %139 = vector.shape_cast %138 : vector<2x8xf32> to vector<2x8x1xf32>
    %140 = tpu.reciprocal %139 {approx = true} : vector<2x8x1xf32> -> vector<2x8x1xf32>
    %141 = vector.broadcast %140 : vector<2x8x1xf32> to vector<2x8x8xf32>
    %142 = arith.mulf %137, %141 : vector<2x8x8xf32>
    %143 = arith.truncf %142 : vector<2x8x8xf32> to vector<2x8x8xbf16>
    "tpu.trace_start"() <{level = 10 : i32, message = "bqk,bkd->bqd"}> : () -> ()
    %cst_80 = arith.constant dense<0.000000e+00> : vector<2x8x8xf32>
    %144 = tpu.matmul %143, %129, %cst_80 {dimension_numbers = #tpu.dot_dimension_numbers<[2], [1], [1], [2], [0, 0, 0, 1, 1, 2], [0], [0]>} : vector<2x8x8xbf16>, vector<2x8x8xbf16>, vector<2x8x8xf32> -> vector<2x8x8xf32>
    "tpu.trace_stop"() : () -> ()
    %145 = tpu.concatenate %81, %102, %123, %144 in 2 : vector<2x8x8xf32>, vector<2x8x8xf32>, vector<2x8x8xf32>, vector<2x8x8xf32> -> vector<2x8x32xf32>
    %146 = vector.shape_cast %145 : vector<2x8x32xf32> to vector<16x32xf32>
    %147 = arith.truncf %146 : vector<16x32xf32> to vector<16x32xbf16>
    %c104 = arith.constant 104 : index
    %c0_81 = arith.constant 0 : index
    %148 = vector.load %arg2[%c104, %c0_81] : memref<392x128xbf16, #tpu.memory_space<vmem>>, vector<32x32xbf16>
    %cst_82 = arith.constant dense<0.000000e+00> : vector<16x32xf32>
    %149 = tpu.matmul %147, %148, %cst_82 {dimension_numbers = #tpu.dot_dimension_numbers<[1], [0], [0], [1], [0, 0, 1, 1], [], []>} : vector<16x32xbf16>, vector<32x32xbf16>, vector<16x32xf32> -> vector<16x32xf32>
    %150 = vector.extract_strided_slice %0 {offsets = [2, 0], sizes = [1, 32], strides = [1, 1]} : vector<10x128xf32> to vector<1x32xf32>
    %151 = vector.broadcast %150 : vector<1x32xf32> to vector<16x32xf32>
    %152 = arith.addf %149, %151 : vector<16x32xf32>
    %153 = arith.addf %53, %152 : vector<16x32xf32>
    %154 = vector.extract_strided_slice %0 {offsets = [3, 0], sizes = [1, 32], strides = [1, 1]} : vector<10x128xf32> to vector<1x32xf32>
    %155 = vector.extract_strided_slice %0 {offsets = [4, 0], sizes = [1, 32], strides = [1, 1]} : vector<10x128xf32> to vector<1x32xf32>
    %cst_83 = arith.constant dense<0.000000e+00> : vector<16xf32>
    %156 = vector.multi_reduction <add>, %153, %cst_83 [1] : vector<16x32xf32> to vector<16xf32>
    %157 = vector.shape_cast %156 : vector<16xf32> to vector<16x1xf32>
    %cst_84 = arith.constant 3.200000e+01 : f32
    %158 = vector.broadcast %cst_84 : f32 to vector<16x1xf32>
    %159 = arith.divf %157, %158 : vector<16x1xf32>
    %160 = vector.broadcast %159 : vector<16x1xf32> to vector<16x32xf32>
    %161 = arith.subf %153, %160 : vector<16x32xf32>
    %162 = arith.mulf %161, %161 : vector<16x32xf32>
    %cst_85 = arith.constant dense<0.000000e+00> : vector<16xf32>
    %163 = vector.multi_reduction <add>, %162, %cst_85 [1] : vector<16x32xf32> to vector<16xf32>
    %164 = vector.shape_cast %163 : vector<16xf32> to vector<16x1xf32>
    %cst_86 = arith.constant 3.200000e+01 : f32
    %165 = vector.broadcast %cst_86 : f32 to vector<16x1xf32>
    %166 = arith.divf %164, %165 : vector<16x1xf32>
    %167 = vector.broadcast %159 : vector<16x1xf32> to vector<16x32xf32>
    %168 = arith.subf %153, %167 : vector<16x32xf32>
    %cst_87 = arith.constant 9.99999974E-6 : f32
    %169 = vector.broadcast %cst_87 : f32 to vector<16x1xf32>
    %170 = arith.addf %166, %169 : vector<16x1xf32>
    %171 = math.rsqrt %170 : vector<16x1xf32>
    %172 = vector.broadcast %171 : vector<16x1xf32> to vector<16x32xf32>
    %173 = arith.mulf %168, %172 : vector<16x32xf32>
    %174 = vector.broadcast %154 : vector<1x32xf32> to vector<16x32xf32>
    %175 = arith.mulf %173, %174 : vector<16x32xf32>
    %176 = vector.broadcast %155 : vector<1x32xf32> to vector<16x32xf32>
    %177 = arith.addf %175, %176 : vector<16x32xf32>
    %c136 = arith.constant 136 : index
    %c0_88 = arith.constant 0 : index
    %178 = vector.load %arg2[%c136, %c0_88] : memref<392x128xbf16, #tpu.memory_space<vmem>>, vector<32x64xbf16>
    %c168 = arith.constant 168 : index
    %c0_89 = arith.constant 0 : index
    %179 = vector.load %arg2[%c168, %c0_89] : memref<392x128xbf16, #tpu.memory_space<vmem>>, vector<64x32xbf16>
    %180 = arith.truncf %177 : vector<16x32xf32> to vector<16x32xbf16>
    %cst_90 = arith.constant dense<0.000000e+00> : vector<16x64xf32>
    %181 = tpu.matmul %180, %178, %cst_90 {dimension_numbers = #tpu.dot_dimension_numbers<[1], [0], [0], [1], [0, 0, 1, 1], [], []>} : vector<16x32xbf16>, vector<32x64xbf16>, vector<16x64xf32> -> vector<16x64xf32>
    %182 = vector.extract_strided_slice %0 {offsets = [5, 0], sizes = [1, 64], strides = [1, 1]} : vector<10x128xf32> to vector<1x64xf32>
    %183 = vector.broadcast %182 : vector<1x64xf32> to vector<16x64xf32>
    %184 = arith.addf %181, %183 : vector<16x64xf32>
    %cst_91 = arith.constant 0.000000e+00 : f32
    %185 = vector.broadcast %cst_91 : f32 to vector<16x64xf32>
    %186 = arith.maximumf %184, %185 : vector<16x64xf32>
    %187 = arith.truncf %186 : vector<16x64xf32> to vector<16x64xbf16>
    %cst_92 = arith.constant dense<0.000000e+00> : vector<16x32xf32>
    %188 = tpu.matmul %187, %179, %cst_92 {dimension_numbers = #tpu.dot_dimension_numbers<[1], [0], [0], [1], [0, 0, 1, 1], [], []>} : vector<16x64xbf16>, vector<64x32xbf16>, vector<16x32xf32> -> vector<16x32xf32>
    %189 = vector.extract_strided_slice %0 {offsets = [6, 0], sizes = [1, 32], strides = [1, 1]} : vector<10x128xf32> to vector<1x32xf32>
    %190 = vector.broadcast %189 : vector<1x32xf32> to vector<16x32xf32>
    %191 = arith.addf %188, %190 : vector<16x32xf32>
    %192 = arith.addf %177, %191 : vector<16x32xf32>
    %193 = vector.extract_strided_slice %0 {offsets = [7, 0], sizes = [1, 32], strides = [1, 1]} : vector<10x128xf32> to vector<1x32xf32>
    %194 = vector.extract_strided_slice %0 {offsets = [8, 0], sizes = [1, 32], strides = [1, 1]} : vector<10x128xf32> to vector<1x32xf32>
    %cst_93 = arith.constant dense<0.000000e+00> : vector<16xf32>
    %195 = vector.multi_reduction <add>, %192, %cst_93 [1] : vector<16x32xf32> to vector<16xf32>
    %196 = vector.shape_cast %195 : vector<16xf32> to vector<16x1xf32>
    %cst_94 = arith.constant 3.200000e+01 : f32
    %197 = vector.broadcast %cst_94 : f32 to vector<16x1xf32>
    %198 = arith.divf %196, %197 : vector<16x1xf32>
    %199 = vector.broadcast %198 : vector<16x1xf32> to vector<16x32xf32>
    %200 = arith.subf %192, %199 : vector<16x32xf32>
    %201 = arith.mulf %200, %200 : vector<16x32xf32>
    %cst_95 = arith.constant dense<0.000000e+00> : vector<16xf32>
    %202 = vector.multi_reduction <add>, %201, %cst_95 [1] : vector<16x32xf32> to vector<16xf32>
    %203 = vector.shape_cast %202 : vector<16xf32> to vector<16x1xf32>
    %cst_96 = arith.constant 3.200000e+01 : f32
    %204 = vector.broadcast %cst_96 : f32 to vector<16x1xf32>
    %205 = arith.divf %203, %204 : vector<16x1xf32>
    %206 = vector.broadcast %198 : vector<16x1xf32> to vector<16x32xf32>
    %207 = arith.subf %192, %206 : vector<16x32xf32>
    %cst_97 = arith.constant 9.99999974E-6 : f32
    %208 = vector.broadcast %cst_97 : f32 to vector<16x1xf32>
    %209 = arith.addf %205, %208 : vector<16x1xf32>
    %210 = math.rsqrt %209 : vector<16x1xf32>
    %211 = vector.broadcast %210 : vector<16x1xf32> to vector<16x32xf32>
    %212 = arith.mulf %207, %211 : vector<16x32xf32>
    %213 = vector.broadcast %193 : vector<1x32xf32> to vector<16x32xf32>
    %214 = arith.mulf %212, %213 : vector<16x32xf32>
    %215 = vector.broadcast %194 : vector<1x32xf32> to vector<16x32xf32>
    %216 = arith.addf %214, %215 : vector<16x32xf32>
    %c0_98 = arith.constant 0 : index
    %c0_99 = arith.constant 0 : index
    %217 = vector.load %arg5[%c0_98, %c0_99] : memref<2x16xbf16, #tpu.memory_space<vmem>>, vector<2x16xbf16>
    %218 = arith.truncf %216 : vector<16x32xf32> to vector<16x32xbf16>
    %cst_100 = arith.constant dense<0.000000e+00> : vector<2x32xf32>
    %219 = tpu.matmul %217, %218, %cst_100 {dimension_numbers = #tpu.dot_dimension_numbers<[1], [0], [0], [1], [0, 0, 1, 1], [], []>} : vector<2x16xbf16>, vector<16x32xbf16>, vector<2x32xf32> -> vector<2x32xf32>
    %220 = tpu.concatenate %52, %219 in 1 : vector<2x128xf32>, vector<2x32xf32> -> vector<2x160xf32>
    %221 = arith.truncf %220 : vector<2x160xf32> to vector<2x160xbf16>
    %c232 = arith.constant 232 : index
    %c0_101 = arith.constant 0 : index
    %222 = vector.load %arg2[%c232, %c0_101] : memref<392x128xbf16, #tpu.memory_space<vmem>>, vector<160x128xbf16>
    %cst_102 = arith.constant dense<0.000000e+00> : vector<2x128xf32>
    %223 = tpu.matmul %221, %222, %cst_102 {dimension_numbers = #tpu.dot_dimension_numbers<[1], [0], [0], [1], [0, 0, 1, 1], [], []>} : vector<2x160xbf16>, vector<160x128xbf16>, vector<2x128xf32> -> vector<2x128xf32>
    %224 = vector.extract_strided_slice %0 {offsets = [9, 0], sizes = [1, 128], strides = [1, 1]} : vector<10x128xf32> to vector<1x128xf32>
    %225 = vector.broadcast %224 : vector<1x128xf32> to vector<2x128xf32>
    %226 = arith.addf %223, %225 : vector<2x128xf32>
    %c0_103 = arith.constant 0 : index
    %c0_104 = arith.constant 0 : index
    %227 = vector.load %arg6[%c0_103, %c0_104] : memref<2x128xf32, #tpu.memory_space<vmem>>, vector<2x128xf32>
    tpu.vector_store %arg6[%c0_103, %c0_104], %226 {strides = array<i32>} : memref<2x128xf32, #tpu.memory_space<vmem>>, vector<2x128xf32>,
    return
  }
}

</mosaic_0001>

<bundles_post_ra>
// kernel: hybrid_forward.1
= control target key start
LH: loop header
LB: loop body
LE: loop exit
PB: predicated region body
PF: predicated region fallthrough
CT: control target
= control target key end

     0   :  { %vm1089_vm0 = vcmask 1041408   ;;  %vm992_vm1 = vcmask 31744   ;;  %vm124_vm2 = vsmask.f32 3328  ;;  %vm125_vm3 = vsmask.f32 7440  ;;  %s17894_s0 = inlined_call_operand.vmem [shape: bf16[2,18,18,4], index: 0, kind: input, shape index: {}]   ;;  %s17895_s1 = inlined_call_operand.vmem [shape: f32[16,32], index: 1, kind: input, shape index: {}]   ;;  %s17896_s2 = inlined_call_operand.vmem [shape: bf16[392,128], index: 2, kind: input, shape index: {}]   ;;  %s17897_s3 = inlined_call_operand.vmem [shape: f32[10,128], index: 3, kind: input, shape index: {}]   ;;  %s17898_s4 = inlined_call_operand.vmem [shape: bf16[2,512], index: 4, kind: input, shape index: {}]   ;;  %s17899_s5 = inlined_call_operand.vmem [shape: bf16[2,16], index: 5, kind: input, shape index: {}]   ;;  %s17900_s6 = inlined_call_operand.hbm [shape: f32[2,128], index: 6, kind: output, shape index: {}]  }
   0x1   :  { %v2867_v0 = vld [vmem:[%s17896_s2 + $0xc] sm:$0x3]  ;;  %v13319_v3 = vld [vmem:[%s17894_s0 + $0x18] sm:$0xff]   ;;  %v895_v4 = vld [vmem:[%s17896_s2 + $0x4] sm:$0x3]  ;;  %vm2026_vm5 = vcmask 1042432  }
   0x2   :  { %13277 = vmatprep.subr.msk.bf16.mxu0 %vm1089_vm0, %v2867_v0  ;;  %v13768_v1 = vsel %vm1089_vm0, %v2867_v0, 0  ;;  %v13318_v2 = vld [vmem:[%s17894_s0 + $0xc] sm:$0xff]   ;;  %13274 = vmatprep.subr.msk.bf16.mxu1 %vm1089_vm0, %v895_v4  ;;  %v1091_v6 = vsel %vm1089_vm0, %v895_v4, 0  ;;  %v27_v7 = vld [vmem:[%s17894_s0] sm:$0xf]  ;;  %v13320_v8 = vld [vmem:[%s17894_s0 + $0x24] sm:$0xff]  }
   0x3   :  { %12227 = vmatpush3.bf16.msra.mxu0 %v13768_v1  ;;  %12228 = vmatprep.mubr.msk.bf16.mxu0 %vm992_vm1, %v13318_v2  ;;  %v4344_v5 = vld [vmem:[%s17896_s2 + $0x10] sm:$0x3]  ;;  %v28_v10 = vld [vmem:[%s17894_s0 + $0x4] sm:$0xf]  ;;  %v92_v11 = vld [vmem:[%s17894_s0 + $0x8] sm:$0x1] }
   0x4   :  { %13279 = vmatprep.subr.msk.bf16.mxu0 %vm1089_vm0, %v4344_v5  ;;  %12029 = vmatpush3.bf16.msra.mxu1 %v1091_v6  ;;  %v4538_v9 = vsel %vm1089_vm0, %v4344_v5, 0  ;;  %v128_v12 = vshrl.u32 %v27_v7, 16  ;;  %v131_v13 = vshll.u32 %v27_v7, 16  ;;  %v137_v14 = vshll.u32 %v28_v10, 16  ;;  %v29_v20 = vld [vmem:[%s17894_s0 + $0xc] sm:$0xf]  ;;  %vm13816_vm4 = vmor %vm124_vm2, %vm125_vm3 }
   0x5   :  { %v141_v16 = vshrl.u32 %v28_v10, 16  ;;  %v147_v17 = vshll.u32 %v92_v11, 16  ;;  %v30_v22 = vld [vmem:[%s17894_s0 + $0x10] sm:$0xf]  ;;  %v93_v23 = vld [vmem:[%s17894_s0 + $0x14] sm:$0x1] }
   0x6   :  { %12229 = vmatmul.mubr.msk.bf16.vlgmr.msra.gmra.mrb[0].mxu0 %vm992_vm1, %v13319_v3  ;;  %v130_v15 = vrot.slane %v128_v12, 4  ;;  %v133_v18 = vrot.slane %v131_v13, 5  ;;  %v139_v19 = vrot.slane %v137_v14, 5  ;;  %v152_v25 = vshrl.u32 %v29_v20, 16  ;;  %v13321_v28 = vld [vmem:[%s17894_s0 + $0x30] sm:$0xff]   ;;  %v13322_v34 = vld [vmem:[%s17894_s0 + $0x3c] sm:$0xff]  }
   0x7   :  { %12293 = vmatpush3.bf16.msra.mxu0 %v4538_v9  ;;  %12232 = vmatprep.mubr.msk.bf16.mxu0 %vm992_vm1, %v13320_v8  ;;  %v143_v21 = vrot.slane %v141_v16, 4  ;;  %v155_v26 = vshll.u32 %v29_v20, 16  ;;  %v161_v27 = vshll.u32 %v30_v22, 16  ;;  %v149_v31 = vrot.slane %v147_v17, 5  ;;  %v31_v39 = vld [vmem:[%s17894_s0 + $0x18] sm:$0xf] }
   0x8   :  { %v134_v24 = vor.u32 %v133_v18, %v130_v15  ;;  %v165_v32 = vshrl.u32 %v30_v22, 16  ;;  %v171_v33 = vshll.u32 %v93_v23, 16  ;;  %v154_v36 = vrot.slane %v152_v25, 4  ;;  %v32_v43 = vld [vmem:[%s17894_s0 + $0x1c] sm:$0xf]  ;;  %v13323_v59 = vld [vmem:[%s17894_s0 + $0x48] sm:$0xff]  }
   0x9   :  { %v144_v30 = vor.u32 %v143_v21, %v139_v19  ;;  %v157_v37 = vrot.slane %v155_v26, 5  ;;  %v163_v38 = vrot.slane %v161_v27, 5  ;;  %v94_v46 = vld [vmem:[%s17894_s0 + $0x20] sm:$0x1]  ;;  %v176_v47 = vshrl.u32 %v31_v39, 16  ;;  %v13324_v17 = vld [vmem:[%s17894_s0 + $0x54] sm:$0xff]  }
   0xa   :  { %v135_v35 = vrot.slane %v134_v24, 4  ;;  %v167_v41 = vrot.slane %v165_v32, 4  ;;  %v173_v42 = vrot.slane %v171_v33, 5  ;;  %v179_v48 = vshll.u32 %v31_v39, 16  ;;  %v33_v53 = vld [vmem:[%s17894_s0 + $0x24] sm:$0xf] }
   0xb   :  { %v145_v40 = vrot.slane %v144_v30, 4  ;;  %v158_v45 = vor.u32 %v157_v37, %v154_v36  ;;  %v185_v51 = vshll.u32 %v32_v43, 16  ;;  %v189_v52 = vshrl.u32 %v32_v43, 16  ;;  %v34_v58 = vld [vmem:[%s17894_s0 + $0x28] sm:$0xf] }
   0xc   :  { %v140_v44 = vsel %vm13816_vm4, %v135_v35, %v139_v19  ;;  %v168_v50 = vor.u32 %v167_v41, %v163_v38  ;;  %v178_v56 = vrot.slane %v176_v47, 4  ;;  %v181_v57 = vrot.slane %v179_v48, 5  ;;  %v95_v0 = vld [vmem:[%s17894_s0 + $0x2c] sm:$0x1]  ;;  %v35_v10 = vld [vmem:[%s17894_s0 + $0x30] sm:$0xf] }
   0xd   :  { %v150_v49 = vsel %vm13816_vm4, %v145_v40, %v149_v31  ;;  %v159_v55 = vrot.slane %v158_v45, 4  ;;  %v187_v61 = vrot.slane %v185_v51, 5  ;;  %v191_v62 = vrot.slane %v189_v52, 4  ;;  %v36_v11 = vld [vmem:[%s17894_s0 + $0x34] sm:$0xf]  ;;  %v13326_v47 = vld [vmem:[%s17894_s0 + $0x6c] sm:$0xff]  }
   0xe   :  { %12233 = vmatmul.mubr.msk.bf16.gmra.mrb[4].mxu0 %vm992_vm1, %v13321_v28  ;;  %v10536_v54 = vcombine.low %v140_v44, %v150_v49  ;;  %v169_v60 = vrot.slane %v168_v50, 4  ;;  %v195_v63 = vshll.u32 %v94_v46, 16  ;;  %v182_v3 = vor.u32 %v181_v57, %v178_v56  ;;  %v96_v16 = vld [vmem:[%s17894_s0 + $0x38] sm:$0x1]  ;;  %v37_v26 = vld [vmem:[%s17894_s0 + $0x3c] sm:$0xf] }
   0xf   :  { %12236 = vmatprep.mubr.msk.bf16.mxu0 %vm992_vm1, %v13322_v34  ;;  %v164_v2 = vsel %vm13816_vm4, %v159_v55, %v163_v38  ;;  %v200_v4 = vshrl.u32 %v33_v53, 16  ;;  %v203_v5 = vshll.u32 %v33_v53, 16  ;;  %v192_v7 = vor.u32 %v191_v62, %v187_v61  ;;  %v38_v32 = vld [vmem:[%s17894_s0 + $0x40] sm:$0xf]  ;;  %v97_v37 = vld [vmem:[%s17894_s0 + $0x44] sm:$0x1] }
  0x10   :  { %12030 = vmatprep.mubr.msk.bf16.mxu1 %vm992_vm1, %v10536_v54  ;;  %v174_v6 = vsel %vm13816_vm4, %v169_v60, %v173_v42  ;;  %v197_v8 = vrot.slane %v195_v63, 5  ;;  %v209_v9 = vshll.u32 %v34_v58, 16  ;;  %v183_v13 = vrot.slane %v182_v3, 4  ;;  %v13325_v46 = vld [vmem:[%s17894_s0 + $0x60] sm:$0xff]   ;;  %v39_v52 = vld [vmem:[%s17894_s0 + $0x48] sm:$0xf] }
  0x11   :  { %v10537_v12 = vcombine.low %v164_v2, %v174_v6  ;;  %v202_v14 = vrot.slane %v200_v4, 4  ;;  %v205_v15 = vrot.slane %v203_v5, 5  ;;  %v193_v18 = vrot.slane %v192_v7, 4  ;;  %v40_v57 = vld [vmem:[%s17894_s0 + $0x4c] sm:$0xf] }
  0x12   :  { %v211_v19 = vrot.slane %v209_v9, 5  ;;  %v213_v20 = vshrl.u32 %v34_v58, 16  ;;  %v219_v21 = vshll.u32 %v95_v0, 16  ;;  %v188_v22 = vsel %vm13816_vm4, %v183_v13, %v187_v61  ;;  %v98_v3 = vld [vmem:[%s17894_s0 + $0x50] sm:$0x1] }
  0x13   :  { %12031 = vmatmul.mubr.msk.bf16.vlgmr.msra.gmra.mrb[0].mxu1 %vm992_vm1, %v10537_v12  ;;  %v206_v23 = vor.u32 %v205_v15, %v202_v14  ;;  %v224_v24 = vshrl.u32 %v35_v10, 16  ;;  %v227_v25 = vshll.u32 %v35_v10, 16  ;;  %v198_v27 = vsel %vm13816_vm4, %v193_v18, %v197_v8  ;;  %v41_v4 = vld [vmem:[%s17894_s0 + $0x54] sm:$0xf]  ;;  %v42_v9 = vld [vmem:[%s17894_s0 + $0x58] sm:$0xf] }
  0x14   :  { %v215_v28 = vrot.slane %v213_v20, 4  ;;  %v221_v30 = vrot.slane %v219_v21, 5  ;;  %v233_v31 = vshll.u32 %v36_v11, 16  ;;  %v10538_v33 = vcombine.low %v188_v22, %v198_v27  ;;  %v99_v22 = vld [vmem:[%s17894_s0 + $0x5c] sm:$0x1] }
  0x15   :  { %v207_v34 = vrot.slane %v206_v23, 4  ;;  %v226_v35 = vrot.slane %v224_v24, 4  ;;  %v229_v36 = vrot.slane %v227_v25, 5  ;;  %v237_v40 = vshrl.u32 %v36_v11, 16  ;;  %v13327_v23 = vld [vmem:[%s17894_s0 + $0x78] sm:$0xff]  }
  0x16   :  { %12237 = vmatmul.mubr.msk.bf16.gmra.mrb[8].mxu0 %vm992_vm1, %v13323_v59  ;;  %v216_v38 = vor.u32 %v215_v28, %v211_v19  ;;  %v235_v39 = vrot.slane %v233_v31, 5  ;;  %v243_v41 = vshll.u32 %v96_v16, 16  ;;  %12034 = vmatprep.mubr.msk.bf16.mxu1 %vm992_vm1, %v10538_v33  ;;  %v248_v44 = vshrl.u32 %v37_v26, 16  ;;  %v43_v28 = vld [vmem:[%s17894_s0 + $0x60] sm:$0xf] }
  0x17   :  { %12240 = vmatprep.mubr.msk.bf16.mxu0 %vm992_vm1, %v13324_v17  ;;  %v212_v42 = vsel %vm13816_vm4, %v207_v34, %v211_v19  ;;  %v230_v43 = vor.u32 %v229_v36, %v226_v35  ;;  %v251_v45 = vshll.u32 %v37_v26, 16  ;;  %v239_v49 = vrot.slane %v237_v40, 4 }
  0x18   :  { %v217_v48 = vrot.slane %v216_v38, 4  ;;  %v245_v50 = vrot.slane %v243_v41, 5  ;;  %v257_v51 = vshll.u32 %v38_v32, 16  ;;  %v250_v54 = vrot.slane %v248_v44, 4  ;;  %v100_v44 = vld [vmem:[%s17894_s0 + $0x68] sm:$0x1] }
  0x19   :  { %v231_v53 = vrot.slane %v230_v43, 4  ;;  %v253_v55 = vrot.slane %v251_v45, 5  ;;  %v261_v56 = vshrl.u32 %v38_v32, 16  ;;  %v240_v59 = vor.u32 %v239_v49, %v235_v39  ;;  %v45_v49 = vld [vmem:[%s17894_s0 + $0x6c] sm:$0xf] }
  0x1a   :  { %v222_v58 = vsel %vm13816_vm4, %v217_v48, %v221_v30  ;;  %v259_v60 = vrot.slane %v257_v51, 5  ;;  %v267_v61 = vshll.u32 %v97_v37, 16  ;;  %v272_v7 = vshrl.u32 %v39_v52, 16  ;;  %v13328_v30 = vld [vmem:[%s17894_s0 + $0x84] sm:$0xff]  }
  0x1b   :  { %v10539_v62 = vcombine.low %v212_v42, %v222_v58  ;;  %v236_v63 = vsel %vm13816_vm4, %v231_v53, %v235_v39  ;;  %v254_v0 = vor.u32 %v253_v55, %v250_v54  ;;  %v263_v2 = vrot.slane %v261_v56, 4  ;;  %v44_v39 = vld [vmem:[%s17894_s0 + $0x64] sm:$0xf]  ;;  %v46_v58 = vld [vmem:[%s17894_s0 + $0x70] sm:$0xf] }
  0x1c   :  { %v241_v5 = vrot.slane %v240_v59, 4  ;;  %v269_v6 = vrot.slane %v267_v61, 5  ;;  %v275_v8 = vshll.u32 %v39_v52, 16  ;;  %v281_v12 = vshll.u32 %v40_v57, 16 }
  0x1d   :  { %12035 = vmatmul.mubr.msk.bf16.gmra.mrb[4].mxu1 %vm992_vm1, %v10539_v62  ;;  %v255_v10 = vrot.slane %v254_v0, 4  ;;  %v264_v11 = vor.u32 %v263_v2, %v259_v60  ;;  %v285_v13 = vshrl.u32 %v40_v57, 16  ;;  %v274_v15 = vrot.slane %v272_v7, 4  ;;  %v13329_v0 = vld [vmem:[%s17894_s0 + $0x90] sm:$0xff]   ;;  %v13330_v7 = vld [vmem:[%s17894_s0 + $0x9c] sm:$0xff]  }
  0x1e   :  { %12241 = vmatmul.mubr.msk.bf16.gmra.mrb[12].mxu0 %vm992_vm1, %v13325_v46  ;;  %v246_v14 = vsel %vm13816_vm4, %v241_v5, %v245_v50  ;;  %v277_v16 = vrot.slane %v275_v8, 5  ;;  %v291_v17 = vshll.u32 %v98_v3, 16  ;;  %v283_v21 = vrot.slane %v281_v12, 5 }
  0x1f   :  { %12244 = vmatprep.mubr.msk.bf16.mxu0 %vm992_vm1, %v13326_v47  ;;  %v10540_v18 = vcombine.low %v236_v63, %v246_v14  ;;  %v260_v19 = vsel %vm13816_vm4, %v255_v10, %v259_v60  ;;  %v265_v20 = vrot.slane %v264_v11, 4  ;;  %v287_v25 = vrot.slane %v285_v13, 4  ;;  %v101_v63 = vld [vmem:[%s17894_s0 + $0x74] sm:$0x1] }
  0x20   :  { %v278_v24 = vor.u32 %v277_v16, %v274_v15  ;;  %v293_v26 = vrot.slane %v291_v17, 5  ;;  %v296_v27 = vshrl.u32 %v41_v4, 16  ;;  %v299_v32 = vshll.u32 %v41_v4, 16  ;;  %v48_v16 = vld [vmem:[%s17894_s0 + $0x7c] sm:$0xf] }
  0x21   :  { %12038 = vmatprep.mubr.msk.bf16.mxu1 %vm992_vm1, %v10540_v18  ;;  %v270_v31 = vsel %vm13816_vm4, %v265_v20, %v269_v6  ;;  %v305_v33 = vshll.u32 %v42_v9, 16  ;;  %v309_v34 = vshrl.u32 %v42_v9, 16  ;;  %v288_v37 = vor.u32 %v287_v25, %v283_v21  ;;  %v47_v6 = vld [vmem:[%s17894_s0 + $0x78] sm:$0xf] }
  0x22   :  { %v10541_v35 = vcombine.low %v260_v19, %v270_v31  ;;  %v279_v36 = vrot.slane %v278_v24, 4  ;;  %v298_v38 = vrot.slane %v296_v27, 4  ;;  %v301_v40 = vrot.slane %v299_v32, 5 }
  0x23   :  { %v307_v41 = vrot.slane %v305_v33, 5  ;;  %v311_v42 = vrot.slane %v309_v34, 4  ;;  %v315_v43 = vshll.u32 %v99_v22, 16  ;;  %v289_v46 = vrot.slane %v288_v37, 4  ;;  %v49_v22 = vld [vmem:[%s17894_s0 + $0x84] sm:$0xf] }
  0x24   :  { %v284_v45 = vsel %vm13816_vm4, %v279_v36, %v283_v21  ;;  %v320_v47 = vshrl.u32 %v43_v28, 16  ;;  %v323_v48 = vshll.u32 %v43_v28, 16  ;;  %v302_v50 = vor.u32 %v301_v40, %v298_v38  ;;  %v102_v21 = vld [vmem:[%s17894_s0 + $0x80] sm:$0x1]  ;;  %v50_v40 = vld [vmem:[%s17894_s0 + $0x88] sm:$0xf] }
  0x25   :  { %12039 = vmatmul.mubr.msk.bf16.gmra.mrb[8].mxu1 %vm992_vm1, %v10541_v35  ;;  %v312_v51 = vor.u32 %v311_v42, %v307_v41  ;;  %v317_v52 = vrot.slane %v315_v43, 5  ;;  %v329_v53 = vshll.u32 %v44_v39, 16  ;;  %v294_v54 = vsel %vm13816_vm4, %v289_v46, %v293_v26  ;;  %v13332_v42 = vld [vmem:[%s17894_s0 + $0xb4] sm:$0xff]  }
  0x26   :  { %12245 = vmatmul.mubr.msk.bf16.gmra.mrb[16].mxu0 %vm992_vm1, %v13327_v23  ;;  %v322_v55 = vrot.slane %v320_v47, 4  ;;  %v325_v56 = vrot.slane %v323_v48, 5  ;;  %v333_v57 = vshrl.u32 %v44_v39, 16  ;;  %v10542_v59 = vcombine.low %v284_v45, %v294_v54 }
  0x27   :  { %12248 = vmatprep.mubr.msk.bf16.mxu0 %vm992_vm1, %v13328_v30  ;;  %v303_v60 = vrot.slane %v302_v50, 4  ;;  %v313_v61 = vrot.slane %v312_v51, 4  ;;  %v331_v62 = vrot.slane %v329_v53, 5  ;;  %v339_v4 = vshll.u32 %v100_v44, 16  ;;  %v103_v50 = vld [vmem:[%s17894_s0 + $0x8c] sm:$0x1] }
  0x28   :  { %v326_v2 = vor.u32 %v325_v56, %v322_v55  ;;  %v335_v3 = vrot.slane %v333_v57, 4  ;;  %v344_v5 = vshrl.u32 %v45_v49, 16  ;;  %12042 = vmatprep.mubr.msk.bf16.mxu1 %vm992_vm1, %v10542_v59  ;;  %v347_v10 = vshll.u32 %v45_v49, 16  ;;  %v51_v56 = vld [vmem:[%s17894_s0 + $0x90] sm:$0xf] }
  0x29   :  { %v308_v8 = vsel %vm13816_vm4, %v303_v60, %v307_v41  ;;  %v318_v9 = vsel %vm13816_vm4, %v313_v61, %v317_v52  ;;  %v353_v11 = vshll.u32 %v46_v58, 16  ;;  %v341_v15 = vrot.slane %v339_v4, 5  ;;  %v13331_v41 = vld [vmem:[%s17894_s0 + $0xa8] sm:$0xff]   ;;  %v52_v61 = vld [vmem:[%s17894_s0 + $0x94] sm:$0xf] }
  0x2a   :  { %v10543_v12 = vcombine.low %v308_v8, %v318_v9  ;;  %v327_v13 = vrot.slane %v326_v2, 4  ;;  %v336_v14 = vor.u32 %v335_v3, %v331_v62  ;;  %v346_v17 = vrot.slane %v344_v5, 4 }
  0x2b   :  { %v349_v18 = vrot.slane %v347_v10, 5  ;;  %v355_v19 = vrot.slane %v353_v11, 5  ;;  %v357_v20 = vshrl.u32 %v46_v58, 16  ;;  %v363_v25 = vshll.u32 %v101_v63, 16 }
  0x2c   :  { %v332_v23 = vsel %vm13816_vm4, %v327_v13, %v331_v62  ;;  %v337_v24 = vrot.slane %v336_v14, 4  ;;  %v368_v26 = vshrl.u32 %v47_v6, 16  ;;  %v371_v30 = vshll.u32 %v47_v6, 16  ;;  %v104_v6 = vld [vmem:[%s17894_s0 + $0x98] sm:$0x1] }
  0x2d   :  { %12043 = vmatmul.mubr.msk.bf16.gmra.mrb[12].mxu1 %vm992_vm1, %v10543_v12  ;;  %v350_v27 = vor.u32 %v349_v18, %v346_v17  ;;  %v359_v28 = vrot.slane %v357_v20, 4  ;;  %v377_v31 = vshll.u32 %v48_v16, 16  ;;  %v365_v33 = vrot.slane %v363_v25, 5  ;;  %v53_v12 = vld [vmem:[%s17894_s0 + $0x9c] sm:$0xf]  ;;  %v13333_v18 = vld [vmem:[%s17894_s0 + $0xc0] sm:$0xff]  }
  0x2e   :  { %12249 = vmatmul.mubr.msk.bf16.gmra.mrb[20].mxu0 %vm992_vm1, %v13329_v0  ;;  %v342_v32 = vsel %vm13816_vm4, %v337_v24, %v341_v15  ;;  %v370_v34 = vrot.slane %v368_v26, 4  ;;  %v381_v35 = vshrl.u32 %v48_v16, 16  ;;  %v373_v39 = vrot.slane %v371_v30, 5  ;;  %v54_v17 = vld [vmem:[%s17894_s0 + $0xa0] sm:$0xf] }
  0x2f   :  { %12252 = vmatprep.mubr.msk.bf16.mxu0 %vm992_vm1, %v13330_v7  ;;  %v10544_v36 = vcombine.low %v332_v23, %v342_v32  ;;  %v351_v37 = vrot.slane %v350_v27, 4  ;;  %v360_v38 = vor.u32 %v359_v28, %v355_v19  ;;  %v379_v43 = vrot.slane %v377_v31, 5  ;;  %v105_v25 = vld [vmem:[%s17894_s0 + $0xa4] sm:$0x1] }
  0x30   :  { %v383_v44 = vrot.slane %v381_v35, 4  ;;  %v387_v45 = vshll.u32 %v102_v21, 16  ;;  %v392_v46 = vshrl.u32 %v49_v22, 16  ;;  %v374_v49 = vor.u32 %v373_v39, %v370_v34 }
  0x31   :  { %12046 = vmatprep.mubr.msk.bf16.mxu1 %vm992_vm1, %v10544_v36  ;;  %v356_v47 = vsel %vm13816_vm4, %v351_v37, %v355_v19  ;;  %v361_v48 = vrot.slane %v360_v38, 4  ;;  %v395_v51 = vshll.u32 %v49_v22, 16  ;;  %v401_v55 = vshll.u32 %v50_v40, 16  ;;  %v56_v38 = vld [vmem:[%s17894_s0 + $0xac] sm:$0xf] }
  0x32   :  { %v384_v52 = vor.u32 %v383_v44, %v379_v43  ;;  %v389_v53 = vrot.slane %v387_v45, 5  ;;  %v394_v54 = vrot.slane %v392_v46, 4  ;;  %v375_v58 = vrot.slane %v374_v49, 4  ;;  %v106_v46 = vld [vmem:[%s17894_s0 + $0xb0] sm:$0x1] }
  0x33   :  { %v366_v57 = vsel %vm13816_vm4, %v361_v48, %v365_v33  ;;  %v397_v59 = vrot.slane %v395_v51, 5  ;;  %v405_v60 = vshrl.u32 %v50_v40, 16  ;;  %v403_v0 = vrot.slane %v401_v55, 5  ;;  %v55_v33 = vld [vmem:[%s17894_s0 + $0xa8] sm:$0xf] }
  0x34   :  { %v10545_v62 = vcombine.low %v356_v47, %v366_v57  ;;  %v385_v63 = vrot.slane %v384_v52, 4  ;;  %v411_v2 = vshll.u32 %v103_v50, 16  ;;  %v380_v3 = vsel %vm13816_vm4, %v375_v58, %v379_v43  ;;  %v10888_v52 = vld [vmem:[%s17894_s0 + $0xc] sm:$0xf]  ;;  %v14054_v57 = vld [vmem:[%s17896_s2 + $0x14] sm:$0x3] }
  0x35   :  { %v398_v4 = vor.u32 %v397_v59, %v394_v54  ;;  %v407_v5 = vrot.slane %v405_v60, 4  ;;  %v416_v7 = vshrl.u32 %v51_v56, 16  ;;  %v419_v10 = vshll.u32 %v51_v56, 16  ;;  %13280 = vmatprep.subr.msk.bf16.mxu0 %vm1089_vm0, %v14054_v57 }
  0x36   :  { %12253 = vmatmul.mubr.msk.bf16.gmra.mrb[24].mxu0 %vm992_vm1, %v13331_v41  ;;  %12047 = vmatmul.mubr.msk.bf16.gmra.mrb[16].mxu1 %vm992_vm1, %v10545_v62  ;;  %v390_v8 = vsel %vm13816_vm4, %v385_v63, %v389_v53  ;;  %v413_v9 = vrot.slane %v411_v2, 5  ;;  %v425_v11 = vshll.u32 %v52_v61, 16  ;;  %v429_v21 = vshrl.u32 %v52_v61, 16  ;;  %v10889_v62 = vld [vmem:[%s17894_s0 + $0x10] sm:$0xf] }
  0x37   :  { %12256 = vmatprep.mubr.msk.bf16.mxu0 %vm992_vm1, %v13332_v42  ;;  %v10546_v13 = vcombine.low %v380_v3, %v390_v8  ;;  %v399_v14 = vrot.slane %v398_v4, 4  ;;  %v408_v15 = vor.u32 %v407_v5, %v403_v0  ;;  %v418_v16 = vrot.slane %v416_v7, 4 }
  0x38   :  { %v421_v19 = vrot.slane %v419_v10, 5  ;;  %v427_v20 = vrot.slane %v425_v11, 5  ;;  %v435_v22 = vshll.u32 %v104_v6, 16  ;;  %v440_v26 = vshrl.u32 %v53_v12, 16  ;;  %v10890_v6 = vld [vmem:[%s17894_s0 + $0x14] sm:$0x1] }
  0x39   :  { %12050 = vmatprep.mubr.msk.bf16.mxu1 %vm992_vm1, %v10546_v13  ;;  %v404_v23 = vsel %vm13816_vm4, %v399_v14, %v403_v0  ;;  %v409_v24 = vrot.slane %v408_v15, 4  ;;  %v443_v27 = vshll.u32 %v53_v12, 16  ;;  %v431_v30 = vrot.slane %v429_v21, 4  ;;  %v57_v13 = vld [vmem:[%s17894_s0 + $0xb4] sm:$0xf] }
  0x3a   :  { %v422_v28 = vor.u32 %v421_v19, %v418_v16  ;;  %v437_v31 = vrot.slane %v435_v22, 5  ;;  %v449_v32 = vshll.u32 %v54_v17, 16  ;;  %v442_v35 = vrot.slane %v440_v26, 4 }
  0x3b   :  { %v414_v34 = vsel %vm13816_vm4, %v409_v24, %v413_v9  ;;  %v445_v36 = vrot.slane %v443_v27, 5  ;;  %v453_v37 = vshrl.u32 %v54_v17, 16  ;;  %v432_v41 = vor.u32 %v431_v30, %v427_v20 }
  0x3c   :  { %v10547_v39 = vcombine.low %v404_v23, %v414_v34  ;;  %v423_v40 = vrot.slane %v422_v28, 4  ;;  %v451_v42 = vrot.slane %v449_v32, 5  ;;  %v459_v45 = vshll.u32 %v105_v25, 16 }
  0x3d   :  { %v446_v43 = vor.u32 %v445_v36, %v442_v35  ;;  %v455_v44 = vrot.slane %v453_v37, 4  ;;  %v464_v47 = vshrl.u32 %v55_v33, 16  ;;  %v433_v49 = vrot.slane %v432_v41, 4 }
  0x3e   :  { %12257 = vmatmul.mubr.msk.bf16.gmra.mrb[28].mxu0 %vm992_vm1, %v13333_v18  ;;  %12051 = vmatmul.mubr.msk.bf16.gmra.mrb[20].mxu1 %vm992_vm1, %v10547_v39  ;;  %v428_v48 = vsel %vm13816_vm4, %v423_v40, %v427_v20  ;;  %v467_v50 = vshll.u32 %v55_v33, 16  ;;  %v473_v51 = vshll.u32 %v56_v38, 16  ;;  %v461_v55 = vrot.slane %v459_v45, 5  ;;  %v58_v18 = vld [vmem:[%s17894_s0 + $0xb8] sm:$0xf] }
  0x3f   :  { %v447_v53 = vrot.slane %v446_v43, 4  ;;  %v456_v54 = vor.u32 %v455_v44, %v451_v42  ;;  %v466_v56 = vrot.slane %v464_v47, 4  ;;  %v438_v58 = vsel %vm13816_vm4, %v433_v49, %v437_v31  ;;  %v107_v31 = vld [vmem:[%s17894_s0 + $0xbc] sm:$0x1]  ;;  %v10891_v33 = vld [vmem:[%s17894_s0 + $0x18] sm:$0xf] }
  0x40   :  { %v469_v59 = vrot.slane %v467_v50, 5  ;;  %v475_v60 = vrot.slane %v473_v51, 5  ;;  %v477_v61 = vshrl.u32 %v56_v38, 16  ;;  %v10548_v63 = vcombine.low %v428_v48, %v438_v58  ;;  %v10892_v38 = vld [vmem:[%s17894_s0 + $0x1c] sm:$0xf] }
  0x41   :  { %v452_v0 = vsel %vm13816_vm4, %v447_v53, %v451_v42  ;;  %v457_v2 = vrot.slane %v456_v54, 4  ;;  %v483_v3 = vshll.u32 %v106_v46, 16  ;;  %v3577_v7 = vshrl.u32 %v10888_v52, 16  ;;  %v10893_v49 = vld [vmem:[%s17894_s0 + $0x20] sm:$0x1] }
  0x42   :  { %v470_v4 = vor.u32 %v469_v59, %v466_v56  ;;  %v479_v5 = vrot.slane %v477_v61, 4  ;;  %v3580_v8 = vshll.u32 %v10888_v52, 16  ;;  %12054 = vmatprep.mubr.msk.bf16.mxu1 %vm992_vm1, %v10548_v63  ;;  %v3586_v11 = vshll.u32 %v10889_v62, 16  ;;  %v59_v56 = vld [vmem:[%s17894_s0 + $0xd8] sm:$0xf] }
  0x43   :  { %v462_v9 = vsel %vm13816_vm4, %v457_v2, %v461_v55  ;;  %v485_v10 = vrot.slane %v483_v3, 5  ;;  %v3590_v12 = vshrl.u32 %v10889_v62, 16  ;;  %v3579_v17 = vrot.slane %v3577_v7, 4  ;;  %v60_v62 = vld [vmem:[%s17894_s0 + $0xdc] sm:$0xf] }
  0x44   :  { %v10549_v14 = vcombine.low %v452_v0, %v462_v9  ;;  %v471_v15 = vrot.slane %v470_v4, 4  ;;  %v480_v16 = vor.u32 %v479_v5, %v475_v60  ;;  %v3582_v19 = vrot.slane %v3580_v8, 5 }
  0x45   :  { %v3588_v20 = vrot.slane %v3586_v11, 5  ;;  %v3592_v21 = vrot.slane %v3590_v12, 4  ;;  %v3596_v22 = vshll.u32 %v10890_v6, 16  ;;  %v488_v25 = vshrl.u32 %v57_v13, 16  ;;  %v108_v6 = vld [vmem:[%s17894_s0 + $0xe0] sm:$0x1] }
  0x46   :  { %12055 = vmatmul.mubr.msk.bf16.gmra.mrb[24].mxu1 %vm992_vm1, %v10549_v14  ;;  %v476_v23 = vsel %vm13816_vm4, %v471_v15, %v475_v60  ;;  %v481_v24 = vrot.slane %v480_v16, 4  ;;  %v491_v26 = vshll.u32 %v57_v13, 16  ;;  %v3583_v27 = vor.u32 %v3582_v19, %v3579_v17  ;;  %v10894_v13 = vld [vmem:[%s17894_s0 + $0x24] sm:$0xf]  ;;  %v10895_v17 = vld [vmem:[%s17894_s0 + $0x28] sm:$0xf] }
  0x47   :  { %v3593_v28 = vor.u32 %v3592_v21, %v3588_v20  ;;  %v3598_v30 = vrot.slane %v3596_v22, 5  ;;  %v497_v32 = vshll.u32 %v58_v18, 16  ;;  %v490_v35 = vrot.slane %v488_v25, 4 }
  0x48   :  { %v486_v34 = vsel %vm13816_vm4, %v481_v24, %v485_v10  ;;  %v493_v36 = vrot.slane %v491_v26, 5  ;;  %v501_v37 = vshrl.u32 %v58_v18, 16  ;;  %v3584_v40 = vrot.slane %v3583_v27, 4 }
  0x49   :  { %v10550_v39 = vcombine.low %v476_v23, %v486_v34  ;;  %v3594_v41 = vrot.slane %v3593_v28, 4  ;;  %v499_v42 = vrot.slane %v497_v32, 5  ;;  %v507_v45 = vshll.u32 %v107_v31, 16  ;;  %v61_v32 = vld [vmem:[%s17894_s0 + $0xe4] sm:$0xf] }
  0x4a   :  { %v494_v43 = vor.u32 %v493_v36, %v490_v35  ;;  %v503_v44 = vrot.slane %v501_v37, 4  ;;  %v3601_v46 = vshrl.u32 %v10891_v33, 16  ;;  %v3589_v47 = vsel %vm13816_vm4, %v3584_v40, %v3588_v20  ;;  %v62_v37 = vld [vmem:[%s17894_s0 + $0xe8] sm:$0xf] }
  0x4b   :  { %12058 = vmatprep.mubr.msk.bf16.mxu1 %vm992_vm1, %v10550_v39  ;;  %v3599_v48 = vsel %vm13816_vm4, %v3594_v41, %v3598_v30  ;;  %v3604_v50 = vshll.u32 %v10891_v33, 16  ;;  %v3610_v51 = vshll.u32 %v10892_v38, 16  ;;  %v509_v55 = vrot.slane %v507_v45, 5  ;;  %v10896_v30 = vld [vmem:[%s17894_s0 + $0x2c] sm:$0x1] }
  0x4c   :  { %v10984_v52 = vcombine.low %v3589_v47, %v3599_v48  ;;  %v495_v53 = vrot.slane %v494_v43, 4  ;;  %v504_v54 = vor.u32 %v503_v44, %v499_v42  ;;  %v3603_v58 = vrot.slane %v3601_v46, 4  ;;  %v109_v48 = vld [vmem:[%s17894_s0 + $0xec] sm:$0x1] }
  0x4d   :  { %v3606_v59 = vrot.slane %v3604_v50, 5  ;;  %v3612_v60 = vrot.slane %v3610_v51, 5  ;;  %v3614_v61 = vshrl.u32 %v10892_v38, 16  ;;  %v3620_v2 = vshll.u32 %v10893_v49, 16  ;;  %v10897_v51 = vld [vmem:[%s17894_s0 + $0x30] sm:$0xf] }
  0x4e   :  { %12294 = vmatprep.mubr.msk.bf16.mxu0 %vm992_vm1, %v10984_v52  ;;  %v500_v63 = vsel %vm13816_vm4, %v495_v53, %v499_v42  ;;  %v505_v0 = vrot.slane %v504_v54, 4  ;;  %v5439_v3 = vsel %vm1089_vm0, %v14054_v57, 0  ;;  %v512_v7 = vshrl.u32 %v59_v56, 16 }
  0x4f   :  { %v3607_v4 = vor.u32 %v3606_v59, %v3603_v58  ;;  %v3616_v5 = vrot.slane %v3614_v61, 4  ;;  %v515_v8 = vshll.u32 %v59_v56, 16  ;;  %v3622_v10 = vrot.slane %v3620_v2, 5  ;;  %v10898_v56 = vld [vmem:[%s17894_s0 + $0x34] sm:$0xf] }
  0x50   :  { %v510_v9 = vsel %vm13816_vm4, %v505_v0, %v509_v55  ;;  %v521_v11 = vshll.u32 %v60_v62, 16  ;;  %v525_v12 = vshrl.u32 %v60_v62, 16  ;;  %v514_v16 = vrot.slane %v512_v7, 4  ;;  %v10899_v2 = vld [vmem:[%s17894_s0 + $0x38] sm:$0x1] }
  0x51   :  { %v10551_v14 = vcombine.low %v500_v63, %v510_v9  ;;  %v3608_v57 = vrot.slane %v3607_v4, 4  ;;  %v3617_v15 = vor.u32 %v3616_v5, %v3612_v60  ;;  %v517_v18 = vrot.slane %v515_v8, 5  ;;  %v63_v8 = vld [vmem:[%s17894_s0 + $0xf0] sm:$0xf] }
  0x52   :  { %v523_v19 = vrot.slane %v521_v11, 5  ;;  %v527_v20 = vrot.slane %v525_v12, 4  ;;  %v531_v21 = vshll.u32 %v108_v6, 16  ;;  %v3625_v24 = vshrl.u32 %v10894_v13, 16 }
  0x53   :  { %12059 = vmatmul.mubr.msk.bf16.gmra.mrb[28].mxu1 %vm992_vm1, %v10551_v14  ;;  %v3613_v22 = vsel %vm13816_vm4, %v3608_v57, %v3612_v60  ;;  %v3618_v23 = vrot.slane %v3617_v15, 4  ;;  %v3628_v25 = vshll.u32 %v10894_v13, 16  ;;  %v518_v26 = vor.u32 %v517_v18, %v514_v16  ;;  %v64_v16 = vld [vmem:[%s17894_s0 + $0xf4] sm:$0xf] }
  0x54   :  { %v528_v27 = vor.u32 %v527_v20, %v523_v19  ;;  %v533_v28 = vrot.slane %v531_v21, 5  ;;  %v3634_v31 = vshll.u32 %v10895_v17, 16  ;;  %v3627_v34 = vrot.slane %v3625_v24, 4  ;;  %v110_v24 = vld [vmem:[%s17894_s0 + $0xf8] sm:$0x1] }
  0x55   :  { %v3623_v33 = vsel %vm13816_vm4, %v3618_v23, %v3622_v10  ;;  %v3630_v35 = vrot.slane %v3628_v25, 5  ;;  %v3638_v36 = vshrl.u32 %v10895_v17, 16  ;;  %v519_v39 = vrot.slane %v518_v26, 4 }
  0x56   :  { %v10985_v38 = vcombine.low %v3613_v22, %v3623_v33  ;;  %v529_v40 = vrot.slane %v528_v27, 4  ;;  %v3636_v41 = vrot.slane %v3634_v31, 5  ;;  %v3644_v44 = vshll.u32 %v10896_v30, 16  ;;  %v10900_v31 = vld [vmem:[%s17894_s0 + $0x3c] sm:$0xf] }
  0x57   :  { %v3631_v42 = vor.u32 %v3630_v35, %v3627_v34  ;;  %v3640_v43 = vrot.slane %v3638_v36, 4  ;;  %v536_v45 = vshrl.u32 %v61_v32, 16  ;;  %v524_v46 = vsel %vm13816_vm4, %v519_v39, %v523_v19  ;;  %v10901_v36 = vld [vmem:[%s17894_s0 + $0x40] sm:$0xf] }
  0x58   :  { %12295 = vmatmul.mubr.msk.bf16.vlgmr.msra.gmra.mrb[0].mxu0 %vm992_vm1, %v10985_v38  ;;  %v534_v47 = vsel %vm13816_vm4, %v529_v40, %v533_v28  ;;  %v539_v49 = vshll.u32 %v61_v32, 16  ;;  %v545_v50 = vshll.u32 %v62_v37, 16  ;;  %v3646_v55 = vrot.slane %v3644_v44, 5  ;;  %v10902_v44 = vld [vmem:[%s17894_s0 + $0x44] sm:$0x1] }
  0x59   :  { %12359 = vmatpush3.bf16.msra.mxu0 %v5439_v3  ;;  %v10552_v52 = vcombine.low %v524_v46, %v534_v47  ;;  %v3632_v53 = vrot.slane %v3631_v42, 4  ;;  %v3641_v54 = vor.u32 %v3640_v43, %v3636_v41  ;;  %v538_v58 = vrot.slane %v536_v45, 4 }
  0x5a   :  { %v541_v59 = vrot.slane %v539_v49, 5  ;;  %v547_v60 = vrot.slane %v545_v50, 5  ;;  %v549_v61 = vshrl.u32 %v62_v37, 16  ;;  %v555_v0 = vshll.u32 %v109_v48, 16  ;;  %v65_v50 = vld [vmem:[%s17894_s0 + $0xfc] sm:$0xf] }
  0x5b   :  { %12062 = vmatprep.mubr.msk.bf16.mxu1 %vm992_vm1, %v10552_v52  ;;  %v3637_v62 = vsel %vm13816_vm4, %v3632_v53, %v3636_v41  ;;  %v3642_v63 = vrot.slane %v3641_v54, 4  ;;  %v3649_v3 = vshrl.u32 %v10897_v51, 16  ;;  %v3652_v6 = vshll.u32 %v10897_v51, 16 }
  0x5c   :  { %v542_v4 = vor.u32 %v541_v59, %v538_v58  ;;  %v551_v5 = vrot.slane %v549_v61, 4  ;;  %v3658_v7 = vshll.u32 %v10898_v56, 16  ;;  %v557_v10 = vrot.slane %v555_v0, 5 }
  0x5d   :  { %v3647_v9 = vsel %vm13816_vm4, %v3642_v63, %v3646_v55  ;;  %v3651_v11 = vrot.slane %v3649_v3, 4  ;;  %v3662_v12 = vshrl.u32 %v10898_v56, 16  ;;  %v3654_v15 = vrot.slane %v3652_v6, 5  ;;  %v66_v55 = vld [vmem:[%s17894_s0 + $0x100] sm:$0xf] }
  0x5e   :  { %v10986_v13 = vcombine.low %v3637_v62, %v3647_v9  ;;  %v543_v14 = vrot.slane %v542_v4, 4  ;;  %v552_v57 = vor.u32 %v551_v5, %v547_v60  ;;  %v3660_v17 = vrot.slane %v3658_v7, 5  ;;  %v111_v63 = vld [vmem:[%s17894_s0 + $0x104] sm:$0x1]  ;;  %v10903_v7 = vld [vmem:[%s17894_s0 + $0x48] sm:$0xf] }
  0x5f   :  { %v3664_v18 = vrot.slane %v3662_v12, 4  ;;  %v3668_v19 = vshll.u32 %v10899_v2, 16  ;;  %v560_v20 = vshrl.u32 %v63_v8, 16  ;;  %v3655_v23 = vor.u32 %v3654_v15, %v3651_v11  ;;  %v10904_v12 = vld [vmem:[%s17894_s0 + $0x4c] sm:$0xf] }
  0x60   :  { %12298 = vmatprep.mubr.msk.bf16.mxu0 %vm992_vm1, %v10986_v13  ;;  %v548_v21 = vsel %vm13816_vm4, %v543_v14, %v547_v60  ;;  %v553_v22 = vrot.slane %v552_v57, 4  ;;  %v563_v25 = vshll.u32 %v63_v8, 16  ;;  %v569_v30 = vshll.u32 %v64_v16, 16 }
  0x61   :  { %v3665_v26 = vor.u32 %v3664_v18, %v3660_v17  ;;  %v3670_v27 = vrot.slane %v3668_v19, 5  ;;  %v562_v28 = vrot.slane %v560_v20, 4  ;;  %v3656_v33 = vrot.slane %v3655_v23, 4 }
  0x62   :  { %v558_v32 = vsel %vm13816_vm4, %v553_v22, %v557_v10  ;;  %v565_v34 = vrot.slane %v563_v25, 5  ;;  %v573_v35 = vshrl.u32 %v64_v16, 16  ;;  %v571_v39 = vrot.slane %v569_v30, 5  ;;  %v10905_v22 = vld [vmem:[%s17894_s0 + $0x50] sm:$0x1] }
  0x63   :  { %v10553_v37 = vcombine.low %v548_v21, %v558_v32  ;;  %v3666_v38 = vrot.slane %v3665_v26, 4  ;;  %v579_v40 = vshll.u32 %v110_v24, 16  ;;  %v3661_v41 = vsel %vm13816_vm4, %v3656_v33, %v3660_v17  ;;  %v67_v30 = vld [vmem:[%s17894_s0 + $0x108] sm:$0xf] }
  0x64   :  { %v566_v42 = vor.u32 %v565_v34, %v562_v28  ;;  %v575_v43 = vrot.slane %v573_v35, 4  ;;  %v3673_v45 = vshrl.u32 %v10900_v31, 16  ;;  %v3676_v48 = vshll.u32 %v10900_v31, 16  ;;  %v68_v35 = vld [vmem:[%s17894_s0 + $0x10c] sm:$0xf] }
  0x65   :  { %12063 = vmatmul.mubr.msk.bf16.gmra.mrb[32].mxu1 %vm992_vm1, %v10553_v37  ;;  %v3671_v46 = vsel %vm13816_vm4, %v3666_v38, %v3670_v27  ;;  %v581_v47 = vrot.slane %v579_v40, 5  ;;  %v3682_v49 = vshll.u32 %v10901_v36, 16  ;;  %v3686_v59 = vshrl.u32 %v10901_v36, 16 }
  0x66   :  { %v10987_v51 = vcombine.low %v3661_v41, %v3671_v46  ;;  %v567_v52 = vrot.slane %v566_v42, 4  ;;  %v576_v53 = vor.u32 %v575_v43, %v571_v39  ;;  %v3675_v54 = vrot.slane %v3673_v45, 4  ;;  %v112_v42 = vld [vmem:[%s17894_s0 + $0x110] sm:$0x1] }
  0x67   :  { %v3678_v56 = vrot.slane %v3676_v48, 5  ;;  %v3684_v58 = vrot.slane %v3682_v49, 5  ;;  %v3692_v60 = vshll.u32 %v10902_v44, 16  ;;  %v584_v0 = vshrl.u32 %v65_v50, 16  ;;  %v10906_v49 = vld [vmem:[%s17894_s0 + $0x54] sm:$0xf] }
  0x68   :  { %12299 = vmatmul.mubr.msk.bf16.gmra.mrb[4].mxu0 %vm992_vm1, %v10987_v51  ;;  %v572_v61 = vsel %vm13816_vm4, %v567_v52, %v571_v39  ;;  %v577_v62 = vrot.slane %v576_v53, 4  ;;  %v587_v2 = vshll.u32 %v65_v50, 16  ;;  %v3688_v4 = vrot.slane %v3686_v59, 4 }
  0x69   :  { %v3679_v3 = vor.u32 %v3678_v56, %v3675_v54  ;;  %v3694_v5 = vrot.slane %v3692_v60, 5  ;;  %v593_v6 = vshll.u32 %v66_v55, 16  ;;  %v586_v9 = vrot.slane %v584_v0, 4  ;;  %v10907_v54 = vld [vmem:[%s17894_s0 + $0x58] sm:$0xf] }
  0x6a   :  { %v582_v8 = vsel %vm13816_vm4, %v577_v62, %v581_v47  ;;  %v589_v10 = vrot.slane %v587_v2, 5  ;;  %v597_v11 = vshrl.u32 %v66_v55, 16  ;;  %v3689_v57 = vor.u32 %v3688_v4, %v3684_v58  ;;  %v10908_v4 = vld [vmem:[%s17894_s0 + $0x5c] sm:$0x1] }
  0x6b   :  { %v10554_v13 = vcombine.low %v572_v61, %v582_v8  ;;  %v3680_v14 = vrot.slane %v3679_v3, 4  ;;  %v595_v15 = vrot.slane %v593_v6, 5  ;;  %v603_v18 = vshll.u32 %v111_v63, 16  ;;  %v69_v6 = vld [vmem:[%s17894_s0 + $0x114] sm:$0xf] }
  0x6c   :  { %v590_v16 = vor.u32 %v589_v10, %v586_v9  ;;  %v599_v17 = vrot.slane %v597_v11, 4  ;;  %v3697_v19 = vshrl.u32 %v10903_v7, 16  ;;  %v3690_v21 = vrot.slane %v3689_v57, 4  ;;  %v70_v11 = vld [vmem:[%s17894_s0 + $0x118] sm:$0xf] }
  0x6d   :  { %12066 = vmatprep.mubr.msk.bf16.mxu1 %vm992_vm1, %v10554_v13  ;;  %v3685_v20 = vsel %vm13816_vm4, %v3680_v14, %v3684_v58  ;;  %v3700_v23 = vshll.u32 %v10903_v7, 16  ;;  %v3706_v24 = vshll.u32 %v10904_v12, 16  ;;  %v605_v27 = vrot.slane %v603_v18, 5 }
  0x6e   :  { %v591_v25 = vrot.slane %v590_v16, 4  ;;  %v600_v26 = vor.u32 %v599_v17, %v595_v15  ;;  %v3699_v28 = vrot.slane %v3697_v19, 4  ;;  %v3695_v31 = vsel %vm13816_vm4, %v3690_v21, %v3694_v5  ;;  %v113_v21 = vld [vmem:[%s17894_s0 + $0x11c] sm:$0x1] }
  0x6f   :  { %v3702_v32 = vrot.slane %v3700_v23, 5  ;;  %v3708_v33 = vrot.slane %v3706_v24, 5  ;;  %v3710_v34 = vshrl.u32 %v10904_v12, 16  ;;  %v10988_v36 = vcombine.low %v3685_v20, %v3695_v31  ;;  %v10909_v24 = vld [vmem:[%s17894_s0 + $0x60] sm:$0xf] }
  0x70   :  { %v596_v37 = vsel %vm13816_vm4, %v591_v25, %v595_v15  ;;  %v601_v38 = vrot.slane %v600_v26, 4  ;;  %v3716_v39 = vshll.u32 %v10905_v22, 16  ;;  %v608_v43 = vshrl.u32 %v67_v30, 16 }
  0x71   :  { %v3703_v40 = vor.u32 %v3702_v32, %v3699_v28  ;;  %v3712_v41 = vrot.slane %v3710_v34, 4  ;;  %v611_v44 = vshll.u32 %v67_v30, 16  ;;  %12302 = vmatprep.mubr.msk.bf16.mxu0 %vm992_vm1, %v10988_v36  ;;  %v617_v47 = vshll.u32 %v68_v35, 16  ;;  %v10910_v30 = vld [vmem:[%s17894_s0 + $0x64] sm:$0xf] }
  0x72   :  { %v606_v45 = vsel %vm13816_vm4, %v601_v38, %v605_v27  ;;  %v3718_v46 = vrot.slane %v3716_v39, 5  ;;  %v621_v48 = vshrl.u32 %v68_v35, 16  ;;  %v610_v53 = vrot.slane %v608_v43, 4  ;;  %v10911_v38 = vld [vmem:[%s17894_s0 + $0x68] sm:$0x1] }
  0x73   :  { %v10555_v50 = vcombine.low %v596_v37, %v606_v45  ;;  %v3704_v51 = vrot.slane %v3703_v40, 4  ;;  %v3713_v52 = vor.u32 %v3712_v41, %v3708_v33  ;;  %v613_v55 = vrot.slane %v611_v44, 5  ;;  %v71_v44 = vld [vmem:[%s17894_s0 + $0x120] sm:$0xf] }
  0x74   :  { %v619_v56 = vrot.slane %v617_v47, 5  ;;  %v623_v58 = vrot.slane %v621_v48, 4  ;;  %v627_v59 = vshll.u32 %v112_v42, 16  ;;  %v3721_v62 = vshrl.u32 %v10906_v49, 16 }
  0x75   :  { %12067 = vmatmul.mubr.msk.bf16.gmra.mrb[36].mxu1 %vm992_vm1, %v10555_v50  ;;  %v3709_v60 = vsel %vm13816_vm4, %v3704_v51, %v3708_v33  ;;  %v3714_v61 = vrot.slane %v3713_v52, 4  ;;  %v3724_v63 = vshll.u32 %v10906_v49, 16  ;;  %v614_v0 = vor.u32 %v613_v55, %v610_v53  ;;  %v72_v53 = vld [vmem:[%s17894_s0 + $0x124] sm:$0xf] }
  0x76   :  { %v624_v2 = vor.u32 %v623_v58, %v619_v56  ;;  %v629_v3 = vrot.slane %v627_v59, 5  ;;  %v3730_v5 = vshll.u32 %v10907_v54, 16  ;;  %v3723_v8 = vrot.slane %v3721_v62, 4  ;;  %v114_v62 = vld [vmem:[%s17894_s0 + $0x128] sm:$0x1] }
  0x77   :  { %v3719_v7 = vsel %vm13816_vm4, %v3714_v61, %v3718_v46  ;;  %v3726_v9 = vrot.slane %v3724_v63, 5  ;;  %v3734_v10 = vshrl.u32 %v10907_v54, 16  ;;  %v615_v13 = vrot.slane %v614_v0, 4 }
  0x78   :  { %v10989_v12 = vcombine.low %v3709_v60, %v3719_v7  ;;  %v625_v14 = vrot.slane %v624_v2, 4  ;;  %v3732_v57 = vrot.slane %v3730_v5, 5  ;;  %v3740_v17 = vshll.u32 %v10908_v4, 16  ;;  %v10912_v5 = vld [vmem:[%s17894_s0 + $0x6c] sm:$0xf] }
  0x79   :  { %v3727_v15 = vor.u32 %v3726_v9, %v3723_v8  ;;  %v3736_v16 = vrot.slane %v3734_v10, 4  ;;  %v632_v18 = vshrl.u32 %v69_v6, 16  ;;  %v620_v19 = vsel %vm13816_vm4, %v615_v13, %v619_v56  ;;  %v10913_v10 = vld [vmem:[%s17894_s0 + $0x70] sm:$0xf] }
  0x7a   :  { %12303 = vmatmul.mubr.msk.bf16.gmra.mrb[8].mxu0 %vm992_vm1, %v10989_v12  ;;  %v630_v20 = vsel %vm13816_vm4, %v625_v14, %v629_v3  ;;  %v635_v22 = vshll.u32 %v69_v6, 16  ;;  %v641_v23 = vshll.u32 %v70_v11, 16  ;;  %v3742_v28 = vrot.slane %v3740_v17, 5  ;;  %v10914_v17 = vld [vmem:[%s17894_s0 + $0x74] sm:$0x1] }
  0x7b   :  { %v10556_v25 = vcombine.low %v620_v19, %v630_v20  ;;  %v3728_v26 = vrot.slane %v3727_v15, 4  ;;  %v3737_v27 = vor.u32 %v3736_v16, %v3732_v57  ;;  %v634_v31 = vrot.slane %v632_v18, 4 }
  0x7c   :  { %v637_v32 = vrot.slane %v635_v22, 5  ;;  %v643_v33 = vrot.slane %v641_v23, 5  ;;  %v645_v34 = vshrl.u32 %v70_v11, 16  ;;  %v651_v37 = vshll.u32 %v113_v21, 16  ;;  %v73_v23 = vld [vmem:[%s17894_s0 + $0x12c] sm:$0xf] }
  0x7d   :  { %12070 = vmatprep.mubr.msk.bf16.mxu1 %vm992_vm1, %v10556_v25  ;;  %v3733_v35 = vsel %vm13816_vm4, %v3728_v26, %v3732_v57  ;;  %v3738_v36 = vrot.slane %v3737_v27, 4  ;;  %v3745_v39 = vshrl.u32 %v10909_v24, 16  ;;  %v3748_v42 = vshll.u32 %v10909_v24, 16 }
  0x7e   :  { %v638_v40 = vor.u32 %v637_v32, %v634_v31  ;;  %v647_v41 = vrot.slane %v645_v34, 4  ;;  %v3754_v43 = vshll.u32 %v10910_v30, 16  ;;  %v653_v46 = vrot.slane %v651_v37, 5  ;;  %v14306_v34 = vld [vmem:[%s17896_s2] sm:$0x3] }
  0x7f   :  { %v3743_v45 = vsel %vm13816_vm4, %v3738_v36, %v3742_v28  ;;  %v3747_v47 = vrot.slane %v3745_v39, 4  ;;  %v3758_v48 = vshrl.u32 %v10910_v30, 16  ;;  %v3750_v52 = vrot.slane %v3748_v42, 5  ;;  %v74_v28 = vld [vmem:[%s17894_s0 + $0x130] sm:$0xf]  ;;  %13275 = vmatprep.subr.msk.bf16.mxu1 %vm1089_vm0, %v14306_v34 }
  0x80   :  { %v10990_v49 = vcombine.low %v3733_v35, %v3743_v45  ;;  %v639_v50 = vrot.slane %v638_v40, 4  ;;  %v648_v51 = vor.u32 %v647_v41, %v643_v33  ;;  %v3756_v54 = vrot.slane %v3754_v43, 5  ;;  %v115_v37 = vld [vmem:[%s17894_s0 + $0x134] sm:$0x1] }
  0x81   :  { %v3760_v55 = vrot.slane %v3758_v48, 4  ;;  %v3764_v56 = vshll.u32 %v10911_v38, 16  ;;  %v656_v58 = vshrl.u32 %v71_v44, 16  ;;  %v3751_v61 = vor.u32 %v3750_v52, %v3747_v47 }
  0x82   :  { %12306 = vmatprep.mubr.msk.bf16.mxu0 %vm992_vm1, %v10990_v49  ;;  %v644_v59 = vsel %vm13816_vm4, %v639_v50, %v643_v33  ;;  %v649_v60 = vrot.slane %v648_v51, 4  ;;  %v659_v63 = vshll.u32 %v71_v44, 16  ;;  %v665_v4 = vshll.u32 %v72_v53, 16  ;;  %v10915_v44 = vld [vmem:[%s17894_s0 + $0x78] sm:$0xf] }
  0x83   :  { %v3761_v0 = vor.u32 %v3760_v55, %v3756_v54  ;;  %v3766_v2 = vrot.slane %v3764_v56, 5  ;;  %v658_v3 = vrot.slane %v656_v58, 4  ;;  %v3752_v7 = vrot.slane %v3751_v61, 4  ;;  %v10916_v49 = vld [vmem:[%s17894_s0 + $0x7c] sm:$0xf] }
  0x84   :  { %v654_v6 = vsel %vm13816_vm4, %v649_v60, %v653_v46  ;;  %v661_v8 = vrot.slane %v659_v63, 5  ;;  %v669_v9 = vshrl.u32 %v72_v53, 16  ;;  %v667_v13 = vrot.slane %v665_v4, 5  ;;  %v10917_v61 = vld [vmem:[%s17894_s0 + $0x80] sm:$0x1] }
  0x85   :  { %v10557_v11 = vcombine.low %v644_v59, %v654_v6  ;;  %v3762_v12 = vrot.slane %v3761_v0, 4  ;;  %v675_v14 = vshll.u32 %v114_v62, 16  ;;  %v3757_v57 = vsel %vm13816_vm4, %v3752_v7, %v3756_v54 }
  0x86   :  { %v662_v15 = vor.u32 %v661_v8, %v658_v3  ;;  %v671_v16 = vrot.slane %v669_v9, 4  ;;  %v3769_v18 = vshrl.u32 %v10912_v5, 16  ;;  %v3772_v21 = vshll.u32 %v10912_v5, 16  ;;  %v75_v5 = vld [vmem:[%s17894_s0 + $0x138] sm:$0xf] }
  0x87   :  { %12071 = vmatmul.mubr.msk.bf16.gmra.mrb[40].mxu1 %vm992_vm1, %v10557_v11  ;;  %v3767_v19 = vsel %vm13816_vm4, %v3762_v12, %v3766_v2  ;;  %v677_v20 = vrot.slane %v675_v14, 5  ;;  %v3778_v22 = vshll.u32 %v10913_v10, 16  ;;  %v3782_v32 = vshrl.u32 %v10913_v10, 16  ;;  %v76_v10 = vld [vmem:[%s17894_s0 + $0x13c] sm:$0xf] }
  0x88   :  { %v10991_v24 = vcombine.low %v3757_v57, %v3767_v19  ;;  %v663_v25 = vrot.slane %v662_v15, 4  ;;  %v672_v26 = vor.u32 %v671_v16, %v667_v13  ;;  %v3771_v27 = vrot.slane %v3769_v18, 4  ;;  %v116_v16 = vld [vmem:[%s17894_s0 + $0x140] sm:$0x1] }
  0x89   :  { %v3774_v30 = vrot.slane %v3772_v21, 5  ;;  %v3780_v31 = vrot.slane %v3778_v22, 5  ;;  %v3788_v33 = vshll.u32 %v10914_v17, 16  ;;  %v680_v38 = vshrl.u32 %v73_v23, 16 }
  0x8a   :  { %12307 = vmatmul.mubr.msk.bf16.gmra.mrb[12].mxu0 %vm992_vm1, %v10991_v24  ;;  %v668_v35 = vsel %vm13816_vm4, %v663_v25, %v667_v13  ;;  %v673_v36 = vrot.slane %v672_v26, 4  ;;  %v683_v39 = vshll.u32 %v73_v23, 16  ;;  %v3784_v41 = vrot.slane %v3782_v32, 4  ;;  %v10918_v23 = vld [vmem:[%s17894_s0 + $0x84] sm:$0xf] }
  0x8b   :  { %v3775_v40 = vor.u32 %v3774_v30, %v3771_v27  ;;  %v3790_v42 = vrot.slane %v3788_v33, 5  ;;  %v689_v43 = vshll.u32 %v74_v28, 16  ;;  %v682_v46 = vrot.slane %v680_v38, 4 }
  0x8c   :  { %v678_v45 = vsel %vm13816_vm4, %v673_v36, %v677_v20  ;;  %v685_v47 = vrot.slane %v683_v39, 5  ;;  %v693_v48 = vshrl.u32 %v74_v28, 16  ;;  %v3785_v52 = vor.u32 %v3784_v41, %v3780_v31  ;;  %v10919_v28 = vld [vmem:[%s17894_s0 + $0x88] sm:$0xf] }
  0x8d   :  { %v10558_v50 = vcombine.low %v668_v35, %v678_v45  ;;  %v3776_v51 = vrot.slane %v3775_v40, 4  ;;  %v691_v53 = vrot.slane %v689_v43, 5  ;;  %v699_v56 = vshll.u32 %v115_v37, 16 }
  0x8e   :  { %v686_v54 = vor.u32 %v685_v47, %v682_v46  ;;  %v695_v55 = vrot.slane %v693_v48, 4  ;;  %v3793_v58 = vshrl.u32 %v10915_v44, 16  ;;  %v3786_v60 = vrot.slane %v3785_v52, 4 }
  0x8f   :  { %12074 = vmatprep.mubr.msk.bf16.mxu1 %vm992_vm1, %v10558_v50  ;;  %v3781_v59 = vsel %vm13816_vm4, %v3776_v51, %v3780_v31  ;;  %v3796_v62 = vshll.u32 %v10915_v44, 16  ;;  %v3802_v63 = vshll.u32 %v10916_v49, 16  ;;  %v701_v3 = vrot.slane %v699_v56, 5  ;;  %v77_v44 = vld [vmem:[%s17894_s0 + $0x144] sm:$0xf] }
  0x90   :  { %v687_v0 = vrot.slane %v686_v54, 4  ;;  %v696_v2 = vor.u32 %v695_v55, %v691_v53  ;;  %v3795_v4 = vrot.slane %v3793_v58, 4  ;;  %v3791_v6 = vsel %vm13816_vm4, %v3786_v60, %v3790_v42  ;;  %v10920_v42 = vld [vmem:[%s17894_s0 + $0x8c] sm:$0x1] }
  0x91   :  { %v3798_v7 = vrot.slane %v3796_v62, 5  ;;  %v3804_v8 = vrot.slane %v3802_v63, 5  ;;  %v3806_v9 = vshrl.u32 %v10916_v49, 16  ;;  %v10992_v11 = vcombine.low %v3781_v59, %v3791_v6  ;;  %v78_v49 = vld [vmem:[%s17894_s0 + $0x148] sm:$0xf] }
  0x92   :  { %v692_v12 = vsel %vm13816_vm4, %v687_v0, %v691_v53  ;;  %v697_v13 = vrot.slane %v696_v2, 4  ;;  %v3812_v14 = vshll.u32 %v10917_v61, 16  ;;  %v704_v17 = vshrl.u32 %v75_v5, 16  ;;  %v117_v61 = vld [vmem:[%s17894_s0 + $0x14c] sm:$0x1] }
  0x93   :  { %v3799_v57 = vor.u32 %v3798_v7, %v3795_v4  ;;  %v3808_v15 = vrot.slane %v3806_v9, 4  ;;  %v707_v18 = vshll.u32 %v75_v5, 16  ;;  %12310 = vmatprep.mubr.msk.bf16.mxu0 %vm992_vm1, %v10992_v11  ;;  %v713_v21 = vshll.u32 %v76_v10, 16  ;;  %v10921_v0 = vld [vmem:[%s17894_s0 + $0x90] sm:$0xf] }
  0x94   :  { %v702_v19 = vsel %vm13816_vm4, %v697_v13, %v701_v3  ;;  %v3814_v20 = vrot.slane %v3812_v14, 5  ;;  %v717_v22 = vshrl.u32 %v76_v10, 16  ;;  %v706_v27 = vrot.slane %v704_v17, 4  ;;  %v10922_v6 = vld [vmem:[%s17894_s0 + $0x94] sm:$0xf] }
  0x95   :  { %v10559_v24 = vcombine.low %v692_v12, %v702_v19  ;;  %v3800_v25 = vrot.slane %v3799_v57, 4  ;;  %v3809_v26 = vor.u32 %v3808_v15, %v3804_v8  ;;  %v709_v30 = vrot.slane %v707_v18, 5  ;;  %v10923_v14 = vld [vmem:[%s17894_s0 + $0x98] sm:$0x1]  ;;  %v79_v19 = vld [vmem:[%s17894_s0 + $0x150] sm:$0xf] }
  0x96   :  { %v715_v31 = vrot.slane %v713_v21, 5  ;;  %v719_v32 = vrot.slane %v717_v22, 4  ;;  %v723_v33 = vshll.u32 %v116_v16, 16  ;;  %v3817_v37 = vshrl.u32 %v10918_v23, 16 }
  0x97   :  { %12075 = vmatmul.mubr.msk.bf16.gmra.mrb[44].mxu1 %vm992_vm1, %v10559_v24  ;;  %v3805_v35 = vsel %vm13816_vm4, %v3800_v25, %v3804_v8  ;;  %v3810_v36 = vrot.slane %v3809_v26, 4  ;;  %v3820_v38 = vshll.u32 %v10918_v23, 16  ;;  %v710_v39 = vor.u32 %v709_v30, %v706_v27 }
  0x98   :  { %v720_v40 = vor.u32 %v719_v32, %v715_v31  ;;  %v725_v41 = vrot.slane %v723_v33, 5  ;;  %v3826_v43 = vshll.u32 %v10919_v28, 16  ;;  %v3819_v46 = vrot.slane %v3817_v37, 4 }
  0x99   :  { %v3815_v45 = vsel %vm13816_vm4, %v3810_v36, %v3814_v20  ;;  %v3822_v47 = vrot.slane %v3820_v38, 5  ;;  %v3830_v48 = vshrl.u32 %v10919_v28, 16  ;;  %v711_v51 = vrot.slane %v710_v39, 4  ;;  %v80_v28 = vld [vmem:[%s17894_s0 + $0x154] sm:$0xf] }
  0x9a   :  { %v10993_v50 = vcombine.low %v3805_v35, %v3815_v45  ;;  %v721_v52 = vrot.slane %v720_v40, 4  ;;  %v3828_v53 = vrot.slane %v3826_v43, 5  ;;  %v3836_v56 = vshll.u32 %v10920_v42, 16  ;;  %v118_v38 = vld [vmem:[%s17894_s0 + $0x158] sm:$0x1] }
  0x9b   :  { %v3823_v54 = vor.u32 %v3822_v47, %v3819_v46  ;;  %v3832_v55 = vrot.slane %v3830_v48, 4  ;;  %v728_v58 = vshrl.u32 %v77_v44, 16  ;;  %v716_v59 = vsel %vm13816_vm4, %v711_v51, %v715_v31 }
  0x9c   :  { %12311 = vmatmul.mubr.msk.bf16.gmra.mrb[16].mxu0 %vm992_vm1, %v10993_v50  ;;  %v726_v60 = vsel %vm13816_vm4, %v721_v52, %v725_v41  ;;  %v731_v62 = vshll.u32 %v77_v44, 16  ;;  %v737_v63 = vshll.u32 %v78_v49, 16  ;;  %v3838_v5 = vrot.slane %v3836_v56, 5  ;;  %v10924_v44 = vld [vmem:[%s17894_s0 + $0x9c] sm:$0xf] }
  0x9d   :  { %v10560_v2 = vcombine.low %v716_v59, %v726_v60  ;;  %v3824_v3 = vrot.slane %v3823_v54, 4  ;;  %v3833_v4 = vor.u32 %v3832_v55, %v3828_v53  ;;  %v730_v7 = vrot.slane %v728_v58, 4  ;;  %v10926_v58 = vld [vmem:[%s17894_s0 + $0xa4] sm:$0x1] }
  0x9e   :  { %v733_v8 = vrot.slane %v731_v62, 5  ;;  %v739_v9 = vrot.slane %v737_v63, 5  ;;  %v741_v10 = vshrl.u32 %v78_v49, 16  ;;  %v747_v13 = vshll.u32 %v117_v61, 16  ;;  %v10925_v49 = vld [vmem:[%s17894_s0 + $0xa0] sm:$0xf] }
  0x9f   :  { %12078 = vmatprep.mubr.msk.bf16.mxu1 %vm992_vm1, %v10560_v2  ;;  %v3829_v11 = vsel %vm13816_vm4, %v3824_v3, %v3828_v53  ;;  %v3834_v12 = vrot.slane %v3833_v4, 4  ;;  %v3841_v57 = vshrl.u32 %v10921_v0, 16  ;;  %v3844_v17 = vshll.u32 %v10921_v0, 16  ;;  %v81_v0 = vld [vmem:[%s17894_s0 + $0x15c] sm:$0xf] }
  0xa0   :  { %v734_v15 = vor.u32 %v733_v8, %v730_v7  ;;  %v743_v16 = vrot.slane %v741_v10, 4  ;;  %v3850_v18 = vshll.u32 %v10922_v6, 16  ;;  %v749_v21 = vrot.slane %v747_v13, 5 }
  0xa1   :  { %v3839_v20 = vsel %vm13816_vm4, %v3834_v12, %v3838_v5  ;;  %v3843_v22 = vrot.slane %v3841_v57, 4  ;;  %v3854_v23 = vshrl.u32 %v10922_v6, 16  ;;  %v3846_v27 = vrot.slane %v3844_v17, 5  ;;  %v82_v6 = vld [vmem:[%s17894_s0 + $0x160] sm:$0xf] }
  0xa2   :  { %v10994_v24 = vcombine.low %v3829_v11, %v3839_v20  ;;  %v735_v25 = vrot.slane %v734_v15, 4  ;;  %v744_v26 = vor.u32 %v743_v16, %v739_v9  ;;  %v3852_v30 = vrot.slane %v3850_v18, 5  ;;  %v119_v11 = vld [vmem:[%s17894_s0 + $0x164] sm:$0x1]  ;;  %v5859_v15 = vld [vmem:[%s17896_s2 + $0x18] sm:$0x3] }
  0xa3   :  { %v3856_v31 = vrot.slane %v3854_v23, 4  ;;  %v3860_v32 = vshll.u32 %v10923_v14, 16  ;;  %v752_v33 = vshrl.u32 %v79_v19, 16  ;;  %v3847_v37 = vor.u32 %v3846_v27, %v3843_v22  ;;  %v10927_v20 = vld [vmem:[%s17894_s0 + $0xa8] sm:$0xf]  ;;  %13281 = vmatprep.subr.msk.bf16.mxu0 %vm1089_vm0, %v5859_v15 }
  0xa4   :  { %12314 = vmatprep.mubr.msk.bf16.mxu0 %vm992_vm1, %v10994_v24  ;;  %v740_v35 = vsel %vm13816_vm4, %v735_v25, %v739_v9  ;;  %v745_v36 = vrot.slane %v744_v26, 4  ;;  %v755_v39 = vshll.u32 %v79_v19, 16  ;;  %v761_v43 = vshll.u32 %v80_v28, 16  ;;  %v10928_v25 = vld [vmem:[%s17894_s0 + $0xac] sm:$0xf] }
  0xa5   :  { %v3857_v40 = vor.u32 %v3856_v31, %v3852_v30  ;;  %v3862_v41 = vrot.slane %v3860_v32, 5  ;;  %v754_v42 = vrot.slane %v752_v33, 4  ;;  %v3848_v46 = vrot.slane %v3847_v37, 4  ;;  %v10929_v31 = vld [vmem:[%s17894_s0 + $0xb0] sm:$0x1] }
  0xa6   :  { %v750_v45 = vsel %vm13816_vm4, %v745_v36, %v749_v21  ;;  %v757_v47 = vrot.slane %v755_v39, 5  ;;  %v765_v48 = vshrl.u32 %v80_v28, 16  ;;  %v763_v52 = vrot.slane %v761_v43, 5  ;;  %v83_v37 = vld [vmem:[%s17894_s0 + $0x168] sm:$0xf] }
  0xa7   :  { %v10561_v50 = vcombine.low %v740_v35, %v750_v45  ;;  %v3858_v51 = vrot.slane %v3857_v40, 4  ;;  %v771_v53 = vshll.u32 %v118_v38, 16  ;;  %v3853_v54 = vsel %vm13816_vm4, %v3848_v46, %v3852_v30 }
  0xa8   :  { %v758_v55 = vor.u32 %v757_v47, %v754_v42  ;;  %v767_v56 = vrot.slane %v765_v48, 4  ;;  %v3865_v59 = vshrl.u32 %v10924_v44, 16  ;;  %v3868_v62 = vshll.u32 %v10924_v44, 16  ;;  %v84_v42 = vld [vmem:[%s17894_s0 + $0x16c] sm:$0xf] }
  0xa9   :  { %12079 = vmatmul.mubr.msk.bf16.gmra.mrb[48].mxu1 %vm992_vm1, %v10561_v50  ;;  %v3863_v60 = vsel %vm13816_vm4, %v3858_v51, %v3862_v41  ;;  %v773_v61 = vrot.slane %v771_v53, 5  ;;  %v3874_v63 = vshll.u32 %v10925_v49, 16  ;;  %v3878_v9 = vshrl.u32 %v10925_v49, 16  ;;  %v120_v51 = vld [vmem:[%s17894_s0 + $0x170] sm:$0x1] }
  0xaa   :  { %v10995_v2 = vcombine.low %v3853_v54, %v3863_v60  ;;  %v759_v3 = vrot.slane %v758_v55, 4  ;;  %v768_v4 = vor.u32 %v767_v56, %v763_v52  ;;  %v3867_v5 = vrot.slane %v3865_v59, 4  ;;  %v10930_v56 = vld [vmem:[%s17894_s0 + $0xb4] sm:$0xf] }
  0xab   :  { %v3870_v7 = vrot.slane %v3868_v62, 5  ;;  %v3876_v8 = vrot.slane %v3874_v63, 5  ;;  %v3884_v10 = vshll.u32 %v10926_v58, 16  ;;  %v776_v14 = vshrl.u32 %v81_v0, 16 }
  0xac   :  { %12315 = vmatmul.mubr.msk.bf16.gmra.mrb[20].mxu0 %vm992_vm1, %v10995_v2  ;;  %v764_v12 = vsel %vm13816_vm4, %v759_v3, %v763_v52  ;;  %v769_v13 = vrot.slane %v768_v4, 4  ;;  %v779_v57 = vshll.u32 %v81_v0, 16  ;;  %v3880_v17 = vrot.slane %v3878_v9, 4 }
  0xad   :  { %v3871_v16 = vor.u32 %v3870_v7, %v3867_v5  ;;  %v3886_v18 = vrot.slane %v3884_v10, 5  ;;  %v785_v19 = vshll.u32 %v82_v6, 16  ;;  %v778_v22 = vrot.slane %v776_v14, 4  ;;  %v10931_v7 = vld [vmem:[%s17894_s0 + $0xb8] sm:$0xf] }
  0xae   :  { %v774_v21 = vsel %vm13816_vm4, %v769_v13, %v773_v61  ;;  %v781_v23 = vrot.slane %v779_v57, 5  ;;  %v789_v24 = vshrl.u32 %v82_v6, 16  ;;  %v3881_v28 = vor.u32 %v3880_v17, %v3876_v8  ;;  %v85_v13 = vld [vmem:[%s17894_s0 + $0x174] sm:$0xf]  ;;  %v86_v17 = vld [vmem:[%s17894_s0 + $0x178] sm:$0xf] }
  0xaf   :  { %v10562_v26 = vcombine.low %v764_v12, %v774_v21  ;;  %v3872_v27 = vrot.slane %v3871_v16, 4  ;;  %v787_v30 = vrot.slane %v785_v19, 5  ;;  %v795_v35 = vshll.u32 %v119_v11, 16  ;;  %v10932_v12 = vld [vmem:[%s17894_s0 + $0xbc] sm:$0x1] }
  0xb0   :  { %v782_v32 = vor.u32 %v781_v23, %v778_v22  ;;  %v791_v33 = vrot.slane %v789_v24, 4  ;;  %v3889_v36 = vshrl.u32 %v10927_v20, 16  ;;  %v3882_v39 = vrot.slane %v3881_v28, 4 }
  0xb1   :  { %12082 = vmatprep.mubr.msk.bf16.mxu1 %vm992_vm1, %v10562_v26  ;;  %v3877_v38 = vsel %vm13816_vm4, %v3872_v27, %v3876_v8  ;;  %v3892_v40 = vshll.u32 %v10927_v20, 16  ;;  %v3898_v41 = vshll.u32 %v10928_v25, 16  ;;  %v797_v45 = vrot.slane %v795_v35, 5 }
  0xb2   :  { %v783_v43 = vrot.slane %v782_v32, 4  ;;  %v792_v44 = vor.u32 %v791_v33, %v787_v30  ;;  %v3891_v46 = vrot.slane %v3889_v36, 4  ;;  %v3887_v47 = vsel %vm13816_vm4, %v3882_v39, %v3886_v18  ;;  %v10933_v32 = vld [vmem:[%s17894_s0 + $0xc0] sm:$0xf] }
  0xb3   :  { %v3894_v48 = vrot.slane %v3892_v40, 5  ;;  %v3900_v49 = vrot.slane %v3898_v41, 5  ;;  %v3902_v50 = vshrl.u32 %v10928_v25, 16  ;;  %v10996_v52 = vcombine.low %v3877_v38, %v3887_v47 }
  0xb4   :  { %v788_v53 = vsel %vm13816_vm4, %v783_v43, %v787_v30  ;;  %v793_v54 = vrot.slane %v792_v44, 4  ;;  %v3908_v55 = vshll.u32 %v10929_v31, 16  ;;  %v800_v60 = vshrl.u32 %v83_v37, 16  ;;  %v121_v31 = vld [vmem:[%s17894_s0 + $0x17c] sm:$0x1] }
  0xb5   :  { %v3895_v58 = vor.u32 %v3894_v48, %v3891_v46  ;;  %v3904_v59 = vrot.slane %v3902_v50, 4  ;;  %v803_v61 = vshll.u32 %v83_v37, 16  ;;  %12318 = vmatprep.mubr.msk.bf16.mxu0 %vm992_vm1, %v10996_v52  ;;  %v809_v0 = vshll.u32 %v84_v42, 16  ;;  %v10934_v46 = vld [vmem:[%s17894_s0 + $0xc4] sm:$0xf] }
  0xb6   :  { %v798_v62 = vsel %vm13816_vm4, %v793_v54, %v797_v45  ;;  %v3910_v63 = vrot.slane %v3908_v55, 5  ;;  %v813_v2 = vshrl.u32 %v84_v42, 16  ;;  %v802_v6 = vrot.slane %v800_v60, 4  ;;  %v87_v52 = vld [vmem:[%s17894_s0 + $0x180] sm:$0xf] }
  0xb7   :  { %v10563_v3 = vcombine.low %v788_v53, %v798_v62  ;;  %v3896_v4 = vrot.slane %v3895_v58, 4  ;;  %v3905_v5 = vor.u32 %v3904_v59, %v3900_v49  ;;  %v805_v8 = vrot.slane %v803_v61, 5  ;;  %v88_v62 = vld [vmem:[%s17894_s0 + $0x184] sm:$0xf] }
  0xb8   :  { %v811_v9 = vrot.slane %v809_v0, 5  ;;  %v815_v10 = vrot.slane %v813_v2, 4  ;;  %v819_v11 = vshll.u32 %v120_v51, 16  ;;  %v3913_v15 = vshrl.u32 %v10930_v56, 16  ;;  %v10935_v51 = vld [vmem:[%s17894_s0 + $0xc8] sm:$0x1] }
  0xb9   :  { %12083 = vmatmul.mubr.msk.bf16.gmra.mrb[52].mxu1 %vm992_vm1, %v10563_v3  ;;  %v3901_v14 = vsel %vm13816_vm4, %v3896_v4, %v3900_v49  ;;  %v3906_v57 = vrot.slane %v3905_v5, 4  ;;  %v3916_v16 = vshll.u32 %v10930_v56, 16  ;;  %v806_v18 = vor.u32 %v805_v8, %v802_v6  ;;  %v122_v8 = vld [vmem:[%s17894_s0 + $0x188] sm:$0x1] }
  0xba   :  { %v816_v19 = vor.u32 %v815_v10, %v811_v9  ;;  %v821_v20 = vrot.slane %v819_v11, 5  ;;  %v3922_v21 = vshll.u32 %v10931_v7, 16  ;;  %v3915_v23 = vrot.slane %v3913_v15, 4 }
  0xbb   :  { %v3911_v22 = vsel %vm13816_vm4, %v3906_v57, %v3910_v63  ;;  %v3918_v24 = vrot.slane %v3916_v16, 5  ;;  %v3926_v25 = vshrl.u32 %v10931_v7, 16  ;;  %v807_v27 = vrot.slane %v806_v18, 4 }
  0xbc   :  { %v10997_v26 = vcombine.low %v3901_v14, %v3911_v22  ;;  %v817_v28 = vrot.slane %v816_v19, 4  ;;  %v3924_v30 = vrot.slane %v3922_v21, 5  ;;  %v3932_v36 = vshll.u32 %v10932_v12, 16  ;;  %v10937_v21 = vld [vmem:[%s17894_s0 + $0xe8] sm:$0xf] }
  0xbd   :  { %v3919_v33 = vor.u32 %v3918_v24, %v3915_v23  ;;  %v3928_v35 = vrot.slane %v3926_v25, 4  ;;  %v824_v37 = vshrl.u32 %v85_v13, 16  ;;  %v812_v38 = vsel %vm13816_vm4, %v807_v27, %v811_v9 }
  0xbe   :  { %12319 = vmatmul.mubr.msk.bf16.gmra.mrb[24].mxu0 %vm992_vm1, %v10997_v26  ;;  %v822_v39 = vsel %vm13816_vm4, %v817_v28, %v821_v20  ;;  %v827_v40 = vshll.u32 %v85_v13, 16  ;;  %v833_v41 = vshll.u32 %v86_v17, 16  ;;  %v3934_v45 = vrot.slane %v3932_v36, 5  ;;  %v10936_v13 = vld [vmem:[%s17894_s0 + $0xe4] sm:$0xf] }
  0xbf   :  { %v10564_v42 = vcombine.low %v812_v38, %v822_v39  ;;  %v3920_v43 = vrot.slane %v3919_v33, 4  ;;  %v3929_v44 = vor.u32 %v3928_v35, %v3924_v30  ;;  %v826_v47 = vrot.slane %v824_v37, 4  ;;  %v10938_v26 = vld [vmem:[%s17894_s0 + $0xec] sm:$0x1]  ;;  %v90_v38 = vld [vmem:[%s17894_s0 + $0x190] sm:$0xf] }
  0xc0   :  { %v829_v48 = vrot.slane %v827_v40, 5  ;;  %v835_v49 = vrot.slane %v833_v41, 5  ;;  %v837_v50 = vshrl.u32 %v86_v17, 16  ;;  %v843_v55 = vshll.u32 %v121_v31, 16 }
  0xc1   :  { %12086 = vmatprep.mubr.msk.bf16.mxu1 %vm992_vm1, %v10564_v42  ;;  %v3925_v53 = vsel %vm13816_vm4, %v3920_v43, %v3924_v30  ;;  %v3930_v54 = vrot.slane %v3929_v44, 4  ;;  %v3937_v56 = vshrl.u32 %v10933_v32, 16  ;;  %v3940_v60 = vshll.u32 %v10933_v32, 16  ;;  %v89_v32 = vld [vmem:[%s17894_s0 + $0x18c] sm:$0xf] }
  0xc2   :  { %v830_v58 = vor.u32 %v829_v48, %v826_v47  ;;  %v839_v59 = vrot.slane %v837_v50, 4  ;;  %v3946_v61 = vshll.u32 %v10934_v46, 16  ;;  %v845_v0 = vrot.slane %v843_v55, 5 }
  0xc3   :  { %v3935_v63 = vsel %vm13816_vm4, %v3930_v54, %v3934_v45  ;;  %v3939_v2 = vrot.slane %v3937_v56, 4  ;;  %v3950_v3 = vshrl.u32 %v10934_v46, 16  ;;  %v3942_v7 = vrot.slane %v3940_v60, 5 }
  0xc4   :  { %v10998_v4 = vcombine.low %v3925_v53, %v3935_v63  ;;  %v831_v5 = vrot.slane %v830_v58, 4  ;;  %v840_v6 = vor.u32 %v839_v59, %v835_v49  ;;  %v3948_v9 = vrot.slane %v3946_v61, 5  ;;  %v10939_v61 = vld [vmem:[%s17894_s0 + $0xf0] sm:$0xf] }
  0xc5   :  { %v3952_v10 = vrot.slane %v3950_v3, 4  ;;  %v3956_v11 = vshll.u32 %v10935_v51, 16  ;;  %v848_v12 = vshrl.u32 %v87_v52, 16  ;;  %v3943_v15 = vor.u32 %v3942_v7, %v3939_v2  ;;  %v123_v51 = vld [vmem:[%s17894_s0 + $0x194] sm:$0x1] }
  0xc6   :  { %12322 = vmatprep.mubr.msk.bf16.mxu0 %vm992_vm1, %v10998_v4  ;;  %v836_v14 = vsel %vm13816_vm4, %v831_v5, %v835_v49  ;;  %v841_v57 = vrot.slane %v840_v6, 4  ;;  %v851_v16 = vshll.u32 %v87_v52, 16  ;;  %v857_v20 = vshll.u32 %v88_v62, 16  ;;  %v10940_v3 = vld [vmem:[%s17894_s0 + $0xf4] sm:$0xf] }
  0xc7   :  { %v3953_v17 = vor.u32 %v3952_v10, %v3948_v9  ;;  %v3958_v18 = vrot.slane %v3956_v11, 5  ;;  %v850_v19 = vrot.slane %v848_v12, 4  ;;  %v3944_v23 = vrot.slane %v3943_v15, 4 }
  0xc8   :  { %v846_v22 = vsel %vm13816_vm4, %v841_v57, %v845_v0  ;;  %v853_v24 = vrot.slane %v851_v16, 5  ;;  %v861_v25 = vshrl.u32 %v88_v62, 16  ;;  %v859_v30 = vrot.slane %v857_v20, 5  ;;  %v10942_v16 = vld [vmem:[%s17894_s0 + $0xfc] sm:$0xf] }
  0xc9   :  { %v10565_v27 = vcombine.low %v836_v14, %v846_v22  ;;  %v3954_v28 = vrot.slane %v3953_v17, 4  ;;  %v867_v31 = vshll.u32 %v122_v8, 16  ;;  %v3949_v33 = vsel %vm13816_vm4, %v3944_v23, %v3948_v9  ;;  %v10941_v8 = vld [vmem:[%s17894_s0 + $0xf8] sm:$0x1] }
  0xca   :  { %v854_v35 = vor.u32 %v853_v24, %v850_v19  ;;  %v863_v36 = vrot.slane %v861_v25, 4  ;;  %v3961_v37 = vshrl.u32 %v10936_v13, 16  ;;  %v3964_v41 = vshll.u32 %v10936_v13, 16 }
  0xcb   :  { %12087 = vmatmul.mubr.msk.bf16.gmra.mrb[56].mxu1 %vm992_vm1, %v10565_v27  ;;  %v3959_v39 = vsel %vm13816_vm4, %v3954_v28, %v3958_v18  ;;  %v869_v40 = vrot.slane %v867_v31, 5  ;;  %v3970_v42 = vshll.u32 %v10937_v21, 16  ;;  %v3974_v49 = vshrl.u32 %v10937_v21, 16  ;;  %v10943_v21 = vld [vmem:[%s17894_s0 + $0x100] sm:$0xf] }
  0xcc   :  { %v10999_v43 = vcombine.low %v3949_v33, %v3959_v39  ;;  %v855_v44 = vrot.slane %v854_v35, 4  ;;  %v864_v45 = vor.u32 %v863_v36, %v859_v30  ;;  %v3963_v46 = vrot.slane %v3961_v37, 4  ;;  %v13474_v36 = vld [vmem:[%s17894_s0] sm:$0xf]  ;;  %v13475_v37 = vld [vmem:[%s17894_s0 + $0x4] sm:$0xf] }
  0xcd   :  { %v3966_v47 = vrot.slane %v3964_v41, 5  ;;  %v3972_v48 = vrot.slane %v3970_v42, 5  ;;  %v3980_v50 = vshll.u32 %v10938_v26, 16  ;;  %v872_v54 = vshrl.u32 %v89_v32, 16  ;;  %v10944_v26 = vld [vmem:[%s17894_s0 + $0x104] sm:$0x1] }
  0xce   :  { %12323 = vmatmul.mubr.msk.bf16.gmra.mrb[28].mxu0 %vm992_vm1, %v10999_v43  ;;  %v860_v52 = vsel %vm13816_vm4, %v855_v44, %v859_v30  ;;  %v865_v53 = vrot.slane %v864_v45, 4  ;;  %v875_v55 = vshll.u32 %v89_v32, 16  ;;  %v3976_v58 = vrot.slane %v3974_v49, 4  ;;  %v10945_v39 = vld [vmem:[%s17894_s0 + $0x108] sm:$0xf] }
  0xcf   :  { %v3967_v56 = vor.u32 %v3966_v47, %v3963_v46  ;;  %v3982_v59 = vrot.slane %v3980_v50, 5  ;;  %v881_v60 = vshll.u32 %v90_v38, 16  ;;  %v874_v63 = vrot.slane %v872_v54, 4  ;;  %v10946_v43 = vld [vmem:[%s17894_s0 + $0x10c] sm:$0xf] }
  0xd0   :  { %v870_v62 = vsel %vm13816_vm4, %v865_v53, %v869_v40  ;;  %v877_v0 = vrot.slane %v875_v55, 5  ;;  %v885_v2 = vshrl.u32 %v90_v38, 16  ;;  %v3977_v6 = vor.u32 %v3976_v58, %v3972_v48  ;;  %v13477_v58 = vld [vmem:[%s17894_s0 + $0x10] sm:$0xf] }
  0xd1   :  { %v10566_v4 = vcombine.low %v860_v52, %v870_v62  ;;  %v3968_v5 = vrot.slane %v3967_v56, 4  ;;  %v883_v7 = vrot.slane %v881_v60, 5  ;;  %v891_v11 = vshll.u32 %v123_v51, 16  ;;  %v10947_v52 = vld [vmem:[%s17894_s0 + $0x110] sm:$0x1] }
  0xd2   :  { %v878_v9 = vor.u32 %v877_v0, %v874_v63  ;;  %v887_v10 = vrot.slane %v885_v2, 4  ;;  %v3985_v12 = vshrl.u32 %v10939_v61, 16  ;;  %v3978_v14 = vrot.slane %v3977_v6, 4  ;;  %v13476_v56 = vld [vmem:[%s17894_s0 + $0xc] sm:$0xf] }
  0xd3   :  { %12090 = vmatprep.mubr.msk.bf16.mxu1 %vm992_vm1, %v10566_v4  ;;  %v3973_v13 = vsel %vm13816_vm4, %v3968_v5, %v3972_v48  ;;  %v3988_v57 = vshll.u32 %v10939_v61, 16  ;;  %v3994_v15 = vshll.u32 %v10940_v3, 16  ;;  %v893_v19 = vrot.slane %v891_v11, 5  ;;  %v10948_v60 = vld [vmem:[%s17894_s0 + $0x114] sm:$0xf] }
  0xd4   :  { %v879_v17 = vrot.slane %v878_v9, 4  ;;  %v888_v18 = vor.u32 %v887_v10, %v883_v7  ;;  %v3987_v20 = vrot.slane %v3985_v12, 4  ;;  %v3983_v22 = vsel %vm13816_vm4, %v3978_v14, %v3982_v59  ;;  %v10949_v6 = vld [vmem:[%s17894_s0 + $0x118] sm:$0xf] }
  0xd5   :  { %v3990_v23 = vrot.slane %v3988_v57, 5  ;;  %v3996_v24 = vrot.slane %v3994_v15, 5  ;;  %v3998_v25 = vshrl.u32 %v10940_v3, 16  ;;  %v11000_v27 = vcombine.low %v3973_v13, %v3983_v22  ;;  %v10950_v57 = vld [vmem:[%s17894_s0 + $0x11c] sm:$0x1] }
  0xd6   :  { %v884_v28 = vsel %vm13816_vm4, %v879_v17, %v883_v7  ;;  %v889_v30 = vrot.slane %v888_v18, 4  ;;  %v4004_v31 = vshll.u32 %v10941_v8, 16  ;;  %v1639_v35 = vsel %vm1089_vm0, %v14306_v34, 0  ;;  %v13478_v17 = vld [vmem:[%s17894_s0 + $0x18] sm:$0xf] }
  0xd7   :  { %v3991_v32 = vor.u32 %v3990_v23, %v3987_v20  ;;  %v4000_v33 = vrot.slane %v3998_v25, 4  ;;  %v10600_v38 = vcombine.low %v13474_v36, %v13475_v37  ;;  %12326 = vmatprep.mubr.msk.bf16.mxu0 %vm992_vm1, %v11000_v27  ;;  %12095 = vmatpush3.bf16.msra.mxu1 %v1639_v35  ;;  %v4009_v34 = vshrl.u32 %v10942_v16, 16  ;;  %v13479_v18 = vld [vmem:[%s17894_s0 + $0x1c] sm:$0xf]  ;;  %v10953_v37 = vld [vmem:[%s17894_s0 + $0x128] sm:$0x1] }
  0xd8   :  { %v894_v40 = vsel %vm13816_vm4, %v889_v30, %v893_v19  ;;  %v4006_v41 = vrot.slane %v4004_v31, 5  ;;  %v4012_v42 = vshll.u32 %v10942_v16, 16  ;;  %v4018_v47 = vshll.u32 %v10943_v21, 16  ;;  %v10952_v31 = vld [vmem:[%s17894_s0 + $0x124] sm:$0xf] }
  0xd9   :  { %v10567_v44 = vcombine.low %v884_v28, %v894_v40  ;;  %v3992_v45 = vrot.slane %v3991_v32, 4  ;;  %v4001_v46 = vor.u32 %v4000_v33, %v3996_v24  ;;  %v4011_v48 = vrot.slane %v4009_v34, 4  ;;  %v13481_v34 = vld [vmem:[%s17894_s0 + $0x28] sm:$0xf] }
  0xda   :  { %v4014_v49 = vrot.slane %v4012_v42, 5  ;;  %v4022_v50 = vshrl.u32 %v10943_v21, 16  ;;  %v4028_v51 = vshll.u32 %v10944_v26, 16  ;;  %v4020_v55 = vrot.slane %v4018_v47, 5  ;;  %v10951_v21 = vld [vmem:[%s17894_s0 + $0x120] sm:$0xf] }
  0xdb   :  { %12091 = vmatmul.mubr.msk.bf16.gmra.mrb[60].mxu1 %vm992_vm1, %v10567_v44  ;;  %v3997_v53 = vsel %vm13816_vm4, %v3992_v45, %v3996_v24  ;;  %v4002_v54 = vrot.slane %v4001_v46, 4  ;;  %v10601_v59 = vcombine.low %v13476_v56, %v13477_v58  ;;  %v4033_v0 = vshrl.u32 %v10945_v39, 16  ;;  %v14651_v56 = vld [vmem:[%s17896_s2 + $0x8] sm:$0x3] }
  0xdc   :  { %12096 = vmatprep.mubr.msk.bf16.mxu1 %vm992_vm1, %v10600_v38  ;;  %v4015_v61 = vor.u32 %v4014_v49, %v4011_v48  ;;  %v4024_v62 = vrot.slane %v4022_v50, 4  ;;  %v4030_v63 = vrot.slane %v4028_v51, 5  ;;  %v4036_v3 = vshll.u32 %v10945_v39, 16  ;;  %13276 = vmatprep.subr.msk.bf16.mxu1 %vm1089_vm0, %v14651_v56 }
  0xdd   :  { %v4007_v2 = vsel %vm13816_vm4, %v4002_v54, %v4006_v41  ;;  %v4042_v4 = vshll.u32 %v10946_v43, 16  ;;  %v4046_v5 = vshrl.u32 %v10946_v43, 16  ;;  %v4035_v10 = vrot.slane %v4033_v0, 4  ;;  %v13480_v41 = vld [vmem:[%s17894_s0 + $0x24] sm:$0xf] }
  0xde   :  { %v11001_v7 = vcombine.low %v3997_v53, %v4007_v2  ;;  %v4016_v8 = vrot.slane %v4015_v61, 4  ;;  %v4025_v9 = vor.u32 %v4024_v62, %v4020_v55  ;;  %v4038_v11 = vrot.slane %v4036_v3, 5  ;;  %v10954_v43 = vld [vmem:[%s17894_s0 + $0x12c] sm:$0xf]  ;;  %v13482_v61 = vld [vmem:[%s17894_s0 + $0x30] sm:$0xf] }
  0xdf   :  { %v4044_v12 = vrot.slane %v4042_v4, 5  ;;  %v4048_v13 = vrot.slane %v4046_v5, 4  ;;  %v4052_v14 = vshll.u32 %v10947_v52, 16  ;;  %v10602_v19 = vcombine.low %v13478_v17, %v13479_v18  ;;  %v13483_v62 = vld [vmem:[%s17894_s0 + $0x34] sm:$0xf] }
  0xe0   :  { %12327 = vmatmul.mubr.msk.bf16.gmra.mrb[32].mxu0 %vm992_vm1, %v11001_v7  ;;  %v4021_v15 = vsel %vm13816_vm4, %v4016_v8, %v4020_v55  ;;  %v4026_v16 = vrot.slane %v4025_v9, 4  ;;  %v4057_v20 = vshrl.u32 %v10948_v60, 16  ;;  %v4039_v22 = vor.u32 %v4038_v11, %v4035_v10  ;;  %v10955_v0 = vld [vmem:[%s17894_s0 + $0x130] sm:$0xf]  ;;  %v10956_v5 = vld [vmem:[%s17894_s0 + $0x134] sm:$0x1] }
  0xe1   :  { %v4049_v23 = vor.u32 %v4048_v13, %v4044_v12  ;;  %v4054_v24 = vrot.slane %v4052_v14, 5  ;;  %v4060_v25 = vshll.u32 %v10948_v60, 16  ;;  %v4066_v28 = vshll.u32 %v10949_v6, 16  ;;  %v10957_v11 = vld [vmem:[%s17894_s0 + $0x138] sm:$0xf] }
  0xe2   :  { %v4031_v26 = vsel %vm13816_vm4, %v4026_v16, %v4030_v63  ;;  %v4059_v27 = vrot.slane %v4057_v20, 4  ;;  %v4070_v30 = vshrl.u32 %v10949_v6, 16  ;;  %v4040_v33 = vrot.slane %v4039_v22, 4  ;;  %v10959_v20 = vld [vmem:[%s17894_s0 + $0x140] sm:$0x1] }
  0xe3   :  { %v11002_v32 = vcombine.low %v4021_v15, %v4031_v26  ;;  %12097 = vmatmul.mubr.msk.bf16.vlgmr.msra.gmra.mrb[0].mxu1 %vm992_vm1, %v10601_v59  ;;  %v4050_v35 = vrot.slane %v4049_v23, 4  ;;  %v4062_v36 = vrot.slane %v4060_v25, 5  ;;  %v4068_v38 = vrot.slane %v4066_v28, 5  ;;  %v13484_v23 = vld [vmem:[%s17894_s0 + $0x3c] sm:$0xf] }
  0xe4   :  { %12100 = vmatprep.mubr.msk.bf16.mxu1 %vm992_vm1, %v10602_v19  ;;  %v4072_v39 = vrot.slane %v4070_v30, 4  ;;  %v4076_v40 = vshll.u32 %v10950_v57, 16  ;;  %v10603_v42 = vcombine.low %v13480_v41, %v13481_v34  ;;  %v4045_v44 = vsel %vm13816_vm4, %v4040_v33, %v4044_v12  ;;  %v10958_v12 = vld [vmem:[%s17894_s0 + $0x13c] sm:$0xf]  ;;  %v10961_v34 = vld [vmem:[%s17894_s0 + $0x148] sm:$0xf] }
  0xe5   :  { %12330 = vmatprep.mubr.msk.bf16.mxu0 %vm992_vm1, %v11002_v32  ;;  %v4055_v45 = vsel %vm13816_vm4, %v4050_v35, %v4054_v24  ;;  %v4063_v46 = vor.u32 %v4062_v36, %v4059_v27  ;;  %v4081_v47 = vshrl.u32 %v10951_v21, 16  ;;  %v4084_v51 = vshll.u32 %v10951_v21, 16  ;;  %v13485_v24 = vld [vmem:[%s17894_s0 + $0x40] sm:$0xf] }
  0xe6   :  { %v11003_v48 = vcombine.low %v4045_v44, %v4055_v45  ;;  %v4073_v49 = vor.u32 %v4072_v39, %v4068_v38  ;;  %v4078_v50 = vrot.slane %v4076_v40, 5  ;;  %v4090_v54 = vshll.u32 %v10952_v31, 16  ;;  %v13486_v45 = vld [vmem:[%s17894_s0 + $0x48] sm:$0xf] }
  0xe7   :  { %v4064_v52 = vrot.slane %v4063_v46, 4  ;;  %v4083_v53 = vrot.slane %v4081_v47, 4  ;;  %v4094_v55 = vshrl.u32 %v10952_v31, 16  ;;  %v4086_v59 = vrot.slane %v4084_v51, 5  ;;  %v13487_v46 = vld [vmem:[%s17894_s0 + $0x4c] sm:$0xf] }
  0xe8   :  { %12331 = vmatmul.mubr.msk.bf16.gmra.mrb[36].mxu0 %vm992_vm1, %v11003_v48  ;;  %v4074_v58 = vrot.slane %v4073_v49, 4  ;;  %v4100_v60 = vshll.u32 %v10953_v37, 16  ;;  %v10604_v63 = vcombine.low %v13482_v61, %v13483_v62  ;;  %v4092_v3 = vrot.slane %v4090_v54, 5  ;;  %v10960_v37 = vld [vmem:[%s17894_s0 + $0x144] sm:$0xf] }
  0xe9   :  { %v4069_v2 = vsel %vm13816_vm4, %v4064_v52, %v4068_v38  ;;  %v4096_v4 = vrot.slane %v4094_v55, 4  ;;  %v4105_v6 = vshrl.u32 %v10954_v43, 16  ;;  %v4087_v8 = vor.u32 %v4086_v59, %v4083_v53  ;;  %v10962_v48 = vld [vmem:[%s17894_s0 + $0x14c] sm:$0x1]  ;;  %v10963_v53 = vld [vmem:[%s17894_s0 + $0x150] sm:$0xf] }
  0xea   :  { %v4079_v7 = vsel %vm13816_vm4, %v4074_v58, %v4078_v50  ;;  %v4102_v9 = vrot.slane %v4100_v60, 5  ;;  %v4108_v10 = vshll.u32 %v10954_v43, 16  ;;  %v4114_v15 = vshll.u32 %v10955_v0, 16  ;;  %v10964_v60 = vld [vmem:[%s17894_s0 + $0x154] sm:$0xf] }
  0xeb   :  { %v11004_v13 = vcombine.low %v4069_v2, %v4079_v7  ;;  %12101 = vmatmul.mubr.msk.bf16.gmra.mrb[4].mxu1 %vm992_vm1, %v10603_v42  ;;  %v4097_v14 = vor.u32 %v4096_v4, %v4092_v3  ;;  %v4107_v57 = vrot.slane %v4105_v6, 4  ;;  %v4088_v16 = vrot.slane %v4087_v8, 4 }
  0xec   :  { %12104 = vmatprep.mubr.msk.bf16.mxu1 %vm992_vm1, %v10604_v63  ;;  %v4110_v17 = vrot.slane %v4108_v10, 5  ;;  %v4118_v18 = vshrl.u32 %v10955_v0, 16  ;;  %v4124_v19 = vshll.u32 %v10956_v5, 16  ;;  %v4116_v22 = vrot.slane %v4114_v15, 5  ;;  %v13489_v10 = vld [vmem:[%s17894_s0 + $0x58] sm:$0xf] }
  0xed   :  { %12334 = vmatprep.mubr.msk.bf16.mxu0 %vm992_vm1, %v11004_v13  ;;  %v4098_v21 = vrot.slane %v4097_v14, 4  ;;  %v10605_v25 = vcombine.low %v13484_v23, %v13485_v24  ;;  %v4129_v26 = vshrl.u32 %v10957_v11, 16  ;;  %v4093_v27 = vsel %vm13816_vm4, %v4088_v16, %v4092_v3  ;;  %v10965_v14 = vld [vmem:[%s17894_s0 + $0x158] sm:$0x1] }
  0xee   :  { %v4111_v28 = vor.u32 %v4110_v17, %v4107_v57  ;;  %v4120_v30 = vrot.slane %v4118_v18, 4  ;;  %v4126_v31 = vrot.slane %v4124_v19, 5  ;;  %v4132_v35 = vshll.u32 %v10957_v11, 16 }
  0xef   :  { %v4103_v32 = vsel %vm13816_vm4, %v4098_v21, %v4102_v9  ;;  %v4131_v33 = vrot.slane %v4129_v26, 4  ;;  %v4138_v36 = vshll.u32 %v10958_v12, 16  ;;  %v4142_v41 = vshrl.u32 %v10958_v12, 16  ;;  %v13488_v9 = vld [vmem:[%s17894_s0 + $0x54] sm:$0xf] }
  0xf0   :  { %v11005_v38 = vcombine.low %v4093_v27, %v4103_v32  ;;  %v4112_v39 = vrot.slane %v4111_v28, 4  ;;  %v4121_v40 = vor.u32 %v4120_v30, %v4116_v22  ;;  %v4134_v42 = vrot.slane %v4132_v35, 5  ;;  %v10967_v21 = vld [vmem:[%s17894_s0 + $0x160] sm:$0xf]  ;;  %v10968_v26 = vld [vmem:[%s17894_s0 + $0x164] sm:$0x1] }
  0xf1   :  { %v4140_v43 = vrot.slane %v4138_v36, 5  ;;  %v4148_v44 = vshll.u32 %v10959_v20, 16  ;;  %v10606_v47 = vcombine.low %v13486_v45, %v13487_v46  ;;  %v4144_v51 = vrot.slane %v4142_v41, 4  ;;  %v10966_v20 = vld [vmem:[%s17894_s0 + $0x15c] sm:$0xf] }
  0xf2   :  { %12335 = vmatmul.mubr.msk.bf16.gmra.mrb[40].mxu0 %vm992_vm1, %v11005_v38  ;;  %v4117_v49 = vsel %vm13816_vm4, %v4112_v39, %v4116_v22  ;;  %v4122_v50 = vrot.slane %v4121_v40, 4  ;;  %v4153_v52 = vshrl.u32 %v10960_v37, 16  ;;  %v4135_v54 = vor.u32 %v4134_v42, %v4131_v33  ;;  %v10969_v32 = vld [vmem:[%s17894_s0 + $0x168] sm:$0xf]  ;;  %v13490_v36 = vld [vmem:[%s17894_s0 + $0x60] sm:$0xf] }
  0xf3   :  { %12105 = vmatmul.mubr.msk.bf16.gmra.mrb[8].mxu1 %vm992_vm1, %v10605_v25  ;;  %v4150_v55 = vrot.slane %v4148_v44, 5  ;;  %v4156_v58 = vshll.u32 %v10960_v37, 16  ;;  %v4162_v59 = vshll.u32 %v10961_v34, 16  ;;  %v4145_v62 = vor.u32 %v4144_v51, %v4140_v43  ;;  %v13491_v37 = vld [vmem:[%s17894_s0 + $0x64] sm:$0xf] }
  0xf4   :  { %v4127_v61 = vsel %vm13816_vm4, %v4122_v50, %v4126_v31  ;;  %12108 = vmatprep.mubr.msk.bf16.mxu1 %vm992_vm1, %v10606_v47  ;;  %v4155_v63 = vrot.slane %v4153_v52, 4  ;;  %v4166_v0 = vshrl.u32 %v10961_v34, 16  ;;  %v4136_v3 = vrot.slane %v4135_v54, 4  ;;  %v13492_v54 = vld [vmem:[%s17894_s0 + $0x6c] sm:$0xf] }
  0xf5   :  { %v11006_v2 = vcombine.low %v4117_v49, %v4127_v61  ;;  %v4158_v4 = vrot.slane %v4156_v58, 5  ;;  %v4164_v5 = vrot.slane %v4162_v59, 5  ;;  %v4146_v6 = vrot.slane %v4145_v62, 4  ;;  %v10971_v59 = vld [vmem:[%s17894_s0 + $0x170] sm:$0x1] }
  0xf6   :  { %v4168_v7 = vrot.slane %v4166_v0, 4  ;;  %v4172_v8 = vshll.u32 %v10962_v48, 16  ;;  %v10607_v11 = vcombine.low %v13488_v9, %v13489_v10  ;;  %v4141_v12 = vsel %vm13816_vm4, %v4136_v3, %v4140_v43  ;;  %v10970_v43 = vld [vmem:[%s17894_s0 + $0x16c] sm:$0xf] }
  0xf7   :  { %12338 = vmatprep.mubr.msk.bf16.mxu0 %vm992_vm1, %v11006_v2  ;;  %v4159_v13 = vor.u32 %v4158_v4, %v4155_v63  ;;  %v4177_v57 = vshrl.u32 %v10963_v53, 16  ;;  %v4180_v15 = vshll.u32 %v10963_v53, 16  ;;  %v4151_v16 = vsel %vm13816_vm4, %v4146_v6, %v4150_v55  ;;  %v13493_v55 = vld [vmem:[%s17894_s0 + $0x70] sm:$0xf]  ;;  %v10972_v2 = vld [vmem:[%s17894_s0 + $0x174] sm:$0xf] }
  0xf8   :  { %v4169_v17 = vor.u32 %v4168_v7, %v4164_v5  ;;  %v4174_v18 = vrot.slane %v4172_v8, 5  ;;  %v4186_v19 = vshll.u32 %v10964_v60, 16  ;;  %v11007_v22 = vcombine.low %v4141_v12, %v4151_v16  ;;  %v10973_v7 = vld [vmem:[%s17894_s0 + $0x178] sm:$0xf]  ;;  %v10974_v8 = vld [vmem:[%s17894_s0 + $0x17c] sm:$0x1] }
  0xf9   :  { %v4160_v23 = vrot.slane %v4159_v13, 4  ;;  %v4179_v24 = vrot.slane %v4177_v57, 4  ;;  %v4182_v25 = vrot.slane %v4180_v15, 5  ;;  %v4190_v30 = vshrl.u32 %v10964_v60, 16 }
  0xfa   :  { %v4170_v27 = vrot.slane %v4169_v17, 4  ;;  %v4188_v28 = vrot.slane %v4186_v19, 5  ;;  %v4196_v31 = vshll.u32 %v10965_v14, 16  ;;  %12339 = vmatmul.mubr.msk.bf16.gmra.mrb[44].mxu0 %vm992_vm1, %v11007_v22  ;;  %v10608_v38 = vcombine.low %v13490_v36, %v13491_v37  ;;  %v13494_v19 = vld [vmem:[%s17894_s0 + $0x78] sm:$0xf] }
  0xfb   :  { %v4165_v33 = vsel %vm13816_vm4, %v4160_v23, %v4164_v5  ;;  %12109 = vmatmul.mubr.msk.bf16.gmra.mrb[12].mxu1 %vm992_vm1, %v10607_v11  ;;  %v4183_v35 = vor.u32 %v4182_v25, %v4179_v24  ;;  %v4201_v39 = vshrl.u32 %v10966_v20, 16  ;;  %v4192_v41 = vrot.slane %v4190_v30, 4  ;;  %v10975_v22 = vld [vmem:[%s17894_s0 + $0x180] sm:$0xf]  ;;  %v10976_v37 = vld [vmem:[%s17894_s0 + $0x184] sm:$0xf] }
  0xfc   :  { %v4175_v40 = vsel %vm13816_vm4, %v4170_v27, %v4174_v18  ;;  %v4198_v34 = vrot.slane %v4196_v31, 5  ;;  %v4204_v42 = vshll.u32 %v10966_v20, 16  ;;  %12112 = vmatprep.mubr.msk.bf16.mxu1 %vm992_vm1, %v10608_v38  ;;  %v4210_v47 = vshll.u32 %v10967_v21, 16  ;;  %v14796_v20 = vld [vmem:[%s17894_s0 + $0x7c] sm:$0xf] }
  0xfd   :  { %v11008_v44 = vcombine.low %v4165_v33, %v4175_v40  ;;  %v4184_v45 = vrot.slane %v4183_v35, 4  ;;  %v4203_v46 = vrot.slane %v4201_v39, 4  ;;  %v4193_v48 = vor.u32 %v4192_v41, %v4188_v28 }
  0xfe   :  { %v4206_v49 = vrot.slane %v4204_v42, 5  ;;  %v4214_v50 = vshrl.u32 %v10967_v21, 16  ;;  %v4220_v51 = vshll.u32 %v10968_v26, 16  ;;  %v4212_v53 = vrot.slane %v4210_v47, 5 }
  0xff   :  { %12342 = vmatprep.mubr.msk.bf16.mxu0 %vm992_vm1, %v11008_v44  ;;  %v4189_v52 = vsel %vm13816_vm4, %v4184_v45, %v4188_v28  ;;  %v10609_v58 = vcombine.low %v13492_v54, %v13493_v55  ;;  %v4225_v60 = vshrl.u32 %v10969_v32, 16  ;;  %v4194_v61 = vrot.slane %v4193_v48, 4  ;;  %v13496_v44 = vld [vmem:[%s17894_s0 + $0x84] sm:$0xf]  ;;  %v14823_v45 = vld [vmem:[%s17894_s0 + $0x88] sm:$0xf] }
 0x100   :  { %v4207_v62 = vor.u32 %v4206_v49, %v4203_v46  ;;  %v4216_v63 = vrot.slane %v4214_v50, 4  ;;  %v4222_v0 = vrot.slane %v4220_v51, 5  ;;  %v4228_v4 = vshll.u32 %v10969_v32, 16  ;;  %v10978_v48 = vld [vmem:[%s17894_s0 + $0x18c] sm:$0xf] }
 0x101   :  { %v4227_v3 = vrot.slane %v4225_v60, 4  ;;  %v4234_v5 = vshll.u32 %v10970_v43, 16  ;;  %v4238_v6 = vshrl.u32 %v10970_v43, 16  ;;  %v4199_v9 = vsel %vm13816_vm4, %v4194_v61, %v4198_v34  ;;  %v10977_v34 = vld [vmem:[%s17894_s0 + $0x188] sm:$0x1] }
 0x102   :  { %v4208_v10 = vrot.slane %v4207_v62, 4  ;;  %v4217_v11 = vor.u32 %v4216_v63, %v4212_v53  ;;  %v4244_v12 = vshll.u32 %v10971_v59, 16  ;;  %v11009_v13 = vcombine.low %v4189_v52, %v4199_v9  ;;  %v10980_v60 = vld [vmem:[%s17894_s0 + $0x194] sm:$0x1] }
 0x103   :  { %12113 = vmatmul.mubr.msk.bf16.gmra.mrb[16].mxu1 %vm992_vm1, %v10609_v58  ;;  %v4230_v14 = vrot.slane %v4228_v4, 5  ;;  %v4236_v57 = vrot.slane %v4234_v5, 5  ;;  %v4240_v15 = vrot.slane %v4238_v6, 4  ;;  %v10610_v21 = vcombine.low %v13494_v19, %v14796_v20  ;;  %v10981_v4 = vld [vmem:[%s17894_s0 + $0x198] sm:$0xf] }
 0x104   :  { %v4213_v16 = vsel %vm13816_vm4, %v4208_v10, %v4212_v53  ;;  %v4218_v17 = vrot.slane %v4217_v11, 4  ;;  %v4246_v18 = vrot.slane %v4244_v12, 5  ;;  %12343 = vmatmul.mubr.msk.bf16.gmra.mrb[48].mxu0 %vm992_vm1, %v11009_v13  ;;  %v4249_v25 = vshrl.u32 %v10972_v2, 16  ;;  %v10979_v53 = vld [vmem:[%s17894_s0 + $0x190] sm:$0xf] }
 0x105   :  { %v4231_v23 = vor.u32 %v4230_v14, %v4227_v3  ;;  %v4241_v24 = vor.u32 %v4240_v15, %v4236_v57  ;;  %v4252_v26 = vshll.u32 %v10972_v2, 16  ;;  %12116 = vmatprep.mubr.msk.bf16.mxu1 %vm992_vm1, %v10610_v21  ;;  %v4258_v28 = vshll.u32 %v10973_v7, 16  ;;  %v14842_v2 = vld [vmem:[%s17894_s0 + $0x94] sm:$0xf]  ;;  %v10982_v21 = vld [vmem:[%s17894_s0 + $0x19c] sm:$0xf] }
 0x106   :  { %v4223_v27 = vsel %vm13816_vm4, %v4218_v17, %v4222_v0  ;;  %v4262_v30 = vshrl.u32 %v10973_v7, 16  ;;  %v4268_v31 = vshll.u32 %v10974_v8, 16  ;;  %v4251_v36 = vrot.slane %v4249_v25, 4  ;;  %v13498_v0 = vld [vmem:[%s17894_s0 + $0x90] sm:$0xf] }
 0x107   :  { %v11010_v32 = vcombine.low %v4213_v16, %v4223_v27  ;;  %v4232_v33 = vrot.slane %v4231_v23, 4  ;;  %v4242_v35 = vrot.slane %v4241_v24, 4  ;;  %v4254_v38 = vrot.slane %v4252_v26, 5  ;;  %v13500_v24 = vld [vmem:[%s17894_s0 + $0x9c] sm:$0xf] }
 0x108   :  { %v4260_v39 = vrot.slane %v4258_v28, 5  ;;  %v4264_v40 = vrot.slane %v4262_v30, 4  ;;  %v4270_v41 = vrot.slane %v4268_v31, 5  ;;  %v10611_v46 = vcombine.low %v13496_v44, %v14823_v45  ;;  %v14864_v25 = vld [vmem:[%s17894_s0 + $0xa0] sm:$0xf] }
 0x109   :  { %12346 = vmatprep.mubr.msk.bf16.mxu0 %vm992_vm1, %v11010_v32  ;;  %v4237_v42 = vsel %vm13816_vm4, %v4232_v33, %v4236_v57  ;;  %v4247_v43 = vsel %vm13816_vm4, %v4242_v35, %v4246_v18  ;;  %v4273_v47 = vshrl.u32 %v10975_v22, 16  ;;  %v4255_v50 = vor.u32 %v4254_v38, %v4251_v36  ;;  %v10983_v27 = vld [vmem:[%s17894_s0 + $0x1a0] sm:$0x1]  ;;  %v11048_v35 = vld [vmem:[%s17894_s0 + $0xc] sm:$0xe] }
 0x10a   :  { %v11011_v49 = vcombine.low %v4237_v42, %v4247_v43  ;;  %v4265_v51 = vor.u32 %v4264_v40, %v4260_v39  ;;  %v4276_v52 = vshll.u32 %v10975_v22, 16  ;;  %v4282_v55 = vshll.u32 %v10976_v37, 16 }
 0x10b   :  { %12117 = vmatmul.mubr.msk.bf16.gmra.mrb[20].mxu1 %vm992_vm1, %v10611_v46  ;;  %v4275_v54 = vrot.slane %v4273_v47, 4  ;;  %v4286_v58 = vshrl.u32 %v10976_v37, 16  ;;  %v4292_v59 = vshll.u32 %v10977_v34, 16  ;;  %v4256_v61 = vrot.slane %v4255_v50, 4  ;;  %v13502_v47 = vld [vmem:[%s17894_s0 + $0xa8] sm:$0xf] }
 0x10c   :  { %v4266_v62 = vrot.slane %v4265_v51, 4  ;;  %v4278_v63 = vrot.slane %v4276_v52, 5  ;;  %v10612_v3 = vcombine.low %v13498_v0, %v14842_v2  ;;  %12347 = vmatmul.mubr.msk.bf16.gmra.mrb[52].mxu0 %vm992_vm1, %v11011_v49  ;;  %v4284_v5 = vrot.slane %v4282_v55, 5 }
 0x10d   :  { %v4288_v6 = vrot.slane %v4286_v58, 4  ;;  %v4294_v7 = vrot.slane %v4292_v59, 5  ;;  %v4297_v8 = vshrl.u32 %v10978_v48, 16  ;;  %v4261_v9 = vsel %vm13816_vm4, %v4256_v61, %v4260_v39  ;;  %v13504_v61 = vld [vmem:[%s17894_s0 + $0x10] sm:$0xf] }
 0x10e   :  { %v4271_v10 = vsel %vm13816_vm4, %v4266_v62, %v4270_v41  ;;  %v4279_v11 = vor.u32 %v4278_v63, %v4275_v54  ;;  %12120 = vmatprep.mubr.msk.bf16.mxu1 %vm992_vm1, %v10612_v3  ;;  %v4300_v12 = vshll.u32 %v10978_v48, 16  ;;  %v4306_v15 = vshll.u32 %v10979_v53, 16  ;;  %v14884_v48 = vld [vmem:[%s17894_s0 + $0xac] sm:$0xf]  ;;  %v13505_v63 = vld [vmem:[%s17894_s0 + $0x14] sm:$0x1] }
 0x10f   :  { %v11012_v13 = vcombine.low %v4261_v9, %v4271_v10  ;;  %v4289_v14 = vor.u32 %v4288_v6, %v4284_v5  ;;  %v4299_v57 = vrot.slane %v4297_v8, 4  ;;  %v4310_v18 = vshrl.u32 %v10979_v53, 16  ;;  %v11049_v3 = vld [vmem:[%s17894_s0 + $0x18] sm:$0xe]  ;;  %v13506_v6 = vld [vmem:[%s17894_s0 + $0xb4] sm:$0xf] }
 0x110   :  { %v4280_v16 = vrot.slane %v4279_v11, 4  ;;  %v4302_v17 = vrot.slane %v4300_v12, 5  ;;  %v4316_v19 = vshll.u32 %v10980_v60, 16  ;;  %v4308_v23 = vrot.slane %v4306_v15, 5  ;;  %v11050_v9 = vld [vmem:[%s17894_s0 + $0x24] sm:$0xe] }
 0x111   :  { %12350 = vmatprep.mubr.msk.bf16.mxu0 %vm992_vm1, %v11012_v13  ;;  %v4290_v22 = vrot.slane %v4289_v14, 4  ;;  %v10613_v26 = vcombine.low %v13500_v24, %v14864_v25  ;;  %v4321_v28 = vshrl.u32 %v10981_v4, 16  ;;  %v4312_v32 = vrot.slane %v4310_v18, 4  ;;  %v13508_v13 = vld [vmem:[%s17894_s0 + $0x1c] sm:$0xf] }
 0x112   :  { %v4285_v30 = vsel %vm13816_vm4, %v4280_v16, %v4284_v5  ;;  %v4303_v31 = vor.u32 %v4302_v17, %v4299_v57  ;;  %v4318_v33 = vrot.slane %v4316_v19, 5  ;;  %v4324_v38 = vshll.u32 %v10981_v4, 16  ;;  %v13509_v16 = vld [vmem:[%s17894_s0 + $0xd8] sm:$0xf]  ;;  %v14933_v17 = vld [vmem:[%s17894_s0 + $0xdc] sm:$0xf] }
 0x113   :  { %v4295_v36 = vsel %vm13816_vm4, %v4290_v22, %v4294_v7  ;;  %12121 = vmatmul.mubr.msk.bf16.gmra.mrb[24].mxu1 %vm992_vm1, %v10613_v26  ;;  %v4323_v37 = vrot.slane %v4321_v28, 4  ;;  %v4330_v39 = vshll.u32 %v10982_v21, 16  ;;  %v4313_v34 = vor.u32 %v4312_v32, %v4308_v23  ;;  %v14912_v7 = vld [vmem:[%s17894_s0 + $0xb8] sm:$0xf]  ;;  %v13513_v32 = vld [vmem:[%s17894_s0 + $0x2c] sm:$0x1] }
 0x114   :  { %v11013_v40 = vcombine.low %v4285_v30, %v4295_v36  ;;  %v4304_v41 = vrot.slane %v4303_v31, 4  ;;  %v4334_v42 = vshrl.u32 %v10982_v21, 16  ;;  %v4326_v43 = vrot.slane %v4324_v38, 5  ;;  %v13512_v30 = vld [vmem:[%s17894_s0 + $0x28] sm:$0xf] }
 0x115   :  { %v4332_v44 = vrot.slane %v4330_v39, 5  ;;  %v4340_v46 = vshll.u32 %v10983_v27, 16  ;;  %v10614_v49 = vcombine.low %v13502_v47, %v14884_v48  ;;  %v4314_v51 = vrot.slane %v4313_v34, 4  ;;  %v13514_v36 = vld [vmem:[%s17894_s0 + $0xe4] sm:$0xf] }
 0x116   :  { %12351 = vmatmul.mubr.msk.bf16.gmra.mrb[56].mxu0 %vm992_vm1, %v11013_v40  ;;  %v4309_v50 = vsel %vm13816_vm4, %v4304_v41, %v4308_v23  ;;  %v4336_v52 = vrot.slane %v4334_v42, 4  ;;  %v4327_v53 = vor.u32 %v4326_v43, %v4323_v37  ;;  %vm2027_vm6 = vcmask 1046532   ;;  %v13511_v23 = vld [vmem:[%s17894_s0 + $0x20] sm:$0x1]  ;;  %v14957_v37 = vld [vmem:[%s17894_s0 + $0xe8] sm:$0xf] }
 0x117   :  { %v4342_v54 = vrot.slane %v4340_v46, 5  ;;  %12124 = vmatprep.mubr.msk.bf16.mxu1 %vm992_vm1, %v10614_v49  ;;  %v11080_v55 = vrot.slane %v11048_v35, 9  ;;  %v4319_v58 = vsel %vm13816_vm4, %v4314_v51, %v4318_v33  ;;  %vm14893_vm7 = vmor %vm2026_vm5, %vm2027_vm6  ;;  %v5023_v62 = vrot.slane %v13504_v61, 5  ;;  %v11051_v41 = vld [vmem:[%s17894_s0 + $0x30] sm:$0xe] }
 0x118   :  { %v4337_v59 = vor.u32 %v4336_v52, %v4332_v44  ;;  %v5026_v0 = vrot.slane %v13505_v63, 5  ;;  %v11014_v4 = vcombine.low %v4309_v50, %v4319_v58  ;;  %v4328_v5 = vrot.slane %v4327_v53, 4  ;;  %v13516_v34 = vld [vmem:[%s17894_s0 + $0x34] sm:$0xf]  ;;  %v13517_v43 = vld [vmem:[%s17894_s0 + $0xf0] sm:$0xf] }
 0x119   :  { %v10615_v8 = vcombine.low %v13506_v6, %v14912_v7  ;;  %v5024_v11 = vsel %vm14893_vm7, %v11080_v55, %v5023_v62  ;;  %v5025_v12 = vrot.slane %v5023_v62, 4  ;;  %v5030_v14 = vrot.slane %v13508_v13, 5  ;;  %v11052_v47 = vld [vmem:[%s17894_s0 + $0x3c] sm:$0xe]  ;;  %v13519_v51 = vld [vmem:[%s17894_s0 + $0x40] sm:$0xf] }
 0x11a   :  { %v4338_v10 = vrot.slane %v4337_v59, 4  ;;  %12354 = vmatprep.mubr.msk.bf16.mxu0 %vm992_vm1, %v11014_v4  ;;  %v4333_v57 = vsel %vm13816_vm4, %v4328_v5, %v4332_v44  ;;  %v11081_v15 = vrot.slane %v11049_v3, 9  ;;  %v10616_v18 = vcombine.low %v13509_v16, %v14933_v17  ;;  %v14977_v44 = vld [vmem:[%s17894_s0 + $0xf4] sm:$0xf]  ;;  %v13521_v59 = vld [vmem:[%s17894_s0 + $0x38] sm:$0x1] }
 0x11b   :  { %12125 = vmatmul.mubr.msk.bf16.gmra.mrb[28].mxu1 %vm992_vm1, %v10615_v8  ;;  %v5027_v21 = vsel %vm14893_vm7, %v5025_v12, %v5026_v0  ;;  %v5032_v22 = vrot.slane %v5030_v14, 4  ;;  %v5033_v24 = vrot.slane %v13511_v23, 5  ;;  %v11082_v28 = vrot.slane %v11050_v9, 9  ;;  %v13522_v4 = vld [vmem:[%s17894_s0 + $0x44] sm:$0x1] }
 0x11c   :  { %v4343_v19 = vsel %vm13816_vm4, %v4338_v10, %v4342_v54  ;;  %v11112_v27 = vcombine.low %v5024_v11, %v5027_v21  ;;  %12128 = vmatprep.mubr.msk.bf16.mxu1 %vm992_vm1, %v10616_v18  ;;  %v5037_v31 = vrot.slane %v13512_v30, 5  ;;  %v5040_v33 = vrot.slane %v13513_v32, 5  ;;  %v13520_v54 = vld [vmem:[%s17896_s2 + $0x18] sm:$0x3]  ;;  %v13523_v6 = vld [vmem:[%s17894_s0 + $0xfc] sm:$0xf] }
 0x11d   :  { %v11015_v26 = vcombine.low %v4333_v57, %v4343_v19  ;;  %v10617_v38 = vcombine.low %v13514_v36, %v14957_v37  ;;  %v5031_v39 = vsel %vm14893_vm7, %v11081_v15, %v5030_v14  ;;  %v5034_v40 = vsel %vm14893_vm7, %v5032_v22, %v5033_v24  ;;  %v15009_v8 = vld [vmem:[%s17894_s0 + $0x100] sm:$0xf]  ;;  %v15015_v10 = vld [vmem:[%s17896_s2 + $0x1c] sm:$0x3]  ;;  %v11053_v13 = vld [vmem:[%s17894_s0 + $0x48] sm:$0xe] }
 0x11e   :  { %v5039_v35 = vrot.slane %v5037_v31, 4  ;;  %v5044_v42 = vrot.slane %v13516_v34, 5  ;;  %v10618_v46 = vcombine.low %v13517_v43, %v14977_v44  ;;  %v5038_v49 = vsel %vm14893_vm7, %v11082_v28, %v5037_v31  ;;  %v13525_v14 = vld [vmem:[%s17894_s0 + $0x4c] sm:$0xf]  ;;  %v13526_v15 = vld [vmem:[%s17894_s0 + $0x108] sm:$0xf] }
 0x11f   :  { %12355 = vmatmul.mubr.msk.bf16.gmra.mrb[60].mxu0 %vm992_vm1, %v11015_v26  ;;  %v5051_v52 = vrot.slane %v13519_v51, 5  ;;  %v11113_v53 = vcombine.low %v5031_v39, %v5034_v40  ;;  %v6117_v55 = vsel %vm1089_vm0, %v13520_v54, 0  ;;  %v11083_v58 = vrot.slane %v11051_v41, 9  ;;  %v15034_v16 = vld [vmem:[%s17894_s0 + $0x10c] sm:$0xf] }
 0x120   :  { %12360 = vmatprep.mubr.msk.bf16.mxu0 %vm992_vm1, %v11112_v27  ;;  %v5041_v50 = vsel %vm14893_vm7, %v5039_v35, %v5040_v33  ;;  %v5047_v61 = vrot.slane %v13521_v59, 5  ;;  %v5046_v63 = vrot.slane %v5044_v42, 4  ;;  %v11084_v0 = vrot.slane %v11052_v47, 9  ;;  %v11054_v22 = vld [vmem:[%s17894_s0 + $0x54] sm:$0xe] }
 0x121   :  { %v11114_v62 = vcombine.low %v5038_v49, %v5041_v50  ;;  %v5053_v3 = vrot.slane %v5051_v52, 4  ;;  %v5054_v5 = vrot.slane %v13522_v4, 5  ;;  %v10619_v9 = vcombine.low %v13523_v6, %v15009_v8  ;;  %v13528_v23 = vld [vmem:[%s17894_s0 + $0x58] sm:$0xf]  ;;  %v13529_v31 = vld [vmem:[%s17894_s0 + $0x50] sm:$0x1] }
 0x122   :  { %v5045_v11 = vsel %vm14893_vm7, %v11083_v58, %v5044_v42  ;;  %v5048_v12 = vsel %vm14893_vm7, %v5046_v63, %v5047_v61  ;;  %v5058_v57 = vrot.slane %v13525_v14, 5  ;;  %v10620_v18 = vcombine.low %v13526_v15, %v15034_v16  ;;  %v13530_v36 = vld [vmem:[%s17894_s0 + $0x5c] sm:$0x1]  ;;  %v13531_v39 = vld [vmem:[%s17894_s0 + $0x114] sm:$0xf] }
 0x123   :  { %12129 = vmatmul.mubr.msk.bf16.gmra.mrb[32].mxu1 %vm992_vm1, %v10617_v38  ;;  %v5052_v19 = vsel %vm14893_vm7, %v11084_v0, %v5051_v52  ;;  %v5055_v21 = vsel %vm14893_vm7, %v5053_v3, %v5054_v5  ;;  %v5065_v24 = vrot.slane %v13528_v23, 5  ;;  %v11115_v26 = vcombine.low %v5045_v11, %v5048_v12  ;;  %v15064_v40 = vld [vmem:[%s17894_s0 + $0x118] sm:$0xf]  ;;  %v11055_v43 = vld [vmem:[%s17894_s0 + $0x60] sm:$0xe] }
 0x124   :  { %12132 = vmatprep.mubr.msk.bf16.mxu1 %vm992_vm1, %v10618_v46  ;;  %v11085_v27 = vrot.slane %v11053_v13, 9  ;;  %v11116_v28 = vcombine.low %v5052_v19, %v5055_v21  ;;  %v5060_v30 = vrot.slane %v5058_v57, 4  ;;  %v5061_v32 = vrot.slane %v13529_v31, 5  ;;  %v13533_v46 = vld [vmem:[%s17894_s0 + $0x64] sm:$0xf] }
 0x125   :  { %v11086_v33 = vrot.slane %v11054_v22, 9  ;;  %v5067_v35 = vrot.slane %v5065_v24, 4  ;;  %v5068_v38 = vrot.slane %v13530_v36, 5  ;;  %v10621_v41 = vcombine.low %v13531_v39, %v15064_v40  ;;  %v13534_v49 = vld [vmem:[%s17894_s0 + $0x120] sm:$0xf] }
 0x126   :  { %v5059_v34 = vsel %vm14893_vm7, %v11085_v27, %v5058_v57  ;;  %v5062_v42 = vsel %vm14893_vm7, %v5060_v30, %v5061_v32  ;;  %v5072_v47 = vrot.slane %v13533_v46, 5  ;;  %v15084_v50 = vld [vmem:[%s17894_s0 + $0x124] sm:$0xf]  ;;  %v13536_v54 = vld [vmem:[%s17894_s0 + $0x70] sm:$0xf] }
 0x127   :  { %12361 = vmatmul.mubr.msk.bf16.vlgmr.msra.gmra.mrb[0].mxu0 %vm992_vm1, %v11113_v53  ;;  %v10622_v51 = vcombine.low %v13534_v49, %v15084_v50  ;;  %v5066_v52 = vsel %vm14893_vm7, %v11086_v33, %v5065_v24  ;;  %v5069_v53 = vsel %vm14893_vm7, %v5067_v35, %v5068_v38 }
 0x128   :  { %12425 = vmatpush3.bf16.msra.mxu0 %v6117_v55  ;;  %12364 = vmatprep.mubr.msk.bf16.mxu0 %vm992_vm1, %v11114_v62  ;;  %v5079_v55 = vrot.slane %v13536_v54, 5 }
 0x129   :  { %13282 = vmatprep.subr.msk.bf16.mxu0 %vm1089_vm0, %v15015_v10 }
 0x12b   :  { %12133 = vmatmul.mubr.msk.bf16.gmra.mrb[36].mxu1 %vm992_vm1, %v10619_v9 }
 0x12c   :  { %12136 = vmatprep.mubr.msk.bf16.mxu1 %vm992_vm1, %v10620_v18 }
 0x12f   :  { %12365 = vmatmul.mubr.msk.bf16.gmra.mrb[4].mxu0 %vm992_vm1, %v11115_v26 }
 0x130   :  { %12368 = vmatprep.mubr.msk.bf16.mxu0 %vm992_vm1, %v11116_v28 }
 0x131   :  { %11 = vsyncpa [#allocation3], 0  ;;  %v11056_v58 = vld [vmem:[%s17894_s0 + $0x6c] sm:$0xe]  ;;  %v11117_v59 = vcombine.low %v5059_v34, %v5062_v42  ;;  %v11118_v61 = vcombine.low %v5066_v52, %v5069_v53  ;;  %v11087_v62 = vrot.slane %v11055_v43, 9  ;;  %v5074_v63 = vrot.slane %v5072_v47, 4 }
 0x132   :  { %v13537_v0 = vld [vmem:[%s17894_s0 + $0x68] sm:$0x1]  ;;  %v11088_v4 = vrot.slane %v11056_v58, 9  ;;  %v5081_v5 = vrot.slane %v5079_v55, 4  ;;  %v13538_v6 = vld [vmem:[%s17894_s0 + $0x74] sm:$0x1] }
 0x133   :  { %12137 = vmatmul.mubr.msk.bf16.gmra.mrb[40].mxu1 %vm992_vm1, %v10621_v41  ;;  %v5075_v3 = vrot.slane %v13537_v0, 5  ;;  %v5082_v9 = vrot.slane %v13538_v6, 5  ;;  %v13539_v11 = vld [vmem:[%s17894_s0 + $0x12c] sm:$0xf]  ;;  %v15112_v12 = vld [vmem:[%s17894_s0 + $0x130] sm:$0xf]  ;;  %v5073_v14 = vsel %vm14893_vm7, %v11087_v62, %v5072_v47 }
 0x134   :  { %12140 = vmatprep.mubr.msk.bf16.mxu1 %vm992_vm1, %v10622_v51  ;;  %v10623_v13 = vcombine.low %v13539_v11, %v15112_v12  ;;  %v11057_v15 = vld [vmem:[%s17894_s0 + $0x78] sm:$0xe]  ;;  %v13541_v18 = vld [vmem:[%s17894_s0 + $0x7c] sm:$0xf]  ;;  %v5080_v24 = vsel %vm14893_vm7, %v11088_v4, %v5079_v55  ;;  %v13544_v27 = vld [vmem:[%s17894_s0 + $0x88] sm:$0xf] }
 0x135   :  { %v5076_v57 = vsel %vm14893_vm7, %v5074_v63, %v5075_v3  ;;  %v5086_v19 = vrot.slane %v13541_v18, 5  ;;  %v13542_v21 = vld [vmem:[%s17894_s0 + $0x138] sm:$0xf]  ;;  %v15132_v22 = vld [vmem:[%s17894_s0 + $0x13c] sm:$0xf]  ;;  %v5083_v26 = vsel %vm14893_vm7, %v5081_v5, %v5082_v9  ;;  %v5093_v28 = vrot.slane %v13544_v27, 5 }
 0x136   :  { %v10624_v23 = vcombine.low %v13542_v21, %v15132_v22  ;;  %v11058_v30 = vld [vmem:[%s17894_s0 + $0x84] sm:$0xe]  ;;  %v11119_v31 = vcombine.low %v5073_v14, %v5076_v57  ;;  %v11089_v32 = vrot.slane %v11057_v15, 9  ;;  %v11120_v33 = vcombine.low %v5080_v24, %v5083_v26  ;;  %v13545_v36 = vld [vmem:[%s17894_s0 + $0x80] sm:$0x1]  ;;  %s13713_s21 = smov 64  }
 0x137   :  { %12369 = vmatmul.mubr.msk.bf16.gmra.mrb[8].mxu0 %vm992_vm1, %v11117_v59  ;;  %v5088_v35 = vrot.slane %v5086_v19, 4  ;;  %v5089_v38 = vrot.slane %v13545_v36, 5  ;;  %v2447_v39 = vsel %vm1089_vm0, %v14651_v56, 0  ;;  %v11090_v41 = vrot.slane %v11058_v30, 9  ;;  %v13546_v42 = vld [vmem:[%s17894_s0 + $0x8c] sm:$0x1] }
 0x138   :  { %12372 = vmatprep.mubr.msk.bf16.mxu0 %vm992_vm1, %v11118_v61  ;;  %v5095_v34 = vrot.slane %v5093_v28, 4  ;;  %v5096_v43 = vrot.slane %v13546_v42, 5  ;;  %12161 = vmatpush3.bf16.msra.mxu1 %v2447_v39  ;;  %v13547_v46 = vld [vmem:[%s17896_s2 + $0xc] sm:$0x3]  ;;  %v13548_v56 = vld [vmem:[%s17894_s0 + $0x144] sm:$0xf]  ;;  %v5087_v51 = vsel %vm14893_vm7, %v11089_v32, %v5086_v19 }
 0x139   :  { %13278 = vmatprep.subr.msk.bf16.mxu1 %vm1089_vm0, %v13547_v46  ;;  %v15166_v47 = vld [vmem:[%s17894_s0 + $0x148] sm:$0xf]  ;;  %v5090_v52 = vsel %vm14893_vm7, %v5088_v35, %v5089_v38  ;;  %v13550_v53 = vld [vmem:[%s17894_s0 + $0x94] sm:$0xf]  ;;  %v13551_v55 = vld [vmem:[%s17894_s0 + $0x150] sm:$0xf]  ;;  %v5094_v61 = vsel %vm14893_vm7, %v11090_v41, %v5093_v28 }
 0x13a   :  { %v10625_v49 = vcombine.low %v13548_v56, %v15166_v47  ;;  %v5100_v54 = vrot.slane %v13550_v53, 5  ;;  %v15183_v58 = vld [vmem:[%s17894_s0 + $0x154] sm:$0xf]  ;;  %v5097_v62 = vsel %vm14893_vm7, %v5095_v34, %v5096_v43  ;;  %v11059_v63 = vld [vmem:[%s17894_s0 + $0x90] sm:$0xe]  ;;  %v11121_v5 = vcombine.low %v5087_v51, %v5090_v52  ;;  %s13714_s22 = smov 88  }
 0x13b   :  { %12141 = vmatmul.mubr.msk.bf16.gmra.mrb[44].mxu1 %vm992_vm1, %v10623_v13  ;;  %v10626_v59 = vcombine.low %v13551_v55, %v15183_v58  ;;  %v13553_v0 = vld [vmem:[%s17894_s0 + $0xa0] sm:$0xf]  ;;  %v11060_v4 = vld [vmem:[%s17894_s0 + $0x9c] sm:$0xe]  ;;  %v11122_v6 = vcombine.low %v5094_v61, %v5097_v62  ;;  %v11091_v9 = vrot.slane %v11059_v63, 9  ;;  %vm13711_vm8 = vmmov 0  }
 0x13c   :  { %12144 = vmatprep.mubr.msk.bf16.mxu1 %vm992_vm1, %v10624_v23  ;;  %v5107_v3 = vrot.slane %v13553_v0, 5  ;;  %v5102_v11 = vrot.slane %v5100_v54, 4  ;;  %v13554_v13 = vld [vmem:[%s17894_s0 + $0x98] sm:$0x1]  ;;  %v11092_v57 = vrot.slane %v11060_v4, 9  ;;  %vm9083_vm9 = vcmask 261120  }
 0x13d   :  { %v5103_v14 = vrot.slane %v13554_v13, 5  ;;  %v13555_v18 = vld [vmem:[%s17894_s0 + $0xa4] sm:$0x1]  ;;  %v13556_v21 = vld [vmem:[%s17894_s0 + $0x15c] sm:$0xf]  ;;  %v5101_v26 = vsel %vm14893_vm7, %v11091_v9, %v5100_v54  ;;  %vm9136_vm10 = vcmask 64512  }
 0x13e   :  { %v5109_v15 = vrot.slane %v5107_v3, 4  ;;  %v5110_v19 = vrot.slane %v13555_v18, 5  ;;  %v15214_v23 = vld [vmem:[%s17894_s0 + $0x160] sm:$0xf]  ;;  %v13558_v28 = vld [vmem:[%s17894_s0 + $0xac] sm:$0xf]  ;;  %v5108_v35 = vsel %vm14893_vm7, %v11092_v57, %v5107_v3 }
 0x13f   :  { %12373 = vmatmul.mubr.msk.bf16.gmra.mrb[12].mxu0 %vm992_vm1, %v11119_v31  ;;  %v10627_v24 = vcombine.low %v13556_v21, %v15214_v23  ;;  %v5104_v27 = vsel %vm14893_vm7, %v5102_v11, %v5103_v14  ;;  %v5114_v30 = vrot.slane %v13558_v28, 5  ;;  %v13559_v31 = vld [vmem:[%s17894_s0 + $0x168] sm:$0xf]  ;;  %v15231_v32 = vld [vmem:[%s17894_s0 + $0x16c] sm:$0xf]  ;;  %vm9262_vm11 = vcmask 1043456  }
 0x140   :  { %12376 = vmatprep.mubr.msk.bf16.mxu0 %vm992_vm1, %v11120_v33  ;;  %v10628_v33 = vcombine.low %v13559_v31, %v15231_v32  ;;  %v5111_v36 = vsel %vm14893_vm7, %v5109_v15, %v5110_v19  ;;  %v11061_v38 = vld [vmem:[%s17894_s0 + $0xa8] sm:$0xe]  ;;  %v13561_v39 = vld [vmem:[%s17894_s0 + $0xb8] sm:$0xf]  ;;  %v11062_v34 = vld [vmem:[%s17894_s0 + $0xb4] sm:$0xe]  ;;  %v11123_v42 = vcombine.low %v5101_v26, %v5104_v27 }
 0x141   :  { %v5121_v41 = vrot.slane %v13561_v39, 5  ;;  %v11124_v43 = vcombine.low %v5108_v35, %v5111_v36  ;;  %v11093_v46 = vrot.slane %v11061_v38, 9  ;;  %v5116_v56 = vrot.slane %v5114_v30, 4  ;;  %v13563_v54 = vld [vmem:[%s17894_s0 + $0xbc] sm:$0x1]  ;;  %s13715_s23 = smov 120  }
 0x142   :  { %v11094_v52 = vrot.slane %v11062_v34, 9  ;;  %v5124_v55 = vrot.slane %v13563_v54, 5  ;;  %v1930_v62 = vld [vmem:[%s17894_s0] sm:$0xe]  ;;  %v13565_v63 = vld [vmem:[%s17894_s0 + $0x8] sm:$0x1] }
 0x143   :  { %12145 = vmatmul.mubr.msk.bf16.gmra.mrb[48].mxu1 %vm992_vm1, %v10625_v49  ;;  %v13562_v49 = vld [vmem:[%s17894_s0 + $0xb0] sm:$0x1]  ;;  %v5123_v53 = vrot.slane %v5121_v41, 4  ;;  %v2034_v0 = vrot.slane %v13565_v63, 5  ;;  %v13566_v3 = vld [vmem:[%s17894_s0 + $0x174] sm:$0xf]  ;;  %v5115_v13 = vsel %vm14893_vm7, %v11093_v46, %v5114_v30 }
 0x144   :  { %12148 = vmatprep.mubr.msk.bf16.mxu1 %vm992_vm1, %v10626_v59  ;;  %v5117_v51 = vrot.slane %v13562_v49, 5  ;;  %v13564_v59 = vld [vmem:[%s17894_s0 + $0x4] sm:$0xf]  ;;  %v15271_v4 = vld [vmem:[%s17894_s0 + $0x178] sm:$0xf]  ;;  %v5122_v26 = vsel %vm14893_vm7, %v11094_v52, %v5121_v41  ;;  %v10664_v28 = vrot.slane %v1930_v62, 9 }
 0x145   :  { %v2031_v61 = vrot.slane %v13564_v59, 5  ;;  %v13568_v9 = vld [vmem:[%s17894_s0 + $0xc4] sm:$0xf]  ;;  %v13569_v57 = vld [vmem:[%s17894_s0 + $0x180] sm:$0xf]  ;;  %v5125_v27 = vsel %vm14893_vm7, %v5123_v53, %v5124_v55  ;;  %s13716_s24 = smov 56  }
 0x146   :  { %v5128_v11 = vrot.slane %v13568_v9, 5  ;;  %v5118_v14 = vsel %vm14893_vm7, %v5116_v56, %v5117_v51  ;;  %v15291_v15 = vld [vmem:[%s17894_s0 + $0x184] sm:$0xf]  ;;  %v13571_v21 = vld [vmem:[%s17894_s0 + $0xe8] sm:$0xf]  ;;  %s13717_s25 = smov 80  }
 0x147   :  { %12377 = vmatmul.mubr.msk.bf16.gmra.mrb[16].mxu0 %vm992_vm1, %v11121_v5  ;;  %v10629_v5 = vcombine.low %v13566_v3, %v15271_v4  ;;  %v10630_v18 = vcombine.low %v13569_v57, %v15291_v15  ;;  %v11064_v19 = vld [vmem:[%s17894_s0 + $0xe4] sm:$0xe]  ;;  %v2033_v30 = vrot.slane %v2031_v61, 4  ;;  %v13572_v36 = vld [vmem:[%s17894_s0 + $0xc8] sm:$0x1]  ;;  %v2032_v49 = vsel %vm14893_vm7, %v10664_v28, %v2031_v61  ;;  %s13718_s26 = smov 112  }
 0x148   :  { %12380 = vmatprep.mubr.msk.bf16.mxu0 %vm992_vm1, %v11122_v6  ;;  %v11063_v6 = vld [vmem:[%s17894_s0 + $0xc0] sm:$0xe]  ;;  %v5130_v35 = vrot.slane %v5128_v11, 4  ;;  %v5131_v38 = vrot.slane %v13572_v36, 5  ;;  %v11096_v39 = vrot.slane %v11064_v19, 9  ;;  %s13719_s27 = smov 48  }
 0x149   :  { %v11095_v31 = vrot.slane %v11063_v6, 9  ;;  %v13573_v41 = vld [vmem:[%s17894_s0 + $0x10] sm:$0xf]  ;;  %v13574_v46 = vld [vmem:[%s17894_s0 + $0xec] sm:$0x1]  ;;  %v2035_v51 = vsel %vm14893_vm7, %v2033_v30, %v2034_v0  ;;  %s13720_s28 = smov 72  }
 0x14a   :  { %v2038_v34 = vrot.slane %v13573_v41, 5  ;;  %v5138_v56 = vrot.slane %v13574_v46, 5  ;;  %v1931_v52 = vld [vmem:[%s17894_s0 + $0xc] sm:$0xe]  ;;  %v13575_v53 = vld [vmem:[%s17894_s0 + $0x1c] sm:$0xf]  ;;  %v5132_v63 = vsel %vm14893_vm7, %v5130_v35, %v5131_v38  ;;  %v10696_v57 = vcombine.low %v2032_v49, %v2035_v51 }
 0x14b   :  { %12149 = vmatmul.mubr.msk.bf16.gmra.mrb[52].mxu1 %vm992_vm1, %v10627_v24  ;;  %v5135_v24 = vrot.slane %v13571_v21, 5  ;;  %v2045_v54 = vrot.slane %v13575_v53, 5  ;;  %v13576_v55 = vld [vmem:[%s17894_s0 + $0x14] sm:$0x1]  ;;  %v5129_v61 = vsel %vm14893_vm7, %v11095_v31, %v5128_v11  ;;  %v1932_v62 = vld [vmem:[%s17894_s0 + $0x18] sm:$0xe] }
 0x14c   :  { %12152 = vmatprep.mubr.msk.bf16.mxu1 %vm992_vm1, %v10628_v33  ;;  %v11125_v33 = vcombine.low %v5115_v13, %v5118_v14  ;;  %v2041_v59 = vrot.slane %v13576_v55, 5  ;;  %v13577_v3 = vld [vmem:[%s17894_s0 + $0x18c] sm:$0xf]  ;;  %v11065_v9 = vld [vmem:[%s17894_s0 + $0xf0] sm:$0xe]  ;;  %v10665_v19 = vrot.slane %v1931_v52, 9  ;;  %v11127_v38 = vcombine.low %v5129_v61, %v5132_v63 }
 0x14d   :  { %v5136_v0 = vsel %vm14893_vm7, %v11096_v39, %v5135_v24  ;;  %v13579_v11 = vld [vmem:[%s17894_s0 + $0xf4] sm:$0xf]  ;;  %v2040_v21 = vrot.slane %v2038_v34, 4  ;;  %v2047_v28 = vrot.slane %v2045_v54, 4  ;;  %v13581_v30 = vld [vmem:[%s17894_s0 + $0x20] sm:$0x1] }
 0x14e   :  { %v5142_v13 = vrot.slane %v13579_v11, 5  ;;  %v2048_v31 = vrot.slane %v13581_v30, 5  ;;  %v13582_v35 = vld [vmem:[%s17894_s0 + $0xf8] sm:$0x1]  ;;  %v13584_v51 = vld [vmem:[%s17894_s0 + $0x28] sm:$0xf] }
 0x14f   :  { %12381 = vmatmul.mubr.msk.bf16.gmra.mrb[20].mxu0 %vm992_vm1, %v11123_v42  ;;  %v11126_v42 = vcombine.low %v5122_v26, %v5125_v27  ;;  %v10666_v27 = vrot.slane %v1932_v62, 9  ;;  %v5145_v36 = vrot.slane %v13582_v35, 5  ;;  %v2042_v49 = vsel %vm14893_vm7, %v2040_v21, %v2041_v59  ;;  %v1933_v62 = vld [vmem:[%s17894_s0 + $0x24] sm:$0xe]  ;;  %v13649_v29 = vld [vmem:[%s17894_s0 + $0x34] sm:$0xf] }
 0x150   :  { %12384 = vmatprep.mubr.msk.bf16.mxu0 %vm992_vm1, %v11124_v43  ;;  %v5137_v43 = vrot.slane %v5135_v24, 4  ;;  %v13580_v24 = vld [vmem:[%s17894_s0 + $0x100] sm:$0xf]  ;;  %v5144_v41 = vrot.slane %v5142_v13, 4  ;;  %v2052_v52 = vrot.slane %v13584_v51, 5  ;;  %v2049_v61 = vsel %vm14893_vm7, %v2047_v28, %v2048_v31  ;;  %s13721_s29 = smov 104  }
 0x151   :  { %v5149_v26 = vrot.slane %v13580_v24, 5  ;;  %v2046_v55 = vsel %vm14893_vm7, %v10666_v27, %v2045_v54  ;;  %v10667_v21 = vrot.slane %v1933_v62, 9  ;;  %s13722_s30 = smov 40   ;;  %s13723_s7 = smov 8   ;;  %vm10046_vm12 = vcmask 130048  }
 0x152   :  { %v5139_v14 = vsel %vm14893_vm7, %v5137_v43, %v5138_v56  ;;  %v13583_v43 = vld [vmem:[%s17894_s0 + $0x104] sm:$0x1]  ;;  %v2039_v56 = vsel %vm14893_vm7, %v10665_v19, %v2038_v34  ;;  %v13585_v34 = vld [vmem:[%s17894_s0 + $0x34] sm:$0xf]  ;;  %v2054_v24 = vrot.slane %v2052_v52, 4  ;;  %s13724_s8 = smov 16  }
 0x153   :  { %12153 = vmatmul.mubr.msk.bf16.gmra.mrb[56].mxu1 %vm992_vm1, %v10629_v5  ;;  %v15344_v5 = vld [vmem:[%s17894_s0 + $0x190] sm:$0xf]  ;;  %v11128_v39 = vcombine.low %v5136_v0, %v5139_v14  ;;  %v5152_v46 = vrot.slane %v13583_v43, 5  ;;  %v5151_v53 = vrot.slane %v5149_v26, 4  ;;  %v2059_v59 = vrot.slane %v13585_v34, 5  ;;  %s13725_s12 = smov 24  }
 0x154   :  { %12156 = vmatprep.mubr.msk.bf16.mxu1 %vm992_vm1, %v10630_v18  ;;  %v10631_v6 = vcombine.low %v13577_v3, %v15344_v5  ;;  %v11066_v18 = vld [vmem:[%s17894_s0 + $0xfc] sm:$0xe]  ;;  %v13586_v0 = vld [vmem:[%s17894_s0 + $0x10c] sm:$0xf]  ;;  %v1934_v3 = vld [vmem:[%s17894_s0 + $0x30] sm:$0xe]  ;;  %v10697_v11 = vcombine.low %v2039_v56, %v2042_v49 }
 0x155   :  { %v5156_v54 = vrot.slane %v13586_v0, 5  ;;  %v13587_v14 = vld [vmem:[%s17894_s0 + $0x118] sm:$0xf]  ;;  %v11068_v19 = vld [vmem:[%s17894_s0 + $0x114] sm:$0xe]  ;;  %v5153_v28 = vsel %vm14893_vm7, %v5151_v53, %v5152_v46  ;;  %v10668_v30 = vrot.slane %v1934_v3, 9  ;;  %v2053_v53 = vsel %vm14893_vm7, %v10667_v21, %v2052_v52 }
 0x156   :  { %v2061_v31 = vrot.slane %v2059_v59, 4  ;;  %v11100_v43 = vrot.slane %v11068_v19, 9  ;;  %v13591_v46 = vld [vmem:[%s17894_s0 + $0x11c] sm:$0x1]  ;;  %v1935_v52 = vld [vmem:[%s17894_s0 + $0x3c] sm:$0xe] }
 0x157   :  { %12385 = vmatmul.mubr.msk.bf16.gmra.mrb[24].mxu0 %vm992_vm1, %v11125_v33  ;;  %v11097_v33 = vrot.slane %v11065_v9, 9  ;;  %v5166_v49 = vrot.slane %v13591_v46, 5  ;;  %v2060_v34 = vsel %vm14893_vm7, %v10668_v30, %v2059_v59  ;;  %v13593_v0 = vld [vmem:[%s17894_s0 + $0x4c] sm:$0xf]  ;;  %v1936_v59 = vld [vmem:[%s17894_s0 + $0x48] sm:$0xe] }
 0x158   :  { %12388 = vmatprep.mubr.msk.bf16.mxu0 %vm992_vm1, %v11126_v42  ;;  %v11098_v42 = vrot.slane %v11066_v18, 9  ;;  %v10698_v18 = vcombine.low %v2046_v55, %v2049_v61  ;;  %v13592_v61 = vld [vmem:[%s17894_s0 + $0x40] sm:$0xf]  ;;  %v2073_v3 = vrot.slane %v13593_v0, 5  ;;  %v10669_v21 = vrot.slane %v1935_v52, 9 }
 0x159   :  { %v5143_v63 = vsel %vm14893_vm7, %v11097_v33, %v5142_v13  ;;  %v11067_v13 = vld [vmem:[%s17894_s0 + $0x108] sm:$0xe]  ;;  %v13589_v33 = vld [vmem:[%s17894_s0 + $0x38] sm:$0x1]  ;;  %v2066_v62 = vrot.slane %v13592_v61, 5  ;;  %vm10049_vm13 = vcmask 195584  }
 0x15a   :  { %v5150_v9 = vsel %vm14893_vm7, %v11098_v42, %v5149_v26  ;;  %v13588_v26 = vld [vmem:[%s17894_s0 + $0x2c] sm:$0x1]  ;;  %v2062_v35 = vrot.slane %v13589_v33, 5  ;;  %v2075_v33 = vrot.slane %v2073_v3, 4  ;;  %v13600_v61 = vld [vmem:[%s17894_s0 + $0x58] sm:$0xf] }
 0x15b   :  { %12157 = vmatmul.mubr.msk.bf16.gmra.mrb[60].mxu1 %vm992_vm1, %v10631_v6  ;;  %v5146_v6 = vsel %vm14893_vm7, %v5144_v41, %v5145_v36  ;;  %v2055_v27 = vrot.slane %v13588_v26, 5  ;;  %v11099_v36 = vrot.slane %v11067_v13, 9  ;;  %v11130_v51 = vcombine.low %v5150_v9, %v5153_v28  ;;  %v13595_v26 = vld [vmem:[%s17894_s0 + $0x44] sm:$0x1]  ;;  %v13596_v28 = vld [vmem:[%s17894_s0 + $0x130] sm:$0xf] }
 0x15c   :  { %12162 = vmatprep.mubr.msk.bf16.mxu1 %vm992_vm1, %v10696_v57  ;;  %v5163_v57 = vrot.slane %v13587_v14, 5  ;;  %v11129_v42 = vcombine.low %v5143_v63, %v5146_v6  ;;  %v2063_v63 = vsel %vm14893_vm7, %v2061_v31, %v2062_v35  ;;  %v13594_v14 = vld [vmem:[%s17894_s0 + $0x124] sm:$0xf]  ;;  %v5177_v30 = vrot.slane %v13596_v28, 5  ;;  %v13597_v35 = vld [vmem:[%s17894_s0 + $0x50] sm:$0x1] }
 0x15d   :  { %v2056_v55 = vsel %vm14893_vm7, %v2054_v24, %v2055_v27  ;;  %v5157_v6 = vsel %vm14893_vm7, %v11099_v36, %v5156_v54  ;;  %v10700_v19 = vcombine.low %v2060_v34, %v2063_v63  ;;  %v2068_v24 = vrot.slane %v2066_v62, 4  ;;  %v13604_v28 = vld [vmem:[%s17894_s0 + $0x5c] sm:$0x1] }
 0x15e   :  { %v5165_v56 = vrot.slane %v5163_v57, 4  ;;  %v5164_v9 = vsel %vm14893_vm7, %v11100_v43, %v5163_v57  ;;  %v10699_v13 = vcombine.low %v2053_v53, %v2056_v55  ;;  %v11070_v57 = vld [vmem:[%s17894_s0 + $0x12c] sm:$0xe]  ;;  %v2069_v27 = vrot.slane %v13595_v26, 5  ;;  %v13598_v43 = vld [vmem:[%s17894_s0 + $0x128] sm:$0x1] }
 0x15f   :  { %12389 = vmatmul.mubr.msk.bf16.gmra.mrb[28].mxu0 %vm992_vm1, %v11127_v38  ;;  %v5158_v38 = vrot.slane %v5156_v54, 4  ;;  %v11069_v54 = vld [vmem:[%s17894_s0 + $0x120] sm:$0xe]  ;;  %v10670_v31 = vrot.slane %v1936_v59, 9  ;;  %v2076_v36 = vrot.slane %v13597_v35, 5  ;;  %v11102_v46 = vrot.slane %v11070_v57, 9 }
 0x160   :  { %12392 = vmatprep.mubr.msk.bf16.mxu0 %vm992_vm1, %v11128_v39  ;;  %v13590_v39 = vld [vmem:[%s17894_s0 + $0x110] sm:$0x1]  ;;  %v2067_v53 = vsel %vm14893_vm7, %v10669_v21, %v2066_v62  ;;  %v2070_v55 = vsel %vm14893_vm7, %v2068_v24, %v2069_v27  ;;  %v2080_v34 = vrot.slane %v13600_v61, 5  ;;  %v5179_v63 = vrot.slane %v5177_v30, 4  ;;  %v13601_v62 = vld [vmem:[%s17894_s0 + $0x64] sm:$0xf] }
 0x161   :  { %v5159_v41 = vrot.slane %v13590_v39, 5  ;;  %v11101_v39 = vrot.slane %v11069_v54, 9  ;;  %v2074_v52 = vsel %vm14893_vm7, %v10670_v31, %v2073_v3  ;;  %v2077_v0 = vsel %vm14893_vm7, %v2075_v33, %v2076_v36  ;;  %v11072_v24 = vld [vmem:[%s17894_s0 + $0x144] sm:$0xe]  ;;  %v13605_v36 = vld [vmem:[%s17894_s0 + $0x68] sm:$0x1] }
 0x162   :  { %v5178_v54 = vsel %vm14893_vm7, %v11102_v46, %v5177_v30  ;;  %v10702_v21 = vcombine.low %v2074_v52, %v2077_v0  ;;  %v2082_v27 = vrot.slane %v2080_v34, 4  ;;  %v2083_v30 = vrot.slane %v13604_v28, 5  ;;  %v13608_v52 = vld [vmem:[%s17894_s0 + $0x70] sm:$0xf]  ;;  %v13611_v28 = vld [vmem:[%s17894_s0 + $0x160] sm:$0xf] }
 0x163   :  { %12163 = vmatmul.mubr.msk.bf16.vlgmr.msra.gmra.mrb[0].mxu1 %vm992_vm1, %v10697_v11  ;;  %v5167_v11 = vsel %vm14893_vm7, %v5165_v56, %v5166_v49  ;;  %v5173_v56 = vrot.slane %v13598_v43, 5  ;;  %v13599_v49 = vld [vmem:[%s17894_s0 + $0x134] sm:$0x1]  ;;  %v11104_v46 = vrot.slane %v11072_v24, 9  ;;  %v2094_v0 = vrot.slane %v13608_v52, 5 }
 0x164   :  { %12166 = vmatprep.mubr.msk.bf16.mxu1 %vm992_vm1, %v10698_v18  ;;  %12761 = vmatpush3.bf16.msra.mxu1 %v13768_v1  ;;  %v5160_v1 = vsel %vm14893_vm7, %v5158_v38, %v5159_v41  ;;  %v5170_v18 = vrot.slane %v13594_v14, 5  ;;  %v11132_v41 = vcombine.low %v5164_v9, %v5167_v11  ;;  %v13602_v9 = vld [vmem:[%s17894_s0 + $0x13c] sm:$0xf]  ;;  %v1938_v11 = vld [vmem:[%s17894_s0 + $0x60] sm:$0xe]  ;;  %v10701_v14 = vcombine.low %v2067_v53, %v2070_v55 }
 0x165   :  { %v11131_v38 = vcombine.low %v5157_v6, %v5160_v1  ;;  %v1937_v6 = vld [vmem:[%s17894_s0 + $0x54] sm:$0xe]  ;;  %v2087_v1 = vrot.slane %v13601_v62, 5  ;;  %v5184_v3 = vrot.slane %v13602_v9, 5  ;;  %v10672_v33 = vrot.slane %v1938_v11, 9 }
 0x166   :  { %v5171_v59 = vsel %vm14893_vm7, %v11101_v39, %v5170_v18  ;;  %v10671_v26 = vrot.slane %v1937_v6, 9  ;;  %v2096_v24 = vrot.slane %v2094_v0, 4  ;;  %vm10262_vm14 = vcmask 523264  }
 0x167   :  { %12393 = vmatmul.mubr.msk.bf16.gmra.mrb[32].mxu0 %vm992_vm1, %v11129_v42  ;;  %v5172_v42 = vrot.slane %v5170_v18, 4  ;;  %v11071_v18 = vld [vmem:[%s17894_s0 + $0x138] sm:$0xe]  ;;  %v2089_v35 = vrot.slane %v2087_v1, 4  ;;  %v2088_v6 = vsel %vm14893_vm7, %v10672_v33, %v2087_v1 }
 0x168   :  { %12396 = vmatprep.mubr.msk.bf16.mxu0 %vm992_vm1, %v11130_v51  ;;  %v5180_v51 = vrot.slane %v13599_v49, 5  ;;  %v11103_v39 = vrot.slane %v11071_v18, 9  ;;  %v2081_v61 = vsel %vm14893_vm7, %v10671_v26, %v2080_v34  ;;  %v2101_v34 = vrot.slane %v14796_v20, 5  ;;  %v11073_v20 = vld [vmem:[%s17894_s0 + $0x150] sm:$0xe] }
 0x169   :  { %v13610_v26 = vld [vmem:[%s17894_s0 + $0x74] sm:$0x1] }
 0x16a   :  { %v5181_v31 = vsel %vm14893_vm7, %v5179_v63, %v5180_v51  ;;  %v13607_v51 = vld [vmem:[%s17894_s0 + $0x14c] sm:$0x1]  ;;  %v2084_v63 = vsel %vm14893_vm7, %v2082_v27, %v2083_v30  ;;  %v5185_v9 = vsel %vm14893_vm7, %v11103_v39, %v5184_v3  ;;  %v2097_v27 = vrot.slane %v13610_v26, 5 }
 0x16b   :  { %12167 = vmatmul.mubr.msk.bf16.gmra.mrb[4].mxu1 %vm992_vm1, %v10699_v13  ;;  %v5174_v13 = vsel %vm14893_vm7, %v5172_v42, %v5173_v56  ;;  %v13606_v42 = vld [vmem:[%s17894_s0 + $0x140] sm:$0x1]  ;;  %v5194_v53 = vrot.slane %v13607_v51, 5  ;;  %v11134_v55 = vcombine.low %v5178_v54, %v5181_v31  ;;  %v5205_v30 = vrot.slane %v13611_v28, 5  ;;  %v13618_v28 = vld [vmem:[%s17894_s0 + $0x98] sm:$0x1] }
 0x16c   :  { %12170 = vmatprep.mubr.msk.bf16.mxu1 %vm992_vm1, %v10700_v19  ;;  %v13603_v19 = vld [vmem:[%s17894_s0 + $0x148] sm:$0xf]  ;;  %v5187_v43 = vrot.slane %v13606_v42, 5  ;;  %v11133_v56 = vcombine.low %v5171_v59, %v5174_v13  ;;  %v1939_v59 = vld [vmem:[%s17894_s0 + $0x6c] sm:$0xe]  ;;  %v2103_v33 = vrot.slane %v2101_v34, 4 }
 0x16d   :  { %v5191_v57 = vrot.slane %v13603_v19, 5  ;;  %v1940_v13 = vld [vmem:[%s17894_s0 + $0x78] sm:$0xe]  ;;  %v11105_v39 = vrot.slane %v11073_v20, 9 }
 0x16e   :  { %v10674_v31 = vrot.slane %v1940_v13, 9 }
 0x16f   :  { %12397 = vmatmul.mubr.msk.bf16.gmra.mrb[36].mxu0 %vm992_vm1, %v11131_v38  ;;  %v2090_v38 = vrot.slane %v13605_v36, 5  ;;  %v5193_v49 = vrot.slane %v5191_v57, 4  ;;  %v5192_v1 = vsel %vm14893_vm7, %v11104_v46, %v5191_v57  ;;  %v11074_v57 = vld [vmem:[%s17894_s0 + $0x15c] sm:$0xe] }
 0x170   :  { %12400 = vmatprep.mubr.msk.bf16.mxu0 %vm992_vm1, %v11132_v41  ;;  %v5186_v41 = vrot.slane %v5184_v3, 4  ;;  %v13609_v3 = vld [vmem:[%s17894_s0 + $0x154] sm:$0xf]  ;;  %v11106_v46 = vrot.slane %v11074_v57, 9  ;;  %v2102_v52 = vsel %vm14893_vm7, %v10674_v31, %v2101_v34  ;;  %v1942_v34 = vld [vmem:[%s17894_s0 + $0x90] sm:$0xe] }
 0x171   :  { %v2091_v62 = vsel %vm14893_vm7, %v2089_v35, %v2090_v38  ;;  %v5195_v54 = vsel %vm14893_vm7, %v5193_v49, %v5194_v53  ;;  %v5198_v18 = vrot.slane %v13609_v3, 5  ;;  %v13612_v35 = vld [vmem:[%s17894_s0 + $0x80] sm:$0x1]  ;;  %v13614_v49 = vld [vmem:[%s17894_s0 + $0x164] sm:$0x1]  ;;  %v10676_v26 = vrot.slane %v1942_v34, 9 }
 0x172   :  { %v5188_v11 = vsel %vm14893_vm7, %v5186_v41, %v5187_v43  ;;  %v10704_v19 = vcombine.low %v2088_v6, %v2091_v62  ;;  %v2104_v36 = vrot.slane %v13612_v35, 5  ;;  %v11136_v41 = vcombine.low %v5192_v1, %v5195_v54  ;;  %v13613_v43 = vld [vmem:[%s17894_s0 + $0x158] sm:$0x1]  ;;  %v1941_v62 = vld [vmem:[%s17894_s0 + $0x84] sm:$0xe] }
 0x173   :  { %12171 = vmatmul.mubr.msk.bf16.gmra.mrb[8].mxu1 %vm992_vm1, %v10701_v14  ;;  %v10703_v14 = vcombine.low %v2081_v61, %v2084_v63  ;;  %v11135_v38 = vcombine.low %v5185_v9, %v5188_v11  ;;  %v5200_v42 = vrot.slane %v5198_v18, 4  ;;  %v5208_v51 = vrot.slane %v13614_v49, 5  ;;  %v11075_v1 = vld [vmem:[%s17894_s0 + $0x168] sm:$0xe]  ;;  %v13616_v54 = vld [vmem:[%s17894_s0 + $0x178] sm:$0xf] }
 0x174   :  { %12174 = vmatprep.mubr.msk.bf16.mxu1 %vm992_vm1, %v10702_v21  ;;  %v10673_v21 = vrot.slane %v1939_v59, 9  ;;  %v2108_v61 = vrot.slane %v14823_v45, 5  ;;  %v5207_v63 = vrot.slane %v5205_v30, 4  ;;  %v2105_v6 = vsel %vm14893_vm7, %v2103_v33, %v2104_v36  ;;  %v13615_v45 = vld [vmem:[%s17894_s0 + $0x16c] sm:$0xf] }
 0x175   :  { %v2115_v59 = vrot.slane %v14842_v2, 5  ;;  %v5212_v9 = vrot.slane %v13615_v45, 5  ;;  %v5206_v2 = vsel %vm14893_vm7, %v11106_v46, %v5205_v30  ;;  %v10706_v20 = vcombine.low %v2102_v52, %v2105_v6  ;;  %v11076_v3 = vld [vmem:[%s17894_s0 + $0x174] sm:$0xe]  ;;  %v13617_v57 = vld [vmem:[%s17894_s0 + $0x8c] sm:$0x1] }
 0x176   :  { %v2095_v53 = vsel %vm14893_vm7, %v10673_v21, %v2094_v0  ;;  %v5199_v0 = vsel %vm14893_vm7, %v11105_v39, %v5198_v18  ;;  %v10675_v18 = vrot.slane %v1941_v62, 9  ;;  %v2111_v21 = vrot.slane %v13617_v57, 5  ;;  %v13619_v35 = vld [vmem:[%s17894_s0 + $0x170] sm:$0x1]  ;;  %v13621_v45 = vld [vmem:[%s17894_s0 + $0x184] sm:$0xf] }
 0x177   :  { %12401 = vmatmul.mubr.msk.bf16.gmra.mrb[40].mxu0 %vm992_vm1, %v11133_v56  ;;  %v5201_v56 = vrot.slane %v13613_v43, 5  ;;  %v2118_v30 = vrot.slane %v13618_v28, 5  ;;  %v11107_v31 = vrot.slane %v11075_v1, 9  ;;  %v5214_v33 = vrot.slane %v5212_v9, 4  ;;  %v13622_v1 = vld [vmem:[%s17894_s0 + $0xa4] sm:$0x1] }
 0x178   :  { %12404 = vmatprep.mubr.msk.bf16.mxu0 %vm992_vm1, %v11134_v55  ;;  %v2098_v55 = vsel %vm14893_vm7, %v2096_v24, %v2097_v27  ;;  %v5209_v24 = vsel %vm14893_vm7, %v5207_v63, %v5208_v51  ;;  %v2117_v27 = vrot.slane %v2115_v59, 4  ;;  %v5215_v36 = vrot.slane %v13619_v35, 5  ;;  %v1943_v63 = vld [vmem:[%s17894_s0 + $0x9c] sm:$0xe]  ;;  %v13625_v28 = vld [vmem:[%s17894_s0 + $0x188] sm:$0x1] }
 0x179   :  { %v5202_v11 = vsel %vm14893_vm7, %v5200_v42, %v5201_v56  ;;  %v10705_v13 = vcombine.low %v2095_v53, %v2098_v55  ;;  %v11108_v39 = vrot.slane %v11076_v3, 9  ;;  %v13620_v42 = vld [vmem:[%s17894_s0 + $0x17c] sm:$0x1]  ;;  %v11138_v56 = vcombine.low %v5206_v2, %v5209_v24 }
 0x17a   :  { %v5222_v43 = vrot.slane %v13620_v42, 5  ;;  %v2109_v46 = vsel %vm14893_vm7, %v10675_v18, %v2108_v61  ;;  %v2122_v51 = vrot.slane %v14864_v25, 5  ;;  %v2116_v53 = vsel %vm14893_vm7, %v10676_v26, %v2115_v59  ;;  %v1944_v25 = vld [vmem:[%s17894_s0 + $0xa8] sm:$0xe] }
 0x17b   :  { %12175 = vmatmul.mubr.msk.bf16.gmra.mrb[12].mxu1 %vm992_vm1, %v10703_v14  ;;  %v5219_v14 = vrot.slane %v13616_v54, 5  ;;  %v2119_v55 = vsel %vm14893_vm7, %v2117_v27, %v2118_v30  ;;  %v2129_v52 = vrot.slane %v14884_v48, 5  ;;  %v5216_v6 = vsel %vm14893_vm7, %v5214_v33, %v5215_v36  ;;  %v11077_v48 = vld [vmem:[%s17894_s0 + $0x180] sm:$0xe]  ;;  %v13626_v33 = vld [vmem:[%s17894_s0 + $0x194] sm:$0x1] }
 0x17c   :  { %12178 = vmatprep.mubr.msk.bf16.mxu1 %vm992_vm1, %v10704_v19  ;;  %v2110_v19 = vrot.slane %v2108_v61, 4  ;;  %v5213_v61 = vsel %vm14893_vm7, %v11107_v31, %v5212_v9  ;;  %v5226_v9 = vrot.slane %v13621_v45, 5  ;;  %v10708_v34 = vcombine.low %v2116_v53, %v2119_v55 }
 0x17d   :  { %v5220_v62 = vsel %vm14893_vm7, %v11108_v39, %v5219_v14  ;;  %v10677_v2 = vrot.slane %v1943_v63, 9  ;;  %v2125_v54 = vrot.slane %v13622_v1, 5  ;;  %v10678_v3 = vrot.slane %v1944_v25, 9  ;;  %v13630_v1 = vld [vmem:[%s17894_s0 + $0x1a0] sm:$0x1] }
 0x17e   :  { %v2112_v49 = vsel %vm14893_vm7, %v2110_v19, %v2111_v21  ;;  %v2131_v18 = vrot.slane %v2129_v52, 4  ;;  %v13624_v19 = vld [vmem:[%s17894_s0 + $0xb0] sm:$0x1]  ;;  %v11139_v21 = vcombine.low %v5213_v61, %v5216_v6  ;;  %v11109_v24 = vrot.slane %v11077_v48, 9 }
 0x17f   :  { %12405 = vmatmul.mubr.msk.bf16.gmra.mrb[44].mxu0 %vm992_vm1, %v11135_v38  ;;  %v11137_v38 = vcombine.low %v5199_v0, %v5202_v11  ;;  %v10707_v0 = vcombine.low %v2109_v46, %v2112_v49  ;;  %v11078_v11 = vld [vmem:[%s17894_s0 + $0x18c] sm:$0xe]  ;;  %v2132_v57 = vrot.slane %v13624_v19, 5  ;;  %v5228_v27 = vrot.slane %v5226_v9, 4 }
 0x180   :  { %12408 = vmatprep.mubr.msk.bf16.mxu0 %vm992_vm1, %v11136_v41  ;;  %v5221_v41 = vrot.slane %v5219_v14, 4  ;;  %v13623_v14 = vld [vmem:[%s17894_s0 + $0x190] sm:$0xf]  ;;  %v5229_v30 = vrot.slane %v13625_v28, 5  ;;  %v11110_v31 = vrot.slane %v11078_v11, 9  ;;  %v5236_v35 = vrot.slane %v13626_v33, 5 }
 0x181   :  { %v2123_v36 = vsel %vm14893_vm7, %v10677_v2, %v2122_v51  ;;  %v2136_v39 = vrot.slane %v14912_v7, 5  ;;  %v2130_v42 = vsel %vm14893_vm7, %v10678_v3, %v2129_v52  ;;  %v2143_v46 = vrot.slane %v14933_v17, 5  ;;  %v1946_v7 = vld [vmem:[%s17894_s0 + $0xd8] sm:$0xe]  ;;  %v13627_v17 = vld [vmem:[%s17894_s0 + $0x19c] sm:$0xf] }
 0x182   :  { %v5223_v59 = vsel %vm14893_vm7, %v5221_v41, %v5222_v43  ;;  %v2133_v43 = vsel %vm14893_vm7, %v2131_v18, %v2132_v57  ;;  %v5227_v49 = vsel %vm14893_vm7, %v11109_v24, %v5226_v9  ;;  %v5240_v63 = vrot.slane %v13627_v17, 5  ;;  %v11079_v52 = vld [vmem:[%s17894_s0 + $0x198] sm:$0xe]  ;;  %v13629_v9 = vld [vmem:[%s17894_s0 + $0xe0] sm:$0x1] }
 0x183   :  { %12179 = vmatmul.mubr.msk.bf16.gmra.mrb[16].mxu1 %vm992_vm1, %v10705_v13  ;;  %v2124_v13 = vrot.slane %v2122_v51, 4  ;;  %v11140_v26 = vcombine.low %v5220_v62, %v5223_v59  ;;  %v5230_v51 = vsel %vm14893_vm7, %v5228_v27, %v5229_v30  ;;  %v10710_v61 = vcombine.low %v2130_v42, %v2133_v43  ;;  %v13628_v62 = vld [vmem:[%s17894_s0 + $0xbc] sm:$0x1]  ;;  %v1950_v17 = vld [vmem:[%s17894_s0 + $0x108] sm:$0xe] }
 0x184   :  { %12182 = vmatprep.mubr.msk.bf16.mxu1 %vm992_vm1, %v10706_v20  ;;  %v5233_v20 = vrot.slane %v13623_v14, 5  ;;  %v2138_v25 = vrot.slane %v2136_v39, 4  ;;  %v2139_v59 = vrot.slane %v13628_v62, 5  ;;  %v10680_v48 = vrot.slane %v1946_v7, 9  ;;  %v13366_v43 = vld [vmem:[%s17894_s0 + $0x18] sm:$0xff]  }
 0x185   :  { %v2145_v45 = vrot.slane %v2143_v46, 4  ;;  %v11141_v11 = vcombine.low %v5227_v49, %v5230_v51  ;;  %v11111_v2 = vrot.slane %v11079_v52, 9  ;;  %v2150_v18 = vrot.slane %v14957_v37, 5 }
 0x186   :  { %v5235_v41 = vrot.slane %v5233_v20, 4  ;;  %v5234_v53 = vsel %vm14893_vm7, %v11110_v31, %v5233_v20  ;;  %v2140_v3 = vsel %vm14893_vm7, %v2138_v25, %v2139_v59  ;;  %v2144_v19 = vsel %vm14893_vm7, %v10680_v48, %v2143_v46  ;;  %v13367_v48 = vld [vmem:[%s17894_s0 + $0x24] sm:$0xff]  }
 0x187   :  { %12409 = vmatmul.mubr.msk.bf16.gmra.mrb[48].mxu0 %vm992_vm1, %v11137_v38  ;;  %v2126_v38 = vsel %vm14893_vm7, %v2124_v13, %v2125_v54  ;;  %v5242_v13 = vrot.slane %v5240_v63, 4  ;;  %v5243_v54 = vrot.slane %v13630_v1, 5  ;;  %v2157_v24 = vrot.slane %v14977_v44, 5  ;;  %v13631_v44 = vld [vmem:[%s17894_s0 + $0xec] sm:$0x1] }
 0x188   :  { %12412 = vmatprep.mubr.msk.bf16.mxu0 %vm992_vm1, %v11138_v56  ;;  %v1945_v56 = vld [vmem:[%s17894_s0 + $0xb4] sm:$0xe]  ;;  %v10709_v55 = vcombine.low %v2123_v36, %v2126_v38  ;;  %v5241_v37 = vsel %vm14893_vm7, %v11111_v2, %v5240_v63  ;;  %v2152_v33 = vrot.slane %v2150_v18, 4  ;;  %v2164_v49 = vrot.slane %v15009_v8, 5 }
 0x189   :  { %v10679_v6 = vrot.slane %v1945_v56, 9  ;;  %v5244_v27 = vsel %vm14893_vm7, %v5242_v13, %v5243_v54  ;;  %v2159_v38 = vrot.slane %v2157_v24, 4  ;;  %v10684_v62 = vrot.slane %v1950_v17, 9  ;;  %v1951_v54 = vld [vmem:[%s17894_s0 + $0x114] sm:$0xe] }
 0x18a   :  { %v11143_v42 = vcombine.low %v5241_v37, %v5244_v27  ;;  %v7530_v2 = vsel %vm1089_vm0, %v15015_v10, 0  ;;  %v15830_v10 = vld [vmem:[%s17896_s2 + $0x20] sm:$0x3] }
 0x18b   :  { %12183 = vmatmul.mubr.msk.bf16.gmra.mrb[20].mxu1 %vm992_vm1, %v10707_v0  ;;  %v5237_v0 = vsel %vm14893_vm7, %v5235_v41, %v5236_v35  ;;  %v2137_v20 = vsel %vm14893_vm7, %v10679_v6, %v2136_v39  ;;  %v2153_v35 = vrot.slane %v13631_v44, 5  ;;  %v13632_v39 = vld [vmem:[%s17894_s0 + $0xf8] sm:$0x1]  ;;  %v13633_v6 = vld [vmem:[%s17894_s0 + $0x104] sm:$0x1]  ;;  %v13369_v27 = vld [vmem:[%s17894_s0 + $0x3c] sm:$0xff]  }
 0x18c   :  { %12186 = vmatprep.mubr.msk.bf16.mxu1 %vm992_vm1, %v10708_v34  ;;  %v2146_v34 = vrot.slane %v13629_v9, 5  ;;  %v11142_v14 = vcombine.low %v5234_v53, %v5237_v0  ;;  %v10711_v28 = vcombine.low %v2137_v20, %v2140_v3  ;;  %v2160_v41 = vrot.slane %v13632_v39, 5  ;;  %v1949_v53 = vld [vmem:[%s17894_s0 + $0xfc] sm:$0xe]  ;;  %v1952_v20 = vld [vmem:[%s17894_s0 + $0x120] sm:$0xe] }
 0x18d   :  { %v2154_v46 = vsel %vm14893_vm7, %v2152_v33, %v2153_v35  ;;  %v10683_v52 = vrot.slane %v1949_v53, 9  ;;  %v2167_v25 = vrot.slane %v13633_v6, 5  ;;  %v2192_v33 = vrot.slane %v15112_v12, 5  ;;  %v1954_v39 = vld [vmem:[%s17894_s0 + $0x138] sm:$0xe] }
 0x18e   :  { %v2147_v57 = vsel %vm14893_vm7, %v2145_v45, %v2146_v34  ;;  %v2161_v51 = vsel %vm14893_vm7, %v2159_v38, %v2160_v41  ;;  %v13368_v45 = vld [vmem:[%s17894_s0 + $0x30] sm:$0xff]   ;;  %v2199_v38 = vrot.slane %v15132_v22, 5  ;;  %v13638_v22 = vld [vmem:[%s17894_s0 + $0x140] sm:$0x1]  ;;  %v1955_v6 = vld [vmem:[%s17894_s0 + $0x144] sm:$0xe] }
 0x18f   :  { %12413 = vmatmul.mubr.msk.bf16.gmra.mrb[52].mxu0 %vm992_vm1, %v11139_v21  ;;  %v1947_v21 = vld [vmem:[%s17894_s0 + $0xe4] sm:$0xe]  ;;  %v10712_v30 = vcombine.low %v2144_v19, %v2147_v57  ;;  %v2165_v9 = vsel %vm14893_vm7, %v10683_v52, %v2164_v49  ;;  %v13371_v53 = vld [vmem:[%s17894_s0 + $0x54] sm:$0xff]  }
 0x190   :  { %12416 = vmatprep.mubr.msk.bf16.mxu0 %vm992_vm1, %v11140_v26  ;;  %v1948_v26 = vld [vmem:[%s17894_s0 + $0xf0] sm:$0xe]  ;;  %v10681_v31 = vrot.slane %v1947_v21, 9  ;;  %v10686_v21 = vrot.slane %v1952_v20, 9 }
 0x191   :  { %v10682_v36 = vrot.slane %v1948_v26, 9  ;;  %v13636_v26 = vld [vmem:[%s17894_s0 + $0x128] sm:$0x1] }
 0x192   :  { %v2151_v56 = vsel %vm14893_vm7, %v10681_v31, %v2150_v18  ;;  %v10685_v18 = vrot.slane %v1951_v54, 9  ;;  %v2188_v37 = vrot.slane %v13636_v26, 5 }
 0x193   :  { %12187 = vmatmul.mubr.msk.bf16.gmra.mrb[24].mxu1 %vm992_vm1, %v10709_v55  ;;  %v2158_v7 = vsel %vm14893_vm7, %v10682_v36, %v2157_v24  ;;  %v2171_v55 = vrot.slane %v15034_v16, 5  ;;  %v10713_v63 = vcombine.low %v2151_v56, %v2154_v46  ;;  %v13634_v16 = vld [vmem:[%s17894_s0 + $0x110] sm:$0x1]  ;;  %v1953_v36 = vld [vmem:[%s17894_s0 + $0x12c] sm:$0xe] }
 0x194   :  { %12190 = vmatprep.mubr.msk.bf16.mxu1 %vm992_vm1, %v10710_v61  ;;  %v10714_v8 = vcombine.low %v2158_v7, %v2161_v51  ;;  %v2166_v61 = vrot.slane %v2164_v49, 4  ;;  %v2174_v0 = vrot.slane %v13634_v16, 5  ;;  %v13637_v56 = vld [vmem:[%s17894_s0 + $0x134] sm:$0x1]  ;;  %v10688_v49 = vrot.slane %v1954_v39, 9 }
 0x195   :  { %v2173_v59 = vrot.slane %v2171_v55, 4  ;;  %v2172_v13 = vsel %vm14893_vm7, %v10684_v62, %v2171_v55  ;;  %v2195_v46 = vrot.slane %v13637_v56, 5  ;;  %v2201_v7 = vrot.slane %v2199_v38, 4  ;;  %v13372_v55 = vld [vmem:[%s17894_s0 + $0x60] sm:$0xff]   ;;  %v1956_v62 = vld [vmem:[%s17894_s0 + $0x150] sm:$0xe] }
 0x196   :  { %v2168_v34 = vsel %vm14893_vm7, %v2166_v61, %v2167_v25  ;;  %v2202_v51 = vrot.slane %v13638_v22, 5  ;;  %v2200_v52 = vsel %vm14893_vm7, %v10688_v49, %v2199_v38  ;;  %v2213_v25 = vrot.slane %v15183_v58, 5  ;;  %v13640_v58 = vld [vmem:[%s17894_s0 + $0x158] sm:$0x1]  ;;  %v1959_v39 = vld [vmem:[%s17894_s0 + $0x174] sm:$0xe] }
 0x197   :  { %12417 = vmatmul.mubr.msk.bf16.gmra.mrb[56].mxu0 %vm992_vm1, %v11141_v11  ;;  %v2178_v11 = vrot.slane %v15064_v40, 5  ;;  %v2175_v1 = vsel %vm14893_vm7, %v2173_v59, %v2174_v0  ;;  %v10715_v40 = vcombine.low %v2165_v9, %v2168_v34  ;;  %v10689_v16 = vrot.slane %v1955_v6, 9  ;;  %v1961_v6 = vld [vmem:[%s17894_s0 + $0x18c] sm:$0xe] }
 0x198   :  { %12420 = vmatprep.mubr.msk.bf16.mxu0 %vm992_vm1, %v11142_v14  ;;  %v2185_v14 = vrot.slane %v15084_v50, 5  ;;  %v10716_v3 = vcombine.low %v2172_v13, %v2175_v1  ;;  %v13635_v50 = vld [vmem:[%s17894_s0 + $0x11c] sm:$0x1]  ;;  %v2203_v61 = vsel %vm14893_vm7, %v2201_v7, %v2202_v51  ;;  %v10690_v9 = vrot.slane %v1956_v62, 9 }
 0x199   :  { %v2180_v19 = vrot.slane %v2178_v11, 4  ;;  %v2181_v57 = vrot.slane %v13635_v50, 5  ;;  %v2215_v34 = vrot.slane %v2213_v25, 4  ;;  %v13374_v13 = vld [vmem:[%s17894_s0 + $0x78] sm:$0xff]  }
 0x19a   :  { %v2187_v24 = vrot.slane %v2185_v14, 4  ;;  %v2186_v44 = vsel %vm14893_vm7, %v10686_v21, %v2185_v14  ;;  %v2220_v14 = vrot.slane %v15214_v23, 5  ;;  %v2214_v20 = vsel %vm14893_vm7, %v10690_v9, %v2213_v25 }
 0x19b   :  { %12191 = vmatmul.mubr.msk.bf16.gmra.mrb[28].mxu1 %vm992_vm1, %v10711_v28  ;;  %v13370_v28 = vld [vmem:[%s17894_s0 + $0x48] sm:$0xff]   ;;  %v2182_v31 = vsel %vm14893_vm7, %v2180_v19, %v2181_v57 }
 0x19c   :  { %12194 = vmatprep.mubr.msk.bf16.mxu1 %vm992_vm1, %v10712_v30  ;;  %v2179_v30 = vsel %vm14893_vm7, %v10685_v18, %v2178_v11  ;;  %v2189_v35 = vsel %vm14893_vm7, %v2187_v24, %v2188_v37  ;;  %v2216_v11 = vrot.slane %v13640_v58, 5  ;;  %v2227_v18 = vrot.slane %v15231_v32, 5  ;;  %v1958_v19 = vld [vmem:[%s17894_s0 + $0x168] sm:$0xe]  ;;  %v13641_v24 = vld [vmem:[%s17894_s0 + $0x164] sm:$0x1] }
 0x19d   :  { %v10717_v41 = vcombine.low %v2179_v30, %v2182_v31  ;;  %v10718_v12 = vcombine.low %v2186_v44, %v2189_v35  ;;  %v2222_v21 = vrot.slane %v2220_v14, 4  ;;  %v2223_v26 = vrot.slane %v13641_v24, 5  ;;  %v13642_v32 = vld [vmem:[%s17894_s0 + $0x170] sm:$0x1]  ;;  %v13375_v30 = vld [vmem:[%s17894_s0 + $0x84] sm:$0xff]  }
 0x19e   :  { %v10692_v37 = vrot.slane %v1958_v19, 9  ;;  %v13376_v31 = vld [vmem:[%s17894_s0 + $0x90] sm:$0xff]   ;;  %v2234_v35 = vrot.slane %v15271_v4, 5  ;;  %v13384_v58 = vld [vmem:[%s17894_s0 + $0xe4] sm:$0xff]  }
 0x19f   :  { %12421 = vmatmul.mubr.msk.bf16.gmra.mrb[60].mxu0 %vm992_vm1, %v11143_v42  ;;  %v10687_v42 = vrot.slane %v1953_v36, 9  ;;  %v2224_v44 = vsel %vm14893_vm7, %v2222_v21, %v2223_v26  ;;  %v13394_v19 = vld [vmem:[%s17894_s0 + $0x120] sm:$0xff]   ;;  %v13398_v21 = vld [vmem:[%s17894_s0 + $0x138] sm:$0xff]  }
 0x1a0   :  { %12426 = vmatprep.mubr.msk.bf16.mxu0 %vm992_vm1, %v13366_v43  ;;  %v2194_v43 = vrot.slane %v2192_v33, 4  ;;  %v2228_v36 = vsel %vm14893_vm7, %v10692_v37, %v2227_v18  ;;  %v2236_v56 = vrot.slane %v2234_v35, 4  ;;  %v13400_v24 = vld [vmem:[%s17894_s0 + $0x144] sm:$0xff]   ;;  %v11304_v26 = vld [vmem:[%s17894_s0 + $0x18] sm:$0xf] }
 0x1a1   :  { %v2193_v17 = vsel %vm14893_vm7, %v10687_v42, %v2192_v33  ;;  %v11305_v37 = vld [vmem:[%s17894_s0 + $0x1c] sm:$0xf] }
 0x1a3   :  { %12195 = vmatmul.mubr.msk.bf16.gmra.mrb[32].mxu1 %vm992_vm1, %v10713_v63  ;;  %v2196_v63 = vsel %vm14893_vm7, %v2194_v43, %v2195_v46  ;;  %v10693_v43 = vrot.slane %v1959_v39, 9  ;;  %v13643_v46 = vld [vmem:[%s17894_s0 + $0x17c] sm:$0x1]  ;;  %v13402_v39 = vld [vmem:[%s17894_s0 + $0x150] sm:$0xff]  }
 0x1a4   :  { %12198 = vmatprep.mubr.msk.bf16.mxu1 %vm992_vm1, %v10714_v8  ;;  %v2206_v8 = vrot.slane %v15166_v47, 5  ;;  %v10719_v59 = vcombine.low %v2193_v17, %v2196_v63  ;;  %v10720_v47 = vcombine.low %v2200_v52, %v2203_v61  ;;  %v2237_v49 = vrot.slane %v13643_v46, 5 }
 0x1a5   :  { %v2235_v17 = vsel %vm14893_vm7, %v10693_v43, %v2234_v35  ;;  %v11308_v35 = vld [vmem:[%s17894_s0 + $0x28] sm:$0xf] }
 0x1a6   :  { %v2208_v0 = vrot.slane %v2206_v8, 4  ;;  %v2207_v1 = vsel %vm14893_vm7, %v10689_v16, %v2206_v8  ;;  %v2238_v63 = vsel %vm14893_vm7, %v2236_v56, %v2237_v49  ;;  %v2248_v8 = vrot.slane %v15344_v5, 5  ;;  %v13645_v5 = vld [vmem:[%s17894_s0 + $0x194] sm:$0x1]  ;;  %v11306_v49 = vld [vmem:[%s17894_s0 + $0x20] sm:$0x1] }
 0x1a7   :  { %12427 = vmatmul.mubr.msk.bf16.vlgmr.msra.gmra.mrb[0].mxu0 %vm992_vm1, %v13367_v48  ;;  %v13639_v48 = vld [vmem:[%s17894_s0 + $0x14c] sm:$0x1]  ;;  %v10725_v25 = vcombine.low %v2235_v17, %v2238_v63  ;;  %v2251_v16 = vrot.slane %v13645_v5, 5 }
 0x1a8   :  { %12491 = vmatpush3.bf16.msra.mxu0 %v7530_v2  ;;  %12430 = vmatprep.mubr.msk.bf16.mxu0 %vm992_vm1, %v13368_v45  ;;  %v2209_v45 = vrot.slane %v13639_v48, 5  ;;  %v13373_v2 = vld [vmem:[%s17894_s0 + $0x6c] sm:$0xff]   ;;  %v13380_v48 = vld [vmem:[%s17894_s0 + $0xc0] sm:$0xff]  }
 0x1a9   :  { %13283 = vmatprep.subr.msk.bf16.mxu0 %vm1089_vm0, %v15830_v10 }
 0x1aa   :  { %v2210_v54 = vsel %vm14893_vm7, %v2208_v0, %v2209_v45  ;;  %v13379_v0 = vld [vmem:[%s17894_s0 + $0xb4] sm:$0xff]  }
 0x1ab   :  { %12199 = vmatmul.mubr.msk.bf16.gmra.mrb[36].mxu1 %vm992_vm1, %v10715_v40  ;;  %v2217_v40 = vsel %vm14893_vm7, %v2215_v34, %v2216_v11  ;;  %v10721_v50 = vcombine.low %v2207_v1, %v2210_v54  ;;  %v13381_v11 = vld [vmem:[%s17894_s0 + $0xcc] sm:$0xff]   ;;  %v13388_v1 = vld [vmem:[%s17894_s0 + $0xfc] sm:$0xff]  }
 0x1ac   :  { %12202 = vmatprep.mubr.msk.bf16.mxu1 %vm992_vm1, %v10716_v3  ;;  %v1957_v3 = vld [vmem:[%s17894_s0 + $0x15c] sm:$0xe]  ;;  %v10722_v23 = vcombine.low %v2214_v20, %v2217_v40  ;;  %v13390_v20 = vld [vmem:[%s17894_s0 + $0x108] sm:$0xff]   ;;  %v13392_v40 = vld [vmem:[%s17894_s0 + $0x114] sm:$0xff]  }
 0x1ad   :  { %v10691_v57 = vrot.slane %v1957_v3, 9  ;;  %v13383_v54 = vld [vmem:[%s17894_s0 + $0xfc] sm:$0xff]   ;;  %v13387_v3 = vld [vmem:[%s17894_s0 + $0x114] sm:$0xff]  }
 0x1af   :  { %12431 = vmatmul.mubr.msk.bf16.gmra.mrb[4].mxu0 %vm992_vm1, %v13369_v27  ;;  %v2229_v27 = vrot.slane %v2227_v18, 4  ;;  %v2221_v33 = vsel %vm14893_vm7, %v10691_v57, %v2220_v14  ;;  %v13385_v14 = vld [vmem:[%s17894_s0 + $0x108] sm:$0xff]   ;;  %v13389_v18 = vld [vmem:[%s17894_s0 + $0x120] sm:$0xff]   ;;  %v13393_v57 = vld [vmem:[%s17894_s0 + $0x138] sm:$0xff]  }
 0x1b0   :  { %12434 = vmatprep.mubr.msk.bf16.mxu0 %vm992_vm1, %v13370_v28  ;;  %v2230_v28 = vrot.slane %v13642_v32, 5  ;;  %v10723_v42 = vcombine.low %v2221_v33, %v2224_v44  ;;  %v13395_v32 = vld [vmem:[%s17894_s0 + $0x144] sm:$0xff]   ;;  %v6578_v33 = vshll.u32 %v11305_v37, 16  ;;  %v6582_v44 = vshrl.u32 %v11305_v37, 16 }
 0x1b2   :  { %v2231_v38 = vsel %vm14893_vm7, %v2229_v27, %v2230_v28  ;;  %v11307_v27 = vld [vmem:[%s17894_s0 + $0x24] sm:$0xf]  ;;  %v13397_v28 = vld [vmem:[%s17894_s0 + $0x150] sm:$0xff]   ;;  %v16103_v56 = vrot.slane %v6578_v33, 5  ;;  %v6584_v46 = vrot.slane %v6582_v44, 4 }
 0x1b3   :  { %12203 = vmatmul.mubr.msk.bf16.gmra.mrb[40].mxu1 %vm992_vm1, %v10717_v41  ;;  %v2241_v41 = vrot.slane %v15291_v15, 5  ;;  %v10724_v4 = vcombine.low %v2228_v36, %v2231_v38  ;;  %v13644_v15 = vld [vmem:[%s17894_s0 + $0x188] sm:$0x1]  ;;  %v6593_v36 = vshrl.u32 %v11307_v27, 16  ;;  %v6596_v38 = vshll.u32 %v11307_v27, 16  ;;  %v13410_v33 = vld [vmem:[%s17894_s0 + $0x180] sm:$0xff]  }
 0x1b4   :  { %12206 = vmatprep.mubr.msk.bf16.mxu1 %vm992_vm1, %v10718_v12  ;;  %v1960_v12 = vld [vmem:[%s17894_s0 + $0x180] sm:$0xe]  ;;  %v2244_v51 = vrot.slane %v13644_v15, 5  ;;  %v6585_v63 = vor.u32 %v6584_v46, %v16103_v56  ;;  %v13412_v44 = vld [vmem:[%s17894_s0 + $0x18c] sm:$0xff]   ;;  %v11315_v46 = vld [vmem:[%s17894_s0 + $0x44] sm:$0x1] }
 0x1b5   :  { %v10694_v7 = vrot.slane %v1960_v12, 9  ;;  %v2243_v22 = vrot.slane %v2241_v41, 4  ;;  %v6606_v12 = vshrl.u32 %v11308_v35, 16  ;;  %v13399_v15 = vld [vmem:[%s17894_s0 + $0x15c] sm:$0xff]  }
 0x1b7   :  { %12435 = vmatmul.mubr.msk.bf16.gmra.mrb[8].mxu0 %vm992_vm1, %v13371_v53  ;;  %v13377_v53 = vld [vmem:[%s17894_s0 + $0x9c] sm:$0xff]   ;;  %v2242_v52 = vsel %vm14893_vm7, %v10694_v7, %v2241_v41  ;;  %v2245_v61 = vsel %vm14893_vm7, %v2243_v22, %v2244_v51  ;;  %v6602_v41 = vshll.u32 %v11308_v35, 16  ;;  %v6595_v7 = vrot.slane %v6593_v36, 4 }
 0x1b8   :  { %12438 = vmatprep.mubr.msk.bf16.mxu0 %vm992_vm1, %v13372_v55  ;;  %v13378_v55 = vld [vmem:[%s17894_s0 + $0xa8] sm:$0xff]   ;;  %v10726_v62 = vcombine.low %v2242_v52, %v2245_v61  ;;  %v6598_v22 = vrot.slane %v6596_v38, 5 }
 0x1b9   :  { %v16112_v51 = vrot.slane %v6602_v41, 5  ;;  %v11309_v52 = vld [vmem:[%s17894_s0 + $0x2c] sm:$0x1]  ;;  %v11312_v41 = vld [vmem:[%s17894_s0 + $0x38] sm:$0x1] }
 0x1ba   :  { %v6599_v61 = vor.u32 %v6598_v22, %v6595_v7 }
 0x1bb   :  { %12207 = vmatmul.mubr.msk.bf16.gmra.mrb[44].mxu1 %vm992_vm1, %v10719_v59  ;;  %v10695_v59 = vrot.slane %v1961_v6, 9  ;;  %v13406_v6 = vld [vmem:[%s17894_s0 + $0x168] sm:$0xff]  }
 0x1bc   :  { %12210 = vmatprep.mubr.msk.bf16.mxu1 %vm992_vm1, %v10720_v47  ;;  %v2250_v47 = vrot.slane %v2248_v8, 4 }
 0x1bd   :  { %v2249_v45 = vsel %vm14893_vm7, %v10695_v59, %v2248_v8  ;;  %v6588_v8 = vshll.u32 %v11306_v49, 16  ;;  %v11310_v59 = vld [vmem:[%s17894_s0 + $0x30] sm:$0xf] }
 0x1be   :  { %v2252_v9 = vsel %vm14893_vm7, %v2250_v47, %v2251_v16  ;;  %v13408_v47 = vld [vmem:[%s17894_s0 + $0x174] sm:$0xff]   ;;  %v6586_v16 = vrot.slane %v6585_v63, 4 }
 0x1bf   :  { %12439 = vmatmul.mubr.msk.bf16.gmra.mrb[12].mxu0 %vm992_vm1, %v13373_v2  ;;  %v10727_v34 = vcombine.low %v2249_v45, %v2252_v9  ;;  %v13382_v2 = vld [vmem:[%s17894_s0 + $0xf0] sm:$0xff]   ;;  %v16140_v9 = vrot.slane %v6599_v61, 4 }
 0x1c0   :  { %12442 = vmatprep.mubr.msk.bf16.mxu0 %vm992_vm1, %v13374_v13  ;;  %v13386_v13 = vld [vmem:[%s17894_s0 + $0xf0] sm:$0xff]  }
 0x1c1   :  { %v13403_v45 = vld [vmem:[%s17894_s0 + $0x174] sm:$0xff]  }
 0x1c3   :  { %12211 = vmatmul.mubr.msk.bf16.gmra.mrb[48].mxu1 %vm992_vm1, %v10721_v50  ;;  %v13396_v50 = vld [vmem:[%s17894_s0 + $0x12c] sm:$0xff]  }
 0x1c4   :  { %12214 = vmatprep.mubr.msk.bf16.mxu1 %vm992_vm1, %v10722_v23  ;;  %v13391_v23 = vld [vmem:[%s17894_s0 + $0x12c] sm:$0xff]  }
 0x1c7   :  { %12443 = vmatmul.mubr.msk.bf16.gmra.mrb[16].mxu0 %vm992_vm1, %v13375_v30  ;;  %v6569_v30 = vshrl.u32 %v11304_v26, 16 }
 0x1c8   :  { %12446 = vmatprep.mubr.msk.bf16.mxu0 %vm992_vm1, %v13376_v31  ;;  %v6572_v31 = vshll.u32 %v11304_v26, 16 }
 0x1ca   :  { %v6574_v43 = vrot.slane %v6572_v31, 5 }
 0x1cb   :  { %12215 = vmatmul.mubr.msk.bf16.gmra.mrb[52].mxu1 %vm992_vm1, %v10723_v42  ;;  %v13404_v42 = vld [vmem:[%s17894_s0 + $0x15c] sm:$0xff]  }
 0x1cc   :  { %12218 = vmatprep.mubr.msk.bf16.mxu1 %vm992_vm1, %v10724_v4  ;;  %v6571_v4 = vrot.slane %v6569_v30, 4 }
 0x1ce   :  { %v6575_v17 = vor.u32 %v6574_v43, %v6571_v4 }
 0x1cf   :  { %12447 = vmatmul.mubr.msk.bf16.gmra.mrb[20].mxu0 %vm992_vm1, %v13377_v53  ;;  %v6608_v53 = vrot.slane %v6606_v12, 4 }
 0x1d0   :  { %12450 = vmatprep.mubr.msk.bf16.mxu0 %vm992_vm1, %v13378_v55  ;;  %v13401_v55 = vld [vmem:[%s17894_s0 + $0x168] sm:$0xff]   ;;  %v6576_v5 = vrot.slane %v6575_v17, 4 }
 0x1d3   :  { %12219 = vmatmul.mubr.msk.bf16.gmra.mrb[56].mxu1 %vm992_vm1, %v10725_v25  ;;  %v6609_v25 = vor.u32 %v6608_v53, %v16112_v51 }
 0x1d4   :  { %12222 = vmatprep.mubr.msk.bf16.mxu1 %vm992_vm1, %v10726_v62  ;;  %v6612_v62 = vshll.u32 %v11309_v52, 16 }
 0x1d7   :  { %12451 = vmatmul.mubr.msk.bf16.gmra.mrb[24].mxu0 %vm992_vm1, %v13379_v0  ;;  %v6590_v0 = vrot.slane %v6588_v8, 5  ;;  %v11321_v8 = vld [vmem:[%s17894_s0 + $0x5c] sm:$0x1] }
 0x1d8   :  { %12454 = vmatprep.mubr.msk.bf16.mxu0 %vm992_vm1, %v13380_v48  ;;  %v11311_v48 = vld [vmem:[%s17894_s0 + $0x34] sm:$0xf] }
 0x1db   :  { %12223 = vmatmul.mubr.msk.bf16.gmra.mrb[60].mxu1 %vm992_vm1, %v10727_v34  ;;  %v11313_v34 = vld [vmem:[%s17894_s0 + $0x3c] sm:$0xf] }
 0x1dc   :  { %12260 = vmatprep.mubr.msk.bf16.mxu1 %vm992_vm1, %v13384_v58  ;;  %v13405_v58 = vld [vmem:[%s17894_s0 + $0x180] sm:$0xff]  }
 0x1df   :  { %12455 = vmatmul.mubr.msk.bf16.gmra.mrb[28].mxu0 %vm992_vm1, %v13381_v11  ;;  %v6617_v11 = vshrl.u32 %v11310_v59, 16 }
 0x1e0   :  { %12458 = vmatprep.mubr.msk.bf16.mxu0 %vm992_vm1, %v13382_v2  ;;  %v6620_v2 = vshll.u32 %v11310_v59, 16  ;;  %v13409_v59 = vld [vmem:[%s17894_s0 + $0x198] sm:$0xff]  }
 0x1e3   :  { %12261 = vmatmul.mubr.msk.bf16.vlgmr.msra.gmra.mrb[32].mxu1 %vm992_vm1, %v13386_v13  ;;  %v11314_v13 = vld [vmem:[%s17894_s0 + $0x40] sm:$0xf] }
 0x1e4   :  { %12264 = vmatprep.mubr.msk.bf16.mxu1 %vm992_vm1, %v13388_v1  ;;  %v11316_v1 = vld [vmem:[%s17894_s0 + $0x48] sm:$0xf]  ;;  %v6654_v26 = vshrl.u32 %v11314_v13, 16 }
 0x1e5   :  { %v6665_v37 = vshrl.u32 %v11316_v1, 16  ;;  %v6668_v27 = vshll.u32 %v11316_v1, 16 }
 0x1e6   :  { %v6656_v7 = vrot.slane %v6654_v26, 4 }
 0x1e7   :  { %12459 = vmatmul.mubr.msk.bf16.gmra.mrb[32].mxu0 %vm992_vm1, %v13383_v54  ;;  %v16155_v54 = vrot.slane %v6609_v25, 4  ;;  %v6667_v22 = vrot.slane %v6665_v37, 4  ;;  %v11325_v37 = vld [vmem:[%s17894_s0 + $0x6c] sm:$0xf] }
 0x1e8   :  { %12462 = vmatprep.mubr.msk.bf16.mxu0 %vm992_vm1, %v13385_v14  ;;  %v16157_v14 = vrot.slane %v6612_v62, 5  ;;  %v11322_v62 = vld [vmem:[%s17894_s0 + $0x60] sm:$0xf] }
 0x1e9   :  { %v6713_v1 = vshrl.u32 %v11322_v62, 16 }
 0x1eb   :  { %12265 = vmatmul.mubr.msk.bf16.gmra.mrb[36].mxu1 %vm992_vm1, %v13390_v20  ;;  %v6626_v20 = vshll.u32 %v11311_v48, 16 }
 0x1ec   :  { %12268 = vmatprep.mubr.msk.bf16.mxu1 %vm992_vm1, %v13392_v40  ;;  %v6630_v40 = vshrl.u32 %v11311_v48, 16 }
 0x1ed   :  { %v16185_v12 = vrot.slane %v6626_v20, 5  ;;  %v13413_v20 = vld [vmem:[%s17894_s0 + $0x198] sm:$0xff]  }
 0x1ef   :  { %12463 = vmatmul.mubr.msk.bf16.gmra.mrb[36].mxu0 %vm992_vm1, %v13387_v3  ;;  %v11317_v3 = vld [vmem:[%s17894_s0 + $0x4c] sm:$0xf] }
 0x1f0   :  { %12466 = vmatprep.mubr.msk.bf16.mxu0 %vm992_vm1, %v13389_v18  ;;  %v6581_v18 = vsel %vm13816_vm4, %v6576_v5, %v16103_v56  ;;  %v6674_v30 = vshll.u32 %v11317_v3, 16  ;;  %v6678_v31 = vshrl.u32 %v11317_v3, 16  ;;  %v13407_v56 = vld [vmem:[%s17894_s0 + $0x18c] sm:$0xff]  }
 0x1f2   :  { %v16200_v17 = vrot.slane %v6674_v30, 5  ;;  %v6680_v63 = vrot.slane %v6678_v31, 4  ;;  %v11326_v31 = vld [vmem:[%s17894_s0 + $0x70] sm:$0xf] }
 0x1f3   :  { %12269 = vmatmul.mubr.msk.bf16.gmra.mrb[40].mxu1 %vm992_vm1, %v13394_v19  ;;  %v6591_v19 = vsel %vm13816_vm4, %v6586_v16, %v6590_v0  ;;  %v6636_v16 = vshll.u32 %v11312_v41, 16 }
 0x1f4   :  { %12272 = vmatprep.mubr.msk.bf16.mxu1 %vm992_vm1, %v13396_v50  ;;  %v6641_v50 = vshrl.u32 %v11313_v34, 16  ;;  %v16195_v53 = vcombine.low %v6581_v18, %v6591_v19 }
 0x1f6   :  { %v6643_v4 = vrot.slane %v6641_v50, 4 }
 0x1f7   :  { %12467 = vmatmul.mubr.msk.bf16.gmra.mrb[40].mxu0 %vm992_vm1, %v13391_v23  ;;  %v6644_v23 = vshll.u32 %v11313_v34, 16 }
 0x1f8   :  { %12470 = vmatprep.mubr.msk.bf16.mxu0 %vm992_vm1, %v13393_v57  ;;  %v11319_v57 = vld [vmem:[%s17894_s0 + $0x54] sm:$0xf] }
 0x1f9   :  { %v6689_v35 = vshrl.u32 %v11319_v57, 16  ;;  %v6692_v36 = vshll.u32 %v11319_v57, 16  ;;  %v6646_v43 = vrot.slane %v6644_v23, 5  ;;  %v6638_v23 = vrot.slane %v6636_v16, 5 }
 0x1fb   :  { %12273 = vmatmul.mubr.msk.bf16.gmra.mrb[44].mxu1 %vm992_vm1, %v13398_v21  ;;  %v11320_v21 = vld [vmem:[%s17894_s0 + $0x58] sm:$0xf]  ;;  %v6691_v52 = vrot.slane %v6689_v35, 4  ;;  %v6694_v61 = vrot.slane %v6692_v36, 5  ;;  %v6647_v0 = vor.u32 %v6646_v43, %v6643_v4  ;;  %v11324_v35 = vld [vmem:[%s17894_s0 + $0x68] sm:$0x1] }
 0x1fc   :  { %12276 = vmatprep.mubr.msk.bf16.mxu1 %vm992_vm1, %v13400_v24  ;;  %v6650_v24 = vshll.u32 %v11314_v13, 16  ;;  %v6698_v38 = vshll.u32 %v11320_v21, 16  ;;  %v6708_v13 = vshll.u32 %v11321_v8, 16  ;;  %v6740_v4 = vshll.u32 %v11325_v37, 16 }
 0x1fd   :  { %v6695_v3 = vor.u32 %v6694_v61, %v6691_v52  ;;  %v6648_v57 = vrot.slane %v6647_v0, 4 }
 0x1fe   :  { %v16193_v49 = vrot.slane %v6650_v24, 5 }
 0x1ff   :  { %12471 = vmatmul.mubr.msk.bf16.gmra.mrb[44].mxu0 %vm992_vm1, %v13395_v32  ;;  %v6619_v32 = vrot.slane %v6617_v11, 4  ;;  %v6605_v11 = vsel %vm13816_vm4, %v16140_v9, %v16112_v51  ;;  %v11323_v51 = vld [vmem:[%s17894_s0 + $0x64] sm:$0xf]  ;;  %v6716_v9 = vshll.u32 %v11322_v62, 16  ;;  %v6742_v62 = vrot.slane %v6740_v4, 5 }
 0x200   :  { %12474 = vmatprep.mubr.msk.bf16.mxu0 %vm992_vm1, %v13397_v28  ;;  %v6622_v28 = vrot.slane %v6620_v2, 5  ;;  %v6657_v48 = vor.u32 %v6656_v7, %v16193_v49  ;;  %v6681_v2 = vor.u32 %v6680_v63, %v16200_v17  ;;  %v6722_v30 = vshll.u32 %v11323_v51, 16  ;;  %v11333_v4 = vld [vmem:[%s17894_s0 + $0x8c] sm:$0x1] }
 0x201   :  { %v6718_v36 = vrot.slane %v6716_v9, 5  ;;  %v6653_v43 = vsel %vm13816_vm4, %v6648_v57, %v16193_v49  ;;  %v6750_v7 = vshrl.u32 %v11326_v31, 16  ;;  %v6732_v63 = vshll.u32 %v11324_v35, 16 }
 0x202   :  { %v6658_v24 = vrot.slane %v6657_v48, 4  ;;  %v11329_v48 = vld [vmem:[%s17894_s0 + $0x7c] sm:$0xf] }
 0x203   :  { %12277 = vmatmul.mubr.msk.bf16.gmra.mrb[48].mxu1 %vm992_vm1, %v13402_v39  ;;  %v6702_v39 = vshrl.u32 %v11320_v21, 16  ;;  %v13411_v21 = vld [vmem:[%s17894_s0 + $0x1a4] sm:$0xff]   ;;  %v6752_v0 = vrot.slane %v6750_v7, 4  ;;  %v6770_v9 = vshll.u32 %v11329_v48, 16  ;;  %v6774_v57 = vshrl.u32 %v11329_v48, 16 }
 0x204   :  { %12280 = vmatprep.mubr.msk.bf16.mxu1 %vm992_vm1, %v13404_v42  ;;  %v6632_v42 = vrot.slane %v6630_v40, 4  ;;  %v6615_v40 = vsel %vm13816_vm4, %v16155_v54, %v16157_v14 }
 0x205   :  { %v6704_v25 = vrot.slane %v6702_v39, 4 }
 0x206   :  { %v6633_v5 = vor.u32 %v6632_v42, %v16185_v12  ;;  %v6737_v42 = vshrl.u32 %v11325_v37, 16 }
 0x207   :  { %12475 = vmatmul.mubr.msk.bf16.gmra.mrb[48].mxu0 %vm992_vm1, %v13399_v15  ;;  %v6670_v15 = vrot.slane %v6668_v27, 5  ;;  %v6682_v27 = vrot.slane %v6681_v2, 4 }
 0x208   :  { %12478 = vmatprep.mubr.msk.bf16.mxu0 %vm992_vm1, %v13401_v55  ;;  %v11318_v55 = vld [vmem:[%s17894_s0 + $0x50] sm:$0x1]  ;;  %v6634_v50 = vrot.slane %v6633_v5, 4  ;;  %v11401_v5 = vcombine.low %v6605_v11, %v6615_v40  ;;  %v11331_v11 = vld [vmem:[%s17894_s0 + $0x84] sm:$0xf] }
 0x209   :  { %v6671_v34 = vor.u32 %v6670_v15, %v6667_v22  ;;  %v11328_v22 = vld [vmem:[%s17894_s0 + $0x78] sm:$0xf]  ;;  %v11334_v40 = vld [vmem:[%s17894_s0 + $0x90] sm:$0xf] }
 0x20a   :  { %v6639_v41 = vsel %vm13816_vm4, %v6634_v50, %v6638_v23  ;;  %v11330_v23 = vld [vmem:[%s17894_s0 + $0x80] sm:$0x1]  ;;  %v6812_v37 = vshll.u32 %v11334_v40, 16 }
 0x20b   :  { %12281 = vmatmul.mubr.msk.bf16.gmra.mrb[52].mxu1 %vm992_vm1, %v13406_v6  ;;  %v16206_v6 = vrot.slane %v6698_v38, 5  ;;  %v6672_v14 = vrot.slane %v6671_v34, 4  ;;  %v6726_v38 = vshrl.u32 %v11323_v51, 16  ;;  %v6780_v35 = vshll.u32 %v11330_v23, 16 }
 0x20c   :  { %12284 = vmatprep.mubr.msk.bf16.mxu1 %vm992_vm1, %v13408_v47  ;;  %v6623_v47 = vor.u32 %v6622_v28, %v6619_v32  ;;  %v6710_v32 = vrot.slane %v6708_v13, 5  ;;  %v6715_v28 = vrot.slane %v6713_v1, 4  ;;  %v6814_v7 = vrot.slane %v6812_v37, 5  ;;  %v11339_v37 = vld [vmem:[%s17894_s0 + $0xa4] sm:$0x1] }
 0x20d   :  { %v6705_v18 = vor.u32 %v6704_v25, %v16206_v6  ;;  %v6728_v61 = vrot.slane %v6726_v38, 4  ;;  %v6739_v25 = vrot.slane %v6737_v42, 4 }
 0x20e   :  { %v6624_v19 = vrot.slane %v6623_v47, 4  ;;  %v6719_v52 = vor.u32 %v6718_v36, %v6715_v28  ;;  %v6764_v47 = vshll.u32 %v11328_v22, 16  ;;  %v11337_v36 = vld [vmem:[%s17894_s0 + $0x9c] sm:$0xf] }
 0x20f   :  { %12479 = vmatmul.mubr.msk.bf16.gmra.mrb[52].mxu0 %vm992_vm1, %v13403_v45  ;;  %v6660_v45 = vshll.u32 %v11315_v46, 16  ;;  %v6746_v46 = vshll.u32 %v11326_v31, 16 }
 0x210   :  { %12482 = vmatprep.mubr.msk.bf16.mxu0 %vm992_vm1, %v13405_v58  ;;  %v6684_v58 = vshll.u32 %v11318_v55, 16  ;;  %v6629_v39 = vsel %vm13816_vm4, %v6624_v19, %v16185_v12  ;;  %v6677_v12 = vsel %vm13816_vm4, %v6672_v14, %v16200_v17  ;;  %v16266_v55 = vrot.slane %v6722_v30, 5  ;;  %v11327_v17 = vld [vmem:[%s17894_s0 + $0x74] sm:$0x1] }
 0x211   :  { %v6662_v54 = vrot.slane %v6660_v45, 5  ;;  %v16281_v16 = vrot.slane %v6746_v46, 5  ;;  %v6756_v1 = vshll.u32 %v11327_v17, 16  ;;  %v6766_v51 = vrot.slane %v6764_v47, 5  ;;  %v11335_v19 = vld [vmem:[%s17894_s0 + $0x94] sm:$0xf] }
 0x212   :  { %v6686_v26 = vrot.slane %v6684_v58, 5  ;;  %v16290_v58 = vrot.slane %v6732_v63, 5  ;;  %v6729_v13 = vor.u32 %v6728_v61, %v16266_v55  ;;  %v6818_v28 = vshll.u32 %v11335_v19, 16 }
 0x213   :  { %12285 = vmatmul.mubr.msk.bf16.gmra.mrb[56].mxu1 %vm992_vm1, %v13410_v33  ;;  %v6696_v33 = vrot.slane %v6695_v3, 4  ;;  %v6743_v3 = vor.u32 %v6742_v62, %v6739_v25  ;;  %v6753_v50 = vor.u32 %v6752_v0, %v16281_v16  ;;  %v6822_v30 = vshrl.u32 %v11335_v19, 16 }
 0x214   :  { %12288 = vmatprep.mubr.msk.bf16.mxu1 %vm992_vm1, %v13412_v44  ;;  %v6706_v44 = vrot.slane %v6705_v18, 4  ;;  %v6687_v15 = vsel %vm13816_vm4, %v6682_v27, %v6686_v26  ;;  %v6809_v26 = vshrl.u32 %v11334_v40, 16  ;;  %v6730_v27 = vrot.slane %v6729_v13, 4 }
 0x215   :  { %v6701_v49 = vsel %vm13816_vm4, %v6696_v33, %v16206_v6  ;;  %v8431_v6 = vsel %vm1089_vm0, %v15830_v10, 0  ;;  %v16288_v34 = vcombine.low %v6677_v12, %v6687_v15  ;;  %v16297_v10 = vrot.slane %v6719_v52, 4  ;;  %v11336_v12 = vld [vmem:[%s17894_s0 + $0x98] sm:$0x1] }
 0x216   :  { %v6711_v8 = vsel %vm13816_vm4, %v6706_v44, %v6710_v32  ;;  %v6758_v32 = vrot.slane %v6756_v1, 5  ;;  %v6744_v31 = vrot.slane %v6743_v3, 4  ;;  %v16315_v44 = vrot.slane %v6770_v9, 5 }
 0x217   :  { %12483 = vmatmul.mubr.msk.bf16.gmra.mrb[56].mxu0 %vm992_vm1, %v13407_v56  ;;  %v6663_v56 = vsel %vm13816_vm4, %v6658_v24, %v6662_v54  ;;  %v16295_v2 = vcombine.low %v6701_v49, %v6711_v8  ;;  %v6788_v24 = vshll.u32 %v11331_v11, 16  ;;  %v6754_v38 = vrot.slane %v6753_v50, 4 }
 0x218   :  { %12486 = vmatprep.mubr.msk.bf16.mxu0 %vm992_vm1, %v13409_v59  ;;  %v6761_v59 = vshrl.u32 %v11328_v22, 16  ;;  %v16286_v45 = vcombine.low %v6653_v43, %v6663_v56  ;;  %v6811_v46 = vrot.slane %v6809_v26, 4  ;;  %v6725_v22 = vsel %vm13816_vm4, %v16297_v10, %v16266_v55  ;;  %v11338_v55 = vld [vmem:[%s17894_s0 + $0xa0] sm:$0xf] }
 0x219   :  { %v6790_v42 = vrot.slane %v6788_v24, 5  ;;  %v16332_v15 = vrot.slane %v6818_v28, 5  ;;  %v6824_v63 = vrot.slane %v6822_v30, 4  ;;  %v6833_v49 = vshrl.u32 %v11337_v36, 16 }
 0x21a   :  { %v6763_v18 = vrot.slane %v6761_v59, 4  ;;  %v6735_v8 = vsel %vm13816_vm4, %v6730_v27, %v16290_v58  ;;  %v6749_v52 = vsel %vm13816_vm4, %v6744_v31, %v16281_v16  ;;  %v16340_v61 = vrot.slane %v6780_v35, 5  ;;  %v11342_v31 = vld [vmem:[%s17894_s0 + $0xb0] sm:$0x1] }
 0x21b   :  { %12289 = vmatmul.mubr.msk.bf16.gmra.mrb[60].mxu1 %vm992_vm1, %v13413_v20  ;;  %v11332_v20 = vld [vmem:[%s17894_s0 + $0x88] sm:$0xf]  ;;  %v6836_v17 = vshll.u32 %v11337_v36, 16  ;;  %v6804_v47 = vshll.u32 %v11333_v4, 16  ;;  %v6759_v16 = vsel %vm13816_vm4, %v6754_v38, %v6758_v32  ;;  %v6815_v48 = vor.u32 %v6814_v7, %v6811_v46 }
 0x21c   :  { %v6794_v54 = vshll.u32 %v11332_v20, 16  ;;  %v6798_v14 = vshrl.u32 %v11332_v20, 16  ;;  %v6767_v33 = vor.u32 %v6766_v51, %v6763_v18  ;;  %v6825_v58 = vor.u32 %v6824_v63, %v16332_v15 }
 0x21d   :  { %v6842_v10 = vshll.u32 %v11338_v55, 16  ;;  %v6846_v13 = vshrl.u32 %v11338_v55, 16  ;;  %v6838_v1 = vrot.slane %v6836_v17, 5  ;;  %v6806_v9 = vrot.slane %v6804_v47, 5 }
 0x21e   :  { %v16323_v43 = vrot.slane %v6794_v54, 5  ;;  %v6800_v56 = vrot.slane %v6798_v14, 4  ;;  %v16345_v25 = vrot.slane %v6767_v33, 4  ;;  %v11406_v50 = vcombine.low %v6725_v22, %v6735_v8 }
 0x21f   :  { %12487 = vmatmul.mubr.msk.bf16.gmra.mrb[60].mxu0 %vm992_vm1, %v13411_v21  ;;  %v6785_v21 = vshrl.u32 %v11331_v11, 16  ;;  %v6835_v11 = vrot.slane %v6833_v49, 4  ;;  %v16362_v23 = vcombine.low %v6749_v52, %v6759_v16  ;;  %v6816_v24 = vrot.slane %v6815_v48, 4 }
 0x220   :  { %12492 = vmatprep.mubr.msk.bf16.mxu0 %vm992_vm1, %v16195_v53  ;;  %v11402_v53 = vcombine.low %v6629_v39, %v6639_v41  ;;  %v6776_v39 = vrot.slane %v6774_v57, 4  ;;  %v6801_v0 = vor.u32 %v6800_v56, %v16323_v43  ;;  %v6826_v54 = vrot.slane %v6825_v58, 4 }
 0x221   :  { %v6787_v41 = vrot.slane %v6785_v21, 4  ;;  %v11343_v21 = vld [vmem:[%s17894_s0 + $0xb4] sm:$0xf]  ;;  %v16370_v14 = vrot.slane %v6842_v10, 5  ;;  %v6848_v26 = vrot.slane %v6846_v13, 4  ;;  %v6839_v27 = vor.u32 %v6838_v1, %v6835_v11 }
 0x222   :  { %v6777_v62 = vor.u32 %v6776_v39, %v16315_v44  ;;  %v6881_v35 = vshrl.u32 %v11343_v21, 16  ;;  %v6884_v36 = vshll.u32 %v11343_v21, 16  ;;  %v6876_v52 = vshll.u32 %v11342_v31, 16 }
 0x223   :  { %v6791_v59 = vor.u32 %v6790_v42, %v6787_v41  ;;  %v6773_v41 = vsel %vm13816_vm4, %v16345_v25, %v16315_v44  ;;  %v6821_v44 = vsel %vm13816_vm4, %v6816_v24, %v16332_v15  ;;  %v6849_v22 = vor.u32 %v6848_v26, %v16370_v14 }
 0x224   :  { %v6778_v18 = vrot.slane %v6777_v62, 4  ;;  %v16413_v8 = vrot.slane %v6839_v27, 4  ;;  %v6883_v17 = vrot.slane %v6881_v35, 4  ;;  %v6886_v25 = vrot.slane %v6884_v36, 5 }
 0x225   :  { %v6792_v51 = vrot.slane %v6791_v59, 4  ;;  %v11345_v59 = vld [vmem:[%s17894_s0 + $0xbc] sm:$0x1]  ;;  %v6850_v48 = vrot.slane %v6849_v22, 4  ;;  %v6878_v1 = vrot.slane %v6876_v52, 5 }
 0x226   :  { %v6783_v42 = vsel %vm13816_vm4, %v6778_v18, %v16340_v61  ;;  %v6887_v18 = vor.u32 %v6886_v25, %v6883_v17  ;;  %v11355_v25 = vld [vmem:[%s17894_s0 + $0xfc] sm:$0xf] }
 0x227   :  { %12493 = vmatmul.mubr.msk.bf16.vlgmr.msra.gmra.mrb[0].mxu0 %vm992_vm1, %v11401_v5  ;;  %v11340_v5 = vld [vmem:[%s17894_s0 + $0xa8] sm:$0xf]  ;;  %v6797_v4 = vsel %vm13816_vm4, %v6792_v51, %v16323_v43  ;;  %v11346_v43 = vld [vmem:[%s17894_s0 + $0xc0] sm:$0xf]  ;;  %v6900_v51 = vshll.u32 %v11345_v59, 16 }
 0x228   :  { %12557 = vmatpush3.bf16.msra.mxu0 %v8431_v6  ;;  %12496 = vmatprep.mubr.msk.bf16.mxu0 %vm992_vm1, %v11402_v53  ;;  %v11341_v6 = vld [vmem:[%s17894_s0 + $0xac] sm:$0xf]  ;;  %v6828_v53 = vshll.u32 %v11336_v12, 16  ;;  %v6857_v20 = vshrl.u32 %v11340_v5, 16  ;;  %v6860_v40 = vshll.u32 %v11340_v5, 16  ;;  %v6852_v12 = vshll.u32 %v11339_v37, 16 }
 0x229   :  { %v6866_v3 = vshll.u32 %v11341_v6, 16  ;;  %v6870_v19 = vshrl.u32 %v11341_v6, 16  ;;  %v6905_v5 = vshrl.u32 %v11346_v43, 16  ;;  %v6908_v6 = vshll.u32 %v11346_v43, 16  ;;  %v11356_v59 = vld [vmem:[%s17894_s0 + $0x100] sm:$0xf] }
 0x22a   :  { %v6830_v57 = vrot.slane %v6828_v53, 5  ;;  %v6859_v32 = vrot.slane %v6857_v20, 4  ;;  %v6862_v28 = vrot.slane %v6860_v40, 5  ;;  %v6854_v53 = vrot.slane %v6852_v12, 5  ;;  %v11349_v20 = vld [vmem:[%s17894_s0 + $0xcc] sm:$0xf] }
 0x22b   :  { %v16375_v30 = vrot.slane %v6866_v3, 5  ;;  %v6872_v33 = vrot.slane %v6870_v19, 4  ;;  %v6845_v40 = vsel %vm13816_vm4, %v16413_v8, %v16370_v14  ;;  %v11352_v19 = vld [vmem:[%s17894_s0 + $0xf0] sm:$0xf]  ;;  %v6907_v21 = vrot.slane %v6905_v5, 4 }
 0x22c   :  { %v6831_v49 = vsel %vm13816_vm4, %v6826_v54, %v6830_v57  ;;  %v6863_v15 = vor.u32 %v6862_v28, %v6859_v32  ;;  %v11348_v57 = vld [vmem:[%s17894_s0 + $0xc8] sm:$0x1]  ;;  %v6855_v14 = vsel %vm13816_vm4, %v6850_v48, %v6854_v53  ;;  %v6929_v37 = vshrl.u32 %v11349_v20, 16  ;;  %v11353_v32 = vld [vmem:[%s17894_s0 + $0xf4] sm:$0xf] }
 0x22d   :  { %v6873_v55 = vor.u32 %v6872_v33, %v16375_v30  ;;  %v16423_v10 = vcombine.low %v6821_v44, %v6831_v49  ;;  %v6932_v27 = vshll.u32 %v11349_v20, 16  ;;  %v6953_v35 = vshrl.u32 %v11352_v19, 16 }
 0x22e   :  { %v6864_v13 = vrot.slane %v6863_v15, 4  ;;  %v6962_v44 = vshll.u32 %v11353_v32, 16  ;;  %v6966_v22 = vshrl.u32 %v11353_v32, 16  ;;  %v6924_v43 = vshll.u32 %v11348_v57, 16 }
 0x22f   :  { %12497 = vmatmul.mubr.msk.bf16.gmra.mrb[4].mxu0 %vm992_vm1, %v16286_v45  ;;  %v6802_v45 = vrot.slane %v6801_v0, 4  ;;  %v11408_v0 = vcombine.low %v6773_v41, %v6783_v42  ;;  %v6874_v3 = vrot.slane %v6873_v55, 4  ;;  %v16465_v42 = vrot.slane %v6887_v18, 4 }
 0x230   :  { %12500 = vmatprep.mubr.msk.bf16.mxu0 %vm992_vm1, %v16288_v34  ;;  %v11344_v34 = vld [vmem:[%s17894_s0 + $0xb8] sm:$0xf]  ;;  %v6934_v49 = vrot.slane %v6932_v27, 5  ;;  %v6955_v52 = vrot.slane %v6953_v35, 4  ;;  %v11411_v17 = vcombine.low %v6845_v40, %v6855_v14  ;;  %v6968_v48 = vrot.slane %v6966_v22, 4 }
 0x231   :  { %v6890_v38 = vshll.u32 %v11344_v34, 16  ;;  %v6894_v56 = vshrl.u32 %v11344_v34, 16  ;;  %v6807_v7 = vsel %vm13816_vm4, %v6802_v45, %v6806_v9  ;;  %v11350_v9 = vld [vmem:[%s17894_s0 + $0xd0] sm:$0xf]  ;;  %v6910_v34 = vrot.slane %v6908_v6, 5 }
 0x232   :  { %v11409_v11 = vcombine.low %v6797_v4, %v6807_v7  ;;  %v6938_v31 = vshll.u32 %v11350_v9, 16  ;;  %v6942_v33 = vshrl.u32 %v11350_v9, 16  ;;  %v6879_v41 = vsel %vm13816_vm4, %v6874_v3, %v6878_v1  ;;  %v11358_v40 = vld [vmem:[%s17894_s0 + $0x108] sm:$0xf]  ;;  %v11359_v9 = vld [vmem:[%s17894_s0 + $0x10c] sm:$0xf] }
 0x233   :  { %v16418_v62 = vrot.slane %v6890_v38, 5  ;;  %v6896_v47 = vrot.slane %v6894_v56, 4  ;;  %v6869_v38 = vsel %vm13816_vm4, %v6864_v13, %v16375_v30  ;;  %v16467_v4 = vrot.slane %v6900_v51, 5  ;;  %v11351_v30 = vld [vmem:[%s17894_s0 + $0xd4] sm:$0x1] }
 0x234   :  { %v6911_v7 = vor.u32 %v6910_v34, %v6907_v21  ;;  %v16475_v8 = vrot.slane %v6938_v31, 5  ;;  %v6944_v15 = vrot.slane %v6942_v33, 4  ;;  %v11412_v5 = vcombine.low %v6869_v38, %v6879_v41  ;;  %v11362_v22 = vld [vmem:[%s17894_s0 + $0x118] sm:$0xf] }
 0x235   :  { %v6897_v45 = vor.u32 %v6896_v47, %v16418_v62  ;;  %v6926_v1 = vrot.slane %v6924_v43, 5  ;;  %v6948_v20 = vshll.u32 %v11351_v30, 16  ;;  %v6977_v57 = vshrl.u32 %v11355_v25, 16 }
 0x236   :  { %v16380_v39 = vpop.f32.mrb[0].mxu1  ;;  %v6912_v6 = vrot.slane %v6911_v7, 4  ;;  %v6980_v21 = vshll.u32 %v11355_v25, 16  ;;  %v6986_v34 = vshll.u32 %v11356_v59, 16  ;;  %v7004_v32 = vshll.u32 %v11358_v40, 16 }
 0x237   :  { %12501 = vmatmul.mubr.msk.bf16.gmra.mrb[8].mxu0 %vm992_vm1, %v16295_v2  ;;  %v16394_v46 = vpop.f32.mrb[1].mxu1  ;;  %v11347_v2 = vld [vmem:[%s17894_s0 + $0xc4] sm:$0xf]  ;;  %v16469_v56 = vrot.slane %v6897_v45, 4  ;;  %v6950_v27 = vrot.slane %v6948_v20, 5  ;;  %v7010_v31 = vshll.u32 %v11359_v9, 16 }
 0x238   :  { %12504 = vmatprep.mubr.msk.bf16.mxu0 %vm992_vm1, %v11406_v50  ;;  %v16409_v63 = vpop.f32.mrb[2].mxu1  ;;  %v6914_v16 = vshll.u32 %v11347_v2, 16  ;;  %v6918_v58 = vshrl.u32 %v11347_v2, 16  ;;  %v6931_v2 = vrot.slane %v6929_v37, 4  ;;  %v7001_v37 = vshrl.u32 %v11358_v40, 16 }
 0x239   :  { %v16415_v61 = vpop.f32.mrb[3].mxu1  ;;  %v6903_v13 = vsel %vm13816_vm4, %v16469_v56, %v16467_v4  ;;  %v7014_v33 = vshrl.u32 %v11359_v9, 16  ;;  %v6979_v56 = vrot.slane %v6977_v57, 4  ;;  %v6982_v7 = vrot.slane %v6980_v21, 5 }
 0x23a   :  { %v16444_v24 = vrot.slane %v6914_v16, 5  ;;  %v6920_v26 = vrot.slane %v6918_v58, 4  ;;  %v11354_v16 = vld [vmem:[%s17894_s0 + $0xf8] sm:$0x1]  ;;  %v6893_v58 = vsel %vm13816_vm4, %v16465_v42, %v16418_v62  ;;  %v6935_v18 = vor.u32 %v6934_v49, %v6931_v2  ;;  %v11357_v42 = vld [vmem:[%s17894_s0 + $0x104] sm:$0x1] }
 0x23b   :  { %v6945_v62 = vor.u32 %v6944_v15, %v16475_v8  ;;  %v6972_v45 = vshll.u32 %v11354_v16, 16  ;;  %v16536_v49 = vld [vmem:[%s17894_s0 + $0x110] sm:$0x1]  ;;  %v7003_v30 = vrot.slane %v7001_v37, 4  ;;  %v7016_v25 = vrot.slane %v7014_v33, 4 }
 0x23c   :  { %v6921_v12 = vor.u32 %v6920_v26, %v16444_v24  ;;  %v6990_v26 = vshrl.u32 %v11356_v59, 16  ;;  %v7020_v9 = vshll.u32 %v16536_v49, 16 }
 0x23d   :  { %v6946_v38 = vrot.slane %v6945_v62, 4  ;;  %v6974_v4 = vrot.slane %v6972_v45, 5  ;;  %v6983_v62 = vor.u32 %v6982_v7, %v6979_v56 }
 0x23e   :  { %v16438_v50 = vpop.f32.mrb[4].mxu1  ;;  %v6922_v3 = vrot.slane %v6921_v12, 4  ;;  %v6992_v2 = vrot.slane %v6990_v26, 4 }
 0x23f   :  { %12505 = vmatmul.mubr.msk.bf16.gmra.mrb[12].mxu0 %vm992_vm1, %v16362_v23  ;;  %v16448_v54 = vpop.f32.mrb[5].mxu1  ;;  %v6956_v23 = vshll.u32 %v11352_v19, 16 }
 0x240   :  { %17905 = vst [vmem:[#allocation5_spill] sm:$0xff] %v16448_v54  ;;  %12508 = vmatprep.mubr.msk.bf16.mxu0 %vm992_vm1, %v11408_v0  ;;  %v16456_v28 = vpop.f32.mrb[6].mxu1  ;;  %v16488_v0 = vrot.slane %v6962_v44, 5  ;;  %v6927_v35 = vsel %vm13816_vm4, %v6922_v3, %v6926_v1  ;;  %v16526_v44 = vrot.slane %v6986_v34, 5  ;;  %v6951_v3 = vsel %vm13816_vm4, %v6946_v38, %v6950_v27  ;;  %v16913_v54 = vld [vmem:[%s17894_s0 + $0x1ac] sm:$0x1] }
 0x241   :  { %17906 = vst [vmem:[#allocation6_spill] sm:$0xff] %v16456_v28  ;;  %v16458_v36 = vpop.f32.mrb[7].mxu1  ;;  %v6958_v55 = vrot.slane %v6956_v23, 5  ;;  %v6936_v23 = vrot.slane %v6935_v18, 4  ;;  %v6996_v18 = vshll.u32 %v11357_v42, 16  ;;  %v6984_v38 = vrot.slane %v6983_v62, 4 }
 0x242   :  { %17907 = vst [vmem:[#allocation7_spill] sm:$0xff] %v16458_v36  ;;  %v6969_v14 = vor.u32 %v6968_v48, %v16488_v0  ;;  %v7022_v42 = vrot.slane %v7020_v9, 5 }
 0x243   :  { %v6959_v51 = vor.u32 %v6958_v55, %v6955_v52  ;;  %v7006_v52 = vrot.slane %v7004_v32, 5  ;;  %v16541_v55 = vrot.slane %v7010_v31, 5  ;;  %v6941_v1 = vsel %vm13816_vm4, %v6936_v23, %v16475_v8 }
 0x244   :  { %v6970_v43 = vrot.slane %v6969_v14, 4  ;;  %v6998_v27 = vrot.slane %v6996_v18, 5 }
 0x245   :  { %v6960_v41 = vrot.slane %v6959_v51, 4  ;;  %v6993_v51 = vor.u32 %v6992_v2, %v16526_v44  ;;  %v7007_v57 = vor.u32 %v7006_v52, %v7003_v30  ;;  %v7017_v21 = vor.u32 %v7016_v25, %v16541_v55  ;;  %v16590_v2 = vld [vmem:[%s17894_s0 + $0x130] sm:$0xf]  ;;  %v16598_v25 = vld [vmem:[%s17894_s0 + $0x128] sm:$0x1] }
 0x246   :  { %v16483_v47 = vpop.f32.mrb[8].mxu1  ;;  %v6975_v45 = vsel %vm13816_vm4, %v6970_v43, %v6974_v4  ;;  %v7082_v62 = vshll.u32 %v16590_v2, 16 }
 0x247   :  { %17908 = vst [vmem:[#allocation8_spill] sm:$0xff] %v16483_v47  ;;  %12509 = vmatmul.mubr.msk.bf16.gmra.mrb[16].mxu0 %vm992_vm1, %v11409_v11  ;;  %v16491_v53 = vpop.f32.mrb[9].mxu1  ;;  %v6965_v8 = vsel %vm13816_vm4, %v6960_v41, %v16488_v0  ;;  %v6994_v41 = vrot.slane %v6993_v51, 4  ;;  %v7008_v7 = vrot.slane %v7007_v57, 4  ;;  %v7086_v51 = vshrl.u32 %v16590_v2, 16 }
 0x248   :  { %17909 = vst [vmem:[#allocation9_spill] sm:$0xff] %v16491_v53  ;;  %12512 = vmatprep.mubr.msk.bf16.mxu0 %vm992_vm1, %v16423_v10  ;;  %v16506_v11 = vpop.f32.mrb[10].mxu1  ;;  %v6917_v10 = vsel %vm13816_vm4, %v6912_v6, %v16444_v24  ;;  %v11361_v24 = vld [vmem:[%s17894_s0 + $0x114] sm:$0xf]  ;;  %v11413_v6 = vcombine.low %v6893_v58, %v6903_v13  ;;  %v7038_v58 = vshrl.u32 %v11362_v22, 16  ;;  %v11416_v56 = vcombine.low %v6965_v8, %v6975_v45 }
 0x249   :  { %17910 = vst [vmem:[#allocation10_spill] sm:$0xff] %v16506_v11  ;;  %v16512_v19 = vpop.f32.mrb[11].mxu1  ;;  %v7025_v59 = vshrl.u32 %v11361_v24, 16  ;;  %v11414_v48 = vcombine.low %v6917_v10, %v6927_v35  ;;  %v7028_v20 = vshll.u32 %v11361_v24, 16  ;;  %v16559_v13 = vld [vmem:[%s17894_s0 + $0x124] sm:$0xf]  ;;  %v11415_v35 = vcombine.low %v6941_v1, %v6951_v3 }
 0x24a   :  { %17911 = vst [vmem:[#allocation11_spill] sm:$0xff] %v16512_v19  ;;  %v16572_v10 = vld [vmem:[%s17894_s0 + $0x11c] sm:$0x1]  ;;  %v7058_v37 = vshll.u32 %v16559_v13, 16  ;;  %v7040_v31 = vrot.slane %v7038_v58, 4  ;;  %v7062_v33 = vshrl.u32 %v16559_v13, 16  ;;  %v6989_v58 = vsel %vm13816_vm4, %v6984_v38, %v16526_v44 }
 0x24b   :  { %v7027_v34 = vrot.slane %v7025_v59, 4  ;;  %v7030_v14 = vrot.slane %v7028_v20, 5  ;;  %v11367_v24 = vld [vmem:[%s17894_s0 + $0x12c] sm:$0xf]  ;;  %v7044_v43 = vshll.u32 %v16572_v10, 16  ;;  %v6999_v8 = vsel %vm13816_vm4, %v6994_v41, %v6998_v27 }
 0x24c   :  { %v16600_v1 = vrot.slane %v7058_v37, 5  ;;  %v7064_v3 = vrot.slane %v7062_v33, 4  ;;  %v7073_v18 = vshrl.u32 %v11367_v24, 16  ;;  %v7013_v9 = vsel %vm13816_vm4, %v7008_v7, %v16541_v55  ;;  %v16626_v44 = vld [vmem:[%s17894_s0 + $0x13c] sm:$0xf] }
 0x24d   :  { %v7031_v52 = vor.u32 %v7030_v14, %v7027_v34  ;;  %v16620_v57 = vrot.slane %v7044_v43, 5  ;;  %v16636_v27 = vld [vmem:[%s17894_s0 + $0x134] sm:$0x1]  ;;  %v16640_v41 = vrot.slane %v7082_v62, 5  ;;  %v7110_v7 = vshrl.u32 %v16626_v44, 16 }
 0x24e   :  { %v16531_v12 = vpop.f32.mrb[12].mxu1  ;;  %v7065_v55 = vor.u32 %v7064_v3, %v16600_v1  ;;  %v7092_v62 = vshll.u32 %v16636_v27, 16 }
 0x24f   :  { %17912 = vst [vmem:[#allocation12_spill] sm:$0xff] %v16531_v12  ;;  %12513 = vmatmul.mubr.msk.bf16.gmra.mrb[20].mxu0 %vm992_vm1, %v11411_v17  ;;  %v16539_v15 = vpop.f32.mrb[13].mxu1  ;;  %v11364_v17 = vld [vmem:[%s17894_s0 + $0x120] sm:$0xf]  ;;  %v16628_v34 = vrot.slane %v7031_v52, 4 }
 0x250   :  { %17913 = vst [vmem:[#allocation13_spill] sm:$0xff] %v16539_v15  ;;  %12516 = vmatprep.mubr.msk.bf16.mxu0 %vm992_vm1, %v11412_v5  ;;  %v16544_v16 = vpop.f32.mrb[14].mxu1  ;;  %v7034_v5 = vshll.u32 %v11362_v22, 16  ;;  %v7049_v26 = vshrl.u32 %v11364_v17, 16  ;;  %v7052_v0 = vshll.u32 %v11364_v17, 16  ;;  %v7018_v22 = vrot.slane %v7017_v21, 4 }
 0x251   :  { %17914 = vst [vmem:[#allocation14_spill] sm:$0xff] %v16544_v16  ;;  %v16552_v40 = vpop.f32.mrb[15].mxu1  ;;  %v7068_v21 = vshll.u32 %v16598_v25, 16 }
 0x252   :  { %17915 = vst [vmem:[#allocation15_spill] sm:$0xff] %v16552_v40  ;;  %v16575_v32 = vrot.slane %v7034_v5, 5  ;;  %v7051_v59 = vrot.slane %v7049_v26, 4  ;;  %v7076_v5 = vshll.u32 %v11367_v24, 16  ;;  %v7023_v45 = vsel %vm13816_vm4, %v7018_v22, %v7022_v42 }
 0x253   :  { %v7088_v42 = vrot.slane %v7086_v51, 4  ;;  %v7106_v24 = vshll.u32 %v16626_v44, 16  ;;  %v11417_v22 = vcombine.low %v6989_v58, %v6999_v8  ;;  %v16647_v52 = vrot.slane %v7068_v21, 5  ;;  %v16674_v51 = vld [vmem:[%s17894_s0 + $0x140] sm:$0x1] }
 0x254   :  { %v7041_v17 = vor.u32 %v7040_v31, %v16575_v32  ;;  %v7075_v31 = vrot.slane %v7073_v18, 4  ;;  %v7078_v33 = vrot.slane %v7076_v5, 5  ;;  %v7037_v58 = vsel %vm13816_vm4, %v16628_v34, %v16575_v32 }
 0x255   :  { %v7089_v32 = vor.u32 %v7088_v42, %v16640_v41  ;;  %v16680_v21 = vrot.slane %v7106_v24, 5  ;;  %v7112_v34 = vrot.slane %v7110_v7, 4  ;;  %v16692_v24 = vrot.slane %v7092_v62, 5  ;;  %v16697_v7 = vld [vmem:[%s17894_s0 + $0x14c] sm:$0x1] }
 0x256   :  { %v16578_v23 = vpop.f32.mrb[16].mxu1  ;;  %v16630_v37 = vrot.slane %v7041_v17, 4  ;;  %v11418_v17 = vcombine.low %v7013_v9, %v7023_v45  ;;  %v7079_v8 = vor.u32 %v7078_v33, %v7075_v31  ;;  %v11376_v9 = vld [vmem:[%s17894_s0 + $0x150] sm:$0xf]  ;;  %v7066_v45 = vrot.slane %v7065_v55, 4 }
 0x257   :  { %17916 = vst [vmem:[#allocation16_spill] sm:$0xff] %v16578_v23  ;;  %12517 = vmatmul.mubr.msk.bf16.gmra.mrb[24].mxu0 %vm992_vm1, %v11413_v6  ;;  %v16584_v4 = vpop.f32.mrb[17].mxu1  ;;  %v7054_v6 = vrot.slane %v7052_v0, 5  ;;  %v7116_v33 = vshll.u32 %v16674_v51, 16  ;;  %v7145_v55 = vshrl.u32 %v11376_v9, 16  ;;  %v7113_v62 = vor.u32 %v7112_v34, %v16680_v21 }
 0x258   :  { %17917 = vst [vmem:[#allocation17_spill] sm:$0xff] %v16584_v4  ;;  %12520 = vmatprep.mubr.msk.bf16.mxu0 %vm992_vm1, %v11414_v48  ;;  %v16593_v30 = vpop.f32.mrb[18].mxu1  ;;  %v11370_v48 = vld [vmem:[%s17894_s0 + $0x138] sm:$0xf]  ;;  %v16690_v42 = vrot.slane %v7079_v8, 4  ;;  %v16709_v8 = vrot.slane %v7089_v32, 4 }
 0x259   :  { %17918 = vst [vmem:[#allocation18_spill] sm:$0xff] %v16593_v30  ;;  %v16602_v20 = vpop.f32.mrb[19].mxu1  ;;  %v7055_v14 = vor.u32 %v7054_v6, %v7051_v59  ;;  %v7097_v26 = vshrl.u32 %v11370_v48, 16  ;;  %v7100_v0 = vshll.u32 %v11370_v48, 16  ;;  %v11373_v59 = vld [vmem:[%s17894_s0 + $0x144] sm:$0xf] }
 0x25a   :  { %17919 = vst [vmem:[#allocation19_spill] sm:$0xff] %v16602_v20  ;;  %v7118_v20 = vrot.slane %v7116_v33, 5  ;;  %v7147_v30 = vrot.slane %v7145_v55, 4 }
 0x25b   :  { %v7056_v3 = vrot.slane %v7055_v14, 4  ;;  %v7099_v18 = vrot.slane %v7097_v26, 4  ;;  %v7102_v5 = vrot.slane %v7100_v0, 5  ;;  %v7121_v14 = vshrl.u32 %v11373_v59, 16 }
 0x25c   :  { %v7124_v26 = vshll.u32 %v11373_v59, 16 }
 0x25d   :  { %v7103_v31 = vor.u32 %v7102_v5, %v7099_v18  ;;  %v7061_v18 = vsel %vm13816_vm4, %v7056_v3, %v16600_v1  ;;  %v7071_v5 = vsel %vm13816_vm4, %v7066_v45, %v16647_v52  ;;  %v7123_v3 = vrot.slane %v7121_v14, 4 }
 0x25e   :  { %v16638_v38 = vpop.f32.mrb[20].mxu1  ;;  %v7114_v14 = vrot.slane %v7113_v62, 4 }
 0x25f   :  { %17920 = vst [vmem:[#allocation20_spill] sm:$0xff] %v16638_v38  ;;  %12521 = vmatmul.mubr.msk.bf16.gmra.mrb[28].mxu0 %vm992_vm1, %v11415_v35  ;;  %v16645_v43 = vpop.f32.mrb[21].mxu1  ;;  %v16658_v35 = vld [vmem:[%s17894_s0 + $0x148] sm:$0xf]  ;;  %v7126_v38 = vrot.slane %v7124_v26, 5  ;;  %v7104_v34 = vrot.slane %v7103_v31, 4  ;;  %v11420_v31 = vcombine.low %v7061_v18, %v7071_v5 }
 0x260   :  { %17921 = vst [vmem:[#allocation21_spill] sm:$0xff] %v16645_v43  ;;  %12524 = vmatprep.mubr.msk.bf16.mxu0 %vm992_vm1, %v11416_v56  ;;  %v16653_v6 = vpop.f32.mrb[22].mxu1  ;;  %v7047_v56 = vsel %vm13816_vm4, %v16630_v37, %v16620_v57  ;;  %v16685_v57 = vld [vmem:[%s17894_s0 + $0x154] sm:$0xf]  ;;  %v7130_v0 = vshll.u32 %v16658_v35, 16  ;;  %v7134_v37 = vshrl.u32 %v16658_v35, 16 }
 0x261   :  { %17922 = vst [vmem:[#allocation22_spill] sm:$0xff] %v16653_v6  ;;  %v16660_v48 = vpop.f32.mrb[23].mxu1  ;;  %v7154_v59 = vshll.u32 %v16685_v57, 16  ;;  %v7158_v6 = vshrl.u32 %v16685_v57, 16  ;;  %v7140_v26 = vshll.u32 %v16697_v7, 16  ;;  %v7127_v33 = vor.u32 %v7126_v38, %v7123_v3 }
 0x262   :  { %17923 = vst [vmem:[#allocation23_spill] sm:$0xff] %v16660_v48  ;;  %v7148_v48 = vshll.u32 %v11376_v9, 16  ;;  %v11379_v9 = vld [vmem:[%s17894_s0 + $0x15c] sm:$0xf]  ;;  %v16723_v52 = vrot.slane %v7130_v0, 5  ;;  %v7136_v45 = vrot.slane %v7134_v37, 4  ;;  %v7109_v62 = vsel %vm13816_vm4, %v7104_v34, %v16680_v21 }
 0x263   :  { %v16730_v40 = vrot.slane %v7154_v59, 5  ;;  %v7169_v16 = vshrl.u32 %v11379_v9, 16  ;;  %v7095_v59 = vsel %vm13816_vm4, %v16709_v8, %v16692_v24  ;;  %v11382_v38 = vld [vmem:[%s17894_s0 + $0x168] sm:$0xf]  ;;  %v16769_v21 = vld [vmem:[%s17894_s0 + $0x164] sm:$0x1] }
 0x264   :  { %v7150_v4 = vrot.slane %v7148_v48, 5  ;;  %v11419_v48 = vcombine.low %v7037_v58, %v7047_v56  ;;  %v7137_v55 = vor.u32 %v7136_v45, %v16723_v52  ;;  %v7193_v45 = vshrl.u32 %v11382_v38, 16 }
 0x265   :  { %v7171_v18 = vrot.slane %v7169_v16, 4  ;;  %v7196_v34 = vshll.u32 %v11382_v38, 16 }
 0x266   :  { %v16701_v43 = vpop.f32.mrb[24].mxu1  ;;  %v7138_v3 = vrot.slane %v7137_v55, 4 }
 0x267   :  { %17924 = vst [vmem:[#allocation24_spill] sm:$0xff] %v16701_v43  ;;  %v16718_v43 = vld [vmem:[%s17894_s0 + $0x160] sm:$0xf]  ;;  %12525 = vmatmul.mubr.msk.bf16.gmra.mrb[32].mxu0 %vm992_vm1, %v11417_v22  ;;  %v16721_v1 = vpop.f32.mrb[25].mxu1  ;;  %v7160_v22 = vrot.slane %v7158_v6, 4  ;;  %v7085_v6 = vsel %vm13816_vm4, %v16690_v42, %v16640_v41 }
 0x268   :  { %17925 = vst [vmem:[#allocation25_spill] sm:$0xff] %v16721_v1  ;;  %12528 = vmatprep.mubr.msk.bf16.mxu0 %vm992_vm1, %v11418_v17  ;;  %v16726_v32 = vpop.f32.mrb[26].mxu1  ;;  %v7172_v1 = vshll.u32 %v11379_v9, 16  ;;  %v16736_v17 = vld [vmem:[%s17894_s0 + $0x158] sm:$0x1]  ;;  %v7178_v0 = vshll.u32 %v16718_v43, 16  ;;  %v7151_v9 = vor.u32 %v7150_v4, %v7147_v30  ;;  %v7119_v4 = vsel %vm13816_vm4, %v7114_v14, %v7118_v20 }
 0x269   :  { %17926 = vst [vmem:[#allocation26_spill] sm:$0xff] %v16726_v32  ;;  %v16728_v23 = vpop.f32.mrb[27].mxu1  ;;  %v7182_v37 = vshrl.u32 %v16718_v43, 16  ;;  %v7161_v58 = vor.u32 %v7160_v22, %v16730_v40  ;;  %v7164_v56 = vshll.u32 %v16736_v17, 16  ;;  %v16760_v42 = vld [vmem:[%s17894_s0 + $0x16c] sm:$0xf]  ;;  %v11421_v55 = vcombine.low %v7085_v6, %v7095_v59 }
 0x26a   :  { %17927 = vst [vmem:[#allocation27_spill] sm:$0xff] %v16728_v23  ;;  %v7174_v41 = vrot.slane %v7172_v1, 5  ;;  %v7142_v30 = vrot.slane %v7140_v26, 5  ;;  %v16771_v5 = vrot.slane %v7178_v0, 5  ;;  %v7128_v1 = vrot.slane %v7127_v33, 4 }
 0x26b   :  { %v7184_v16 = vrot.slane %v7182_v37, 4  ;;  %v7152_v22 = vrot.slane %v7151_v9, 4  ;;  %v7202_v14 = vshll.u32 %v16760_v42, 16  ;;  %v7206_v26 = vshrl.u32 %v16760_v42, 16  ;;  %v11385_v33 = vld [vmem:[%s17894_s0 + $0x174] sm:$0xf] }
 0x26c   :  { %v7162_v37 = vrot.slane %v7161_v58, 4  ;;  %v16791_v9 = vld [vmem:[%s17894_s0 + $0x178] sm:$0xf]  ;;  %v7133_v58 = vsel %vm13816_vm4, %v7128_v1, %v16723_v52  ;;  %v7195_v6 = vrot.slane %v7193_v45, 4  ;;  %v7198_v59 = vrot.slane %v7196_v34, 5 }
 0x26d   :  { %v7185_v38 = vor.u32 %v7184_v16, %v16771_v5  ;;  %v7217_v16 = vshrl.u32 %v11385_v33, 16  ;;  %v16811_v52 = vld [vmem:[%s17894_s0 + $0x184] sm:$0xf] }
 0x26e   :  { %v16762_v24 = vpop.f32.mrb[28].mxu1  ;;  %v7250_v32 = vshll.u32 %v16811_v52, 16 }
 0x26f   :  { %17928 = vst [vmem:[#allocation28_spill] sm:$0xff] %v16762_v24  ;;  %12529 = vmatmul.mubr.msk.bf16.gmra.mrb[36].mxu0 %vm992_vm1, %v11419_v48  ;;  %v16774_v8 = vpop.f32.mrb[29].mxu1  ;;  %v7166_v24 = vrot.slane %v7164_v56, 5  ;;  %v7175_v48 = vor.u32 %v7174_v41, %v7171_v18  ;;  %v7143_v56 = vsel %vm13816_vm4, %v7138_v3, %v7142_v30  ;;  %v16801_v18 = vld [vmem:[%s17894_s0 + $0x170] sm:$0x1]  ;;  %v16806_v41 = vrot.slane %v7202_v14, 5 }
 0x270   :  { %17929 = vst [vmem:[#allocation29_spill] sm:$0xff] %v16774_v8  ;;  %12532 = vmatprep.mubr.msk.bf16.mxu0 %vm992_vm1, %v11420_v31  ;;  %v16777_v20 = vpop.f32.mrb[30].mxu1  ;;  %v7188_v8 = vshll.u32 %v16769_v21, 16  ;;  %v11422_v31 = vcombine.low %v7109_v62, %v7119_v4  ;;  %v11388_v62 = vld [vmem:[%s17894_s0 + $0x180] sm:$0xf]  ;;  %v7208_v4 = vrot.slane %v7206_v26, 4  ;;  %v7157_v30 = vsel %vm13816_vm4, %v7152_v22, %v16730_v40 }
 0x271   :  { %17930 = vst [vmem:[#allocation30_spill] sm:$0xff] %v16777_v20  ;;  %v16781_v0 = vpop.f32.mrb[31].mxu1  ;;  %v7167_v1 = vsel %vm13816_vm4, %v7162_v37, %v7166_v24  ;;  %v7176_v3 = vrot.slane %v7175_v48, 4  ;;  %v7186_v34 = vrot.slane %v7185_v38, 4  ;;  %v7212_v14 = vshll.u32 %v16801_v18, 16 }
 0x272   :  { %17931 = vst [vmem:[#allocation31_spill] sm:$0xff] %v16781_v0  ;;  %v7220_v0 = vshll.u32 %v11385_v33, 16  ;;  %v7190_v45 = vrot.slane %v7188_v8, 5  ;;  %v7226_v26 = vshll.u32 %v16791_v9, 16  ;;  %v7230_v33 = vshrl.u32 %v16791_v9, 16 }
 0x273   :  { %v7241_v20 = vshrl.u32 %v11388_v62, 16  ;;  %v7244_v23 = vshll.u32 %v11388_v62, 16  ;;  %v7254_v40 = vshrl.u32 %v16811_v52, 16  ;;  %v7199_v24 = vor.u32 %v7198_v59, %v7195_v6 }
 0x274   :  { %v7209_v8 = vor.u32 %v7208_v4, %v16806_v41  ;;  %v7219_v22 = vrot.slane %v7217_v16, 4  ;;  %v7222_v37 = vrot.slane %v7220_v0, 5  ;;  %v11423_v48 = vcombine.low %v7133_v58, %v7143_v56  ;;  %v11391_v0 = vld [vmem:[%s17894_s0 + $0x18c] sm:$0xf] }
 0x275   :  { %v11424_v38 = vcombine.low %v7157_v30, %v7167_v1  ;;  %v7181_v15 = vsel %vm13816_vm4, %v7176_v3, %v16771_v5  ;;  %v7191_v62 = vsel %vm13816_vm4, %v7186_v34, %v7190_v45  ;;  %v16836_v6 = vrot.slane %v7226_v26, 5  ;;  %v16844_v5 = vld [vmem:[%s17894_s0 + $0x188] sm:$0x1]  ;;  %v16852_v34 = vld [vmem:[%s17894_s0 + $0x190] sm:$0xf] }
 0x276   :  { %v7232_v59 = vrot.slane %v7230_v33, 4  ;;  %v7243_v58 = vrot.slane %v7241_v20, 4  ;;  %v7246_v56 = vrot.slane %v7244_v23, 5  ;;  %v16846_v4 = vrot.slane %v7250_v32, 5  ;;  %v11394_v26 = vld [vmem:[%s17894_s0 + $0x198] sm:$0xf] }
 0x277   :  { %12533 = vmatmul.mubr.msk.bf16.gmra.mrb[40].mxu0 %vm992_vm1, %v11421_v55  ;;  %v16832_v55 = vld [vmem:[%s17894_s0 + $0x17c] sm:$0x1]  ;;  %v7256_v16 = vrot.slane %v7254_v40, 4  ;;  %v7200_v30 = vrot.slane %v7199_v24, 4  ;;  %v7210_v1 = vrot.slane %v7209_v8, 4  ;;  %v7223_v3 = vor.u32 %v7222_v37, %v7219_v22 }
 0x278   :  { %12536 = vmatprep.mubr.msk.bf16.mxu0 %vm992_vm1, %v11422_v31  ;;  %v7214_v31 = vrot.slane %v7212_v14, 5  ;;  %v7236_v45 = vshll.u32 %v16832_v55, 16  ;;  %v11425_v14 = vcombine.low %v7181_v15, %v7191_v62  ;;  %v7233_v23 = vor.u32 %v7232_v59, %v16836_v6  ;;  %v16862_v40 = vld [vmem:[%s17894_s0 + $0x19c] sm:$0xf] }
 0x279   :  { %v7260_v32 = vshll.u32 %v16844_v5, 16  ;;  %v7265_v20 = vshrl.u32 %v11391_v0, 16  ;;  %v7268_v33 = vshll.u32 %v11391_v0, 16  ;;  %v7247_v24 = vor.u32 %v7246_v56, %v7243_v58 }
 0x27a   :  { %v7257_v15 = vor.u32 %v7256_v16, %v16846_v4  ;;  %v7274_v8 = vshll.u32 %v16852_v34, 16  ;;  %v7278_v22 = vshrl.u32 %v16852_v34, 16  ;;  %v7205_v37 = vsel %vm13816_vm4, %v7200_v30, %v16806_v41  ;;  %v11397_v30 = vld [vmem:[%s17894_s0 + $0x1a4] sm:$0xf] }
 0x27b   :  { %v7215_v62 = vsel %vm13816_vm4, %v7210_v1, %v7214_v31  ;;  %v7224_v59 = vrot.slane %v7223_v3, 4  ;;  %v7238_v0 = vrot.slane %v7236_v45, 5  ;;  %v7289_v12 = vshrl.u32 %v11394_v26, 16  ;;  %v16879_v31 = vld [vmem:[%s17894_s0 + $0x194] sm:$0x1] }
 0x27c   :  { %v7298_v58 = vshll.u32 %v16862_v40, 16  ;;  %v7302_v56 = vshrl.u32 %v16862_v40, 16  ;;  %v7234_v16 = vrot.slane %v7233_v23, 4  ;;  %v7262_v19 = vrot.slane %v7260_v32, 5  ;;  %v16887_v23 = vld [vmem:[%s17894_s0 + $0x1a8] sm:$0xf] }
 0x27d   :  { %v7267_v11 = vrot.slane %v7265_v20, 4  ;;  %v7270_v53 = vrot.slane %v7268_v33, 5  ;;  %v7258_v47 = vrot.slane %v7257_v15, 4  ;;  %v7276_v36 = vrot.slane %v7274_v8, 5 }
 0x27e   :  { %v7280_v28 = vrot.slane %v7278_v22, 4  ;;  %v11426_v41 = vcombine.low %v7205_v37, %v7215_v62  ;;  %v7291_v1 = vrot.slane %v7289_v12, 4  ;;  %v7300_v45 = vrot.slane %v7298_v58, 5  ;;  %v16897_v12 = vld [vmem:[%s17894_s0 + $0x1a0] sm:$0x1] }
 0x27f   :  { %12537 = vmatmul.mubr.msk.bf16.gmra.mrb[44].mxu0 %vm992_vm1, %v11423_v48  ;;  %v7292_v48 = vshll.u32 %v11394_v26, 16  ;;  %v7304_v26 = vrot.slane %v7302_v56, 4  ;;  %v7229_v32 = vsel %vm13816_vm4, %v7224_v59, %v16836_v6  ;;  %v7239_v20 = vsel %vm13816_vm4, %v7234_v16, %v7238_v0 }
 0x280   :  { %12540 = vmatprep.mubr.msk.bf16.mxu0 %vm992_vm1, %v11424_v38  ;;  %v7248_v38 = vrot.slane %v7247_v24, 4  ;;  %v7271_v33 = vor.u32 %v7270_v53, %v7267_v11  ;;  %v7263_v15 = vsel %vm13816_vm4, %v7258_v47, %v7262_v19  ;;  %v7281_v8 = vor.u32 %v7280_v28, %v7276_v36 }
 0x281   :  { %v7294_v3 = vrot.slane %v7292_v48, 5  ;;  %v7284_v6 = vshll.u32 %v16879_v31, 16  ;;  %v7313_v53 = vshrl.u32 %v11397_v30, 16  ;;  %v7316_v11 = vshll.u32 %v11397_v30, 16 }
 0x282   :  { %v7253_v24 = vsel %vm13816_vm4, %v7248_v38, %v16846_v4  ;;  %v7322_v22 = vshll.u32 %v16887_v23, 16  ;;  %v7326_v37 = vshrl.u32 %v16887_v23, 16  ;;  %v7308_v59 = vshll.u32 %v16897_v12, 16 }
 0x283   :  { %v7295_v62 = vor.u32 %v7294_v3, %v7291_v1  ;;  %v11427_v0 = vcombine.low %v7229_v32, %v7239_v20  ;;  %v11428_v4 = vcombine.low %v7253_v24, %v7263_v15  ;;  %v7272_v48 = vrot.slane %v7271_v33, 4  ;;  %v13646_v15 = vld [vmem:[%s17894_s0 + $0x1c] sm:$0xf] }
 0x284   :  { %v7282_v58 = vrot.slane %v7281_v8, 4  ;;  %v7286_v47 = vrot.slane %v7284_v6, 5  ;;  %v7315_v28 = vrot.slane %v7313_v53, 4  ;;  %v7318_v19 = vrot.slane %v7316_v11, 5  ;;  %v11464_v8 = vld [vmem:[%s17894_s0 + $0x18] sm:$0xe] }
 0x285   :  { %v7324_v56 = vrot.slane %v7322_v22, 5  ;;  %v7328_v16 = vrot.slane %v7326_v37, 4  ;;  %v7296_v38 = vrot.slane %v7295_v62, 4  ;;  %v7310_v30 = vrot.slane %v7308_v59, 5 }
 0x286   :  { %v7277_v1 = vsel %vm13816_vm4, %v7272_v48, %v7276_v36  ;;  %v7287_v3 = vsel %vm13816_vm4, %v7282_v58, %v7286_v47  ;;  %v7332_v20 = vshll.u32 %v16913_v54, 16  ;;  %v8015_v36 = vrot.slane %v13646_v15, 5  ;;  %v13648_v48 = vld [vmem:[%s17894_s0 + $0x28] sm:$0xf] }
 0x287   :  { %12541 = vmatmul.mubr.msk.bf16.gmra.mrb[48].mxu0 %vm992_vm1, %v11425_v14  ;;  %v7305_v14 = vor.u32 %v7304_v26, %v7300_v45  ;;  %v7319_v26 = vor.u32 %v7318_v19, %v7315_v28  ;;  %v7329_v32 = vor.u32 %v7328_v16, %v7324_v56  ;;  %v7301_v33 = vsel %vm13816_vm4, %v7296_v38, %v7300_v45  ;;  %v13647_v45 = vld [vmem:[%s17894_s0 + $0x20] sm:$0x1]  ;;  %v11465_v19 = vld [vmem:[%s17894_s0 + $0x24] sm:$0xe]  ;;  %v11466_v16 = vld [vmem:[%s17894_s0 + $0x30] sm:$0xe] }
 0x288   :  { %12544 = vmatprep.mubr.msk.bf16.mxu0 %vm992_vm1, %v11426_v41  ;;  %v11429_v6 = vcombine.low %v7277_v1, %v7287_v3  ;;  %v7334_v37 = vrot.slane %v7332_v20, 5  ;;  %v11496_v62 = vrot.slane %v11464_v8, 9  ;;  %v8018_v59 = vrot.slane %v13647_v45, 5  ;;  %v13650_v3 = vld [vmem:[%s17894_s0 + $0x2c] sm:$0x1] }
 0x289   :  { %v7306_v41 = vrot.slane %v7305_v14, 4  ;;  %v7320_v11 = vrot.slane %v7319_v26, 4  ;;  %v7330_v22 = vrot.slane %v7329_v32, 4  ;;  %v8017_v14 = vrot.slane %v8015_v36, 4  ;;  %v13652_v8 = vld [vmem:[%s17894_s0 + $0x40] sm:$0xf] }
 0x28a   :  { %v8022_v58 = vrot.slane %v13648_v48, 5  ;;  %v8016_v47 = vsel %vm14893_vm7, %v11496_v62, %v8015_v36  ;;  %v8025_v26 = vrot.slane %v13650_v3, 5  ;;  %v11498_v32 = vrot.slane %v11466_v16, 9  ;;  %v13654_v48 = vld [vmem:[%s17894_s0 + $0x44] sm:$0x1] }
 0x28b   :  { %v7311_v24 = vsel %vm13816_vm4, %v7306_v41, %v7310_v30  ;;  %v8019_v28 = vsel %vm14893_vm7, %v8017_v14, %v8018_v59  ;;  %v11497_v30 = vrot.slane %v11465_v19, 9  ;;  %v11468_v14 = vld [vmem:[%s17894_s0 + $0x48] sm:$0xe]  ;;  %v13655_v19 = vld [vmem:[%s17894_s0 + $0x50] sm:$0x1] }
 0x28c   :  { %v11430_v53 = vcombine.low %v7301_v33, %v7311_v24  ;;  %v11528_v41 = vcombine.low %v8016_v47, %v8019_v28  ;;  %v8024_v1 = vrot.slane %v8022_v58, 4  ;;  %v13651_v33 = vld [vmem:[%s17894_s0 + $0x38] sm:$0x1]  ;;  %v11500_v47 = vrot.slane %v11468_v14, 9  ;;  %v11469_v3 = vld [vmem:[%s17894_s0 + $0x54] sm:$0xe] }
 0x28d   :  { %v8032_v24 = vrot.slane %v13651_v33, 5  ;;  %v8023_v15 = vsel %vm14893_vm7, %v11497_v30, %v8022_v58  ;;  %v8039_v58 = vrot.slane %v13654_v48, 5  ;;  %v11471_v48 = vld [vmem:[%s17894_s0 + $0x6c] sm:$0xe] }
 0x28e   :  { %v8026_v36 = vsel %vm14893_vm7, %v8024_v1, %v8025_v26  ;;  %v13657_v26 = vld [vmem:[%s17894_s0 + $0x64] sm:$0xf] }
 0x28f   :  { %12545 = vmatmul.mubr.msk.bf16.gmra.mrb[52].mxu0 %vm992_vm1, %v11427_v0  ;;  %v7325_v0 = vsel %vm13816_vm4, %v7320_v11, %v7324_v56  ;;  %v8029_v56 = vrot.slane %v13649_v29, 5  ;;  %v11529_v45 = vcombine.low %v8023_v15, %v8026_v36  ;;  %v8046_v29 = vrot.slane %v13655_v19, 5 }
 0x290   :  { %12548 = vmatprep.mubr.msk.bf16.mxu0 %vm992_vm1, %v11428_v4  ;;  %v7335_v4 = vsel %vm13816_vm4, %v7330_v22, %v7334_v37  ;;  %v11467_v22 = vld [vmem:[%s17894_s0 + $0x3c] sm:$0xe]  ;;  %v13653_v37 = vld [vmem:[%s17894_s0 + $0x4c] sm:$0xf]  ;;  %v11501_v15 = vrot.slane %v11469_v3, 9 }
 0x291   :  { %v11431_v38 = vcombine.low %v7325_v0, %v7335_v4  ;;  %v8031_v20 = vrot.slane %v8029_v56, 4  ;;  %v8043_v62 = vrot.slane %v13653_v37, 5  ;;  %v11499_v0 = vrot.slane %v11467_v22, 9  ;;  %v13659_v22 = vld [vmem:[%s17894_s0 + $0x68] sm:$0x1] }
 0x292   :  { %v8060_v37 = vrot.slane %v13659_v22, 5  ;;  %v13663_v3 = vld [vmem:[%s17894_s0 + $0x80] sm:$0x1]  ;;  %v11473_v22 = vld [vmem:[%s17894_s0 + $0x84] sm:$0xe] }
 0x293   :  { %v8033_v11 = vsel %vm14893_vm7, %v8031_v20, %v8032_v24  ;;  %v8045_v28 = vrot.slane %v8043_v62, 4  ;;  %v8044_v30 = vsel %vm14893_vm7, %v11500_v47, %v8043_v62  ;;  %v11470_v20 = vld [vmem:[%s17894_s0 + $0x60] sm:$0xe] }
 0x295   :  { %v8047_v1 = vsel %vm14893_vm7, %v8045_v28, %v8046_v29  ;;  %v11472_v28 = vld [vmem:[%s17894_s0 + $0x78] sm:$0xe] }
 0x296   :  { %v11532_v24 = vcombine.low %v8044_v30, %v8047_v1  ;;  %v11504_v30 = vrot.slane %v11472_v28, 9 }
 0x297   :  { %12549 = vmatmul.mubr.msk.bf16.gmra.mrb[56].mxu0 %vm992_vm1, %v11429_v6  ;;  %v8036_v6 = vrot.slane %v13652_v8, 5  ;;  %v13658_v8 = vld [vmem:[%s17894_s0 + $0x5c] sm:$0x1] }
 0x298   :  { %12552 = vmatprep.mubr.msk.bf16.mxu0 %vm992_vm1, %v11430_v53  ;;  %v8030_v53 = vsel %vm14893_vm7, %v11498_v32, %v8029_v56  ;;  %v8057_v32 = vrot.slane %v13657_v26, 5  ;;  %v8074_v26 = vrot.slane %v13663_v3, 5 }
 0x299   :  { %v11530_v59 = vcombine.low %v8030_v53, %v8033_v11  ;;  %v8038_v4 = vrot.slane %v8036_v6, 4  ;;  %v8037_v56 = vsel %vm14893_vm7, %v11499_v0, %v8036_v6  ;;  %v8053_v6 = vrot.slane %v13658_v8, 5 }
 0x29a   :  { %v11502_v53 = vrot.slane %v11470_v20, 9  ;;  %v8059_v11 = vrot.slane %v8057_v32, 4 }
 0x29b   :  { %v8040_v16 = vsel %vm14893_vm7, %v8038_v4, %v8039_v58  ;;  %v13661_v58 = vld [vmem:[%s17894_s0 + $0x7c] sm:$0xf] }
 0x29c   :  { %v11531_v33 = vcombine.low %v8037_v56, %v8040_v16  ;;  %v8058_v0 = vsel %vm14893_vm7, %v11502_v53, %v8057_v32  ;;  %v8061_v4 = vsel %vm14893_vm7, %v8059_v11, %v8060_v37  ;;  %v8071_v47 = vrot.slane %v13661_v58, 5  ;;  %v13665_v37 = vld [vmem:[%s17894_s0 + $0x94] sm:$0xf] }
 0x29d   :  { %v11534_v29 = vcombine.low %v8058_v0, %v8061_v4  ;;  %v11503_v56 = vrot.slane %v11471_v48, 9  ;;  %v11505_v0 = vrot.slane %v11473_v22, 9  ;;  %v13666_v48 = vld [vmem:[%s17894_s0 + $0x8c] sm:$0x1] }
 0x29e   :  { %v8073_v1 = vrot.slane %v8071_v47, 4  ;;  %v8072_v53 = vsel %vm14893_vm7, %v11504_v30, %v8071_v47  ;;  %v8081_v58 = vrot.slane %v13666_v48, 5  ;;  %v13671_v48 = vld [vmem:[%s17894_s0 + $0xb0] sm:$0x1] }
 0x29f   :  { %12553 = vmatmul.mubr.msk.bf16.gmra.mrb[60].mxu0 %vm992_vm1, %v11431_v38  ;;  %v13656_v38 = vld [vmem:[%s17894_s0 + $0x58] sm:$0xf] }
 0x2a0   :  { %12558 = vmatprep.mubr.msk.bf16.mxu0 %vm992_vm1, %v11528_v41  ;;  %v8050_v41 = vrot.slane %v13656_v38, 5  ;;  %v13662_v38 = vld [vmem:[%s17894_s0 + $0x74] sm:$0x1]  ;;  %v8075_v11 = vsel %vm14893_vm7, %v8073_v1, %v8074_v26  ;;  %v13668_v1 = vld [vmem:[%s17894_s0 + $0xa0] sm:$0xf] }
 0x2a1   :  { %v8092_v3 = vrot.slane %v13668_v1, 5 }
 0x2a2   :  { %v8052_v36 = vrot.slane %v8050_v41, 4  ;;  %v8051_v62 = vsel %vm14893_vm7, %v11501_v15, %v8050_v41  ;;  %v8067_v41 = vrot.slane %v13662_v38, 5 }
 0x2a4   :  { %v8054_v14 = vsel %vm14893_vm7, %v8052_v36, %v8053_v6  ;;  %v13664_v36 = vld [vmem:[%s17894_s0 + $0x88] sm:$0xf] }
 0x2a5   :  { %v11533_v19 = vcombine.low %v8051_v62, %v8054_v14  ;;  %v8078_v8 = vrot.slane %v13664_v36, 5  ;;  %v8085_v62 = vrot.slane %v13665_v37, 5  ;;  %v11474_v14 = vld [vmem:[%s17894_s0 + $0x90] sm:$0xe]  ;;  %v11475_v36 = vld [vmem:[%s17894_s0 + $0x9c] sm:$0xe] }
 0x2a6   :  { %v11506_v47 = vrot.slane %v11474_v14, 9  ;;  %v11507_v14 = vrot.slane %v11475_v36, 9 }
 0x2a7   :  { %12559 = vmatmul.mubr.msk.bf16.vlgmr.msra.gmra.mrb[0].mxu0 %vm992_vm1, %v11529_v45  ;;  %v13660_v45 = vld [vmem:[%s17894_s0 + $0x70] sm:$0xf]  ;;  %v8080_v4 = vrot.slane %v8078_v8, 4  ;;  %v8087_v28 = vrot.slane %v8085_v62, 4  ;;  %v8079_v38 = vsel %vm14893_vm7, %v11505_v0, %v8078_v8  ;;  %v13669_v8 = vld [vmem:[%s17894_s0 + $0xac] sm:$0xf] }
 0x2a8   :  { %12562 = vmatprep.mubr.msk.bf16.mxu0 %vm992_vm1, %v11530_v59  ;;  %v8064_v59 = vrot.slane %v13660_v45, 5 }
 0x2aa   :  { %v8066_v16 = vrot.slane %v8064_v59, 4 }
 0x2af   :  { %12563 = vmatmul.mubr.msk.bf16.gmra.mrb[4].mxu0 %vm992_vm1, %v11531_v33  ;;  %v8065_v33 = vsel %vm14893_vm7, %v11503_v56, %v8064_v59  ;;  %v11536_v59 = vcombine.low %v8072_v53, %v8075_v11  ;;  %v8099_v53 = vrot.slane %v13669_v8, 5  ;;  %v11476_v11 = vld [vmem:[%s17894_s0 + $0xa8] sm:$0xe]  ;;  %v13673_v8 = vld [vmem:[%s17894_s0 + $0xc4] sm:$0xf] }
 0x2b0   :  { %12566 = vmatprep.mubr.msk.bf16.mxu0 %vm992_vm1, %v11532_v24  ;;  %v8068_v24 = vsel %vm14893_vm7, %v8066_v16, %v8067_v41  ;;  %v8082_v41 = vsel %vm14893_vm7, %v8080_v4, %v8081_v58  ;;  %v11508_v0 = vrot.slane %v11476_v11, 9  ;;  %v8102_v58 = vrot.slane %v13671_v48, 5  ;;  %v13675_v48 = vld [vmem:[%s17894_s0 + $0xc8] sm:$0x1] }
 0x2b1   :  { %v11535_v45 = vcombine.low %v8065_v33, %v8068_v24  ;;  %v8086_v33 = vsel %vm14893_vm7, %v11506_v47, %v8085_v62  ;;  %v11537_v22 = vcombine.low %v8079_v38, %v8082_v41  ;;  %v8094_v62 = vrot.slane %v8092_v3, 4  ;;  %v13672_v41 = vld [vmem:[%s17894_s0 + $0xb8] sm:$0xf] }
 0x2b2   :  { %v8101_v4 = vrot.slane %v8099_v53, 4  ;;  %v8106_v1 = vrot.slane %v13672_v41, 5  ;;  %v8113_v11 = vrot.slane %v13673_v8, 5 }
 0x2b4   :  { %v8103_v36 = vsel %vm14893_vm7, %v8101_v4, %v8102_v58  ;;  %v8115_v4 = vrot.slane %v8113_v11, 4  ;;  %v8116_v58 = vrot.slane %v13675_v48, 5 }
 0x2b6   :  { %v17047_v32 = vpop.f32.mrb[32].mxu1 }
 0x2b7   :  { %12567 = vmatmul.mubr.msk.bf16.gmra.mrb[8].mxu0 %vm992_vm1, %v11533_v19  ;;  %v17050_v20 = vpop.f32.mrb[33].mxu1  ;;  %v13667_v19 = vld [vmem:[%s17894_s0 + $0x98] sm:$0x1] }
 0x2b8   :  { %12570 = vmatprep.mubr.msk.bf16.mxu0 %vm992_vm1, %v11534_v29  ;;  %v17057_v15 = vpop.f32.mrb[34].mxu1  ;;  %v8088_v29 = vrot.slane %v13667_v19, 5  ;;  %v8093_v19 = vsel %vm14893_vm7, %v11507_v14, %v8092_v3  ;;  %v11477_v3 = vld [vmem:[%s17894_s0 + $0xb4] sm:$0xe] }
 0x2b9   :  { %v17062_v6 = vpop.f32.mrb[35].mxu1 }
 0x2ba   :  { %v8089_v24 = vsel %vm14893_vm7, %v8087_v28, %v8088_v29 }
 0x2bb   :  { %v11538_v37 = vcombine.low %v8086_v33, %v8089_v24  ;;  %v8100_v24 = vsel %vm14893_vm7, %v11508_v0, %v8099_v53  ;;  %v8108_v53 = vrot.slane %v8106_v1, 4 }
 0x2bc   :  { %v11540_v14 = vcombine.low %v8100_v24, %v8103_v36 }
 0x2be   :  { %v17083_v56 = vpop.f32.mrb[36].mxu1 }
 0x2bf   :  { %12571 = vmatmul.mubr.msk.bf16.gmra.mrb[12].mxu0 %vm992_vm1, %v11535_v45  ;;  %v17086_v16 = vpop.f32.mrb[37].mxu1  ;;  %v13670_v45 = vld [vmem:[%s17894_s0 + $0xa4] sm:$0x1] }
 0x2c0   :  { %12574 = vmatprep.mubr.msk.bf16.mxu0 %vm992_vm1, %v11536_v59  ;;  %v17093_v30 = vpop.f32.mrb[38].mxu1  ;;  %v8095_v59 = vrot.slane %v13670_v45, 5  ;;  %v13674_v45 = vld [vmem:[%s17894_s0 + $0xbc] sm:$0x1] }
 0x2c1   :  { %v17098_v26 = vpop.f32.mrb[39].mxu1 }
 0x2c2   :  { %v8096_v29 = vsel %vm14893_vm7, %v8094_v62, %v8095_v59  ;;  %v11509_v62 = vrot.slane %v11477_v3, 9  ;;  %v8109_v59 = vrot.slane %v13674_v45, 5  ;;  %v13676_v3 = vld [vmem:[%s17894_s0 + $0xd0] sm:$0xf] }
 0x2c3   :  { %v8120_v8 = vrot.slane %v13676_v3, 5  ;;  %v11480_v45 = vld [vmem:[%s17894_s0 + $0xf0] sm:$0xe] }
 0x2c4   :  { %v8110_v24 = vsel %vm14893_vm7, %v8108_v53, %v8109_v59 }
 0x2c6   :  { %v17119_v47 = vpop.f32.mrb[40].mxu1 }
 0x2c7   :  { %12575 = vmatmul.mubr.msk.bf16.gmra.mrb[16].mxu0 %vm992_vm1, %v11537_v22  ;;  %v17122_v28 = vpop.f32.mrb[41].mxu1  ;;  %v11478_v22 = vld [vmem:[%s17894_s0 + $0xc0] sm:$0xe] }
 0x2c8   :  { %12578 = vmatprep.mubr.msk.bf16.mxu0 %vm992_vm1, %v11538_v37  ;;  %v17129_v38 = vpop.f32.mrb[42].mxu1  ;;  %v11539_v37 = vcombine.low %v8093_v19, %v8096_v29  ;;  %v11510_v0 = vrot.slane %v11478_v22, 9  ;;  %v8107_v29 = vsel %vm14893_vm7, %v11509_v62, %v8106_v1  ;;  %v11479_v1 = vld [vmem:[%s17894_s0 + $0xcc] sm:$0xe]  ;;  %v13677_v62 = vld [vmem:[%s17894_s0 + $0xf4] sm:$0xf] }
 0x2c9   :  { %v17134_v33 = vpop.f32.mrb[43].mxu1  ;;  %v8127_v53 = vrot.slane %v13677_v62, 5  ;;  %v11541_v59 = vcombine.low %v8107_v29, %v8110_v24  ;;  %v11511_v3 = vrot.slane %v11479_v1, 9 }
 0x2cb   :  { %v8121_v24 = vsel %vm14893_vm7, %v11511_v3, %v8120_v8  ;;  %v13681_v3 = vld [vmem:[%s17894_s0 + $0x10c] sm:$0xf] }
 0x2ce   :  { %v17155_v41 = vpop.f32.mrb[44].mxu1 }
 0x2cf   :  { %12579 = vmatmul.mubr.msk.bf16.gmra.mrb[20].mxu0 %vm992_vm1, %v11539_v37  ;;  %v17158_v19 = vpop.f32.mrb[45].mxu1  ;;  %v8114_v37 = vsel %vm14893_vm7, %v11510_v0, %v8113_v11  ;;  %v8122_v11 = vrot.slane %v8120_v8, 4  ;;  %v13678_v0 = vld [vmem:[%s17894_s0 + $0xd4] sm:$0x1]  ;;  %v11481_v8 = vld [vmem:[%s17894_s0 + $0xfc] sm:$0xe] }
 0x2d0   :  { %17932 = vst [vmem:[#allocation32_spill] sm:$0xff] %v17158_v19  ;;  %12582 = vmatprep.mubr.msk.bf16.mxu0 %vm992_vm1, %v11540_v14  ;;  %v17165_v36 = vpop.f32.mrb[46].mxu1  ;;  %v8117_v14 = vsel %vm14893_vm7, %v8115_v4, %v8116_v58  ;;  %v8123_v4 = vrot.slane %v13678_v0, 5  ;;  %v11512_v58 = vrot.slane %v11480_v45, 9  ;;  %v11482_v0 = vld [vmem:[%s17894_s0 + $0x108] sm:$0xe] }
 0x2d1   :  { %17933 = vst [vmem:[#allocation33_spill] sm:$0xff] %v17165_v36  ;;  %v17170_v22 = vpop.f32.mrb[47].mxu1  ;;  %v11542_v48 = vcombine.low %v8114_v37, %v8117_v14  ;;  %v13679_v36 = vld [vmem:[%s17894_s0 + $0xf8] sm:$0x1] }
 0x2d2   :  { %17934 = vst [vmem:[#allocation34_spill] sm:$0xff] %v17170_v22  ;;  %v8129_v22 = vrot.slane %v8127_v53, 4  ;;  %v8130_v62 = vrot.slane %v13679_v36, 5  ;;  %v8124_v37 = vsel %vm14893_vm7, %v8122_v11, %v8123_v4  ;;  %v13680_v36 = vld [vmem:[%s17894_s0 + $0x100] sm:$0xf]  ;;  %v8141_v11 = vrot.slane %v13681_v3, 5 }
 0x2d3   :  { %v8134_v1 = vrot.slane %v13680_v36, 5  ;;  %v11543_v4 = vcombine.low %v8121_v24, %v8124_v37 }
 0x2d6   :  { %v17191_v19 = vpop.f32.mrb[48].mxu1 }
 0x2d7   :  { %17935 = vst [vmem:[#allocation35_spill] sm:$0xff] %v17191_v19  ;;  %12583 = vmatmul.mubr.msk.bf16.gmra.mrb[24].mxu0 %vm992_vm1, %v11541_v59  ;;  %v17194_v29 = vpop.f32.mrb[49].mxu1  ;;  %v8128_v59 = vsel %vm14893_vm7, %v11512_v58, %v8127_v53  ;;  %v8136_v53 = vrot.slane %v8134_v1, 4 }
 0x2d8   :  { %17936 = vst [vmem:[#allocation36_spill] sm:$0xff] %v17194_v29  ;;  %12586 = vmatprep.mubr.msk.bf16.mxu0 %vm992_vm1, %v11542_v48  ;;  %v17201_v14 = vpop.f32.mrb[50].mxu1  ;;  %v8131_v48 = vsel %vm14893_vm7, %v8129_v22, %v8130_v62  ;;  %v13682_v22 = vld [vmem:[%s17894_s0 + $0x104] sm:$0x1]  ;;  %v11514_v62 = vrot.slane %v11482_v0, 9  ;;  %v8144_v29 = vrot.slane %v16536_v49, 5 }
 0x2d9   :  { %17937 = vst [vmem:[#allocation37_spill] sm:$0xff] %v17201_v14  ;;  %v17206_v45 = vpop.f32.mrb[51].mxu1  ;;  %v11544_v36 = vcombine.low %v8128_v59, %v8131_v48  ;;  %v8137_v58 = vrot.slane %v13682_v22, 5  ;;  %v8143_v14 = vrot.slane %v8141_v11, 4  ;;  %v13683_v49 = vld [vmem:[%s17894_s0 + $0x118] sm:$0xf] }
 0x2da   :  { %17938 = vst [vmem:[#allocation38_spill] sm:$0xff] %v17206_v45  ;;  %v11513_v45 = vrot.slane %v11481_v8, 9  ;;  %v8148_v48 = vrot.slane %v13683_v49, 5  ;;  %v8142_v0 = vsel %vm14893_vm7, %v11514_v62, %v8141_v11 }
 0x2db   :  { %v8138_v37 = vsel %vm14893_vm7, %v8136_v53, %v8137_v58 }
 0x2dc   :  { %v8135_v24 = vsel %vm14893_vm7, %v11513_v45, %v8134_v1  ;;  %v11483_v1 = vld [vmem:[%s17894_s0 + $0x114] sm:$0xe]  ;;  %v8155_v45 = vrot.slane %v16559_v13, 5  ;;  %v8150_v49 = vrot.slane %v8148_v48, 4 }
 0x2dd   :  { %v11545_v53 = vcombine.low %v8135_v24, %v8138_v37  ;;  %v11515_v58 = vrot.slane %v11483_v1, 9  ;;  %v11485_v1 = vld [vmem:[%s17894_s0 + $0x12c] sm:$0xe] }
 0x2de   :  { %v17225_v19 = vpop.f32.mrb[52].mxu1  ;;  %v8157_v62 = vrot.slane %v8155_v45, 4 }
 0x2df   :  { %12587 = vmatmul.mubr.msk.bf16.gmra.mrb[28].mxu0 %vm992_vm1, %v11543_v4  ;;  %v17228_v3 = vpop.f32.mrb[53].mxu1  ;;  %v8145_v4 = vsel %vm14893_vm7, %v8143_v14, %v8144_v29  ;;  %v8158_v29 = vrot.slane %v16598_v25, 5  ;;  %v8149_v13 = vsel %vm14893_vm7, %v11515_v58, %v8148_v48  ;;  %v8169_v48 = vrot.slane %v16626_v44, 5 }
 0x2e0   :  { %12590 = vmatprep.mubr.msk.bf16.mxu0 %vm992_vm1, %v11544_v36  ;;  %v17235_v59 = vpop.f32.mrb[54].mxu1  ;;  %v11484_v36 = vld [vmem:[%s17894_s0 + $0x120] sm:$0xe]  ;;  %v11546_v22 = vcombine.low %v8142_v0, %v8145_v4  ;;  %v8165_v58 = vrot.slane %v16636_v27, 5  ;;  %v8176_v27 = vrot.slane %v16658_v35, 5 }
 0x2e1   :  { %17939 = vst [vmem:[#allocation39_spill] sm:$0xff] %v17235_v59  ;;  %v17240_v8 = vpop.f32.mrb[55].mxu1  ;;  %v11516_v11 = vrot.slane %v11484_v36, 9  ;;  %v8159_v4 = vsel %vm14893_vm7, %v8157_v62, %v8158_v29 }
 0x2e2   :  { %17940 = vst [vmem:[#allocation40_spill] sm:$0xff] %v17240_v8  ;;  %v8151_v8 = vrot.slane %v16572_v10, 5  ;;  %v8162_v10 = vrot.slane %v16590_v2, 5 }
 0x2e3   :  { %v8156_v25 = vsel %vm14893_vm7, %v11516_v11, %v8155_v45  ;;  %v8172_v11 = vrot.slane %v16674_v51, 5 }
 0x2e4   :  { %v8152_v24 = vsel %vm14893_vm7, %v8150_v49, %v8151_v8  ;;  %v11486_v8 = vld [vmem:[%s17894_s0 + $0x138] sm:$0xe]  ;;  %v11548_v2 = vcombine.low %v8156_v25, %v8159_v4  ;;  %v8171_v49 = vrot.slane %v8169_v48, 4 }
 0x2e5   :  { %v11547_v36 = vcombine.low %v8149_v13, %v8152_v24  ;;  %v11518_v45 = vrot.slane %v11486_v8, 9  ;;  %v11488_v8 = vld [vmem:[%s17894_s0 + $0x150] sm:$0xe] }
 0x2e6   :  { %v17255_v14 = vpop.f32.mrb[56].mxu1  ;;  %v8173_v4 = vsel %vm14893_vm7, %v8171_v49, %v8172_v11  ;;  %v8190_v11 = vrot.slane %v16718_v43, 5 }
 0x2e7   :  { %12591 = vmatmul.mubr.msk.bf16.gmra.mrb[32].mxu0 %vm992_vm1, %v11545_v53  ;;  %v17258_v59 = vpop.f32.mrb[57].mxu1  ;;  %v11517_v53 = vrot.slane %v11485_v1, 9  ;;  %v8170_v51 = vsel %vm14893_vm7, %v11518_v45, %v8169_v48  ;;  %v11487_v1 = vld [vmem:[%s17894_s0 + $0x144] sm:$0xe]  ;;  %v11520_v48 = vrot.slane %v11488_v8, 9  ;;  %v8186_v45 = vrot.slane %v16736_v17, 5 }
 0x2e8   :  { %12594 = vmatprep.mubr.msk.bf16.mxu0 %vm992_vm1, %v11546_v22  ;;  %v17265_v37 = vpop.f32.mrb[58].mxu1  ;;  %v8164_v22 = vrot.slane %v8162_v10, 4  ;;  %v11550_v35 = vcombine.low %v8170_v51, %v8173_v4  ;;  %v11489_v17 = vld [vmem:[%s17894_s0 + $0x15c] sm:$0xe]  ;;  %v8192_v43 = vrot.slane %v8190_v11, 4  ;;  %v8193_v8 = vrot.slane %v16769_v21, 5 }
 0x2e9   :  { %v17268_v0 = vpop.f32.mrb[59].mxu1  ;;  %v8163_v44 = vsel %vm14893_vm7, %v11517_v53, %v8162_v10  ;;  %v8183_v10 = vrot.slane %v16685_v57, 5  ;;  %v8178_v53 = vrot.slane %v8176_v27, 4 }
 0x2ea   :  { %v8166_v13 = vsel %vm14893_vm7, %v8164_v22, %v8165_v58  ;;  %v8179_v22 = vrot.slane %v16697_v7, 5 }
 0x2eb   :  { %v8185_v58 = vrot.slane %v8183_v10, 4 }
 0x2ec   :  { %v8180_v49 = vsel %vm14893_vm7, %v8178_v53, %v8179_v22  ;;  %v8204_v53 = vrot.slane %v16791_v9, 5 }
 0x2ed   :  { %v8187_v7 = vsel %vm14893_vm7, %v8185_v58, %v8186_v45  ;;  %v11492_v58 = vld [vmem:[%s17894_s0 + $0x180] sm:$0xe] }
 0x2ee   :  { %v17283_v62 = vpop.f32.mrb[60].mxu1  ;;  %v8206_v9 = vrot.slane %v8204_v53, 4 }
 0x2ef   :  { %12595 = vmatmul.mubr.msk.bf16.gmra.mrb[36].mxu0 %vm992_vm1, %v11547_v36  ;;  %v17286_v29 = vpop.f32.mrb[61].mxu1  ;;  %v11549_v36 = vcombine.low %v8163_v44, %v8166_v13  ;;  %v8184_v44 = vsel %vm14893_vm7, %v11520_v48, %v8183_v10  ;;  %v8197_v13 = vrot.slane %v16760_v42, 5  ;;  %v8211_v48 = vrot.slane %v16811_v52, 5 }
 0x2f0   :  { %12598 = vmatprep.mubr.msk.bf16.mxu0 %vm992_vm1, %v11548_v2  ;;  %v17293_v24 = vpop.f32.mrb[62].mxu1  ;;  %v11519_v2 = vrot.slane %v11487_v1, 9  ;;  %v11552_v4 = vcombine.low %v8184_v44, %v8187_v7  ;;  %v11521_v1 = vrot.slane %v11489_v17, 9  ;;  %v11524_v44 = vrot.slane %v11492_v58, 9 }
 0x2f1   :  { %v17296_v25 = vpop.f32.mrb[63].mxu1  ;;  %v8213_v7 = vrot.slane %v8211_v48, 4  ;;  %v8214_v17 = vrot.slane %v16844_v5, 5  ;;  %v11493_v5 = vld [vmem:[%s17894_s0 + $0x18c] sm:$0xe] }
 0x2f2   :  { %v8177_v57 = vsel %vm14893_vm7, %v11519_v2, %v8176_v27  ;;  %v11490_v27 = vld [vmem:[%s17894_s0 + $0x168] sm:$0xe]  ;;  %v8191_v42 = vsel %vm14893_vm7, %v11521_v1, %v8190_v11  ;;  %v8194_v2 = vsel %vm14893_vm7, %v8192_v43, %v8193_v8  ;;  %v8207_v11 = vrot.slane %v16832_v55, 5  ;;  %v11494_v1 = vld [vmem:[%s17894_s0 + $0x198] sm:$0xe] }
 0x2f3   :  { %v11551_v51 = vcombine.low %v8177_v57, %v8180_v49  ;;  %v11522_v10 = vrot.slane %v11490_v27, 9  ;;  %v11553_v45 = vcombine.low %v8191_v42, %v8194_v2  ;;  %v8218_v27 = vrot.slane %v16852_v34, 5 }
 0x2f4   :  { %v8215_v55 = vsel %vm14893_vm7, %v8213_v7, %v8214_v17  ;;  %v8228_v2 = vrot.slane %v16897_v12, 5  ;;  %v11495_v12 = vld [vmem:[%s17894_s0 + $0x1a4] sm:$0xe] }
 0x2f5   :  { %v8198_v22 = vsel %vm14893_vm7, %v11522_v10, %v8197_v13  ;;  %v11525_v10 = vrot.slane %v11493_v5, 9  ;;  %v8220_v34 = vrot.slane %v8218_v27, 4  ;;  %v11527_v58 = vrot.slane %v11495_v12, 9  ;;  %v17408_v5 = vld [vmem:[%s17897_s3] sm:$0xff] }
 0x2f7   :  { %12599 = vmatmul.mubr.msk.bf16.gmra.mrb[40].mxu0 %vm992_vm1, %v11549_v36  ;;  %v8199_v36 = vrot.slane %v8197_v13, 4  ;;  %v8208_v13 = vsel %vm14893_vm7, %v8206_v9, %v8207_v11  ;;  %v8786_v11 = vlaneseq }
 0x2f8   :  { %12602 = vmatprep.mubr.msk.bf16.mxu0 %vm992_vm1, %v11550_v35  ;;  %v8200_v35 = vrot.slane %v16801_v18, 5  ;;  %v11491_v18 = vld [vmem:[%s17894_s0 + $0x174] sm:$0xe] }
 0x2f9   :  { %v11523_v49 = vrot.slane %v11491_v18, 9  ;;  %v17393_v17 = vshrl.u32 %v8786_v11, 7 }
 0x2fa   :  { %v8201_v21 = vsel %vm14893_vm7, %v8199_v36, %v8200_v35  ;;  %v8221_v36 = vrot.slane %v16879_v31, 5  ;;  %v11526_v35 = vrot.slane %v11494_v1, 9 }
 0x2fb   :  { %v11554_v57 = vcombine.low %v8198_v22, %v8201_v21  ;;  %v8205_v52 = vsel %vm14893_vm7, %v11523_v49, %v8204_v53  ;;  %v8232_v22 = vrot.slane %v16887_v23, 5 }
 0x2fc   :  { %v11555_v43 = vcombine.low %v8205_v52, %v8208_v13  ;;  %v8222_v53 = vsel %vm14893_vm7, %v8220_v34, %v8221_v36 }
 0x2fd   :  { %v8233_v23 = vsel %vm14893_vm7, %v11527_v58, %v8232_v22 }
 0x2ff   :  { %12603 = vmatmul.mubr.msk.bf16.gmra.mrb[44].mxu0 %vm992_vm1, %v11551_v51  ;;  %v8212_v51 = vsel %vm14893_vm7, %v11524_v44, %v8211_v48  ;;  %v13709_v44 = vmov 1966171168  }
 0x300   :  { %12606 = vmatprep.mubr.msk.bf16.mxu0 %vm992_vm1, %v11552_v4  ;;  %v8225_v4 = vrot.slane %v16862_v40, 5  ;;  %v11556_v8 = vcombine.low %v8212_v51, %v8215_v55  ;;  %v8219_v40 = vsel %vm14893_vm7, %v11525_v10, %v8218_v27  ;;  %v8961_v7 = vunpack.c.l.s4 %v13709_v44 }
 0x301   :  { %v11557_v18 = vcombine.low %v8219_v40, %v8222_v53  ;;  %v8788_v55 = vsub.s32 0, %v17393_v17 }
 0x302   :  { %v8227_v42 = vrot.slane %v8225_v4, 4  ;;  %v8226_v21 = vsel %vm14893_vm7, %v11526_v35, %v8225_v4  ;;  %v8962_v52 = vunpack.c.0.s8 %v8961_v7  ;;  %v17943_v7 = vld [vmem:[#allocation7_spill] sm:$0xff] }
 0x303   :  { %v17413_v4 = vrot.slane %v17408_v5, %v8788_v55 }
 0x304   :  { %v8229_v31 = vsel %vm14893_vm7, %v8227_v42, %v8228_v2  ;;  %v8965_v27 = vsub.s32 %v8962_v52, %v17393_v17 }
 0x305   :  { %v11558_v48 = vcombine.low %v8226_v21, %v8229_v31 }
 0x307   :  { %12607 = vmatmul.mubr.msk.bf16.gmra.mrb[48].mxu0 %vm992_vm1, %v11553_v45  ;;  %v8234_v45 = vrot.slane %v8232_v22, 4 }
 0x308   :  { %12610 = vmatprep.mubr.msk.bf16.mxu0 %vm992_vm1, %v11554_v57  ;;  %v8235_v57 = vrot.slane %v16913_v54, 5  ;;  %v11592_v54 = vld.sshfl [vmem:[%s17898_s4] sm:$0x33 pattern:$0x75316420] }
 0x309   :  { %v8959_v13 = vcombine.high %v11592_v54, %v11592_v54  ;;  %v17401_v60 = vrot.slane %v11592_v54, %v8965_v27 }
 0x30a   :  { %v8236_v49 = vsel %vm14893_vm7, %v8234_v45, %v8235_v57  ;;  %v17941_v45 = vld [vmem:[#allocation5_spill] sm:$0xff] }
 0x30b   :  { %v11559_v9 = vcombine.low %v8233_v23, %v8236_v49  ;;  %v17399_v51 = vrot.slane %v8959_v13, %v8965_v27  ;;  %v17942_v49 = vld [vmem:[#allocation6_spill] sm:$0xff] }
 0x30d   :  { %9012 = vmatprep.mubr.bf16.mxu1 %v17399_v51 }
 0x30f   :  { %12611 = vmatmul.mubr.msk.bf16.gmra.mrb[52].mxu0 %vm992_vm1, %v11555_v43 }
 0x310   :  { %12614 = vmatprep.mubr.msk.bf16.mxu0 %vm992_vm1, %v11556_v8 }
 0x317   :  { %12615 = vmatmul.mubr.msk.bf16.gmra.mrb[56].mxu0 %vm992_vm1, %v11557_v18 }
 0x318   :  { %12618 = vmatprep.mubr.msk.bf16.mxu0 %vm992_vm1, %v11558_v48 }
 0x31f   :  { %12619 = vmatmul.mubr.msk.bf16.gmra.mrb[60].mxu0 %vm992_vm1, %v11559_v9 }
 0x37a   :  { %v12560_v1 = vpop.f32.mrb[0].mxu0 }
 0x37b   :  { %v12762_v43 = vadd.f32 %v12560_v1, %v16380_v39  ;;  %v8467_v8 = vpop.f32.mrb[1].mxu0 }
 0x37c   :  { %v12763_v10 = vadd.f32 %v8467_v8, %v16394_v46  ;;  %v12561_v34 = vpop.f32.mrb[2].mxu0 }
 0x37d   :  { %v8792_v36 = vadd.f32 %v12762_v43, %v17413_v4  ;;  %v12764_v35 = vadd.f32 %v12561_v34, %v16409_v63  ;;  %v8470_v42 = vpop.f32.mrb[3].mxu0  ;;  %v17944_v34 = vld [vmem:[#allocation8_spill] sm:$0xff] }
 0x37e   :  { %v8790_v2 = vadd.f32 %v12763_v10, %v17413_v4  ;;  %v12765_v40 = vadd.f32 %v8470_v42, %v16415_v61 }
 0x37f   :  { %v8793_v53 = vadd.f32 %v12764_v35, %v17413_v4  ;;  %v8856_v21 = vmax.f32 %v8792_v36, 0.0 }
 0x380   :  { %v8791_v22 = vadd.f32 %v12765_v40, %v17413_v4  ;;  %v8854_v39 = vmax.f32 %v8790_v2, 0.0  ;;  %v17945_v2 = vld [vmem:[#allocation9_spill] sm:$0xff] }
 0x381   :  { %v8857_v31 = vmax.f32 %v8793_v53, 0.0 }
 0x382   :  { %v8855_v12 = vmax.f32 %v8791_v22, 0.0  ;;  %v12564_v18 = vpop.f32.mrb[4].mxu0 }
 0x383   :  { %v17423_v46 = vpack.c.bf16 %v8857_v31, %v8856_v21  ;;  %v12766_v48 = vadd.f32 %v12564_v18, %v16438_v50  ;;  %v8483_v58 = vpop.f32.mrb[5].mxu0  ;;  %v17946_v21 = vld [vmem:[#allocation10_spill] sm:$0xff]  ;;  %v17947_v18 = vld [vmem:[#allocation11_spill] sm:$0xff] }
 0x384   :  { %v17426_v63 = vpack.c.bf16 %v8855_v12, %v8854_v39  ;;  %v12767_v57 = vadd.f32 %v8483_v58, %v17941_v45  ;;  %v12565_v23 = vpop.f32.mrb[6].mxu0 }
 0x385   :  { %v8796_v61 = vadd.f32 %v12766_v48, %v17413_v4  ;;  %v12768_v9 = vadd.f32 %v12565_v23, %v17942_v49  ;;  %v8486_v11 = vpop.f32.mrb[7].mxu0 }
 0x386   :  { %v8794_v44 = vadd.f32 %v12767_v57, %v17413_v4  ;;  %v12769_v52 = vadd.f32 %v8486_v11, %v17943_v7 }
 0x387   :  { %v8797_v54 = vadd.f32 %v12768_v9, %v17413_v4  ;;  %v8860_v50 = vmax.f32 %v8796_v61, 0.0 }
 0x388   :  { %v8795_v13 = vadd.f32 %v12769_v52, %v17413_v4  ;;  %v8858_v1 = vmax.f32 %v8794_v44, 0.0  ;;  %v17948_v44 = vld [vmem:[#allocation12_spill] sm:$0xff] }
 0x389   :  { %v8861_v27 = vmax.f32 %v8797_v54, 0.0 }
 0x38a   :  { %v8859_v43 = vmax.f32 %v8795_v13, 0.0  ;;  %v12568_v8 = vpop.f32.mrb[8].mxu0  ;;  %v17949_v13 = vld [vmem:[#allocation13_spill] sm:$0xff] }
 0x38b   :  { %v17435_v10 = vpack.c.bf16 %v8861_v27, %v8860_v50  ;;  %v12770_v36 = vadd.f32 %v12568_v8, %v17944_v34  ;;  %v8499_v35 = vpop.f32.mrb[9].mxu0 }
 0x38c   :  { %v17438_v42 = vpack.c.bf16 %v8859_v43, %v8858_v1  ;;  %v12771_v40 = vadd.f32 %v8499_v35, %v17945_v2  ;;  %v12569_v53 = vpop.f32.mrb[10].mxu0  ;;  %v17950_v43 = vld [vmem:[#allocation14_spill] sm:$0xff]  ;;  %v17951_v35 = vld [vmem:[#allocation15_spill] sm:$0xff] }
 0x38d   :  { %v8800_v22 = vadd.f32 %v12770_v36, %v17413_v4  ;;  %v12772_v31 = vadd.f32 %v12569_v53, %v17946_v21  ;;  %v8502_v39 = vpop.f32.mrb[11].mxu0 }
 0x38e   :  { %v8798_v12 = vadd.f32 %v12771_v40, %v17413_v4  ;;  %v12773_v48 = vadd.f32 %v8502_v39, %v17947_v18 }
 0x38f   :  { %v8801_v58 = vadd.f32 %v12772_v31, %v17413_v4  ;;  %v8864_v57 = vmax.f32 %v8800_v22, 0.0 }
 0x390   :  { %v8799_v45 = vadd.f32 %v12773_v48, %v17413_v4  ;;  %v8862_v61 = vmax.f32 %v8798_v12, 0.0  ;;  %v17952_v48 = vld [vmem:[#allocation16_spill] sm:$0xff] }
 0x391   :  { %v8865_v23 = vmax.f32 %v8801_v58, 0.0 }
 0x392   :  { %v8863_v49 = vmax.f32 %v8799_v45, 0.0  ;;  %v12572_v9 = vpop.f32.mrb[12].mxu0 }
 0x393   :  { %v17447_v11 = vpack.c.bf16 %v8865_v23, %v8864_v57  ;;  %v12774_v7 = vadd.f32 %v12572_v9, %v17948_v44  ;;  %v8515_v52 = vpop.f32.mrb[13].mxu0  ;;  %v17953_v23 = vld [vmem:[#allocation17_spill] sm:$0xff]  ;;  %v17954_v44 = vld [vmem:[#allocation18_spill] sm:$0xff] }
 0x394   :  { %v17450_v54 = vpack.c.bf16 %v8863_v49, %v8862_v61  ;;  %v12775_v50 = vadd.f32 %v8515_v52, %v17949_v13  ;;  %v12573_v27 = vpop.f32.mrb[14].mxu0 }
 0x395   :  { %v8804_v1 = vadd.f32 %v12774_v7, %v17413_v4  ;;  %v12776_v8 = vadd.f32 %v12573_v27, %v17950_v43  ;;  %v8518_v34 = vpop.f32.mrb[15].mxu0 }
 0x396   :  { %v8802_v36 = vadd.f32 %v12775_v50, %v17413_v4  ;;  %v12777_v2 = vadd.f32 %v8518_v34, %v17951_v35  ;;  %v17955_v50 = vld [vmem:[#allocation19_spill] sm:$0xff] }
 0x397   :  { %v8805_v40 = vadd.f32 %v12776_v8, %v17413_v4  ;;  %v8868_v22 = vmax.f32 %v8804_v1, 0.0 }
 0x398   :  { %v8803_v53 = vadd.f32 %v12777_v2, %v17413_v4  ;;  %v8866_v31 = vmax.f32 %v8802_v36, 0.0 }
 0x399   :  { %v8869_v21 = vmax.f32 %v8805_v40, 0.0  ;;  %v17956_v40 = vld [vmem:[#allocation20_spill] sm:$0xff] }
 0x39a   :  { %v8867_v39 = vmax.f32 %v8803_v53, 0.0  ;;  %v12576_v12 = vpop.f32.mrb[16].mxu0 }
 0x39b   :  { %v17459_v18 = vpack.c.bf16 %v8869_v21, %v8868_v22  ;;  %v12778_v58 = vadd.f32 %v12576_v12, %v17952_v48  ;;  %v8531_v45 = vpop.f32.mrb[17].mxu0 }
 0x39c   :  { %v17462_v57 = vpack.c.bf16 %v8867_v39, %v8866_v31  ;;  %v12779_v61 = vadd.f32 %v8531_v45, %v17953_v23  ;;  %v12577_v49 = vpop.f32.mrb[18].mxu0  ;;  %v17957_v31 = vld [vmem:[#allocation21_spill] sm:$0xff]  ;;  %v17958_v45 = vld [vmem:[#allocation22_spill] sm:$0xff] }
 0x39d   :  { %v8808_v9 = vadd.f32 %v12778_v58, %v17413_v4  ;;  %v12780_v7 = vadd.f32 %v12577_v49, %v17954_v44  ;;  %v8534_v52 = vpop.f32.mrb[19].mxu0 }
 0x39e   :  { %v8806_v13 = vadd.f32 %v12779_v61, %v17413_v4  ;;  %v12781_v27 = vadd.f32 %v8534_v52, %v17955_v50 }
 0x39f   :  { %v8809_v1 = vadd.f32 %v12780_v7, %v17413_v4  ;;  %v8872_v8 = vmax.f32 %v8808_v9, 0.0  ;;  %v17959_v9 = vld [vmem:[#allocation23_spill] sm:$0xff] }
 0x3a0   :  { %v8807_v43 = vadd.f32 %v12781_v27, %v17413_v4  ;;  %v8870_v36 = vmax.f32 %v8806_v13, 0.0 }
 0x3a1   :  { %v8873_v34 = vmax.f32 %v8809_v1, 0.0 }
 0x3a2   :  { %v8871_v35 = vmax.f32 %v8807_v43, 0.0  ;;  %v12580_v2 = vpop.f32.mrb[20].mxu0 }
 0x3a3   :  { %v12782_v53 = vadd.f32 %v12580_v2, %v17956_v40  ;;  %v8547_v22 = vpop.f32.mrb[21].mxu0  ;;  %v8928_v21 = vpack.c.bf16 %v8873_v34, %v8872_v8  ;;  %v17960_v8 = vld [vmem:[#allocation24_spill] sm:$0xff]  ;;  %v17961_v2 = vld [vmem:[#allocation25_spill] sm:$0xff] }
 0x3a4   :  { %v12783_v39 = vadd.f32 %v8547_v22, %v17957_v31  ;;  %v12581_v12 = vpop.f32.mrb[22].mxu0  ;;  %v8927_v48 = vpack.c.bf16 %v8871_v35, %v8870_v36  ;;  %v17962_v31 = vld [vmem:[#allocation26_spill] sm:$0xff] }
 0x3a5   :  { %v8812_v58 = vadd.f32 %v12782_v53, %v17413_v4  ;;  %v12784_v23 = vadd.f32 %v12581_v12, %v17958_v45  ;;  %v8550_v61 = vpop.f32.mrb[23].mxu0 }
 0x3a6   :  { %v8810_v49 = vadd.f32 %v12783_v39, %v17413_v4  ;;  %v12785_v44 = vadd.f32 %v8550_v61, %v17959_v9  ;;  %11936 = vmatprep.subr.bf16.mxu1 %v8927_v48  ;;  %v17963_v48 = vld [vmem:[#allocation27_spill] sm:$0xff] }
 0x3a7   :  { %v8813_v7 = vadd.f32 %v12784_v23, %v17413_v4  ;;  %11937 = vmatpush3.bf16.msra.mxu1 %v17426_v63  ;;  %v8876_v13 = vmax.f32 %v8812_v58, 0.0 }
 0x3a8   :  { %v8811_v52 = vadd.f32 %v12785_v44, %v17413_v4  ;;  %11938 = vmatprep.subr.bf16.mxu1 %v8928_v21  ;;  %v8874_v27 = vmax.f32 %v8810_v49, 0.0 }
 0x3a9   :  { %v8877_v50 = vmax.f32 %v8813_v7, 0.0  ;;  %v17964_v7 = vld [vmem:[#allocation28_spill] sm:$0xff] }
 0x3aa   :  { %v8875_v1 = vmax.f32 %v8811_v52, 0.0  ;;  %v12584_v43 = vpop.f32.mrb[24].mxu0 }
 0x3ab   :  { %v12786_v34 = vadd.f32 %v12584_v43, %v17960_v8  ;;  %v8563_v36 = vpop.f32.mrb[25].mxu0  ;;  %11939 = vmatpush3.bf16.msra.mxu1 %v17423_v46  ;;  %v8930_v35 = vpack.c.bf16 %v8877_v50, %v8876_v13 }
 0x3ac   :  { %v12787_v40 = vadd.f32 %v8563_v36, %v17961_v2  ;;  %v12585_v53 = vpop.f32.mrb[26].mxu0  ;;  %v8929_v22 = vpack.c.bf16 %v8875_v1, %v8874_v27  ;;  %v17965_v27 = vld [vmem:[#allocation29_spill] sm:$0xff] }
 0x3ad   :  { %v8816_v63 = vadd.f32 %v12786_v34, %v17413_v4  ;;  %v12788_v39 = vadd.f32 %v12585_v53, %v17962_v31  ;;  %v8566_v21 = vpop.f32.mrb[27].mxu0  ;;  %v17966_v34 = vld [vmem:[#allocation30_spill] sm:$0xff] }
 0x3ae   :  { %v8814_v12 = vadd.f32 %v12787_v40, %v17413_v4  ;;  %v12789_v58 = vadd.f32 %v8566_v21, %v17963_v48  ;;  %11940 = vmatprep.subr.bf16.mxu1 %v8929_v22  ;;  %v17967_v40 = vld [vmem:[#allocation31_spill] sm:$0xff] }
 0x3af   :  { %v8817_v45 = vadd.f32 %v12788_v39, %v17413_v4  ;;  %11941 = vmatpush3.bf16.msra.mxu1 %v17438_v42  ;;  %v8880_v23 = vmax.f32 %v8816_v63, 0.0 }
 0x3b0   :  { %v8815_v46 = vadd.f32 %v12789_v58, %v17413_v4  ;;  %11942 = vmatprep.subr.bf16.mxu1 %v8930_v35  ;;  %v8878_v49 = vmax.f32 %v8814_v12, 0.0 }
 0x3b1   :  { %v8881_v61 = vmax.f32 %v8817_v45, 0.0 }
 0x3b2   :  { %v8879_v9 = vmax.f32 %v8815_v46, 0.0  ;;  %v12588_v44 = vpop.f32.mrb[28].mxu0 }
 0x3b3   :  { %v12790_v52 = vadd.f32 %v12588_v44, %v17964_v7  ;;  %v8579_v13 = vpop.f32.mrb[29].mxu0  ;;  %11943 = vmatpush3.bf16.msra.mxu1 %v17435_v10  ;;  %v8932_v50 = vpack.c.bf16 %v8881_v61, %v8880_v23 }
 0x3b4   :  { %v12791_v1 = vadd.f32 %v8579_v13, %v17965_v27  ;;  %v12589_v43 = vpop.f32.mrb[30].mxu0  ;;  %v8931_v8 = vpack.c.bf16 %v8879_v9, %v8878_v49 }
 0x3b5   :  { %v8820_v42 = vadd.f32 %v12790_v52, %v17413_v4  ;;  %v12792_v36 = vadd.f32 %v12589_v43, %v17966_v34  ;;  %v8582_v35 = vpop.f32.mrb[31].mxu0 }
 0x3b6   :  { %v8818_v2 = vadd.f32 %v12791_v1, %v17413_v4  ;;  %v12793_v53 = vadd.f32 %v8582_v35, %v17967_v40  ;;  %11944 = vmatprep.subr.bf16.mxu1 %v8931_v8 }
 0x3b7   :  { %v8821_v22 = vadd.f32 %v12792_v36, %v17413_v4  ;;  %11945 = vmatpush3.bf16.msra.mxu1 %v17450_v54  ;;  %v8884_v63 = vmax.f32 %v8820_v42, 0.0 }
 0x3b8   :  { %v8819_v10 = vadd.f32 %v12793_v53, %v17413_v4  ;;  %11946 = vmatprep.subr.bf16.mxu1 %v8932_v50  ;;  %v8882_v39 = vmax.f32 %v8818_v2, 0.0 }
 0x3b9   :  { %v8885_v31 = vmax.f32 %v8821_v22, 0.0 }
 0x3ba   :  { %v8883_v21 = vmax.f32 %v8819_v10, 0.0  ;;  %v12592_v12 = vpop.f32.mrb[32].mxu0 }
 0x3bb   :  { %v12794_v48 = vadd.f32 %v12592_v12, %v17047_v32  ;;  %v8595_v58 = vpop.f32.mrb[33].mxu0  ;;  %11947 = vmatpush3.bf16.msra.mxu1 %v17447_v11  ;;  %v8934_v45 = vpack.c.bf16 %v8885_v31, %v8884_v63 }
 0x3bc   :  { %v12795_v46 = vadd.f32 %v8595_v58, %v17050_v20  ;;  %v12593_v23 = vpop.f32.mrb[34].mxu0  ;;  %v8933_v61 = vpack.c.bf16 %v8883_v21, %v8882_v39 }
 0x3bd   :  { %v8824_v54 = vadd.f32 %v12794_v48, %v17413_v4  ;;  %v12796_v49 = vadd.f32 %v12593_v23, %v17057_v15  ;;  %v8598_v9 = vpop.f32.mrb[35].mxu0 }
 0x3be   :  { %v8822_v44 = vadd.f32 %v12795_v46, %v17413_v4  ;;  %v12797_v7 = vadd.f32 %v8598_v9, %v17062_v6  ;;  %11948 = vmatprep.subr.bf16.mxu1 %v8933_v61  ;;  %v8975_v6 = vcombine.high %v17399_v51, %v17399_v51 }
 0x3bf   :  { %v8825_v32 = vadd.f32 %v12796_v49, %v17413_v4  ;;  %11949 = vmatpush3.bf16.msra.mxu1 %v17462_v57  ;;  %v8888_v20 = vmax.f32 %v8824_v54, 0.0 }
 0x3c0   :  { %v8823_v11 = vadd.f32 %v12797_v7, %v17413_v4  ;;  %11950 = vmatprep.subr.bf16.mxu1 %v8934_v45  ;;  %v8886_v13 = vmax.f32 %v8822_v44, 0.0 }
 0x3c1   :  { %v8889_v52 = vmax.f32 %v8825_v32, 0.0 }
 0x3c2   :  { %v8887_v50 = vmax.f32 %v8823_v11, 0.0  ;;  %v12596_v27 = vpop.f32.mrb[36].mxu0  ;;  %v17968_v11 = vld [vmem:[#allocation32_spill] sm:$0xff] }
 0x3c3   :  { %v17510_v1 = vpack.c.bf16 %v8889_v52, %v8888_v20  ;;  %v12798_v15 = vadd.f32 %v12596_v27, %v17083_v56  ;;  %v8611_v43 = vpop.f32.mrb[37].mxu0  ;;  %11951 = vmatpush3.bf16.msra.mxu1 %v17459_v18 }
 0x3c4   :  { %v17516_v8 = vpack.c.bf16 %v8887_v50, %v8886_v13  ;;  %v12799_v57 = vadd.f32 %v8611_v43, %v17086_v16  ;;  %v12597_v42 = vpop.f32.mrb[38].mxu0  ;;  %v17969_v13 = vld [vmem:[#allocation33_spill] sm:$0xff]  ;;  %v17970_v43 = vld [vmem:[#allocation34_spill] sm:$0xff] }
 0x3c5   :  { %v8828_v34 = vadd.f32 %v12798_v15, %v17413_v4  ;;  %v12800_v36 = vadd.f32 %v12597_v42, %v17093_v30  ;;  %v8614_v35 = vpop.f32.mrb[39].mxu0 }
 0x3c6   :  { %v8826_v2 = vadd.f32 %v12799_v57, %v17413_v4  ;;  %v12801_v56 = vadd.f32 %v8614_v35, %v17098_v26  ;;  %9013 = vmatmul.mubr.bf16.vlgmr.msra.gmra.mrb[64].mxu1 %v17401_v60 }
 0x3c7   :  { %v8829_v18 = vadd.f32 %v12800_v36, %v17413_v4  ;;  %9052 = vmatprep.mubr.bf16.mxu1 %v8975_v6  ;;  %v8892_v40 = vmax.f32 %v8828_v34, 0.0 }
 0x3c8   :  { %v8827_v51 = vadd.f32 %v12801_v56, %v17413_v4  ;;  %v8890_v16 = vmax.f32 %v8826_v2, 0.0 }
 0x3c9   :  { %v8893_v53 = vmax.f32 %v8829_v18, 0.0  ;;  %v17971_v18 = vld [vmem:[#allocation35_spill] sm:$0xff] }
 0x3ca   :  { %v8891_v22 = vmax.f32 %v8827_v51, 0.0  ;;  %v12600_v10 = vpop.f32.mrb[40].mxu0 }
 0x3cb   :  { %v17526_v63 = vpack.c.bf16 %v8893_v53, %v8892_v40  ;;  %v12802_v30 = vadd.f32 %v12600_v10, %v17119_v47  ;;  %v8627_v31 = vpop.f32.mrb[41].mxu0 }
 0x3cc   :  { %v17529_v39 = vpack.c.bf16 %v8891_v22, %v8890_v16  ;;  %v12803_v26 = vadd.f32 %v8627_v31, %v17122_v28  ;;  %v12601_v21 = vpop.f32.mrb[42].mxu0  ;;  %v17972_v16 = vld [vmem:[#allocation36_spill] sm:$0xff]  ;;  %v17973_v31 = vld [vmem:[#allocation37_spill] sm:$0xff] }
 0x3cd   :  { %v8832_v12 = vadd.f32 %v12802_v30, %v17413_v4  ;;  %v12804_v48 = vadd.f32 %v12601_v21, %v17129_v38  ;;  %v8630_v58 = vpop.f32.mrb[43].mxu0 }
 0x3ce   :  { %v8830_v45 = vadd.f32 %v12803_v26, %v17413_v4  ;;  %v12805_v46 = vadd.f32 %v8630_v58, %v17134_v33 }
 0x3cf   :  { %v8833_v23 = vadd.f32 %v12804_v48, %v17413_v4  ;;  %v8896_v47 = vmax.f32 %v8832_v12, 0.0  ;;  %v17974_v48 = vld [vmem:[#allocation38_spill] sm:$0xff] }
 0x3d0   :  { %v8831_v61 = vadd.f32 %v12805_v46, %v17413_v4  ;;  %v8894_v49 = vmax.f32 %v8830_v45, 0.0 }
 0x3d1   :  { %v8897_v54 = vmax.f32 %v8833_v23, 0.0 }
 0x3d2   :  { %v8895_v9 = vmax.f32 %v8831_v61, 0.0  ;;  %v12604_v44 = vpop.f32.mrb[44].mxu0 }
 0x3d3   :  { %v17538_v28 = vpack.c.bf16 %v8897_v54, %v8896_v47  ;;  %v12806_v7 = vadd.f32 %v12604_v44, %v17155_v41  ;;  %v8643_v32 = vpop.f32.mrb[45].mxu0 }
 0x3d4   :  { %v17541_v38 = vpack.c.bf16 %v8895_v9, %v8894_v49  ;;  %v12807_v20 = vadd.f32 %v8643_v32, %v17968_v11  ;;  %v12605_v52 = vpop.f32.mrb[46].mxu0 }
 0x3d5   :  { %v8836_v33 = vadd.f32 %v12806_v7, %v17413_v4  ;;  %v12808_v50 = vadd.f32 %v12605_v52, %v17969_v13  ;;  %v8646_v27 = vpop.f32.mrb[47].mxu0 }
 0x3d6   :  { %v8834_v15 = vadd.f32 %v12807_v20, %v17413_v4  ;;  %v12809_v6 = vadd.f32 %v8646_v27, %v17970_v43 }
 0x3d7   :  { %v8837_v57 = vadd.f32 %v12808_v50, %v17413_v4  ;;  %v8900_v41 = vmax.f32 %v8836_v33, 0.0  ;;  %v17975_v33 = vld [vmem:[#allocation39_spill] sm:$0xff] }
 0x3d8   :  { %v8835_v42 = vadd.f32 %v12809_v6, %v17413_v4  ;;  %v8898_v36 = vmax.f32 %v8834_v15, 0.0  ;;  %v17976_v15 = vld [vmem:[#allocation40_spill] sm:$0xff] }
 0x3d9   :  { %v8901_v34 = vmax.f32 %v8837_v57, 0.0 }
 0x3da   :  { %v8899_v35 = vmax.f32 %v8835_v42, 0.0  ;;  %v12608_v2 = vpop.f32.mrb[48].mxu0 }
 0x3db   :  { %v17550_v56 = vpack.c.bf16 %v8901_v34, %v8900_v41  ;;  %v12810_v51 = vadd.f32 %v12608_v2, %v17971_v18  ;;  %v8659_v40 = vpop.f32.mrb[49].mxu0 }
 0x3dc   :  { %v17553_v53 = vpack.c.bf16 %v8899_v35, %v8898_v36  ;;  %v12811_v22 = vadd.f32 %v8659_v40, %v17972_v16  ;;  %v12609_v10 = vpop.f32.mrb[50].mxu0 }
 0x3dd   :  { %v8840_v30 = vadd.f32 %v12810_v51, %v17413_v4  ;;  %v12812_v26 = vadd.f32 %v12609_v10, %v17973_v31  ;;  %v8662_v21 = vpop.f32.mrb[51].mxu0 }
 0x3de   :  { %v8838_v12 = vadd.f32 %v12811_v22, %v17413_v4  ;;  %v12813_v58 = vadd.f32 %v8662_v21, %v17974_v48 }
 0x3df   :  { %v8841_v45 = vadd.f32 %v12812_v26, %v17413_v4  ;;  %v8904_v23 = vmax.f32 %v8840_v30, 0.0 }
 0x3e0   :  { %v8839_v46 = vadd.f32 %v12813_v58, %v17413_v4  ;;  %v8902_v47 = vmax.f32 %v8838_v12, 0.0 }
 0x3e1   :  { %v8905_v61 = vmax.f32 %v8841_v45, 0.0 }
 0x3e2   :  { %v8903_v54 = vmax.f32 %v8839_v46, 0.0  ;;  %v12612_v49 = vpop.f32.mrb[52].mxu0 }
 0x3e3   :  { %v12814_v9 = vadd.f32 %v12612_v49, %v17225_v19  ;;  %v8675_v44 = vpop.f32.mrb[53].mxu0  ;;  %v8944_v7 = vpack.c.bf16 %v8905_v61, %v8904_v23 }
 0x3e4   :  { %v12815_v32 = vadd.f32 %v8675_v44, %v17228_v3  ;;  %v12613_v11 = vpop.f32.mrb[54].mxu0  ;;  %v8943_v20 = vpack.c.bf16 %v8903_v54, %v8902_v47 }
 0x3e5   :  { %v8844_v52 = vadd.f32 %v12814_v9, %v17413_v4  ;;  %v12816_v13 = vadd.f32 %v12613_v11, %v17975_v33  ;;  %v8678_v50 = vpop.f32.mrb[55].mxu0 }
 0x3e6   :  { %v8842_v27 = vadd.f32 %v12815_v32, %v17413_v4  ;;  %v12817_v43 = vadd.f32 %v8678_v50, %v17976_v15  ;;  %11958 = vmatprep.subr.bf16.mxu1 %v8943_v20 }
 0x3e7   :  { %v8845_v6 = vadd.f32 %v12816_v13, %v17413_v4  ;;  %11959 = vmatpush3.bf16.msra.mxu1 %v17516_v8  ;;  %v8908_v3 = vmax.f32 %v8844_v52, 0.0 }
 0x3e8   :  { %v8843_v19 = vadd.f32 %v12817_v43, %v17413_v4  ;;  %11960 = vmatprep.subr.bf16.mxu1 %v8944_v7  ;;  %v8906_v42 = vmax.f32 %v8842_v27, 0.0  ;;  %v9069_v27 = vsub.s32 1, %v17393_v17 }
 0x3e9   :  { %v8909_v57 = vmax.f32 %v8845_v6, 0.0 }
 0x3ea   :  { %v8907_v41 = vmax.f32 %v8843_v19, 0.0  ;;  %v12616_v34 = vpop.f32.mrb[56].mxu0 }
 0x3eb   :  { %v12818_v36 = vadd.f32 %v12616_v34, %v17255_v14  ;;  %v8691_v35 = vpop.f32.mrb[57].mxu0  ;;  %11961 = vmatpush3.bf16.msra.mxu1 %v17510_v1  ;;  %v8946_v2 = vpack.c.bf16 %v8909_v57, %v8908_v3  ;;  %v9070_v3 = vrot.slane %v17408_v5, %v9069_v27 }
 0x3ec   :  { %v12819_v18 = vadd.f32 %v8691_v35, %v17258_v59  ;;  %v12617_v51 = vpop.f32.mrb[58].mxu0  ;;  %v8945_v40 = vpack.c.bf16 %v8907_v41, %v8906_v42 }
 0x3ed   :  { %v8848_v8 = vadd.f32 %v12818_v36, %v17413_v4  ;;  %v12820_v16 = vadd.f32 %v12617_v51, %v17265_v37  ;;  %v8694_v22 = vpop.f32.mrb[59].mxu0 }
 0x3ee   :  { %v8846_v10 = vadd.f32 %v12819_v18, %v17413_v4  ;;  %v12821_v30 = vadd.f32 %v8694_v22, %v17268_v0  ;;  %11962 = vmatprep.subr.bf16.mxu1 %v8945_v40 }
 0x3ef   :  { %v8849_v14 = vadd.f32 %v12820_v16, %v17413_v4  ;;  %11963 = vmatpush3.bf16.msra.mxu1 %v17529_v39  ;;  %v8912_v59 = vmax.f32 %v8848_v8, 0.0 }
 0x3f0   :  { %v8847_v1 = vadd.f32 %v12821_v30, %v17413_v4  ;;  %11964 = vmatprep.subr.bf16.mxu1 %v8946_v2  ;;  %v8910_v26 = vmax.f32 %v8846_v10, 0.0 }
 0x3f1   :  { %v8913_v31 = vmax.f32 %v8849_v14, 0.0 }
 0x3f2   :  { %v8911_v21 = vmax.f32 %v8847_v1, 0.0  ;;  %v12620_v12 = vpop.f32.mrb[60].mxu0 }
 0x3f3   :  { %v12822_v37 = vadd.f32 %v12620_v12, %v17283_v62  ;;  %v8707_v48 = vpop.f32.mrb[61].mxu0  ;;  %11965 = vmatpush3.bf16.msra.mxu1 %v17526_v63  ;;  %v8948_v58 = vpack.c.bf16 %v8913_v31, %v8912_v59 }
 0x3f4   :  { %v12823_v0 = vadd.f32 %v8707_v48, %v17286_v29  ;;  %v12621_v45 = vpop.f32.mrb[62].mxu0  ;;  %v8947_v46 = vpack.c.bf16 %v8911_v21, %v8910_v26 }
 0x3f5   :  { %v8852_v39 = vadd.f32 %v12822_v37, %v17413_v4  ;;  %v12824_v23 = vadd.f32 %v12621_v45, %v17293_v24  ;;  %v8710_v61 = vpop.f32.mrb[63].mxu0 }
 0x3f6   :  { %v8850_v47 = vadd.f32 %v12823_v0, %v17413_v4  ;;  %v12825_v54 = vadd.f32 %v8710_v61, %v17296_v25  ;;  %11966 = vmatprep.subr.bf16.mxu1 %v8947_v46  ;;  %v8974_v25 = vcombine.high %v17401_v60, %v17401_v60  ;;  %v17608_v60 = vld [vmem:[%s17895_s1] sm:$0xff] }
 0x3f7   :  { %v8853_v62 = vadd.f32 %v12824_v23, %v17413_v4  ;;  %11967 = vmatpush3.bf16.msra.mxu1 %v17541_v38  ;;  %v8916_v29 = vmax.f32 %v8852_v39, 0.0  ;;  %v13710_v38 = vmov 0.0  }
 0x3f8   :  { %v8851_v63 = vadd.f32 %v12825_v54, %v17413_v4  ;;  %11968 = vmatprep.subr.bf16.mxu1 %v8948_v58  ;;  %v8914_v9 = vmax.f32 %v8850_v47, 0.0  ;;  %v13414_v4 = vld [vmem:[%s17896_s2 + $0x24] sm:$0xff]  }
 0x3f9   :  { %v8917_v49 = vmax.f32 %v8853_v62, 0.0 }
 0x3fa   :  { %v8915_v44 = vmax.f32 %v8851_v63, 0.0 }
 0x3fb   :  { %11969 = vmatpush3.bf16.msra.mxu1 %v17538_v28  ;;  %v8950_v24 = vpack.c.bf16 %v8917_v49, %v8916_v29  ;;  %v13415_v28 = vld [vmem:[%s17896_s2 + $0x2c] sm:$0xff]  }
 0x3fc   :  { %v8949_v7 = vpack.c.bf16 %v8915_v44, %v8914_v9 }
 0x3fe   :  { %11970 = vmatprep.subr.bf16.mxu1 %v8949_v7 }
 0x3ff   :  { %11971 = vmatpush3.bf16.msra.mxu1 %v17553_v53 }
 0x400   :  { %11972 = vmatprep.subr.bf16.mxu1 %v8950_v24 }
 0x403   :  { %11973 = vmatpush3.bf16.msra.mxu1 %v17550_v56  ;;  %v17613_v56 = vld [vmem:[%s17895_s1 + $0x8] sm:$0xff]  ;;  %s13712_s1 = smov 96  }
 0x404   :  { %12622 = vmatprep.subr.bf16.mxu1 %v13710_v38  ;;  %v9066_v53 = vpack.c.bf16 %v17613_v56, %v17608_v60 }
 0x406   :  { %9053 = vmatmul.mubr.bf16.vlgmr.msra.gmra.mrb[68].mxu1 %v8974_v25 }
 0x407   :  { %12623 = vmatpush3.bf16.msra.mxu1 %v13414_v4  ;;  %12626 = vmatprep.mubr.msk.bf16.mxu1 %vm13711_vm8, %v13710_v38 }
 0x408   :  { %12624 = vmatprep.subr.bf16.mxu1 %v13710_v38 }
 0x40b   :  { %12625 = vmatpush3.bf16.msra.mxu1 %v13415_v28 }
 0x40c   :  { %12630 = vmatprep.subr.bf16.mxu1 %v13710_v38 }
 0x40e   :  { %12627 = vmatmul.mubr.msk.bf16.vlgmr.msra.gmra.mrb[72].mxu1 %vm9083_vm9, %v9066_v53 }
 0x40f   :  { %12632 = vmatprep.mubr.msk.bf16.mxu1 %vm13711_vm8, %v13710_v38 }
 0x499   :  { %v11952_v32 = vpop.f32.mrb[64].mxu1 }
 0x49a   :  { %v11953_v11 = vpop.f32.mrb[65].mxu1 }
 0x49b   :  { %v11954_v20 = vadd.f32 %v11953_v11, %v11952_v32  ;;  %v11955_v52 = vpop.f32.mrb[66].mxu1 }
 0x49c   :  { %v11956_v33 = vpop.f32.mrb[67].mxu1 }
 0x4d9   :  { %v11974_v13 = vpop.f32.mrb[68].mxu1 }
 0x4da   :  { %v11975_v50 = vpop.f32.mrb[69].mxu1 }
 0x4db   :  { %v11976_v15 = vadd.f32 %v11975_v50, %v11974_v13  ;;  %v11977_v43 = vpop.f32.mrb[70].mxu1 }
 0x4dc   :  { %v11978_v6 = vpop.f32.mrb[71].mxu1 }
 0x4dd   :  { %v17623_v19 = vadd.f32 %v11976_v15, %v11954_v20 }
 0x4e1   :  { %v9121_v57 = vpop.f32.mrb[72].mxu1 }
 0x4e2   :  { %v9122_v42 = vadd.f32 %v9121_v57, %v9070_v3  ;;  %v12628_v41 = vpop.f32.mrb[73].mxu1 }
 0x4e3   :  { %v9124_v34 = vpop.f32.mrb[74].mxu1 }
 0x4e4   :  { %v17628_v36 = vpack.c.bf16 %v9122_v42, %v9122_v42  ;;  %v9125_v35 = vadd.f32 %v9124_v34, %v9070_v3  ;;  %v12629_v2 = vpop.f32.mrb[75].mxu1 }
 0x4e6   :  { %9134 = vrot.lane.b32.xlu0 %v17628_v36, %s13712_s1  ;;  %v17631_v18 = vpack.c.bf16 %v9125_v35, %v9125_v35 }
 0x4ea   :  { %9183 = vrot.lane.b32.xlu0 %v17631_v18, %s13712_s1  ;;  %s13727_s1 = smov [#allocation2]  }
 0x558   :  { %v9135_v51 = vpop.permute.xlu0 %9134 }
 0x559   :  { %v9141_v40 = vsel %vm9136_vm10, %v9135_v51, 0 }
 0x55a   :  { %12631 = vmatpush3.bf16.xpose.msra.mxu1 %v9141_v40 }
 0x55b   :  { %12636 = vmatprep.subr.bf16.mxu1 %v13710_v38 }
 0x55c   :  { %v9184_v5 = vpop.permute.xlu0 %9183 }
 0x55d   :  { %v9189_v8 = vsel %vm9136_vm10, %v9184_v5, 0 }
 0x561   :  { %12633 = vmatmul.mubr.msk.bf16.vlgmr.msra.gmra.mrb[76].mxu1 %vm9136_vm10, %v17628_v36 }
 0x562   :  { %12637 = vmatpush3.bf16.xpose.msra.mxu1 %v9189_v8  ;;  %12638 = vmatprep.mubr.msk.bf16.mxu1 %vm13711_vm8, %v13710_v38 }
 0x563   :  { %12642 = vmatprep.subr.bf16.mxu1 %v13710_v38 }
 0x569   :  { %12639 = vmatmul.mubr.msk.bf16.vlgmr.msra.gmra.mrb[80].mxu1 %vm9136_vm10, %v17631_v18 }
 0x56a   :  { %12644 = vmatprep.mubr.msk.bf16.mxu1 %vm13711_vm8, %v13710_v38 }
 0x634   :  { %v9177_v16 = vpop.f32.mrb[76].mxu1 }
 0x635   :  { %v9231_v22 = vmul.f32 0.35355338, %v9177_v16  ;;  %v12634_v10 = vpop.f32.mrb[77].mxu1 }
 0x636   :  { %v9180_v30 = vpop.f32.mrb[78].mxu1 }
 0x637   :  { %v12635_v14 = vpop.f32.mrb[79].mxu1  ;;  %v9233_v1 = vsel %vm9136_vm10, %v9231_v22, -inf }
 0x638   :  { %9234 = vmax.xlane.f32.xlu1 %v9233_v1 }
 0x63c   :  { %v9225_v59 = vpop.f32.mrb[80].mxu1 }
 0x63d   :  { %v9232_v31 = vmul.f32 0.35355338, %v9225_v59  ;;  %v12640_v26 = vpop.f32.mrb[81].mxu1 }
 0x63e   :  { %v9228_v21 = vpop.f32.mrb[82].mxu1 }
 0x63f   :  { %v12641_v12 = vpop.f32.mrb[83].mxu1  ;;  %v9236_v37 = vsel %vm9136_vm10, %v9232_v31, -inf }
 0x640   :  { %9237 = vmax.xlane.f32.xlu1 %v9236_v37 }
 0x651   :  { %9257 = vrot.lane.b32.xlu1 %v17628_v36, %s13713_s21 }
 0x655   :  { %9306 = vrot.lane.b32.xlu1 %v17631_v18, %s13713_s21  ;;  %s10528_s21 = sshll.u32 %s13727_s1, 4  ;;  %s10529_s21 = int_to_ptr.vmem [resolvable:$true] %s10528_s21 }
 0x656   :  { %p13690_p1 = scmp.lt.s32.totalorder %s10529_s21, %s10529_s21 }
 0x6c5   :  { %v9235_v48 = vpop.xlane.xlu1 %9234 }
 0x6c6   :  { %v9239_v58 = vsub.f32 %v9231_v22, %v9235_v48 }
 0x6c8   :  { %v9241_v0 = vmul.f32 1.442695, %v9239_v58 }
 0x6ca   :  { %13434 = vpow2.f32 %v9241_v0 }
 0x6cd   :  { %v9238_v45 = vpop.xlane.xlu1 %9237 }
 0x6ce   :  { %v9240_v46 = vsub.f32 %v9232_v31, %v9238_v45 }
 0x6d0   :  { %v9243_v39 = vmul.f32 1.442695, %v9240_v46 }
 0x6d1   :  { %v9258_v23 = vpop.permute.xlu1 %9257 }
 0x6d2   :  { %13436 = vpow2.f32 %v9243_v39  ;;  %v9264_v61 = vsel %vm9262_vm11, %v9258_v23, 0 }
 0x6d3   :  { %12643 = vmatpush3.bf16.msra.mxu1 %v9264_v61 }
 0x6d4   :  { %v13435_v47 = vpop.eup %13434  ;;  %12648 = vmatprep.subr.bf16.mxu1 %v13710_v38 }
 0x6d5   :  { %v9245_v54 = vsel %vm9136_vm10, %v13435_v47, 0.0  ;;  %v9307_v49 = vpop.permute.xlu1 %9306 }
 0x6d6   :  { %9246 = vadd.xlane.f32.xlu0 %v9245_v54  ;;  %v9312_v25 = vsel %vm9262_vm11, %v9307_v49, 0 }
 0x6dc   :  { %v13437_v62 = vpop.eup %13436 }
 0x6dd   :  { %v9248_v63 = vsel %vm9136_vm10, %v13437_v62, 0.0 }
 0x6de   :  { %9249 = vadd.xlane.f32.xlu1 %v9248_v63 }
 0x6ec   :  { %9406 = vrot.lane.b32.xlu0 %v17631_v18, %s13714_s22 }
 0x6ef   :  { %9356 = vrot.lane.b32.xlu1 %v17628_v36, %s13714_s22 }
 0x6f3   :  { %9354 = vrot.lane.b32.xlu1 %v17628_v36, %s13715_s23 }
 0x6f7   :  { %9404 = vrot.lane.b32.xlu1 %v17631_v18, %s13715_s23 }
 0x763   :  { %v9247_v29 = vpop.xlane.xlu0 %9246 }
 0x764   :  { %13438 = vrcp.f32 %v9247_v29 }
 0x767   :  { %v9407_v20 = vpop.permute.xlu0 %9406 }
 0x768   :  { %v9412_v33 = vsel %vm9136_vm10, %v9407_v20, 0 }
 0x76b   :  { %v9250_v9 = vpop.xlane.xlu1 %9249 }
 0x76c   :  { %13440 = vrcp.f32 %v9250_v9 }
 0x76e   :  { %v13439_v44 = vpop.eup %13438 }
 0x76f   :  { %v9253_v24 = vmul.f32 %v13439_v44, %v13435_v47  ;;  %v9357_v53 = vpop.permute.xlu1 %9356 }
 0x770   :  { %v9362_v11 = vsel %vm9136_vm10, %v9357_v53, 0 }
 0x771   :  { %v9255_v7 = vpack.c.bf16 %v9253_v24, %v9253_v24 }
 0x773   :  { %12645 = vmatmul.mubr.msk.bf16.vlgmr.msra.gmra.mrb[84].mxu1 %vm9136_vm10, %v9255_v7  ;;  %v9355_v52 = vpop.permute.xlu1 %9354 }
 0x774   :  { %12649 = vmatpush3.bf16.msra.mxu1 %v9312_v25  ;;  %12650 = vmatprep.mubr.msk.bf16.mxu1 %vm13711_vm8, %v13710_v38 }
 0x775   :  { %12654 = vmatprep.subr.bf16.mxu1 %v13710_v38 }
 0x776   :  { %v13441_v4 = vpop.eup %13440 }
 0x777   :  { %v9254_v28 = vmul.f32 %v13441_v4, %v13437_v62  ;;  %v9405_v13 = vpop.permute.xlu1 %9404 }
 0x779   :  { %v9256_v32 = vpack.c.bf16 %v9254_v28, %v9254_v28 }
 0x77b   :  { %12651 = vmatmul.mubr.msk.bf16.vlgmr.msra.gmra.mrb[88].mxu1 %vm9136_vm10, %v9256_v32 }
 0x77c   :  { %12656 = vmatprep.mubr.msk.bf16.mxu1 %vm13711_vm8, %v13710_v38 }
 0x77d   :  { %12655 = vmatpush3.bf16.xpose.msra.mxu1 %v9362_v11 }
 0x77e   :  { %12660 = vmatprep.subr.bf16.mxu1 %v13710_v38 }
 0x784   :  { %12657 = vmatmul.mubr.msk.bf16.vlgmr.msra.gmra.mrb[92].mxu1 %vm9136_vm10, %v9355_v52 }
 0x785   :  { %12661 = vmatpush3.bf16.xpose.msra.mxu1 %v9412_v33  ;;  %12662 = vmatprep.mubr.msk.bf16.mxu1 %vm13711_vm8, %v13710_v38 }
 0x786   :  { %12666 = vmatprep.subr.bf16.mxu1 %v13710_v38 }
 0x78c   :  { %12663 = vmatmul.mubr.msk.bf16.vlgmr.msra.gmra.mrb[96].mxu1 %vm9136_vm10, %v9405_v13 }
 0x78d   :  { %12668 = vmatprep.mubr.msk.bf16.mxu1 %vm13711_vm8, %v13710_v38 }
 0x846   :  { %v17676_v50 = vpop.f32.mrb[84].mxu1 }
 0x847   :  { %v12646_v15 = vpop.f32.mrb[85].mxu1 }
 0x848   :  { %v9303_v43 = vpop.f32.mrb[86].mxu1 }
 0x849   :  { %v12647_v6 = vpop.f32.mrb[87].mxu1 }
 0x84e   :  { %v17678_v3 = vpop.f32.mrb[88].mxu1 }
 0x84f   :  { %v12652_v57 = vpop.f32.mrb[89].mxu1 }
 0x850   :  { %v9351_v42 = vpop.f32.mrb[90].mxu1 }
 0x851   :  { %v12653_v41 = vpop.f32.mrb[91].mxu1 }
 0x857   :  { %v9398_v34 = vpop.f32.mrb[92].mxu1 }
 0x858   :  { %v9454_v35 = vmul.f32 0.35355338, %v9398_v34  ;;  %v12658_v2 = vpop.f32.mrb[93].mxu1 }
 0x859   :  { %v9401_v51 = vpop.f32.mrb[94].mxu1 }
 0x85a   :  { %v12659_v40 = vpop.f32.mrb[95].mxu1  ;;  %v9456_v5 = vsel %vm9136_vm10, %v9454_v35, -inf }
 0x85b   :  { %9457 = vmax.xlane.f32.xlu1 %v9456_v5 }
 0x85f   :  { %v9448_v8 = vpop.f32.mrb[96].mxu1 }
 0x860   :  { %v9455_v16 = vmul.f32 0.35355338, %v9448_v8  ;;  %v12664_v22 = vpop.f32.mrb[97].mxu1 }
 0x861   :  { %v9451_v10 = vpop.f32.mrb[98].mxu1 }
 0x862   :  { %v12665_v30 = vpop.f32.mrb[99].mxu1  ;;  %v9459_v14 = vsel %vm9136_vm10, %v9455_v16, -inf }
 0x863   :  { %9460 = vmax.xlane.f32.xlu0 %v9459_v14 }
 0x86c   :  { %9480 = vrot.lane.b32.xlu1 %v17628_v36, %s13716_s24 }
 0x879   :  { %9528 = vrot.lane.b32.xlu0 %v17631_v18, %s13716_s24 }
 0x87d   :  { %9628 = vrot.lane.b32.xlu0 %v17631_v18, %s13717_s25 }
 0x8e8   :  { %v9458_v1 = vpop.xlane.xlu1 %9457 }
 0x8e9   :  { %v9462_v59 = vsub.f32 %v9454_v35, %v9458_v1 }
 0x8eb   :  { %v9464_v31 = vmul.f32 1.442695, %v9462_v59 }
 0x8ec   :  { %v9481_v26 = vpop.permute.xlu1 %9480 }
 0x8ed   :  { %13442 = vpow2.f32 %v9464_v31  ;;  %v9486_v21 = vsel %vm9262_vm11, %v9481_v26, 0 }
 0x8ee   :  { %12667 = vmatpush3.bf16.msra.mxu1 %v9486_v21 }
 0x8ef   :  { %12672 = vmatprep.subr.bf16.mxu1 %v13710_v38 }
 0x8f0   :  { %v9461_v12 = vpop.xlane.xlu0 %9460 }
 0x8f1   :  { %v9463_v37 = vsub.f32 %v9455_v16, %v9461_v12 }
 0x8f3   :  { %v9466_v48 = vmul.f32 1.442695, %v9463_v37 }
 0x8f4   :  { %v9529_v54 = vpop.permute.xlu0 %9528 }
 0x8f5   :  { %13444 = vpow2.f32 %v9466_v48  ;;  %v9534_v63 = vsel %vm9262_vm11, %v9529_v54, 0 }
 0x8f7   :  { %v13443_v58 = vpop.eup %13442 }
 0x8f8   :  { %v9468_v0 = vsel %vm9136_vm10, %v13443_v58, 0.0  ;;  %v9629_v7 = vpop.permute.xlu0 %9628 }
 0x8f9   :  { %9469 = vadd.xlane.f32.xlu1 %v9468_v0  ;;  %v9634_v4 = vsel %vm9136_vm10, %v9629_v7, 0 }
 0x8ff   :  { %v13445_v45 = vpop.eup %13444 }
 0x900   :  { %v9471_v46 = vsel %vm9136_vm10, %v13445_v45, 0.0 }
 0x901   :  { %9472 = vadd.xlane.f32.xlu1 %v9471_v46 }
 0x912   :  { %9578 = vrot.lane.b32.xlu1 %v17628_v36, %s13717_s25 }
 0x916   :  { %9576 = vrot.lane.b32.xlu1 %v17628_v36, %s13718_s26 }
 0x91a   :  { %9626 = vrot.lane.b32.xlu1 %v17631_v18, %s13718_s26 }
 0x986   :  { %v9470_v39 = vpop.xlane.xlu1 %9469 }
 0x987   :  { %13446 = vrcp.f32 %v9470_v39 }
 0x98e   :  { %v9473_v23 = vpop.xlane.xlu1 %9472 }
 0x98f   :  { %13448 = vrcp.f32 %v9473_v23 }
 0x991   :  { %v13447_v61 = vpop.eup %13446 }
 0x992   :  { %v9476_v47 = vmul.f32 %v13447_v61, %v13443_v58  ;;  %v9579_v9 = vpop.permute.xlu1 %9578 }
 0x993   :  { %v9584_v24 = vsel %vm9136_vm10, %v9579_v9, 0 }
 0x994   :  { %v9478_v62 = vpack.c.bf16 %v9476_v47, %v9476_v47 }
 0x996   :  { %12669 = vmatmul.mubr.msk.bf16.vlgmr.msra.gmra.mrb[100].mxu1 %vm9136_vm10, %v9478_v62  ;;  %v9577_v25 = vpop.permute.xlu1 %9576 }
 0x997   :  { %12673 = vmatpush3.bf16.msra.mxu1 %v9534_v63  ;;  %12674 = vmatprep.mubr.msk.bf16.mxu1 %vm13711_vm8, %v13710_v38 }
 0x998   :  { %12678 = vmatprep.subr.bf16.mxu1 %v13710_v38 }
 0x999   :  { %v13449_v29 = vpop.eup %13448 }
 0x99a   :  { %v9477_v49 = vmul.f32 %v13449_v29, %v13445_v45  ;;  %v9627_v28 = vpop.permute.xlu1 %9626 }
 0x99c   :  { %v9479_v44 = vpack.c.bf16 %v9477_v49, %v9477_v49 }
 0x99e   :  { %12675 = vmatmul.mubr.msk.bf16.vlgmr.msra.gmra.mrb[104].mxu1 %vm9136_vm10, %v9479_v44 }
 0x99f   :  { %12680 = vmatprep.mubr.msk.bf16.mxu1 %vm13711_vm8, %v13710_v38 }
 0x9a0   :  { %12679 = vmatpush3.bf16.xpose.msra.mxu1 %v9584_v24 }
 0x9a1   :  { %12684 = vmatprep.subr.bf16.mxu1 %v13710_v38 }
 0x9a7   :  { %12681 = vmatmul.mubr.msk.bf16.vlgmr.msra.gmra.mrb[108].mxu1 %vm9136_vm10, %v9577_v25 }
 0x9a8   :  { %12685 = vmatpush3.bf16.xpose.msra.mxu1 %v9634_v4  ;;  %12686 = vmatprep.mubr.msk.bf16.mxu1 %vm13711_vm8, %v13710_v38 }
 0x9a9   :  { %12690 = vmatprep.subr.bf16.mxu1 %v13710_v38 }
 0x9af   :  { %12687 = vmatmul.mubr.msk.bf16.vlgmr.msra.gmra.mrb[112].mxu1 %vm9136_vm10, %v9627_v28 }
 0x9b0   :  { %12692 = vmatprep.mubr.msk.bf16.mxu1 %vm13711_vm8, %v13710_v38 }
 0xa69   :  { %v17710_v53 = vpop.f32.mrb[100].mxu1 }
 0xa6a   :  { %v12670_v32 = vpop.f32.mrb[101].mxu1 }
 0xa6b   :  { %v9525_v11 = vpop.f32.mrb[102].mxu1 }
 0xa6c   :  { %v12671_v20 = vpop.f32.mrb[103].mxu1 }
 0xa71   :  { %v17712_v52 = vpop.f32.mrb[104].mxu1 }
 0xa72   :  { %v13303_v33 = vpack.i.bf16 %v17712_v52, %v17710_v53  ;;  %v12676_v13 = vpop.f32.mrb[105].mxu1 }
 0xa73   :  { %v9573_v15 = vpop.f32.mrb[106].mxu1 }
 0xa74   :  { %v12677_v43 = vpop.f32.mrb[107].mxu1 }
 0xa7a   :  { %v9620_v6 = vpop.f32.mrb[108].mxu1 }
 0xa7b   :  { %v9676_v57 = vmul.f32 0.35355338, %v9620_v6  ;;  %v12682_v42 = vpop.f32.mrb[109].mxu1 }
 0xa7c   :  { %v9623_v41 = vpop.f32.mrb[110].mxu1 }
 0xa7d   :  { %v12683_v34 = vpop.f32.mrb[111].mxu1  ;;  %v9678_v35 = vsel %vm9136_vm10, %v9676_v57, -inf }
 0xa7e   :  { %9679 = vmax.xlane.f32.xlu0 %v9678_v35 }
 0xa82   :  { %v9670_v2 = vpop.f32.mrb[112].mxu1 }
 0xa83   :  { %v9677_v51 = vmul.f32 0.35355338, %v9670_v2  ;;  %v12688_v40 = vpop.f32.mrb[113].mxu1 }
 0xa84   :  { %v9673_v5 = vpop.f32.mrb[114].mxu1 }
 0xa85   :  { %v12689_v8 = vpop.f32.mrb[115].mxu1  ;;  %v9681_v16 = vsel %vm9136_vm10, %v9677_v51, -inf }
 0xa86   :  { %9682 = vmax.xlane.f32.xlu1 %v9681_v16 }
 0xa97   :  { %9702 = vrot.lane.b32.xlu1 %v17628_v36, %s13719_s27 }
 0xa9b   :  { %9800 = vrot.lane.b32.xlu1 %v17628_v36, %s13720_s28 }
 0xa9f   :  { %9798 = vrot.lane.b32.xlu1 %v17628_v36, %s13721_s29 }
 0xaa3   :  { %9848 = vrot.lane.b32.xlu1 %v17631_v18, %s13721_s29 }
 0xb0b   :  { %v9680_v22 = vpop.xlane.xlu0 %9679 }
 0xb0c   :  { %v9684_v10 = vsub.f32 %v9676_v57, %v9680_v22 }
 0xb0e   :  { %v9686_v30 = vmul.f32 1.442695, %v9684_v10 }
 0xb10   :  { %13450 = vpow2.f32 %v9686_v30 }
 0xb13   :  { %v9683_v14 = vpop.xlane.xlu1 %9682 }
 0xb14   :  { %v9685_v1 = vsub.f32 %v9677_v51, %v9683_v14 }
 0xb16   :  { %v9688_v59 = vmul.f32 1.442695, %v9685_v1 }
 0xb17   :  { %v9703_v31 = vpop.permute.xlu1 %9702 }
 0xb18   :  { %13452 = vpow2.f32 %v9688_v59  ;;  %v9708_v26 = vsel %vm9262_vm11, %v9703_v31, 0 }
 0xb19   :  { %12691 = vmatpush3.bf16.msra.mxu1 %v9708_v26 }
 0xb1a   :  { %v13451_v21 = vpop.eup %13450  ;;  %12696 = vmatprep.subr.bf16.mxu1 %v13710_v38 }
 0xb1b   :  { %v9690_v12 = vsel %vm9136_vm10, %v13451_v21, 0.0  ;;  %v9801_v62 = vpop.permute.xlu1 %9800 }
 0xb1c   :  { %9691 = vadd.xlane.f32.xlu0 %v9690_v12  ;;  %v9806_v29 = vsel %vm9136_vm10, %v9801_v62, 0 }
 0xb1f   :  { %v9799_v9 = vpop.permute.xlu1 %9798 }
 0xb22   :  { %v13453_v37 = vpop.eup %13452 }
 0xb23   :  { %v9693_v48 = vsel %vm9136_vm10, %v13453_v37, 0.0  ;;  %v9849_v24 = vpop.permute.xlu1 %9848 }
 0xb24   :  { %9694 = vadd.xlane.f32.xlu0 %v9693_v48 }
 0xb3a   :  { %9750 = vrot.lane.b32.xlu0 %v17631_v18, %s13719_s27 }
 0xb3e   :  { %9850 = vrot.lane.b32.xlu0 %v17631_v18, %s13720_s28 }
 0xba9   :  { %v9692_v58 = vpop.xlane.xlu0 %9691 }
 0xbaa   :  { %13454 = vrcp.f32 %v9692_v58 }
 0xbb1   :  { %v9695_v0 = vpop.xlane.xlu0 %9694 }
 0xbb2   :  { %13456 = vrcp.f32 %v9695_v0 }
 0xbb4   :  { %v13455_v45 = vpop.eup %13454 }
 0xbb5   :  { %v9698_v46 = vmul.f32 %v13455_v45, %v13451_v21  ;;  %v9751_v39 = vpop.permute.xlu0 %9750 }
 0xbb6   :  { %v9756_v61 = vsel %vm9262_vm11, %v9751_v39, 0  ;;  %v13416_v39 = vld [vmem:[%s17896_s2 + $0x34] sm:$0xff]  }
 0xbb7   :  { %v9700_v23 = vpack.c.bf16 %v9698_v46, %v9698_v46 }
 0xbb9   :  { %12693 = vmatmul.mubr.msk.bf16.vlgmr.msra.gmra.mrb[116].mxu1 %vm9136_vm10, %v9700_v23  ;;  %v9851_v49 = vpop.permute.xlu0 %9850  ;;  %v13417_v23 = vld [vmem:[%s17896_s2 + $0x3c] sm:$0xff]  }
 0xbba   :  { %12697 = vmatpush3.bf16.msra.mxu1 %v9756_v61  ;;  %12698 = vmatprep.mubr.msk.bf16.mxu1 %vm13711_vm8, %v13710_v38  ;;  %v9856_v44 = vsel %vm9136_vm10, %v9851_v49, 0 }
 0xbbb   :  { %12702 = vmatprep.subr.bf16.mxu1 %v13710_v38 }
 0xbbc   :  { %v13457_v47 = vpop.eup %13456 }
 0xbbd   :  { %v9699_v54 = vmul.f32 %v13457_v47, %v13453_v37 }
 0xbbf   :  { %v9701_v63 = vpack.c.bf16 %v9699_v54, %v9699_v54 }
 0xbc1   :  { %12699 = vmatmul.mubr.msk.bf16.vlgmr.msra.gmra.mrb[120].mxu1 %vm9136_vm10, %v9701_v63 }
 0xbc2   :  { %12704 = vmatprep.mubr.msk.bf16.mxu1 %vm13711_vm8, %v13710_v38 }
 0xbc3   :  { %12703 = vmatpush3.bf16.xpose.msra.mxu1 %v9806_v29 }
 0xbc4   :  { %12708 = vmatprep.subr.bf16.mxu1 %v13710_v38 }
 0xbca   :  { %12705 = vmatmul.mubr.msk.bf16.vlgmr.msra.gmra.mrb[124].mxu1 %vm9136_vm10, %v9799_v9 }
 0xbcb   :  { %12709 = vmatpush3.bf16.xpose.msra.mxu1 %v9856_v44  ;;  %12710 = vmatprep.mubr.msk.bf16.mxu1 %vm13711_vm8, %v13710_v38 }
 0xbcc   :  { %12714 = vmatprep.subr.bf16.mxu1 %v13710_v38 }
 0xbd2   :  { %12711 = vmatmul.mubr.msk.bf16.vlgmr.msra.gmra.mrb[128].mxu1 %vm9136_vm10, %v9849_v24 }
 0xbd3   :  { %12716 = vmatprep.mubr.msk.bf16.mxu1 %vm13711_vm8, %v13710_v38 }
 0xc8c   :  { %v9744_v7 = vpop.f32.mrb[116].mxu1 }
 0xc8d   :  { %v12694_v25 = vpop.f32.mrb[117].mxu1 }
 0xc8e   :  { %v9747_v4 = vpop.f32.mrb[118].mxu1 }
 0xc8f   :  { %v12695_v28 = vpop.f32.mrb[119].mxu1 }
 0xc94   :  { %v9792_v32 = vpop.f32.mrb[120].mxu1 }
 0xc95   :  { %v13308_v11 = vpack.i.bf16 %v9792_v32, %v9744_v7  ;;  %v12700_v20 = vpop.f32.mrb[121].mxu1 }
 0xc96   :  { %v9795_v13 = vpop.f32.mrb[122].mxu1 }
 0xc97   :  { %v12701_v15 = vpop.f32.mrb[123].mxu1 }
 0xc9d   :  { %v9842_v43 = vpop.f32.mrb[124].mxu1 }
 0xc9e   :  { %v9898_v6 = vmul.f32 0.35355338, %v9842_v43  ;;  %v12706_v57 = vpop.f32.mrb[125].mxu1 }
 0xc9f   :  { %v9845_v42 = vpop.f32.mrb[126].mxu1 }
 0xca0   :  { %v12707_v41 = vpop.f32.mrb[127].mxu1  ;;  %v9900_v34 = vsel %vm9136_vm10, %v9898_v6, -inf }
 0xca1   :  { %9901 = vmax.xlane.f32.xlu0 %v9900_v34 }
 0xca5   :  { %v9892_v35 = vpop.f32.mrb[128].mxu1 }
 0xca6   :  { %v9899_v2 = vmul.f32 0.35355338, %v9892_v35  ;;  %v12712_v51 = vpop.f32.mrb[129].mxu1  ;;  %v10059_v35 = vsub.s32 2, %v17393_v17 }
 0xca7   :  { %v9895_v40 = vpop.f32.mrb[130].mxu1 }
 0xca8   :  { %v12713_v5 = vpop.f32.mrb[131].mxu1  ;;  %v9903_v8 = vsel %vm9136_vm10, %v9899_v2, -inf }
 0xca9   :  { %9904 = vmax.xlane.f32.xlu1 %v9903_v8 }
 0xcba   :  { %9924 = vrot.lane.b32.xlu1 %v17628_v36, %s13722_s30 }
 0xcbe   :  { %13304 = vrot.lane.b32.xlu1 %v13303_v33, %s13723_s7 }
 0xcc2   :  { %13309 = vrot.lane.b32.xlu1 %v13308_v11, %s13724_s8 }
 0xd2e   :  { %v9902_v16 = vpop.xlane.xlu0 %9901 }
 0xd2f   :  { %v9906_v22 = vsub.f32 %v9898_v6, %v9902_v16 }
 0xd31   :  { %v9908_v10 = vmul.f32 1.442695, %v9906_v22 }
 0xd33   :  { %13458 = vpow2.f32 %v9908_v10 }
 0xd36   :  { %v9905_v30 = vpop.xlane.xlu1 %9904 }
 0xd37   :  { %v9907_v14 = vsub.f32 %v9899_v2, %v9905_v30 }
 0xd39   :  { %v9910_v1 = vmul.f32 1.442695, %v9907_v14 }
 0xd3a   :  { %v9925_v59 = vpop.permute.xlu1 %9924 }
 0xd3b   :  { %13460 = vpow2.f32 %v9910_v1  ;;  %v9930_v31 = vsel %vm9262_vm11, %v9925_v59, 0 }
 0xd3c   :  { %12715 = vmatpush3.bf16.msra.mxu1 %v9930_v31 }
 0xd3d   :  { %v13459_v36 = vpop.eup %13458  ;;  %12720 = vmatprep.subr.bf16.mxu1 %v13710_v38 }
 0xd3e   :  { %v9912_v53 = vsel %vm9136_vm10, %v13459_v36, 0.0  ;;  %v13305_v24 = vpop.permute.xlu1 %13304 }
 0xd3f   :  { %9913 = vadd.xlane.f32.xlu0 %v9912_v53  ;;  %v13307_v25 = vunpack.i.h.bf16 %v13305_v24  ;;  %v13306_v4 = vunpack.i.l.bf16 %v13305_v24  ;;  %v13420_v24 = vld [vmem:[%s17896_s2 + $0x54] sm:$0xff]  }
 0xd41   :  { %v10045_v20 = vsel %vm9136_vm10, %v17678_v3, %v13307_v25  ;;  %v10044_v13 = vsel %vm9136_vm10, %v17676_v50, %v13306_v4  ;;  %v17786_v50 = vld [vmem:[%s17897_s3] sm:$0xff] }
 0xd42   :  { %v13310_v7 = vpop.permute.xlu1 %13309  ;;  %v10060_v3 = vrot.slane %v17786_v50, %v10059_v35  ;;  %v13421_v25 = vld [vmem:[%s17896_s2 + $0x5c] sm:$0xff]   ;;  %v13422_v4 = vld [vmem:[%s17896_s2 + $0x64] sm:$0xff]   ;;  %v10236_v35 = vsub.s32 6, %v17393_v17 }
 0xd43   :  { %v13312_v28 = vunpack.i.h.bf16 %v13310_v7  ;;  %v13311_v32 = vunpack.i.l.bf16 %v13310_v7 }
 0xd45   :  { %v13461_v52 = vpop.eup %13460  ;;  %v10047_v6 = vsel %vm10046_vm12, %v10044_v13, %v13311_v32  ;;  %v10048_v57 = vsel %vm10046_vm12, %v10045_v20, %v13312_v28  ;;  %v13423_v28 = vld [vmem:[%s17896_s2 + $0x6c] sm:$0xff]   ;;  %v10173_v32 = vsub.s32 5, %v17393_v17 }
 0xd46   :  { %v9915_v33 = vsel %vm9136_vm10, %v13461_v52, 0.0 }
 0xd47   :  { %9916 = vadd.xlane.f32.xlu0 %v9915_v33 }
 0xd5d   :  { %9972 = vrot.lane.b32.xlu0 %v17631_v18, %s13722_s30 }
 0xdcc   :  { %v9914_v26 = vpop.xlane.xlu0 %9913 }
 0xdcd   :  { %13462 = vrcp.f32 %v9914_v26 }
 0xdd4   :  { %v9917_v21 = vpop.xlane.xlu0 %9916 }
 0xdd5   :  { %13464 = vrcp.f32 %v9917_v21 }
 0xdd7   :  { %v13463_v12 = vpop.eup %13462 }
 0xdd8   :  { %v9920_v37 = vmul.f32 %v13463_v12, %v13459_v36  ;;  %v9973_v48 = vpop.permute.xlu0 %9972  ;;  %v13419_v12 = vld [vmem:[%s17896_s2 + $0x4c] sm:$0xff]  }
 0xdd9   :  { %v9978_v0 = vsel %vm9262_vm11, %v9973_v48, 0 }
 0xdda   :  { %v9922_v58 = vpack.c.bf16 %v9920_v37, %v9920_v37 }
 0xddc   :  { %12717 = vmatmul.mubr.msk.bf16.vlgmr.msra.gmra.mrb[132].mxu1 %vm9136_vm10, %v9922_v58 }
 0xddd   :  { %12721 = vmatpush3.bf16.msra.mxu1 %v9978_v0  ;;  %12722 = vmatprep.mubr.msk.bf16.mxu1 %vm13711_vm8, %v13710_v38 }
 0xdde   :  { %12726 = vmatprep.subr.bf16.mxu1 %v13710_v38 }
 0xddf   :  { %v13465_v45 = vpop.eup %13464 }
 0xde0   :  { %v9921_v18 = vmul.f32 %v13465_v45, %v13461_v52 }
 0xde2   :  { %v9923_v46 = vpack.c.bf16 %v9921_v18, %v9921_v18 }
 0xde4   :  { %12723 = vmatmul.mubr.msk.bf16.vlgmr.msra.gmra.mrb[136].mxu1 %vm9136_vm10, %v9923_v46  ;;  %v10148_v46 = vsub.s32 3, %v17393_v17 }
 0xde5   :  { %12730 = vmatprep.mubr.msk.bf16.mxu1 %vm13711_vm8, %v13710_v38  ;;  %12727 = vmatpush3.bf16.msra.mxu1 %v13416_v39 }
 0xde6   :  { %12728 = vmatprep.subr.bf16.mxu1 %v13710_v38  ;;  %v10149_v39 = vrot.slane %v17786_v50, %v10148_v46  ;;  %v26_v46 = vld [vmem:[%s17897_s3 + $0x8] sm:$0x3] }
 0xde9   :  { %12729 = vmatpush3.bf16.msra.mxu1 %v13417_v23  ;;  %v10154_v23 = vsub.s32 4, %v17393_v17 }
 0xdea   :  { %12734 = vmatprep.subr.bf16.mxu1 %v13710_v38 }
 0xeaf   :  { %v9966_v61 = vpop.f32.mrb[132].mxu1 }
 0xeb0   :  { %v12718_v47 = vpop.f32.mrb[133].mxu1 }
 0xeb1   :  { %v9969_v54 = vpop.f32.mrb[134].mxu1 }
 0xeb2   :  { %v12719_v62 = vpop.f32.mrb[135].mxu1 }
 0xeb7   :  { %v10014_v63 = vpop.f32.mrb[136].mxu1 }
 0xeb8   :  { %v13313_v29 = vpack.i.bf16 %v10014_v63, %v9966_v61  ;;  %v12724_v49 = vpop.f32.mrb[137].mxu1 }
 0xeb9   :  { %v10017_v9 = vpop.f32.mrb[138].mxu1 }
 0xeba   :  { %13314 = vrot.lane.b32.xlu0 %v13313_v29, %s13725_s12  ;;  %v12725_v44 = vpop.f32.mrb[139].mxu1  ;;  %v10155_v29 = vrot.slane %v17786_v50, %v10154_v23 }
 0xf2c   :  { %v13315_v11 = vpop.permute.xlu0 %13314 }
 0xf2d   :  { %v13317_v15 = vunpack.i.h.bf16 %v13315_v11  ;;  %v13316_v43 = vunpack.i.l.bf16 %v13315_v11  ;;  %v10174_v11 = vrot.slane %v17786_v50, %v10173_v32  ;;  %v13431_v32 = vld [vmem:[%s17896_s2 + $0xac] sm:$0xff]  }
 0xf2f   :  { %v10051_v42 = vsel %vm10049_vm13, %v10048_v57, %v13317_v15  ;;  %v10050_v41 = vsel %vm10049_vm13, %v10047_v6, %v13316_v43 }
 0xf30   :  { %v10052_v34 = vpack.c.bf16 %v10051_v42, %v10050_v41 }
 0xf32   :  { %12731 = vmatmul.mubr.msk.bf16.vlgmr.msra.gmra.mrb[140].mxu1 %vm9083_vm9, %v10052_v34 }
 0xf33   :  { %12738 = vmatprep.mubr.msk.bf16.mxu1 %vm13711_vm8, %v13710_v38 }
0x1005   :  { %v10110_v2 = vpop.f32.mrb[140].mxu1 }
0x1006   :  { %v10111_v51 = vadd.f32 %v10110_v2, %v10060_v3  ;;  %v12732_v40 = vpop.f32.mrb[141].mxu1 }
0x1007   :  { %v10113_v5 = vpop.f32.mrb[142].mxu1 }
0x1008   :  { %v10114_v8 = vadd.f32 %v10113_v5, %v10060_v3  ;;  %v12733_v16 = vpop.f32.mrb[143].mxu1  ;;  %v10117_v22 = vadd.f32 %v10111_v51, %v17608_v60  ;;  %v10237_v3 = vrot.slane %v17786_v50, %v10236_v35 }
0x100a   :  { %v10119_v10 = vsel %vm9083_vm9, %v10117_v22, 0.0  ;;  %v10118_v30 = vadd.f32 %v10114_v8, %v17613_v56  ;;  %v13418_v56 = vld [vmem:[%s17896_s2 + $0x44] sm:$0xff]  }
0x100b   :  { %10120 = vadd.xlane.f32.xlu1 %v10119_v10  ;;  %12735 = vmatpush3.bf16.msra.mxu1 %v13418_v56 }
0x100c   :  { %v10122_v14 = vsel %vm9083_vm9, %v10118_v30, 0.0  ;;  %12736 = vmatprep.subr.bf16.mxu1 %v13710_v38 }
0x100d   :  { %10123 = vadd.xlane.f32.xlu0 %v10122_v14 }
0x100f   :  { %12737 = vmatpush3.bf16.msra.mxu1 %v13419_v12 }
0x1010   :  { %12742 = vmatprep.subr.bf16.mxu1 %v13710_v38 }
0x1098   :  { %v10121_v1 = vpop.xlane.xlu1 %10120 }
0x1099   :  { %v10126_v59 = vmul.f32 0.03125, %v10121_v1 }
0x109a   :  { %v10124_v31 = vpop.xlane.xlu0 %10123 }
0x109b   :  { %v10128_v36 = vsub.f32 %v10117_v22, %v10126_v59  ;;  %v10127_v53 = vmul.f32 0.03125, %v10124_v31 }
0x109d   :  { %v10129_v52 = vsub.f32 %v10118_v30, %v10127_v53  ;;  %v10130_v33 = vmul.f32 %v10128_v36, %v10128_v36 }
0x109f   :  { %v10132_v26 = vsel %vm9083_vm9, %v10130_v33, 0.0  ;;  %v10131_v21 = vmul.f32 %v10129_v52, %v10129_v52 }
0x10a0   :  { %10133 = vadd.xlane.f32.xlu0 %v10132_v26 }
0x10a1   :  { %v10135_v60 = vsel %vm9083_vm9, %v10131_v21, 0.0 }
0x10a2   :  { %10136 = vadd.xlane.f32.xlu1 %v10135_v60 }
0x112d   :  { %v10134_v37 = vpop.xlane.xlu0 %10133 }
0x112e   :  { %v10138_v48 = vmul.f32 0.03125, %v10134_v37 }
0x112f   :  { %v10137_v58 = vpop.xlane.xlu1 %10136 }
0x1130   :  { %v10140_v0 = vadd.f32 1e-05, %v10138_v48  ;;  %v10139_v45 = vmul.f32 0.03125, %v10137_v58 }
0x1132   :  { %13466 = vrsqrt.f32 %v10140_v0  ;;  %v10141_v18 = vadd.f32 1e-05, %v10139_v45  ;;  %v10337_v0 = vsub.s32 7, %v17393_v17 }
0x1134   :  { %13468 = vrsqrt.f32 %v10141_v18  ;;  %v10338_v45 = vrot.slane %v17786_v50, %v10337_v0  ;;  %v10347_v50 = vld [vmem:[%s17899_s5] sm:$0x1] }
0x113c   :  { %v13467_v61 = vpop.eup %13466 }
0x113d   :  { %v10144_v47 = vmul.f32 %v13467_v61, %v10128_v36 }
0x113e   :  { %v13469_v54 = vpop.eup %13468 }
0x113f   :  { %v10150_v62 = vmul.f32 %v10149_v39, %v10144_v47  ;;  %v10145_v63 = vmul.f32 %v13469_v54, %v10129_v52  ;;  %v10344_v54 = vrot.slane %v26_v46, %v8788_v55  ;;  %v13425_v55 = vld [vmem:[%s17896_s2 + $0x7c] sm:$0xff]  }
0x1141   :  { %v10151_v49 = vmul.f32 %v10149_v39, %v10145_v63  ;;  %v10156_v9 = vadd.f32 %v10155_v29, %v10150_v62 }
0x1143   :  { %v10157_v44 = vadd.f32 %v10155_v29, %v10151_v49 }
0x1145   :  { %v10170_v7 = vpack.c.bf16 %v10157_v44, %v10156_v9 }
0x1147   :  { %12739 = vmatmul.mubr.msk.bf16.vlgmr.msra.gmra.mrb[144].mxu1 %vm9083_vm9, %v10170_v7  ;;  %v13427_v7 = vld [vmem:[%s17896_s2 + $0x8c] sm:$0xff]  }
0x1148   :  { %12743 = vmatpush3.bf16.msra.mxu1 %v13420_v24  ;;  %12750 = vmatprep.mubr.msk.bf16.mxu1 %vm13711_vm8, %v13710_v38  ;;  %v13426_v24 = vld [vmem:[%s17896_s2 + $0x84] sm:$0xff]  }
0x1149   :  { %12744 = vmatprep.subr.bf16.mxu1 %v13710_v38 }
0x114c   :  { %12745 = vmatpush3.bf16.msra.mxu1 %v13421_v25  ;;  %v13428_v25 = vld [vmem:[%s17896_s2 + $0x94] sm:$0xff]  }
0x114d   :  { %12746 = vmatprep.subr.bf16.mxu1 %v13710_v38 }
0x1150   :  { %12747 = vmatpush3.bf16.msra.mxu1 %v13422_v4  ;;  %v13429_v4 = vld [vmem:[%s17896_s2 + $0x9c] sm:$0xff]  }
0x1151   :  { %12748 = vmatprep.subr.bf16.mxu1 %v13710_v38 }
0x1154   :  { %12749 = vmatpush3.bf16.msra.mxu1 %v13423_v28  ;;  %v13430_v28 = vld [vmem:[%s17896_s2 + $0xa4] sm:$0xff]  }
0x1155   :  { %12754 = vmatprep.subr.bf16.mxu1 %v13710_v38 }
0x121a   :  { %v10224_v20 = vpop.f32.mrb[144].mxu1 }
0x121b   :  { %v10225_v13 = vadd.f32 %v10224_v20, %v10174_v11  ;;  %v12740_v15 = vpop.f32.mrb[145].mxu1  ;;  %v13433_v20 = vld [vmem:[%s17896_s2 + $0xbc] sm:$0xff]  }
0x121c   :  { %v10227_v43 = vpop.f32.mrb[146].mxu1 }
0x121d   :  { %v10228_v6 = vadd.f32 %v10227_v43, %v10174_v11  ;;  %v12741_v57 = vpop.f32.mrb[147].mxu1  ;;  %v10231_v42 = vmax.f32 %v10225_v13, 0.0  ;;  %v13432_v11 = vld [vmem:[%s17896_s2 + $0xb4] sm:$0xff]  }
0x121f   :  { %v10232_v41 = vmax.f32 %v10228_v6, 0.0  ;;  %v10392_v6 = vpack.c.bf16 %v17623_v19, %v17623_v19 }
0x1221   :  { %v10233_v34 = vpack.c.bf16 %v10232_v41, %v10231_v42  ;;  %v10417_v41 = vrot.slane %v26_v46, %v9069_v27 }
0x1223   :  { %12751 = vmatmul.mubr.msk.bf16.vlgmr.msra.gmra.mrb[148].mxu1 %vm10262_vm14, %v10233_v34 }
0x1224   :  { %12756 = vmatprep.mubr.msk.bf16.mxu1 %vm13711_vm8, %v13710_v38 }
0x12f6   :  { %v10300_v2 = vpop.f32.mrb[148].mxu1 }
0x12f7   :  { %v10301_v51 = vadd.f32 %v10300_v2, %v10237_v3  ;;  %v12752_v40 = vpop.f32.mrb[149].mxu1 }
0x12f8   :  { %v10303_v5 = vpop.f32.mrb[150].mxu1 }
0x12f9   :  { %v10304_v8 = vadd.f32 %v10303_v5, %v10237_v3  ;;  %v12753_v16 = vpop.f32.mrb[151].mxu1  ;;  %v10307_v22 = vadd.f32 %v10301_v51, %v10156_v9  ;;  %v13424_v9 = vld [vmem:[%s17896_s2 + $0x74] sm:$0xff]   ;;  %s13685_s2 = scalar_lea.vmem %s10529_s21, 32 }
0x12fa   :  { %p13686_p0 = scmp.ne.s32.totalorder %s10529_s21, %s13685_s2  ;;  %p13691_p2 = scmp.lt.s32.totalorder %s13685_s2, %s13685_s2 }
0x12fb   :  { %v10309_v10 = vsel %vm9083_vm9, %v10307_v22, 0.0  ;;  %v10308_v30 = vadd.f32 %v10304_v8, %v10157_v44  ;;  %v13726_v44 = vmov 0  }
0x12fc   :  { %10310 = vadd.xlane.f32.xlu0 %v10309_v10  ;;  %p13692_p3 = por %p13691_p2, %p13690_p1 }
0x12fd   :  { %v10312_v14 = vsel %vm9083_vm9, %v10308_v30, 0.0 }
0x12fe   :  { %10313 = vadd.xlane.f32.xlu1 %v10312_v14  ;;  %p13693_p4 = pnand %p13692_p3, %p13686_p0 }
0x1389   :  { %v10311_v1 = vpop.xlane.xlu0 %10310 }
0x138a   :  { %v10315_v38 = vmul.f32 0.03125, %v10311_v1 }
0x138b   :  { %v10314_v59 = vpop.xlane.xlu1 %10313 }
0x138c   :  { %v10317_v31 = vsub.f32 %v10307_v22, %v10315_v38  ;;  %v10316_v36 = vmul.f32 0.03125, %v10314_v59 }
0x138e   :  { %v10318_v53 = vsub.f32 %v10308_v30, %v10316_v36  ;;  %v10319_v52 = vmul.f32 %v10317_v31, %v10317_v31 }
0x1390   :  { %v10321_v33 = vsel %vm9083_vm9, %v10319_v52, 0.0  ;;  %v10320_v26 = vmul.f32 %v10318_v53, %v10318_v53 }
0x1391   :  { %10322 = vadd.xlane.f32.xlu0 %v10321_v33 }
0x1392   :  { %v10324_v21 = vsel %vm9083_vm9, %v10320_v26, 0.0 }
0x1393   :  { %10325 = vadd.xlane.f32.xlu1 %v10324_v21 }
0x141e   :  { %v10323_v60 = vpop.xlane.xlu0 %10322 }
0x141f   :  { %v10327_v56 = vmul.f32 0.03125, %v10323_v60 }
0x1420   :  { %v10326_v12 = vpop.xlane.xlu1 %10325 }
0x1421   :  { %v10329_v37 = vadd.f32 1e-05, %v10327_v56  ;;  %v10328_v48 = vmul.f32 0.03125, %v10326_v12 }
0x1423   :  { %13470 = vrsqrt.f32 %v10329_v37  ;;  %v10330_v58 = vadd.f32 1e-05, %v10328_v48 }
0x1425   :  { %13472 = vrsqrt.f32 %v10330_v58 }
0x142d   :  { %v13471_v18 = vpop.eup %13470 }
0x142e   :  { %v10333_v39 = vmul.f32 %v13471_v18, %v10317_v31 }
0x142f   :  { %v13473_v23 = vpop.eup %13472 }
0x1430   :  { %v10334_v61 = vmul.f32 %v13473_v23, %v10318_v53  ;;  %v10339_v47 = vmul.f32 %v10338_v45, %v10333_v39 }
0x1432   :  { %v10340_v62 = vmul.f32 %v10338_v45, %v10334_v61  ;;  %v10345_v63 = vadd.f32 %v10344_v54, %v10339_v47 }
0x1434   :  { %v10346_v29 = vadd.f32 %v10344_v54, %v10340_v62 }
0x1436   :  { %v10348_v49 = vpack.c.bf16 %v10346_v29, %v10345_v63 }
0x1438   :  { %12755 = vmatpush3.bf16.msra.mxu1 %v10348_v49 }
0x1439   :  { %10481 = vmatprep.subr.bf16.mxu1 %v13726_v44 }
0x143b   :  { %12757 = vmatmul.mubr.msk.bf16.vlgmr.msra.gmra.mrb[152].mxu1 %vm10046_vm12, %v10347_v50 }
0x143c   :  { %10482 = vmatpush1.bf16.msra.mxu1 %v13424_v9 }
0x143d   :  { %10483 = vmatprep.subr.bf16.mxu1 %v13726_v44 }
0x1440   :  { %10484 = vmatpush1.bf16.msra.mxu1 %v13425_v55 }
0x1441   :  { %10485 = vmatprep.subr.bf16.mxu1 %v13726_v44 }
0x1444   :  { %10486 = vmatpush1.bf16.msra.mxu1 %v13426_v24 }
0x1445   :  { %10487 = vmatprep.subr.bf16.mxu1 %v13726_v44 }
0x1448   :  { %10488 = vmatpush1.bf16.msra.mxu1 %v13427_v7 }
0x1449   :  { %10489 = vmatprep.subr.bf16.mxu1 %v13726_v44 }
0x144c   :  { %10490 = vmatpush1.bf16.msra.mxu1 %v13428_v25 }
0x144d   :  { %10491 = vmatprep.subr.bf16.mxu1 %v13726_v44 }
0x1450   :  { %10492 = vmatpush1.bf16.msra.mxu1 %v13429_v4 }
0x1451   :  { %10493 = vmatprep.subr.bf16.mxu1 %v13726_v44 }
0x1454   :  { %10494 = vmatpush1.bf16.msra.mxu1 %v13430_v28 }
0x1455   :  { %10495 = vmatprep.subr.bf16.mxu1 %v13726_v44 }
0x1458   :  { %10496 = vmatpush1.bf16.msra.mxu1 %v13431_v32 }
0x1459   :  { %10497 = vmatprep.subr.bf16.mxu1 %v13726_v44 }
0x145c   :  { %10498 = vmatpush1.bf16.msra.mxu1 %v13432_v11 }
0x145d   :  { %10499 = vmatprep.subr.bf16.mxu1 %v13726_v44 }
0x1460   :  { %10500 = vmatpush1.bf16.msra.mxu1 %v13433_v20 }
0x150e   :  { %v10386_v13 = vpop.f32.mrb[152].mxu1 }
0x150f   :  { %v10393_v15 = vpack.c.bf16 %v10386_v13, %v10386_v13  ;;  %v12758_v43 = vpop.f32.mrb[153].mxu1 }
0x1510   :  { %v10389_v57 = vpop.f32.mrb[154].mxu1 }
0x1511   :  { %11636 = vmatprep.mubr.msk.bf16.mxu1 %vm9083_vm9, %v10393_v15  ;;  %v12759_v42 = vpop.f32.mrb[155].mxu1 }
0x1512   :  { %10514 = vmatmul.mubr.bf16.vlgmr.msra.gmra.mrb[156].mxu1 %v10392_v6 }
0x15e5   :  { %v10515_v34 = vpop.f32.mrb[156].mxu1 }
0x15e6   :  { %v10516_v35 = vadd.f32 %v10515_v34, %v10417_v41  ;;  %v10517_v3 = vpop.f32.mrb[157].mxu1 }
0x15e7   :  { %v10518_v2 = vpop.f32.mrb[158].mxu1 }
0x15e8   :  { %10521 = vst [vmem:[#allocation2] sm:$0x3] %v10516_v35  ;;  %v10519_v51 = vpop.f32.mrb[159].mxu1 }
0x15e9   :  { %13696 = shalt.err (!%p13693_p4)
}
0x15ea   :  { %s13697_s24 = scalar_lea.hbm %s17900_s6, 32 }
0x15eb   :  { %p13698_p5 = scmp.ne.s32.totalorder %s17900_s6, %s13697_s24  ;;  %p13701_p6 = scmp.lt.u32.totalorder %s13697_s24, %s17900_s6 }
0x15ed   :  { %p13703_p7 = pnand %p13701_p6, %p13698_p5 }
0x15ef   :  { %13706 = shalt.err (!%p13703_p7)
}
0x15f0   :  { %10531 = dma.vmem_to_hbm [thread:$0]  %s10529_s21, 32, %s17900_s6, [#allocation3]  }
0x15f1   :  { %13707 = dma.done.wait [#allocation3], 32  }
0x15f2   :  { %13708 = vsyncadd [#allocation3], 4294967264 }
0x15f3   :  { %10535 = vsyncpa [#allocation3], 1 }

</bundles_post_ra>
